<compile_context>
chip_gen: v6e
topology: v6e:2x2x1
jax: 0.10.0
libtpu: 0.0.40
codegen_flags: <defaults>
</compile_context>

<pallas_src>
import jax
import jax.numpy as jnp
from jax.experimental import pallas as pl
from jax.experimental.pallas import tpu as pltpu

# ----------------------- config (small, module-consistent) -------------------
FRAME_STACK = 3           # frame_stack
IN_C = 3                  # per-frame channels (obs_shape[0] // frame_stack)
IMG = 16                  # spatial size
REPR_DIM = 1024           # repr_dim (module default)
STACKS = ("cur", "diff")  # stacks
APPLIED_LAYERS = 2        # run stand-in net[0], net[1], net[2]

# stand-in conv stem: (cin, cout, stride, pad), 3x3 kernels, ReLU
CONV_CFG = ((IN_C, 8, 2, 1), (8, 16, 2, 1), (16, 16, 1, 1))

C0, C1, C2 = (cfg[1] for cfg in CONV_CFG)
S0 = IMG                       # 16
S1 = (S0 + 2 - 3) // 2 + 1     # 8   after layer 0
S2 = (S1 + 2 - 3) // 2 + 1     # 4   after layer 1
S3 = (S2 + 2 - 3) // 1 + 1     # 4   after layer 2
NPOS = S3 * S3                 # 16 spatial positions per frame
PER_FRAME = C2 * NPOS          # 256 (torch (C,H,W) flatten order)
OUT_DIM = 2 * (FRAME_STACK - 1) * PER_FRAME   # 1024 = module fc input dim
FPB = FRAME_STACK * C2         # 48 feature lanes per batch element (f, c)
FC_K = NPOS * FPB              # 768 folded fc contraction length

LANE = 128                     # padded lane width of every conv intermediate
X0_FLAT = 48                   # layer-0 input: 9 rows x 5 cols (+3 zero pad)
X1_FLAT = 26                   # layer-1 input: 5 rows x 5 cols (+1 pad)
X2_FLAT = 38                   # layer-2 input: 6 rows x 6 cols (+2 pad)

_VMEM = pl.BlockSpec(memory_space=pltpu.MemorySpace.VMEM)


# ------------------------------ fused kernel ---------------------------------
def _make_kernel(batch):
    def kernel(x0_ref, wbd0_ref, b0_ref, wbd1_ref, b1_ref, wbd2_ref, b2_ref,
               wfc_hbm, fcb_ref, g_ref, beta_ref,
               out_ref, preln_ref,
               x1_ref, x2_ref, feat_ref, wfc_ref, wsem):
        # Kick off the only large transfer (fc weight, bf16) immediately so it
        # overlaps the whole conv trunk.  TODO(synk): on v5e, chunk this copy
        # along REPR_DIM and interleave fc column-block dots (review item 7).
        wcopy = pltpu.make_async_copy(wfc_hbm, wfc_ref, wsem)
        wcopy.start()

        # Zero conv scratch (provides the conv zero-halo + slab over-read pad).
        # These buffers are tiny now (~20 vreg stores total), so halo-only
        # zeroing would not be cheaper (review item 10).
        x1_ref[...] = jnp.zeros_like(x1_ref)
        x2_ref[...] = jnp.zeros_like(x2_ref)

        # ---- layer 0: 16x16 -> 8x8, stride 2 (pixel normalize folded in) ----
        # x0 layout: [row parity, col phase (mod 4), k*5+u, 18 lanes] where
        # padded pixel (2k+p, 4u+q) lives at [p, q, k*5+u].  For each tap the
        # even-output-column and odd-output-column slabs are contiguous, so one
        # (80,18)x(18,128) dot per tap covers every output row (item 3).
        # Result row oy*5+t holds output column 2t (first 40 rows) / 2t+1
        # (last 40 rows); t=4 rows are discarded garbage.
        acc0 = jnp.zeros((2 * S1 * 5, LANE), jnp.float32)            # (80,128)
        for di in range(3):
            rp, rk = di % 2, di // 2
            for dj in range(3):
                w_tap = wbd0_ref[3 * di + dj]                        # (18,128)
                se = x0_ref[rp, dj, pl.ds(rk * 5, S1 * 5), :]        # even ox
                m = dj + 2
                so = x0_ref[rp, m % 4, pl.ds(rk * 5 + m // 4, S1 * 5), :]
                lhs = jnp.concatenate([se, so], axis=0)              # (80, 18)
                acc0 = acc0 + jnp.dot(lhs, w_tap,
                                      preferred_element_type=jnp.float32)
        y0 = jnp.maximum(acc0 + b0_ref[...], 0.0)                    # (80,128)

        # Scatter into layer-1's (row-parity, col-parity) padded layout.
        # 16 full-128-lane stores (item 5).
        for oy in range(S1):
            rp = (oy + 1) % 2
            k5 = ((oy + 1) // 2) * 5
            x1_ref[rp, 1, pl.ds(k5, 4), :] = y0[oy * 5:oy * 5 + 4, :]
            x1_ref[rp, 0, pl.ds(k5 + 1, 4), :] = y0[40 + oy * 5:40 + oy * 5 + 4, :]

        # ---- layer 1: 8x8 -> 4x4, stride 2 ----
        # x1 layout: [row parity, col parity, k*5+u, 128]; one (20,128)x(128,128)
        # dot per tap; result row oy*5+ox valid for ox<4.
        acc1 = jnp.zeros((S2 * 5, LANE), jnp.float32)                # (20,128)
        for di in range(3):
            for dj in range(3):
                slab = x1_ref[di % 2, dj % 2,
                              pl.ds((di // 2) * 5 + dj // 2, S2 * 5), :]
                acc1 = acc1 + jnp.dot(slab, wbd1_ref[3 * di + dj],
                                      preferred_element_type=jnp.float32)
        y1 = jnp.maximum(acc1 + b1_ref[...], 0.0)                    # (20,128)
        for oy in range(S2):
            x2_ref[pl.ds((oy + 1) * 6 + 1, S3), :] = y1[oy * 5:oy * 5 + 4, :]

        # ---- layer 2: 4x4 -> 4x4, stride 1 ----
        # x2 layout: flattened padded 6x6 image; shifted-slab accumulation,
        # one (24,128)x(128,128) dot per tap; row oy*6+ox valid for ox<4.
        # TODO(synk): on v7x, all 9 taps could accumulate in the MRB via
        # pltpu.matmul_acc_lhs instead of VALU adds (review item 4).
        acc2 = jnp.zeros((S3 * 6, LANE), jnp.float32)                # (24,128)
        for di in range(3):
            for dj in range(3):
                slab = x2_ref[pl.ds(di * 6 + dj, S3 * 6), :]
                acc2 = acc2 + jnp.dot(slab, wbd2_ref[3 * di + dj],
                                      preferred_element_type=jnp.float32)
        y2 = jnp.maximum(acc2 + b2_ref[...], 0.0)                    # (24,128)

        # ---- de-interleave batch out of the lane axis (once, items 2/6) -----
        # y2 lanes are (b, f, c); the folded fc wants K ordered (r, f, c).
        for b_i in range(batch):
            yb = y2[:, b_i * FPB:(b_i + 1) * FPB]                    # (24, 48)
            for r in range(NPOS):
                q = (r // S3) * 6 + (r % S3)
                feat_ref[pl.ds(b_i, 1), pl.ds(r * FPB, FPB)] = yb[q:q + 1, :]

        # ---- fc (ONE MXU dot, item 1) + LayerNorm ----------------------------
        wcopy.wait()
        lhs = feat_ref[...].astype(jnp.bfloat16)                     # (B, 768)
        logits = jnp.dot(lhs, wfc_ref[...],
                         preferred_element_type=jnp.float32) + fcb_ref[...]
        preln_ref[...] = logits
        mean = jnp.mean(logits, axis=-1, keepdims=True)
        var = jnp.mean(jnp.square(logits - mean), axis=-1, keepdims=True)
        out_ref[...] = ((logits - mean) * jax.lax.rsqrt(var + 1e-5)
                        * g_ref[...] + beta_ref[...])

    return kernel


# --------------------------------- params ------------------------------------
def init_params(key):
    """Raw module-style params for the synthetic stand-in trunk + fc/LN head."""
    ks = jax.random.split(key, len(CONV_CFG) + 1)
    conv_w, conv_b = [], []
    for i, (cin, cout, _, _) in enumerate(CONV_CFG):
        fan_in = 9 * cin
        w = jax.random.normal(ks[i], (9, cin, cout), jnp.float32) * (2.0 / fan_in) ** 0.5
        conv_w.append(w)                                   # taps ordered (di, dj)
        conv_b.append(jnp.zeros((cout,), jnp.float32))
    # fc: orthogonal init (== nn.init.orthogonal_), zero bias; stored as (in, out).
    a = jax.random.normal(ks[-1], (OUT_DIM, REPR_DIM), jnp.float32)
    q, r = jnp.linalg.qr(a)
    fc_w = q * jnp.sign(jnp.diag(r))[None, :]
    return {
        "conv_w": conv_w,
        "conv_b": conv_b,
        "fc_w": fc_w,
        "fc_b": jnp.zeros((REPR_DIM,), jnp.float32),
        "ln_g": jnp.ones((REPR_DIM,), jnp.float32),
        "ln_b": jnp.zeros((REPR_DIM,), jnp.float32),
    }


def fold_params(params, batch):
    """Exact algebraic folds -> kernel-ready operands (done once, off hot path)."""
    n_frames = batch * FRAME_STACK
    # TODO(synk): the kron block-diagonal over (batch*frames) scales O(n^2) in
    # weight size; switch to a frames-on-M layout / batch grid axis before
    # using batch sizes where n_frames*C exceeds 128 (review items 8/9).
    assert n_frames * max(C1, C2) <= LANE, "batch too large for lane-kron layout"
    eye = jnp.eye(n_frames, dtype=jnp.float32)

    # Fold `x/255 - 0.5` into conv 0 (exact together with 127.5 raw padding).
    w0, b0 = params["conv_w"][0], params["conv_b"][0]
    convs = [(w0 / 255.0, b0 - 0.5 * jnp.sum(w0, axis=(0, 1))),
             (params["conv_w"][1], params["conv_b"][1]),
             (params["conv_w"][2], params["conv_b"][2])]

    folded = {}
    for li, (wl, bl) in enumerate(convs):
        cin, cout = wl.shape[1], wl.shape[2]
        kin, kout = n_frames * cin, n_frames * cout
        # layers 1/2 read 128-lane slabs (padded outputs of the previous layer)
        kin_pad = kin if li == 0 else LANE
        blk = jnp.stack([jnp.kron(eye, wl[t]) for t in range(9)], axis=0)
        wbd = jnp.zeros((9, kin_pad, LANE), jnp.float32).at[:, :kin, :kout].set(blk)
        folded[f"wbd{li}"] = wbd
        folded[f"b{li}"] = (jnp.zeros((1, LANE), jnp.float32)
                            .at[0, :kout].set(jnp.tile(bl, n_frames)))

    # Fold the ['cur','diff'] stacking into the fc weight:
    #   out = A1 f1 + A2 f2 + B1 (f1-f0) + B2 (f2-f1) + b
    #       = (-B1) f0 + (A1+B1-B2) f1 + (A2+B2) f2 + b
    # and reorder rows to the kernel's K ordering (position, frame, channel).
    fw = params["fc_w"]                                   # (OUT_DIM, REPR)
    a1, a2 = fw[0:PER_FRAME], fw[PER_FRAME:2 * PER_FRAME]
    b1w, b2w = fw[2 * PER_FRAME:3 * PER_FRAME], fw[3 * PER_FRAME:4 * PER_FRAME]
    wm = jnp.stack([-b1w, a1 + b1w - b2w, a2 + b2w], axis=0)   # (fs, c*16+r, out)
    wm = wm.reshape(FRAME_STACK, C2, NPOS, REPR_DIM)
    wm = wm.transpose(2, 0, 1, 3).reshape(FC_K, REPR_DIM)      # (768, 1024)
    folded["wfc"] = wm.astype(jnp.bfloat16)                    # bf16 storage
    folded["fc_b"] = params["fc_b"].reshape(1, REPR_DIM)
    folded["ln_g"] = params["ln_g"].reshape(1, REPR_DIM)
    folded["ln_b"] = params["ln_b"].reshape(1, REPR_DIM)
    return folded


# --------------------------------- wrapper ------------------------------------
def _prep_input(obs):
    """NCHW pixels -> (row-parity, col-phase mod 4) split, padded raw input.

    Returns (2, 4, X0_FLAT, batch*FRAME_STACK*IN_C) float32 at raw pixel scale.
    Spatial padding uses 127.5 (normalizes to exactly 0 once conv-0's folded
    affine is applied); flat index = row_idx*5 + col_idx; lanes are ordered
    (batch, frame, channel).  Extra pad entries only feed discarded columns.
    """
    b = obs.shape[0]
    x = obs.reshape(b, FRAME_STACK, IN_C, IMG, IMG).astype(jnp.float32)
    x = x.transpose(3, 4, 0, 1, 2).reshape(IMG, IMG, b * FRAME_STACK * IN_C)
    xp = jnp.pad(x, ((1, 1), (1, 1), (0, 0)), constant_values=127.5)  # (18,18,L)
    lanes = xp.shape[-1]
    buf = jnp.zeros((2, 4, X0_FLAT, lanes), jnp.float32)
    for p in range(2):
        rows = xp[p::2]                                   # (9, 18, L)
        for q in range(4):
            cols = rows[:, q::4]                          # (9, 5 or 4, L)
            cols = jnp.pad(cols, ((0, 0), (0, 5 - cols.shape[1]), (0, 0)))
            buf = buf.at[p, q, :45, :].set(cols.reshape(45, lanes))
    return buf


def simclr_encoder_forward(obs, kparams):
    """obs: (B, frame_stack*IN_C, H, W) pixel values in [0, 255].

    Returns (ln_output, pre_ln_logits), both (B, repr_dim) float32.
    """
    batch = obs.shape[0]
    x0 = _prep_input(obs)

    out_shape = (jax.ShapeDtypeStruct((batch, REPR_DIM), jnp.float32),
                 jax.ShapeDtypeStruct((batch, REPR_DIM), jnp.float32))
    return pl.pallas_call(
        _make_kernel(batch),
        out_shape=out_shape,
        in_specs=[
            _VMEM,                                # phase-split padded input
            _VMEM, _VMEM,                         # conv0 block-diag w, bias
            _VMEM, _VMEM,                         # conv1
            _VMEM, _VMEM,                         # conv2
            pl.BlockSpec(memory_space=pl.ANY),    # fc weight (HBM, manual DMA)
            _VMEM, _VMEM, _VMEM,                  # fc bias, ln gamma, ln beta
        ],
        out_specs=(_VMEM, _VMEM),
        scratch_shapes=[
            pltpu.VMEM((2, 2, X1_FLAT, LANE), jnp.float32),   # layer-1 input
            pltpu.VMEM((X2_FLAT, LANE), jnp.float32),         # layer-2 input
            pltpu.VMEM((batch, FC_K), jnp.float32),           # fc LHS (feat)
            pltpu.VMEM((FC_K, REPR_DIM), jnp.bfloat16),       # fc weight (VMEM)
            pltpu.SemaphoreType.DMA(()),                      # fc weight DMA sem
        ],
    )(x0, kparams["wbd0"], kparams["b0"], kparams["wbd1"], kparams["b1"],
      kparams["wbd2"], kparams["b2"], kparams["wfc"], kparams["fc_b"],
      kparams["ln_g"], kparams["ln_b"])


# ------------------------- pure-JAX reference (unfolded) ----------------------
def reference_forward(obs, params, fc_bf16=False):
    b = obs.shape[0]
    x = obs.astype(jnp.float32) / 255.0 - 0.5
    x = x.reshape(b * FRAME_STACK, IN_C, IMG, IMG).transpose(0, 2, 3, 1)  # NHWC
    for li, (cin, cout, stride, pad) in enumerate(CONV_CFG):
        wl = params["conv_w"][li].reshape(3, 3, cin, cout)
        x = jax.lax.conv_general_dilated(
            x, wl, window_strides=(stride, stride),
            padding=((pad, pad), (pad, pad)),
            dimension_numbers=("NHWC", "HWIO", "NHWC"),
            precision=jax.lax.Precision.HIGHEST)
        x = jnp.maximum(x + params["conv_b"][li].reshape(1, 1, 1, cout), 0.0)
        if li == APPLIED_LAYERS:
            break
    _, oh, ow, c = x.shape
    feat = x.transpose(0, 3, 1, 2).reshape(b, FRAME_STACK, c * oh * ow)
    cur, prev = feat[:, 1:], feat[:, :-1]
    stacked = jnp.concatenate([cur, cur - prev], axis=1).reshape(b, -1)
    if fc_bf16:   # mimic the kernel's bf16 fc (weights + activations), f32 acc
        y = jnp.dot(stacked.astype(jnp.bfloat16),
                    params["fc_w"].astype(jnp.bfloat16),
                    preferred_element_type=jnp.float32) + params["fc_b"]
    else:
        y = jnp.dot(stacked, params["fc_w"],
                    precision=jax.lax.Precision.HIGHEST) + params["fc_b"]
    mean = y.mean(axis=-1, keepdims=True)
    var = jnp.square(y - mean).mean(axis=-1, keepdims=True)
    out = (y - mean) * jax.lax.rsqrt(var + 1e-5) * params["ln_g"] + params["ln_b"]
    return out, y


if __name__ == "__main__":
    key = jax.random.PRNGKey(0)
    pkey, xkey = jax.random.split(key)
    params = init_params(pkey)
    obs = jax.random.uniform(
        xkey, (2, FRAME_STACK * IN_C, IMG, IMG),
        minval=0.0, maxval=255.0, dtype=jnp.float32)

    kparams = fold_params(params, batch=obs.shape[0])
    fwd = jax.jit(simclr_encoder_forward)
    out, preln = jax.block_until_ready(fwd(obs, kparams))

    assert out.shape == (2, REPR_DIM) and out.dtype == jnp.float32
    assert bool(jnp.all(jnp.isfinite(out)))

    ref_out, _ = reference_forward(obs, params)                     # full f32
    _, bf_pre = reference_forward(obs, params, fc_bf16=True)        # bf16-fc ref

    # Pre-LN logits vs the bf16-matched reference, tight relative tolerance:
    # catches stacking / position-ordering bugs that LayerNorm could hide.
    rel = jnp.max(jnp.abs(preln - bf_pre) / jnp.maximum(jnp.abs(bf_pre), 1.0))
    assert float(rel) < 3e-2, f"pre-LN mismatch vs bf16 reference: {float(rel)}"

    # Final LayerNorm output vs the full-f32 reference (kernel fc is bf16).
    err = float(jnp.max(jnp.abs(out - ref_out)))
    assert err < 5e-2, f"mismatch vs f32 reference: {err}"
    print("KERNEL_OK")
</pallas_src>

<mosaic_0001>
module attributes {stable_mosaic.version = 11 : i64} {
  func.func @kernel(%arg0: memref<2x4x48x18xf32, #tpu.memory_space<vmem>>, %arg1: memref<9x18x128xf32, #tpu.memory_space<vmem>>, %arg2: memref<1x128xf32, #tpu.memory_space<vmem>>, %arg3: memref<9x128x128xf32, #tpu.memory_space<vmem>>, %arg4: memref<1x128xf32, #tpu.memory_space<vmem>>, %arg5: memref<9x128x128xf32, #tpu.memory_space<vmem>>, %arg6: memref<1x128xf32, #tpu.memory_space<vmem>>, %arg7: memref<768x1024xbf16, #tpu.memory_space<any>>, %arg8: memref<1x1024xf32, #tpu.memory_space<vmem>>, %arg9: memref<1x1024xf32, #tpu.memory_space<vmem>>, %arg10: memref<1x1024xf32, #tpu.memory_space<vmem>>, %arg11: memref<2x1024xf32, #tpu.memory_space<vmem>>, %arg12: memref<2x1024xf32, #tpu.memory_space<vmem>>, %arg13: memref<2x2x26x128xf32, #tpu.memory_space<vmem>>, %arg14: memref<38x128xf32, #tpu.memory_space<vmem>>, %arg15: memref<2x768xf32, #tpu.memory_space<vmem>>, %arg16: memref<768x1024xbf16, #tpu.memory_space<vmem>>, %arg17: memref<!tpu.dma_semaphore, #tpu.memory_space<semaphore_mem>>) attributes {dimension_semantics = [], scalar_prefetch = 0 : i64, scratch_operands = 5 : i64, tpu.core_type = #tpu.core_type<tc>} {
    tpu.enqueue_dma source(%arg7 : memref<768x1024xbf16, #tpu.memory_space<any>>) target(%arg16 : memref<768x1024xbf16, #tpu.memory_space<vmem>>) target_semaphore(%arg17 : memref<!tpu.dma_semaphore, #tpu.memory_space<semaphore_mem>>)
    %cst = arith.constant 0.000000e+00 : f32
    %0 = vector.broadcast %cst : f32 to vector<2x2x26x128xf32>
    %c0 = arith.constant 0 : index
    %c0_0 = arith.constant 0 : index
    %c0_1 = arith.constant 0 : index
    %c0_2 = arith.constant 0 : index
    %1 = vector.load %arg13[%c0, %c0_0, %c0_1, %c0_2] : memref<2x2x26x128xf32, #tpu.memory_space<vmem>>, vector<2x2x26x128xf32>
    tpu.vector_store %arg13[%c0, %c0_0, %c0_1, %c0_2], %0 {strides = array<i32>} : memref<2x2x26x128xf32, #tpu.memory_space<vmem>>, vector<2x2x26x128xf32>,
    %cst_3 = arith.constant 0.000000e+00 : f32
    %2 = vector.broadcast %cst_3 : f32 to vector<38x128xf32>
    %c0_4 = arith.constant 0 : index
    %c0_5 = arith.constant 0 : index
    %3 = vector.load %arg14[%c0_4, %c0_5] : memref<38x128xf32, #tpu.memory_space<vmem>>, vector<38x128xf32>
    tpu.vector_store %arg14[%c0_4, %c0_5], %2 {strides = array<i32>} : memref<38x128xf32, #tpu.memory_space<vmem>>, vector<38x128xf32>,
    %cst_6 = arith.constant 0.000000e+00 : f32
    %4 = vector.broadcast %cst_6 : f32 to vector<80x128xf32>
    %c0_7 = arith.constant 0 : index
    %c0_8 = arith.constant 0 : index
    %c0_9 = arith.constant 0 : index
    %5 = vector.load %arg1[%c0_7, %c0_8, %c0_9] : memref<9x18x128xf32, #tpu.memory_space<vmem>>, vector<1x18x128xf32>
    %6 = vector.shape_cast %5 : vector<1x18x128xf32> to vector<18x128xf32>
    %c0_10 = arith.constant 0 : index
    %c0_11 = arith.constant 0 : index
    %c0_12 = arith.constant 0 : index
    %c0_13 = arith.constant 0 : index
    %7 = vector.load %arg0[%c0_10, %c0_11, %c0_12, %c0_13] : memref<2x4x48x18xf32, #tpu.memory_space<vmem>>, vector<1x1x40x18xf32>
    %8 = vector.shape_cast %7 : vector<1x1x40x18xf32> to vector<40x18xf32>
    %c0_14 = arith.constant 0 : index
    %c2 = arith.constant 2 : index
    %c0_15 = arith.constant 0 : index
    %c0_16 = arith.constant 0 : index
    %9 = vector.load %arg0[%c0_14, %c2, %c0_15, %c0_16] : memref<2x4x48x18xf32, #tpu.memory_space<vmem>>, vector<1x1x40x18xf32>
    %10 = vector.shape_cast %9 : vector<1x1x40x18xf32> to vector<40x18xf32>
    %11 = tpu.concatenate %8, %10 in 0 : vector<40x18xf32>, vector<40x18xf32> -> vector<80x18xf32>
    %cst_17 = arith.constant dense<0.000000e+00> : vector<80x128xf32>
    %12 = tpu.matmul %11, %6, %cst_17 {dimension_numbers = #tpu.dot_dimension_numbers<[1], [0], [0], [1], [0, 0, 1, 1], [], []>} : vector<80x18xf32>, vector<18x128xf32>, vector<80x128xf32> -> vector<80x128xf32>
    %13 = arith.addf %4, %12 : vector<80x128xf32>
    %c1 = arith.constant 1 : index
    %c0_18 = arith.constant 0 : index
    %c0_19 = arith.constant 0 : index
    %14 = vector.load %arg1[%c1, %c0_18, %c0_19] : memref<9x18x128xf32, #tpu.memory_space<vmem>>, vector<1x18x128xf32>
    %15 = vector.shape_cast %14 : vector<1x18x128xf32> to vector<18x128xf32>
    %c0_20 = arith.constant 0 : index
    %c1_21 = arith.constant 1 : index
    %c0_22 = arith.constant 0 : index
    %c0_23 = arith.constant 0 : index
    %16 = vector.load %arg0[%c0_20, %c1_21, %c0_22, %c0_23] : memref<2x4x48x18xf32, #tpu.memory_space<vmem>>, vector<1x1x40x18xf32>
    %17 = vector.shape_cast %16 : vector<1x1x40x18xf32> to vector<40x18xf32>
    %c0_24 = arith.constant 0 : index
    %c3 = arith.constant 3 : index
    %c0_25 = arith.constant 0 : index
    %c0_26 = arith.constant 0 : index
    %18 = vector.load %arg0[%c0_24, %c3, %c0_25, %c0_26] : memref<2x4x48x18xf32, #tpu.memory_space<vmem>>, vector<1x1x40x18xf32>
    %19 = vector.shape_cast %18 : vector<1x1x40x18xf32> to vector<40x18xf32>
    %20 = tpu.concatenate %17, %19 in 0 : vector<40x18xf32>, vector<40x18xf32> -> vector<80x18xf32>
    %cst_27 = arith.constant dense<0.000000e+00> : vector<80x128xf32>
    %21 = tpu.matmul %20, %15, %cst_27 {dimension_numbers = #tpu.dot_dimension_numbers<[1], [0], [0], [1], [0, 0, 1, 1], [], []>} : vector<80x18xf32>, vector<18x128xf32>, vector<80x128xf32> -> vector<80x128xf32>
    %22 = arith.addf %13, %21 : vector<80x128xf32>
    %c2_28 = arith.constant 2 : index
    %c0_29 = arith.constant 0 : index
    %c0_30 = arith.constant 0 : index
    %23 = vector.load %arg1[%c2_28, %c0_29, %c0_30] : memref<9x18x128xf32, #tpu.memory_space<vmem>>, vector<1x18x128xf32>
    %24 = vector.shape_cast %23 : vector<1x18x128xf32> to vector<18x128xf32>
    %c0_31 = arith.constant 0 : index
    %c2_32 = arith.constant 2 : index
    %c0_33 = arith.constant 0 : index
    %c0_34 = arith.constant 0 : index
    %25 = vector.load %arg0[%c0_31, %c2_32, %c0_33, %c0_34] : memref<2x4x48x18xf32, #tpu.memory_space<vmem>>, vector<1x1x40x18xf32>
    %26 = vector.shape_cast %25 : vector<1x1x40x18xf32> to vector<40x18xf32>
    %c0_35 = arith.constant 0 : index
    %c0_36 = arith.constant 0 : index
    %c1_37 = arith.constant 1 : index
    %c0_38 = arith.constant 0 : index
    %27 = vector.load %arg0[%c0_35, %c0_36, %c1_37, %c0_38] : memref<2x4x48x18xf32, #tpu.memory_space<vmem>>, vector<1x1x40x18xf32>
    %28 = vector.shape_cast %27 : vector<1x1x40x18xf32> to vector<40x18xf32>
    %29 = tpu.concatenate %26, %28 in 0 : vector<40x18xf32>, vector<40x18xf32> -> vector<80x18xf32>
    %cst_39 = arith.constant dense<0.000000e+00> : vector<80x128xf32>
    %30 = tpu.matmul %29, %24, %cst_39 {dimension_numbers = #tpu.dot_dimension_numbers<[1], [0], [0], [1], [0, 0, 1, 1], [], []>} : vector<80x18xf32>, vector<18x128xf32>, vector<80x128xf32> -> vector<80x128xf32>
    %31 = arith.addf %22, %30 : vector<80x128xf32>
    %c3_40 = arith.constant 3 : index
    %c0_41 = arith.constant 0 : index
    %c0_42 = arith.constant 0 : index
    %32 = vector.load %arg1[%c3_40, %c0_41, %c0_42] : memref<9x18x128xf32, #tpu.memory_space<vmem>>, vector<1x18x128xf32>
    %33 = vector.shape_cast %32 : vector<1x18x128xf32> to vector<18x128xf32>
    %c1_43 = arith.constant 1 : index
    %c0_44 = arith.constant 0 : index
    %c0_45 = arith.constant 0 : index
    %c0_46 = arith.constant 0 : index
    %34 = vector.load %arg0[%c1_43, %c0_44, %c0_45, %c0_46] : memref<2x4x48x18xf32, #tpu.memory_space<vmem>>, vector<1x1x40x18xf32>
    %35 = vector.shape_cast %34 : vector<1x1x40x18xf32> to vector<40x18xf32>
    %c1_47 = arith.constant 1 : index
    %c2_48 = arith.constant 2 : index
    %c0_49 = arith.constant 0 : index
    %c0_50 = arith.constant 0 : index
    %36 = vector.load %arg0[%c1_47, %c2_48, %c0_49, %c0_50] : memref<2x4x48x18xf32, #tpu.memory_space<vmem>>, vector<1x1x40x18xf32>
    %37 = vector.shape_cast %36 : vector<1x1x40x18xf32> to vector<40x18xf32>
    %38 = tpu.concatenate %35, %37 in 0 : vector<40x18xf32>, vector<40x18xf32> -> vector<80x18xf32>
    %cst_51 = arith.constant dense<0.000000e+00> : vector<80x128xf32>
    %39 = tpu.matmul %38, %33, %cst_51 {dimension_numbers = #tpu.dot_dimension_numbers<[1], [0], [0], [1], [0, 0, 1, 1], [], []>} : vector<80x18xf32>, vector<18x128xf32>, vector<80x128xf32> -> vector<80x128xf32>
    %40 = arith.addf %31, %39 : vector<80x128xf32>
    %c4 = arith.constant 4 : index
    %c0_52 = arith.constant 0 : index
    %c0_53 = arith.constant 0 : index
    %41 = vector.load %arg1[%c4, %c0_52, %c0_53] : memref<9x18x128xf32, #tpu.memory_space<vmem>>, vector<1x18x128xf32>
    %42 = vector.shape_cast %41 : vector<1x18x128xf32> to vector<18x128xf32>
    %c1_54 = arith.constant 1 : index
    %c1_55 = arith.constant 1 : index
    %c0_56 = arith.constant 0 : index
    %c0_57 = arith.constant 0 : index
    %43 = vector.load %arg0[%c1_54, %c1_55, %c0_56, %c0_57] : memref<2x4x48x18xf32, #tpu.memory_space<vmem>>, vector<1x1x40x18xf32>
    %44 = vector.shape_cast %43 : vector<1x1x40x18xf32> to vector<40x18xf32>
    %c1_58 = arith.constant 1 : index
    %c3_59 = arith.constant 3 : index
    %c0_60 = arith.constant 0 : index
    %c0_61 = arith.constant 0 : index
    %45 = vector.load %arg0[%c1_58, %c3_59, %c0_60, %c0_61] : memref<2x4x48x18xf32, #tpu.memory_space<vmem>>, vector<1x1x40x18xf32>
    %46 = vector.shape_cast %45 : vector<1x1x40x18xf32> to vector<40x18xf32>
    %47 = tpu.concatenate %44, %46 in 0 : vector<40x18xf32>, vector<40x18xf32> -> vector<80x18xf32>
    %cst_62 = arith.constant dense<0.000000e+00> : vector<80x128xf32>
    %48 = tpu.matmul %47, %42, %cst_62 {dimension_numbers = #tpu.dot_dimension_numbers<[1], [0], [0], [1], [0, 0, 1, 1], [], []>} : vector<80x18xf32>, vector<18x128xf32>, vector<80x128xf32> -> vector<80x128xf32>
    %49 = arith.addf %40, %48 : vector<80x128xf32>
    %c5 = arith.constant 5 : index
    %c0_63 = arith.constant 0 : index
    %c0_64 = arith.constant 0 : index
    %50 = vector.load %arg1[%c5, %c0_63, %c0_64] : memref<9x18x128xf32, #tpu.memory_space<vmem>>, vector<1x18x128xf32>
    %51 = vector.shape_cast %50 : vector<1x18x128xf32> to vector<18x128xf32>
    %c1_65 = arith.constant 1 : index
    %c2_66 = arith.constant 2 : index
    %c0_67 = arith.constant 0 : index
    %c0_68 = arith.constant 0 : index
    %52 = vector.load %arg0[%c1_65, %c2_66, %c0_67, %c0_68] : memref<2x4x48x18xf32, #tpu.memory_space<vmem>>, vector<1x1x40x18xf32>
    %53 = vector.shape_cast %52 : vector<1x1x40x18xf32> to vector<40x18xf32>
    %c1_69 = arith.constant 1 : index
    %c0_70 = arith.constant 0 : index
    %c1_71 = arith.constant 1 : index
    %c0_72 = arith.constant 0 : index
    %54 = vector.load %arg0[%c1_69, %c0_70, %c1_71, %c0_72] : memref<2x4x48x18xf32, #tpu.memory_space<vmem>>, vector<1x1x40x18xf32>
    %55 = vector.shape_cast %54 : vector<1x1x40x18xf32> to vector<40x18xf32>
    %56 = tpu.concatenate %53, %55 in 0 : vector<40x18xf32>, vector<40x18xf32> -> vector<80x18xf32>
    %cst_73 = arith.constant dense<0.000000e+00> : vector<80x128xf32>
    %57 = tpu.matmul %56, %51, %cst_73 {dimension_numbers = #tpu.dot_dimension_numbers<[1], [0], [0], [1], [0, 0, 1, 1], [], []>} : vector<80x18xf32>, vector<18x128xf32>, vector<80x128xf32> -> vector<80x128xf32>
    %58 = arith.addf %49, %57 : vector<80x128xf32>
    %c6 = arith.constant 6 : index
    %c0_74 = arith.constant 0 : index
    %c0_75 = arith.constant 0 : index
    %59 = vector.load %arg1[%c6, %c0_74, %c0_75] : memref<9x18x128xf32, #tpu.memory_space<vmem>>, vector<1x18x128xf32>
    %60 = vector.shape_cast %59 : vector<1x18x128xf32> to vector<18x128xf32>
    %c0_76 = arith.constant 0 : index
    %c0_77 = arith.constant 0 : index
    %c5_78 = arith.constant 5 : index
    %c0_79 = arith.constant 0 : index
    %61 = vector.load %arg0[%c0_76, %c0_77, %c5_78, %c0_79] : memref<2x4x48x18xf32, #tpu.memory_space<vmem>>, vector<1x1x40x18xf32>
    %62 = vector.shape_cast %61 : vector<1x1x40x18xf32> to vector<40x18xf32>
    %c0_80 = arith.constant 0 : index
    %c2_81 = arith.constant 2 : index
    %c5_82 = arith.constant 5 : index
    %c0_83 = arith.constant 0 : index
    %63 = vector.load %arg0[%c0_80, %c2_81, %c5_82, %c0_83] : memref<2x4x48x18xf32, #tpu.memory_space<vmem>>, vector<1x1x40x18xf32>
    %64 = vector.shape_cast %63 : vector<1x1x40x18xf32> to vector<40x18xf32>
    %65 = tpu.concatenate %62, %64 in 0 : vector<40x18xf32>, vector<40x18xf32> -> vector<80x18xf32>
    %cst_84 = arith.constant dense<0.000000e+00> : vector<80x128xf32>
    %66 = tpu.matmul %65, %60, %cst_84 {dimension_numbers = #tpu.dot_dimension_numbers<[1], [0], [0], [1], [0, 0, 1, 1], [], []>} : vector<80x18xf32>, vector<18x128xf32>, vector<80x128xf32> -> vector<80x128xf32>
    %67 = arith.addf %58, %66 : vector<80x128xf32>
    %c7 = arith.constant 7 : index
    %c0_85 = arith.constant 0 : index
    %c0_86 = arith.constant 0 : index
    %68 = vector.load %arg1[%c7, %c0_85, %c0_86] : memref<9x18x128xf32, #tpu.memory_space<vmem>>, vector<1x18x128xf32>
    %69 = vector.shape_cast %68 : vector<1x18x128xf32> to vector<18x128xf32>
    %c0_87 = arith.constant 0 : index
    %c1_88 = arith.constant 1 : index
    %c5_89 = arith.constant 5 : index
    %c0_90 = arith.constant 0 : index
    %70 = vector.load %arg0[%c0_87, %c1_88, %c5_89, %c0_90] : memref<2x4x48x18xf32, #tpu.memory_space<vmem>>, vector<1x1x40x18xf32>
    %71 = vector.shape_cast %70 : vector<1x1x40x18xf32> to vector<40x18xf32>
    %c0_91 = arith.constant 0 : index
    %c3_92 = arith.constant 3 : index
    %c5_93 = arith.constant 5 : index
    %c0_94 = arith.constant 0 : index
    %72 = vector.load %arg0[%c0_91, %c3_92, %c5_93, %c0_94] : memref<2x4x48x18xf32, #tpu.memory_space<vmem>>, vector<1x1x40x18xf32>
    %73 = vector.shape_cast %72 : vector<1x1x40x18xf32> to vector<40x18xf32>
    %74 = tpu.concatenate %71, %73 in 0 : vector<40x18xf32>, vector<40x18xf32> -> vector<80x18xf32>
    %cst_95 = arith.constant dense<0.000000e+00> : vector<80x128xf32>
    %75 = tpu.matmul %74, %69, %cst_95 {dimension_numbers = #tpu.dot_dimension_numbers<[1], [0], [0], [1], [0, 0, 1, 1], [], []>} : vector<80x18xf32>, vector<18x128xf32>, vector<80x128xf32> -> vector<80x128xf32>
    %76 = arith.addf %67, %75 : vector<80x128xf32>
    %c8 = arith.constant 8 : index
    %c0_96 = arith.constant 0 : index
    %c0_97 = arith.constant 0 : index
    %77 = vector.load %arg1[%c8, %c0_96, %c0_97] : memref<9x18x128xf32, #tpu.memory_space<vmem>>, vector<1x18x128xf32>
    %78 = vector.shape_cast %77 : vector<1x18x128xf32> to vector<18x128xf32>
    %c0_98 = arith.constant 0 : index
    %c2_99 = arith.constant 2 : index
    %c5_100 = arith.constant 5 : index
    %c0_101 = arith.constant 0 : index
    %79 = vector.load %arg0[%c0_98, %c2_99, %c5_100, %c0_101] : memref<2x4x48x18xf32, #tpu.memory_space<vmem>>, vector<1x1x40x18xf32>
    %80 = vector.shape_cast %79 : vector<1x1x40x18xf32> to vector<40x18xf32>
    %c0_102 = arith.constant 0 : index
    %c0_103 = arith.constant 0 : index
    %c6_104 = arith.constant 6 : index
    %c0_105 = arith.constant 0 : index
    %81 = vector.load %arg0[%c0_102, %c0_103, %c6_104, %c0_105] : memref<2x4x48x18xf32, #tpu.memory_space<vmem>>, vector<1x1x40x18xf32>
    %82 = vector.shape_cast %81 : vector<1x1x40x18xf32> to vector<40x18xf32>
    %83 = tpu.concatenate %80, %82 in 0 : vector<40x18xf32>, vector<40x18xf32> -> vector<80x18xf32>
    %cst_106 = arith.constant dense<0.000000e+00> : vector<80x128xf32>
    %84 = tpu.matmul %83, %78, %cst_106 {dimension_numbers = #tpu.dot_dimension_numbers<[1], [0], [0], [1], [0, 0, 1, 1], [], []>} : vector<80x18xf32>, vector<18x128xf32>, vector<80x128xf32> -> vector<80x128xf32>
    %85 = arith.addf %76, %84 : vector<80x128xf32>
    %c0_107 = arith.constant 0 : index
    %c0_108 = arith.constant 0 : index
    %86 = vector.load %arg2[%c0_107, %c0_108] : memref<1x128xf32, #tpu.memory_space<vmem>>, vector<1x128xf32>
    %87 = vector.broadcast %86 : vector<1x128xf32> to vector<80x128xf32>
    %88 = arith.addf %85, %87 : vector<80x128xf32>
    %cst_109 = arith.constant 0.000000e+00 : f32
    %89 = vector.broadcast %cst_109 : f32 to vector<80x128xf32>
    %90 = arith.maximumf %88, %89 : vector<80x128xf32>
    %91 = vector.extract_strided_slice %90 {offsets = [0, 0], sizes = [4, 128], strides = [1, 1]} : vector<80x128xf32> to vector<4x128xf32>
    %c1_110 = arith.constant 1 : index
    %c1_111 = arith.constant 1 : index
    %c0_112 = arith.constant 0 : index
    %c0_113 = arith.constant 0 : index
    %92 = vector.load %arg13[%c1_110, %c1_111, %c0_112, %c0_113] : memref<2x2x26x128xf32, #tpu.memory_space<vmem>>, vector<1x1x4x128xf32>
    %93 = vector.shape_cast %92 : vector<1x1x4x128xf32> to vector<4x128xf32>
    %94 = vector.shape_cast %91 : vector<4x128xf32> to vector<1x1x4x128xf32>
    tpu.vector_store %arg13[%c1_110, %c1_111, %c0_112, %c0_113], %94 {strides = array<i32>} : memref<2x2x26x128xf32, #tpu.memory_space<vmem>>, vector<1x1x4x128xf32>,
    %95 = vector.extract_strided_slice %90 {offsets = [40, 0], sizes = [4, 128], strides = [1, 1]} : vector<80x128xf32> to vector<4x128xf32>
    %c1_114 = arith.constant 1 : index
    %c0_115 = arith.constant 0 : index
    %c1_116 = arith.constant 1 : index
    %c0_117 = arith.constant 0 : index
    %96 = vector.load %arg13[%c1_114, %c0_115, %c1_116, %c0_117] : memref<2x2x26x128xf32, #tpu.memory_space<vmem>>, vector<1x1x4x128xf32>
    %97 = vector.shape_cast %96 : vector<1x1x4x128xf32> to vector<4x128xf32>
    %98 = vector.shape_cast %95 : vector<4x128xf32> to vector<1x1x4x128xf32>
    tpu.vector_store %arg13[%c1_114, %c0_115, %c1_116, %c0_117], %98 {strides = array<i32>} : memref<2x2x26x128xf32, #tpu.memory_space<vmem>>, vector<1x1x4x128xf32>,
    %99 = vector.extract_strided_slice %90 {offsets = [5, 0], sizes = [4, 128], strides = [1, 1]} : vector<80x128xf32> to vector<4x128xf32>
    %c0_118 = arith.constant 0 : index
    %c1_119 = arith.constant 1 : index
    %c5_120 = arith.constant 5 : index
    %c0_121 = arith.constant 0 : index
    %100 = vector.load %arg13[%c0_118, %c1_119, %c5_120, %c0_121] : memref<2x2x26x128xf32, #tpu.memory_space<vmem>>, vector<1x1x4x128xf32>
    %101 = vector.shape_cast %100 : vector<1x1x4x128xf32> to vector<4x128xf32>
    %102 = vector.shape_cast %99 : vector<4x128xf32> to vector<1x1x4x128xf32>
    tpu.vector_store %arg13[%c0_118, %c1_119, %c5_120, %c0_121], %102 {strides = array<i32>} : memref<2x2x26x128xf32, #tpu.memory_space<vmem>>, vector<1x1x4x128xf32>,
    %103 = vector.extract_strided_slice %90 {offsets = [45, 0], sizes = [4, 128], strides = [1, 1]} : vector<80x128xf32> to vector<4x128xf32>
    %c0_122 = arith.constant 0 : index
    %c0_123 = arith.constant 0 : index
    %c6_124 = arith.constant 6 : index
    %c0_125 = arith.constant 0 : index
    %104 = vector.load %arg13[%c0_122, %c0_123, %c6_124, %c0_125] : memref<2x2x26x128xf32, #tpu.memory_space<vmem>>, vector<1x1x4x128xf32>
    %105 = vector.shape_cast %104 : vector<1x1x4x128xf32> to vector<4x128xf32>
    %106 = vector.shape_cast %103 : vector<4x128xf32> to vector<1x1x4x128xf32>
    tpu.vector_store %arg13[%c0_122, %c0_123, %c6_124, %c0_125], %106 {strides = array<i32>} : memref<2x2x26x128xf32, #tpu.memory_space<vmem>>, vector<1x1x4x128xf32>,
    %107 = vector.extract_strided_slice %90 {offsets = [10, 0], sizes = [4, 128], strides = [1, 1]} : vector<80x128xf32> to vector<4x128xf32>
    %c1_126 = arith.constant 1 : index
    %c1_127 = arith.constant 1 : index
    %c5_128 = arith.constant 5 : index
    %c0_129 = arith.constant 0 : index
    %108 = vector.load %arg13[%c1_126, %c1_127, %c5_128, %c0_129] : memref<2x2x26x128xf32, #tpu.memory_space<vmem>>, vector<1x1x4x128xf32>
    %109 = vector.shape_cast %108 : vector<1x1x4x128xf32> to vector<4x128xf32>
    %110 = vector.shape_cast %107 : vector<4x128xf32> to vector<1x1x4x128xf32>
    tpu.vector_store %arg13[%c1_126, %c1_127, %c5_128, %c0_129], %110 {strides = array<i32>} : memref<2x2x26x128xf32, #tpu.memory_space<vmem>>, vector<1x1x4x128xf32>,
    %111 = vector.extract_strided_slice %90 {offsets = [50, 0], sizes = [4, 128], strides = [1, 1]} : vector<80x128xf32> to vector<4x128xf32>
    %c1_130 = arith.constant 1 : index
    %c0_131 = arith.constant 0 : index
    %c6_132 = arith.constant 6 : index
    %c0_133 = arith.constant 0 : index
    %112 = vector.load %arg13[%c1_130, %c0_131, %c6_132, %c0_133] : memref<2x2x26x128xf32, #tpu.memory_space<vmem>>, vector<1x1x4x128xf32>
    %113 = vector.shape_cast %112 : vector<1x1x4x128xf32> to vector<4x128xf32>
    %114 = vector.shape_cast %111 : vector<4x128xf32> to vector<1x1x4x128xf32>
    tpu.vector_store %arg13[%c1_130, %c0_131, %c6_132, %c0_133], %114 {strides = array<i32>} : memref<2x2x26x128xf32, #tpu.memory_space<vmem>>, vector<1x1x4x128xf32>,
    %115 = vector.extract_strided_slice %90 {offsets = [15, 0], sizes = [4, 128], strides = [1, 1]} : vector<80x128xf32> to vector<4x128xf32>
    %c0_134 = arith.constant 0 : index
    %c1_135 = arith.constant 1 : index
    %c10 = arith.constant 10 : index
    %c0_136 = arith.constant 0 : index
    %116 = vector.load %arg13[%c0_134, %c1_135, %c10, %c0_136] : memref<2x2x26x128xf32, #tpu.memory_space<vmem>>, vector<1x1x4x128xf32>
    %117 = vector.shape_cast %116 : vector<1x1x4x128xf32> to vector<4x128xf32>
    %118 = vector.shape_cast %115 : vector<4x128xf32> to vector<1x1x4x128xf32>
    tpu.vector_store %arg13[%c0_134, %c1_135, %c10, %c0_136], %118 {strides = array<i32>} : memref<2x2x26x128xf32, #tpu.memory_space<vmem>>, vector<1x1x4x128xf32>,
    %119 = vector.extract_strided_slice %90 {offsets = [55, 0], sizes = [4, 128], strides = [1, 1]} : vector<80x128xf32> to vector<4x128xf32>
    %c0_137 = arith.constant 0 : index
    %c0_138 = arith.constant 0 : index
    %c11 = arith.constant 11 : index
    %c0_139 = arith.constant 0 : index
    %120 = vector.load %arg13[%c0_137, %c0_138, %c11, %c0_139] : memref<2x2x26x128xf32, #tpu.memory_space<vmem>>, vector<1x1x4x128xf32>
    %121 = vector.shape_cast %120 : vector<1x1x4x128xf32> to vector<4x128xf32>
    %122 = vector.shape_cast %119 : vector<4x128xf32> to vector<1x1x4x128xf32>
    tpu.vector_store %arg13[%c0_137, %c0_138, %c11, %c0_139], %122 {strides = array<i32>} : memref<2x2x26x128xf32, #tpu.memory_space<vmem>>, vector<1x1x4x128xf32>,
    %123 = vector.extract_strided_slice %90 {offsets = [20, 0], sizes = [4, 128], strides = [1, 1]} : vector<80x128xf32> to vector<4x128xf32>
    %c1_140 = arith.constant 1 : index
    %c1_141 = arith.constant 1 : index
    %c10_142 = arith.constant 10 : index
    %c0_143 = arith.constant 0 : index
    %124 = vector.load %arg13[%c1_140, %c1_141, %c10_142, %c0_143] : memref<2x2x26x128xf32, #tpu.memory_space<vmem>>, vector<1x1x4x128xf32>
    %125 = vector.shape_cast %124 : vector<1x1x4x128xf32> to vector<4x128xf32>
    %126 = vector.shape_cast %123 : vector<4x128xf32> to vector<1x1x4x128xf32>
    tpu.vector_store %arg13[%c1_140, %c1_141, %c10_142, %c0_143], %126 {strides = array<i32>} : memref<2x2x26x128xf32, #tpu.memory_space<vmem>>, vector<1x1x4x128xf32>,
    %127 = vector.extract_strided_slice %90 {offsets = [60, 0], sizes = [4, 128], strides = [1, 1]} : vector<80x128xf32> to vector<4x128xf32>
    %c1_144 = arith.constant 1 : index
    %c0_145 = arith.constant 0 : index
    %c11_146 = arith.constant 11 : index
    %c0_147 = arith.constant 0 : index
    %128 = vector.load %arg13[%c1_144, %c0_145, %c11_146, %c0_147] : memref<2x2x26x128xf32, #tpu.memory_space<vmem>>, vector<1x1x4x128xf32>
    %129 = vector.shape_cast %128 : vector<1x1x4x128xf32> to vector<4x128xf32>
    %130 = vector.shape_cast %127 : vector<4x128xf32> to vector<1x1x4x128xf32>
    tpu.vector_store %arg13[%c1_144, %c0_145, %c11_146, %c0_147], %130 {strides = array<i32>} : memref<2x2x26x128xf32, #tpu.memory_space<vmem>>, vector<1x1x4x128xf32>,
    %131 = vector.extract_strided_slice %90 {offsets = [25, 0], sizes = [4, 128], strides = [1, 1]} : vector<80x128xf32> to vector<4x128xf32>
    %c0_148 = arith.constant 0 : index
    %c1_149 = arith.constant 1 : index
    %c15 = arith.constant 15 : index
    %c0_150 = arith.constant 0 : index
    %132 = vector.load %arg13[%c0_148, %c1_149, %c15, %c0_150] : memref<2x2x26x128xf32, #tpu.memory_space<vmem>>, vector<1x1x4x128xf32>
    %133 = vector.shape_cast %132 : vector<1x1x4x128xf32> to vector<4x128xf32>
    %134 = vector.shape_cast %131 : vector<4x128xf32> to vector<1x1x4x128xf32>
    tpu.vector_store %arg13[%c0_148, %c1_149, %c15, %c0_150], %134 {strides = array<i32>} : memref<2x2x26x128xf32, #tpu.memory_space<vmem>>, vector<1x1x4x128xf32>,
    %135 = vector.extract_strided_slice %90 {offsets = [65, 0], sizes = [4, 128], strides = [1, 1]} : vector<80x128xf32> to vector<4x128xf32>
    %c0_151 = arith.constant 0 : index
    %c0_152 = arith.constant 0 : index
    %c16 = arith.constant 16 : index
    %c0_153 = arith.constant 0 : index
    %136 = vector.load %arg13[%c0_151, %c0_152, %c16, %c0_153] : memref<2x2x26x128xf32, #tpu.memory_space<vmem>>, vector<1x1x4x128xf32>
    %137 = vector.shape_cast %136 : vector<1x1x4x128xf32> to vector<4x128xf32>
    %138 = vector.shape_cast %135 : vector<4x128xf32> to vector<1x1x4x128xf32>
    tpu.vector_store %arg13[%c0_151, %c0_152, %c16, %c0_153], %138 {strides = array<i32>} : memref<2x2x26x128xf32, #tpu.memory_space<vmem>>, vector<1x1x4x128xf32>,
    %139 = vector.extract_strided_slice %90 {offsets = [30, 0], sizes = [4, 128], strides = [1, 1]} : vector<80x128xf32> to vector<4x128xf32>
    %c1_154 = arith.constant 1 : index
    %c1_155 = arith.constant 1 : index
    %c15_156 = arith.constant 15 : index
    %c0_157 = arith.constant 0 : index
    %140 = vector.load %arg13[%c1_154, %c1_155, %c15_156, %c0_157] : memref<2x2x26x128xf32, #tpu.memory_space<vmem>>, vector<1x1x4x128xf32>
    %141 = vector.shape_cast %140 : vector<1x1x4x128xf32> to vector<4x128xf32>
    %142 = vector.shape_cast %139 : vector<4x128xf32> to vector<1x1x4x128xf32>
    tpu.vector_store %arg13[%c1_154, %c1_155, %c15_156, %c0_157], %142 {strides = array<i32>} : memref<2x2x26x128xf32, #tpu.memory_space<vmem>>, vector<1x1x4x128xf32>,
    %143 = vector.extract_strided_slice %90 {offsets = [70, 0], sizes = [4, 128], strides = [1, 1]} : vector<80x128xf32> to vector<4x128xf32>
    %c1_158 = arith.constant 1 : index
    %c0_159 = arith.constant 0 : index
    %c16_160 = arith.constant 16 : index
    %c0_161 = arith.constant 0 : index
    %144 = vector.load %arg13[%c1_158, %c0_159, %c16_160, %c0_161] : memref<2x2x26x128xf32, #tpu.memory_space<vmem>>, vector<1x1x4x128xf32>
    %145 = vector.shape_cast %144 : vector<1x1x4x128xf32> to vector<4x128xf32>
    %146 = vector.shape_cast %143 : vector<4x128xf32> to vector<1x1x4x128xf32>
    tpu.vector_store %arg13[%c1_158, %c0_159, %c16_160, %c0_161], %146 {strides = array<i32>} : memref<2x2x26x128xf32, #tpu.memory_space<vmem>>, vector<1x1x4x128xf32>,
    %147 = vector.extract_strided_slice %90 {offsets = [35, 0], sizes = [4, 128], strides = [1, 1]} : vector<80x128xf32> to vector<4x128xf32>
    %c0_162 = arith.constant 0 : index
    %c1_163 = arith.constant 1 : index
    %c20 = arith.constant 20 : index
    %c0_164 = arith.constant 0 : index
    %148 = vector.load %arg13[%c0_162, %c1_163, %c20, %c0_164] : memref<2x2x26x128xf32, #tpu.memory_space<vmem>>, vector<1x1x4x128xf32>
    %149 = vector.shape_cast %148 : vector<1x1x4x128xf32> to vector<4x128xf32>
    %150 = vector.shape_cast %147 : vector<4x128xf32> to vector<1x1x4x128xf32>
    tpu.vector_store %arg13[%c0_162, %c1_163, %c20, %c0_164], %150 {strides = array<i32>} : memref<2x2x26x128xf32, #tpu.memory_space<vmem>>, vector<1x1x4x128xf32>,
    %151 = vector.extract_strided_slice %90 {offsets = [75, 0], sizes = [4, 128], strides = [1, 1]} : vector<80x128xf32> to vector<4x128xf32>
    %c0_165 = arith.constant 0 : index
    %c0_166 = arith.constant 0 : index
    %c21 = arith.constant 21 : index
    %c0_167 = arith.constant 0 : index
    %152 = vector.load %arg13[%c0_165, %c0_166, %c21, %c0_167] : memref<2x2x26x128xf32, #tpu.memory_space<vmem>>, vector<1x1x4x128xf32>
    %153 = vector.shape_cast %152 : vector<1x1x4x128xf32> to vector<4x128xf32>
    %154 = vector.shape_cast %151 : vector<4x128xf32> to vector<1x1x4x128xf32>
    tpu.vector_store %arg13[%c0_165, %c0_166, %c21, %c0_167], %154 {strides = array<i32>} : memref<2x2x26x128xf32, #tpu.memory_space<vmem>>, vector<1x1x4x128xf32>,
    %cst_168 = arith.constant 0.000000e+00 : f32
    %155 = vector.broadcast %cst_168 : f32 to vector<20x128xf32>
    %c0_169 = arith.constant 0 : index
    %c0_170 = arith.constant 0 : index
    %c0_171 = arith.constant 0 : index
    %c0_172 = arith.constant 0 : index
    %156 = vector.load %arg13[%c0_169, %c0_170, %c0_171, %c0_172] : memref<2x2x26x128xf32, #tpu.memory_space<vmem>>, vector<1x1x20x128xf32>
    %157 = vector.shape_cast %156 : vector<1x1x20x128xf32> to vector<20x128xf32>
    %c0_173 = arith.constant 0 : index
    %c0_174 = arith.constant 0 : index
    %c0_175 = arith.constant 0 : index
    %158 = vector.load %arg3[%c0_173, %c0_174, %c0_175] : memref<9x128x128xf32, #tpu.memory_space<vmem>>, vector<1x128x128xf32>
    %159 = vector.shape_cast %158 : vector<1x128x128xf32> to vector<128x128xf32>
    %cst_176 = arith.constant dense<0.000000e+00> : vector<20x128xf32>
    %160 = tpu.matmul %157, %159, %cst_176 {dimension_numbers = #tpu.dot_dimension_numbers<[1], [0], [0], [1], [0, 0, 1, 1], [], []>} : vector<20x128xf32>, vector<128x128xf32>, vector<20x128xf32> -> vector<20x128xf32>
    %161 = arith.addf %155, %160 : vector<20x128xf32>
    %c0_177 = arith.constant 0 : index
    %c1_178 = arith.constant 1 : index
    %c0_179 = arith.constant 0 : index
    %c0_180 = arith.constant 0 : index
    %162 = vector.load %arg13[%c0_177, %c1_178, %c0_179, %c0_180] : memref<2x2x26x128xf32, #tpu.memory_space<vmem>>, vector<1x1x20x128xf32>
    %163 = vector.shape_cast %162 : vector<1x1x20x128xf32> to vector<20x128xf32>
    %c1_181 = arith.constant 1 : index
    %c0_182 = arith.constant 0 : index
    %c0_183 = arith.constant 0 : index
    %164 = vector.load %arg3[%c1_181, %c0_182, %c0_183] : memref<9x128x128xf32, #tpu.memory_space<vmem>>, vector<1x128x128xf32>
    %165 = vector.shape_cast %164 : vector<1x128x128xf32> to vector<128x128xf32>
    %cst_184 = arith.constant dense<0.000000e+00> : vector<20x128xf32>
    %166 = tpu.matmul %163, %165, %cst_184 {dimension_numbers = #tpu.dot_dimension_numbers<[1], [0], [0], [1], [0, 0, 1, 1], [], []>} : vector<20x128xf32>, vector<128x128xf32>, vector<20x128xf32> -> vector<20x128xf32>
    %167 = arith.addf %161, %166 : vector<20x128xf32>
    %c0_185 = arith.constant 0 : index
    %c0_186 = arith.constant 0 : index
    %c1_187 = arith.constant 1 : index
    %c0_188 = arith.constant 0 : index
    %168 = vector.load %arg13[%c0_185, %c0_186, %c1_187, %c0_188] : memref<2x2x26x128xf32, #tpu.memory_space<vmem>>, vector<1x1x20x128xf32>
    %169 = vector.shape_cast %168 : vector<1x1x20x128xf32> to vector<20x128xf32>
    %c2_189 = arith.constant 2 : index
    %c0_190 = arith.constant 0 : index
    %c0_191 = arith.constant 0 : index
    %170 = vector.load %arg3[%c2_189, %c0_190, %c0_191] : memref<9x128x128xf32, #tpu.memory_space<vmem>>, vector<1x128x128xf32>
    %171 = vector.shape_cast %170 : vector<1x128x128xf32> to vector<128x128xf32>
    %cst_192 = arith.constant dense<0.000000e+00> : vector<20x128xf32>
    %172 = tpu.matmul %169, %171, %cst_192 {dimension_numbers = #tpu.dot_dimension_numbers<[1], [0], [0], [1], [0, 0, 1, 1], [], []>} : vector<20x128xf32>, vector<128x128xf32>, vector<20x128xf32> -> vector<20x128xf32>
    %173 = arith.addf %167, %172 : vector<20x128xf32>
    %c1_193 = arith.constant 1 : index
    %c0_194 = arith.constant 0 : index
    %c0_195 = arith.constant 0 : index
    %c0_196 = arith.constant 0 : index
    %174 = vector.load %arg13[%c1_193, %c0_194, %c0_195, %c0_196] : memref<2x2x26x128xf32, #tpu.memory_space<vmem>>, vector<1x1x20x128xf32>
    %175 = vector.shape_cast %174 : vector<1x1x20x128xf32> to vector<20x128xf32>
    %c3_197 = arith.constant 3 : index
    %c0_198 = arith.constant 0 : index
    %c0_199 = arith.constant 0 : index
    %176 = vector.load %arg3[%c3_197, %c0_198, %c0_199] : memref<9x128x128xf32, #tpu.memory_space<vmem>>, vector<1x128x128xf32>
    %177 = vector.shape_cast %176 : vector<1x128x128xf32> to vector<128x128xf32>
    %cst_200 = arith.constant dense<0.000000e+00> : vector<20x128xf32>
    %178 = tpu.matmul %175, %177, %cst_200 {dimension_numbers = #tpu.dot_dimension_numbers<[1], [0], [0], [1], [0, 0, 1, 1], [], []>} : vector<20x128xf32>, vector<128x128xf32>, vector<20x128xf32> -> vector<20x128xf32>
    %179 = arith.addf %173, %178 : vector<20x128xf32>
    %c1_201 = arith.constant 1 : index
    %c1_202 = arith.constant 1 : index
    %c0_203 = arith.constant 0 : index
    %c0_204 = arith.constant 0 : index
    %180 = vector.load %arg13[%c1_201, %c1_202, %c0_203, %c0_204] : memref<2x2x26x128xf32, #tpu.memory_space<vmem>>, vector<1x1x20x128xf32>
    %181 = vector.shape_cast %180 : vector<1x1x20x128xf32> to vector<20x128xf32>
    %c4_205 = arith.constant 4 : index
    %c0_206 = arith.constant 0 : index
    %c0_207 = arith.constant 0 : index
    %182 = vector.load %arg3[%c4_205, %c0_206, %c0_207] : memref<9x128x128xf32, #tpu.memory_space<vmem>>, vector<1x128x128xf32>
    %183 = vector.shape_cast %182 : vector<1x128x128xf32> to vector<128x128xf32>
    %cst_208 = arith.constant dense<0.000000e+00> : vector<20x128xf32>
    %184 = tpu.matmul %181, %183, %cst_208 {dimension_numbers = #tpu.dot_dimension_numbers<[1], [0], [0], [1], [0, 0, 1, 1], [], []>} : vector<20x128xf32>, vector<128x128xf32>, vector<20x128xf32> -> vector<20x128xf32>
    %185 = arith.addf %179, %184 : vector<20x128xf32>
    %c1_209 = arith.constant 1 : index
    %c0_210 = arith.constant 0 : index
    %c1_211 = arith.constant 1 : index
    %c0_212 = arith.constant 0 : index
    %186 = vector.load %arg13[%c1_209, %c0_210, %c1_211, %c0_212] : memref<2x2x26x128xf32, #tpu.memory_space<vmem>>, vector<1x1x20x128xf32>
    %187 = vector.shape_cast %186 : vector<1x1x20x128xf32> to vector<20x128xf32>
    %c5_213 = arith.constant 5 : index
    %c0_214 = arith.constant 0 : index
    %c0_215 = arith.constant 0 : index
    %188 = vector.load %arg3[%c5_213, %c0_214, %c0_215] : memref<9x128x128xf32, #tpu.memory_space<vmem>>, vector<1x128x128xf32>
    %189 = vector.shape_cast %188 : vector<1x128x128xf32> to vector<128x128xf32>
    %cst_216 = arith.constant dense<0.000000e+00> : vector<20x128xf32>
    %190 = tpu.matmul %187, %189, %cst_216 {dimension_numbers = #tpu.dot_dimension_numbers<[1], [0], [0], [1], [0, 0, 1, 1], [], []>} : vector<20x128xf32>, vector<128x128xf32>, vector<20x128xf32> -> vector<20x128xf32>
    %191 = arith.addf %185, %190 : vector<20x128xf32>
    %c0_217 = arith.constant 0 : index
    %c0_218 = arith.constant 0 : index
    %c5_219 = arith.constant 5 : index
    %c0_220 = arith.constant 0 : index
    %192 = vector.load %arg13[%c0_217, %c0_218, %c5_219, %c0_220] : memref<2x2x26x128xf32, #tpu.memory_space<vmem>>, vector<1x1x20x128xf32>
    %193 = vector.shape_cast %192 : vector<1x1x20x128xf32> to vector<20x128xf32>
    %c6_221 = arith.constant 6 : index
    %c0_222 = arith.constant 0 : index
    %c0_223 = arith.constant 0 : index
    %194 = vector.load %arg3[%c6_221, %c0_222, %c0_223] : memref<9x128x128xf32, #tpu.memory_space<vmem>>, vector<1x128x128xf32>
    %195 = vector.shape_cast %194 : vector<1x128x128xf32> to vector<128x128xf32>
    %cst_224 = arith.constant dense<0.000000e+00> : vector<20x128xf32>
    %196 = tpu.matmul %193, %195, %cst_224 {dimension_numbers = #tpu.dot_dimension_numbers<[1], [0], [0], [1], [0, 0, 1, 1], [], []>} : vector<20x128xf32>, vector<128x128xf32>, vector<20x128xf32> -> vector<20x128xf32>
    %197 = arith.addf %191, %196 : vector<20x128xf32>
    %c0_225 = arith.constant 0 : index
    %c1_226 = arith.constant 1 : index
    %c5_227 = arith.constant 5 : index
    %c0_228 = arith.constant 0 : index
    %198 = vector.load %arg13[%c0_225, %c1_226, %c5_227, %c0_228] : memref<2x2x26x128xf32, #tpu.memory_space<vmem>>, vector<1x1x20x128xf32>
    %199 = vector.shape_cast %198 : vector<1x1x20x128xf32> to vector<20x128xf32>
    %c7_229 = arith.constant 7 : index
    %c0_230 = arith.constant 0 : index
    %c0_231 = arith.constant 0 : index
    %200 = vector.load %arg3[%c7_229, %c0_230, %c0_231] : memref<9x128x128xf32, #tpu.memory_space<vmem>>, vector<1x128x128xf32>
    %201 = vector.shape_cast %200 : vector<1x128x128xf32> to vector<128x128xf32>
    %cst_232 = arith.constant dense<0.000000e+00> : vector<20x128xf32>
    %202 = tpu.matmul %199, %201, %cst_232 {dimension_numbers = #tpu.dot_dimension_numbers<[1], [0], [0], [1], [0, 0, 1, 1], [], []>} : vector<20x128xf32>, vector<128x128xf32>, vector<20x128xf32> -> vector<20x128xf32>
    %203 = arith.addf %197, %202 : vector<20x128xf32>
    %c0_233 = arith.constant 0 : index
    %c0_234 = arith.constant 0 : index
    %c6_235 = arith.constant 6 : index
    %c0_236 = arith.constant 0 : index
    %204 = vector.load %arg13[%c0_233, %c0_234, %c6_235, %c0_236] : memref<2x2x26x128xf32, #tpu.memory_space<vmem>>, vector<1x1x20x128xf32>
    %205 = vector.shape_cast %204 : vector<1x1x20x128xf32> to vector<20x128xf32>
    %c8_237 = arith.constant 8 : index
    %c0_238 = arith.constant 0 : index
    %c0_239 = arith.constant 0 : index
    %206 = vector.load %arg3[%c8_237, %c0_238, %c0_239] : memref<9x128x128xf32, #tpu.memory_space<vmem>>, vector<1x128x128xf32>
    %207 = vector.shape_cast %206 : vector<1x128x128xf32> to vector<128x128xf32>
    %cst_240 = arith.constant dense<0.000000e+00> : vector<20x128xf32>
    %208 = tpu.matmul %205, %207, %cst_240 {dimension_numbers = #tpu.dot_dimension_numbers<[1], [0], [0], [1], [0, 0, 1, 1], [], []>} : vector<20x128xf32>, vector<128x128xf32>, vector<20x128xf32> -> vector<20x128xf32>
    %209 = arith.addf %203, %208 : vector<20x128xf32>
    %c0_241 = arith.constant 0 : index
    %c0_242 = arith.constant 0 : index
    %210 = vector.load %arg4[%c0_241, %c0_242] : memref<1x128xf32, #tpu.memory_space<vmem>>, vector<1x128xf32>
    %211 = vector.broadcast %210 : vector<1x128xf32> to vector<20x128xf32>
    %212 = arith.addf %209, %211 : vector<20x128xf32>
    %cst_243 = arith.constant 0.000000e+00 : f32
    %213 = vector.broadcast %cst_243 : f32 to vector<20x128xf32>
    %214 = arith.maximumf %212, %213 : vector<20x128xf32>
    %215 = vector.extract_strided_slice %214 {offsets = [0, 0], sizes = [4, 128], strides = [1, 1]} : vector<20x128xf32> to vector<4x128xf32>
    %c7_244 = arith.constant 7 : index
    %c0_245 = arith.constant 0 : index
    %216 = vector.load %arg14[%c7_244, %c0_245] : memref<38x128xf32, #tpu.memory_space<vmem>>, vector<4x128xf32>
    tpu.vector_store %arg14[%c7_244, %c0_245], %215 {strides = array<i32>} : memref<38x128xf32, #tpu.memory_space<vmem>>, vector<4x128xf32>,
    %217 = vector.extract_strided_slice %214 {offsets = [5, 0], sizes = [4, 128], strides = [1, 1]} : vector<20x128xf32> to vector<4x128xf32>
    %c13 = arith.constant 13 : index
    %c0_246 = arith.constant 0 : index
    %218 = vector.load %arg14[%c13, %c0_246] : memref<38x128xf32, #tpu.memory_space<vmem>>, vector<4x128xf32>
    tpu.vector_store %arg14[%c13, %c0_246], %217 {strides = array<i32>} : memref<38x128xf32, #tpu.memory_space<vmem>>, vector<4x128xf32>,
    %219 = vector.extract_strided_slice %214 {offsets = [10, 0], sizes = [4, 128], strides = [1, 1]} : vector<20x128xf32> to vector<4x128xf32>
    %c19 = arith.constant 19 : index
    %c0_247 = arith.constant 0 : index
    %220 = vector.load %arg14[%c19, %c0_247] : memref<38x128xf32, #tpu.memory_space<vmem>>, vector<4x128xf32>
    tpu.vector_store %arg14[%c19, %c0_247], %219 {strides = array<i32>} : memref<38x128xf32, #tpu.memory_space<vmem>>, vector<4x128xf32>,
    %221 = vector.extract_strided_slice %214 {offsets = [15, 0], sizes = [4, 128], strides = [1, 1]} : vector<20x128xf32> to vector<4x128xf32>
    %c25 = arith.constant 25 : index
    %c0_248 = arith.constant 0 : index
    %222 = vector.load %arg14[%c25, %c0_248] : memref<38x128xf32, #tpu.memory_space<vmem>>, vector<4x128xf32>
    tpu.vector_store %arg14[%c25, %c0_248], %221 {strides = array<i32>} : memref<38x128xf32, #tpu.memory_space<vmem>>, vector<4x128xf32>,
    %cst_249 = arith.constant 0.000000e+00 : f32
    %223 = vector.broadcast %cst_249 : f32 to vector<24x128xf32>
    %c0_250 = arith.constant 0 : index
    %c0_251 = arith.constant 0 : index
    %224 = vector.load %arg14[%c0_250, %c0_251] : memref<38x128xf32, #tpu.memory_space<vmem>>, vector<24x128xf32>
    %c0_252 = arith.constant 0 : index
    %c0_253 = arith.constant 0 : index
    %c0_254 = arith.constant 0 : index
    %225 = vector.load %arg5[%c0_252, %c0_253, %c0_254] : memref<9x128x128xf32, #tpu.memory_space<vmem>>, vector<1x128x128xf32>
    %226 = vector.shape_cast %225 : vector<1x128x128xf32> to vector<128x128xf32>
    %cst_255 = arith.constant dense<0.000000e+00> : vector<24x128xf32>
    %227 = tpu.matmul %224, %226, %cst_255 {dimension_numbers = #tpu.dot_dimension_numbers<[1], [0], [0], [1], [0, 0, 1, 1], [], []>} : vector<24x128xf32>, vector<128x128xf32>, vector<24x128xf32> -> vector<24x128xf32>
    %228 = arith.addf %223, %227 : vector<24x128xf32>
    %c1_256 = arith.constant 1 : index
    %c0_257 = arith.constant 0 : index
    %229 = vector.load %arg14[%c1_256, %c0_257] : memref<38x128xf32, #tpu.memory_space<vmem>>, vector<24x128xf32>
    %c1_258 = arith.constant 1 : index
    %c0_259 = arith.constant 0 : index
    %c0_260 = arith.constant 0 : index
    %230 = vector.load %arg5[%c1_258, %c0_259, %c0_260] : memref<9x128x128xf32, #tpu.memory_space<vmem>>, vector<1x128x128xf32>
    %231 = vector.shape_cast %230 : vector<1x128x128xf32> to vector<128x128xf32>
    %cst_261 = arith.constant dense<0.000000e+00> : vector<24x128xf32>
    %232 = tpu.matmul %229, %231, %cst_261 {dimension_numbers = #tpu.dot_dimension_numbers<[1], [0], [0], [1], [0, 0, 1, 1], [], []>} : vector<24x128xf32>, vector<128x128xf32>, vector<24x128xf32> -> vector<24x128xf32>
    %233 = arith.addf %228, %232 : vector<24x128xf32>
    %c2_262 = arith.constant 2 : index
    %c0_263 = arith.constant 0 : index
    %234 = vector.load %arg14[%c2_262, %c0_263] : memref<38x128xf32, #tpu.memory_space<vmem>>, vector<24x128xf32>
    %c2_264 = arith.constant 2 : index
    %c0_265 = arith.constant 0 : index
    %c0_266 = arith.constant 0 : index
    %235 = vector.load %arg5[%c2_264, %c0_265, %c0_266] : memref<9x128x128xf32, #tpu.memory_space<vmem>>, vector<1x128x128xf32>
    %236 = vector.shape_cast %235 : vector<1x128x128xf32> to vector<128x128xf32>
    %cst_267 = arith.constant dense<0.000000e+00> : vector<24x128xf32>
    %237 = tpu.matmul %234, %236, %cst_267 {dimension_numbers = #tpu.dot_dimension_numbers<[1], [0], [0], [1], [0, 0, 1, 1], [], []>} : vector<24x128xf32>, vector<128x128xf32>, vector<24x128xf32> -> vector<24x128xf32>
    %238 = arith.addf %233, %237 : vector<24x128xf32>
    %c6_268 = arith.constant 6 : index
    %c0_269 = arith.constant 0 : index
    %239 = vector.load %arg14[%c6_268, %c0_269] : memref<38x128xf32, #tpu.memory_space<vmem>>, vector<24x128xf32>
    %c3_270 = arith.constant 3 : index
    %c0_271 = arith.constant 0 : index
    %c0_272 = arith.constant 0 : index
    %240 = vector.load %arg5[%c3_270, %c0_271, %c0_272] : memref<9x128x128xf32, #tpu.memory_space<vmem>>, vector<1x128x128xf32>
    %241 = vector.shape_cast %240 : vector<1x128x128xf32> to vector<128x128xf32>
    %cst_273 = arith.constant dense<0.000000e+00> : vector<24x128xf32>
    %242 = tpu.matmul %239, %241, %cst_273 {dimension_numbers = #tpu.dot_dimension_numbers<[1], [0], [0], [1], [0, 0, 1, 1], [], []>} : vector<24x128xf32>, vector<128x128xf32>, vector<24x128xf32> -> vector<24x128xf32>
    %243 = arith.addf %238, %242 : vector<24x128xf32>
    %c7_274 = arith.constant 7 : index
    %c0_275 = arith.constant 0 : index
    %244 = vector.load %arg14[%c7_274, %c0_275] : memref<38x128xf32, #tpu.memory_space<vmem>>, vector<24x128xf32>
    %c4_276 = arith.constant 4 : index
    %c0_277 = arith.constant 0 : index
    %c0_278 = arith.constant 0 : index
    %245 = vector.load %arg5[%c4_276, %c0_277, %c0_278] : memref<9x128x128xf32, #tpu.memory_space<vmem>>, vector<1x128x128xf32>
    %246 = vector.shape_cast %245 : vector<1x128x128xf32> to vector<128x128xf32>
    %cst_279 = arith.constant dense<0.000000e+00> : vector<24x128xf32>
    %247 = tpu.matmul %244, %246, %cst_279 {dimension_numbers = #tpu.dot_dimension_numbers<[1], [0], [0], [1], [0, 0, 1, 1], [], []>} : vector<24x128xf32>, vector<128x128xf32>, vector<24x128xf32> -> vector<24x128xf32>
    %248 = arith.addf %243, %247 : vector<24x128xf32>
    %c8_280 = arith.constant 8 : index
    %c0_281 = arith.constant 0 : index
    %249 = vector.load %arg14[%c8_280, %c0_281] : memref<38x128xf32, #tpu.memory_space<vmem>>, vector<24x128xf32>
    %c5_282 = arith.constant 5 : index
    %c0_283 = arith.constant 0 : index
    %c0_284 = arith.constant 0 : index
    %250 = vector.load %arg5[%c5_282, %c0_283, %c0_284] : memref<9x128x128xf32, #tpu.memory_space<vmem>>, vector<1x128x128xf32>
    %251 = vector.shape_cast %250 : vector<1x128x128xf32> to vector<128x128xf32>
    %cst_285 = arith.constant dense<0.000000e+00> : vector<24x128xf32>
    %252 = tpu.matmul %249, %251, %cst_285 {dimension_numbers = #tpu.dot_dimension_numbers<[1], [0], [0], [1], [0, 0, 1, 1], [], []>} : vector<24x128xf32>, vector<128x128xf32>, vector<24x128xf32> -> vector<24x128xf32>
    %253 = arith.addf %248, %252 : vector<24x128xf32>
    %c12 = arith.constant 12 : index
    %c0_286 = arith.constant 0 : index
    %254 = vector.load %arg14[%c12, %c0_286] : memref<38x128xf32, #tpu.memory_space<vmem>>, vector<24x128xf32>
    %c6_287 = arith.constant 6 : index
    %c0_288 = arith.constant 0 : index
    %c0_289 = arith.constant 0 : index
    %255 = vector.load %arg5[%c6_287, %c0_288, %c0_289] : memref<9x128x128xf32, #tpu.memory_space<vmem>>, vector<1x128x128xf32>
    %256 = vector.shape_cast %255 : vector<1x128x128xf32> to vector<128x128xf32>
    %cst_290 = arith.constant dense<0.000000e+00> : vector<24x128xf32>
    %257 = tpu.matmul %254, %256, %cst_290 {dimension_numbers = #tpu.dot_dimension_numbers<[1], [0], [0], [1], [0, 0, 1, 1], [], []>} : vector<24x128xf32>, vector<128x128xf32>, vector<24x128xf32> -> vector<24x128xf32>
    %258 = arith.addf %253, %257 : vector<24x128xf32>
    %c13_291 = arith.constant 13 : index
    %c0_292 = arith.constant 0 : index
    %259 = vector.load %arg14[%c13_291, %c0_292] : memref<38x128xf32, #tpu.memory_space<vmem>>, vector<24x128xf32>
    %c7_293 = arith.constant 7 : index
    %c0_294 = arith.constant 0 : index
    %c0_295 = arith.constant 0 : index
    %260 = vector.load %arg5[%c7_293, %c0_294, %c0_295] : memref<9x128x128xf32, #tpu.memory_space<vmem>>, vector<1x128x128xf32>
    %261 = vector.shape_cast %260 : vector<1x128x128xf32> to vector<128x128xf32>
    %cst_296 = arith.constant dense<0.000000e+00> : vector<24x128xf32>
    %262 = tpu.matmul %259, %261, %cst_296 {dimension_numbers = #tpu.dot_dimension_numbers<[1], [0], [0], [1], [0, 0, 1, 1], [], []>} : vector<24x128xf32>, vector<128x128xf32>, vector<24x128xf32> -> vector<24x128xf32>
    %263 = arith.addf %258, %262 : vector<24x128xf32>
    %c14 = arith.constant 14 : index
    %c0_297 = arith.constant 0 : index
    %264 = vector.load %arg14[%c14, %c0_297] : memref<38x128xf32, #tpu.memory_space<vmem>>, vector<24x128xf32>
    %c8_298 = arith.constant 8 : index
    %c0_299 = arith.constant 0 : index
    %c0_300 = arith.constant 0 : index
    %265 = vector.load %arg5[%c8_298, %c0_299, %c0_300] : memref<9x128x128xf32, #tpu.memory_space<vmem>>, vector<1x128x128xf32>
    %266 = vector.shape_cast %265 : vector<1x128x128xf32> to vector<128x128xf32>
    %cst_301 = arith.constant dense<0.000000e+00> : vector<24x128xf32>
    %267 = tpu.matmul %264, %266, %cst_301 {dimension_numbers = #tpu.dot_dimension_numbers<[1], [0], [0], [1], [0, 0, 1, 1], [], []>} : vector<24x128xf32>, vector<128x128xf32>, vector<24x128xf32> -> vector<24x128xf32>
    %268 = arith.addf %263, %267 : vector<24x128xf32>
    %c0_302 = arith.constant 0 : index
    %c0_303 = arith.constant 0 : index
    %269 = vector.load %arg6[%c0_302, %c0_303] : memref<1x128xf32, #tpu.memory_space<vmem>>, vector<1x128xf32>
    %270 = vector.broadcast %269 : vector<1x128xf32> to vector<24x128xf32>
    %271 = arith.addf %268, %270 : vector<24x128xf32>
    %cst_304 = arith.constant 0.000000e+00 : f32
    %272 = vector.broadcast %cst_304 : f32 to vector<24x128xf32>
    %273 = arith.maximumf %271, %272 : vector<24x128xf32>
    %274 = vector.extract_strided_slice %273 {offsets = [0, 0], sizes = [24, 48], strides = [1, 1]} : vector<24x128xf32> to vector<24x48xf32>
    %275 = vector.extract_strided_slice %274 {offsets = [0, 0], sizes = [1, 48], strides = [1, 1]} : vector<24x48xf32> to vector<1x48xf32>
    %c0_305 = arith.constant 0 : index
    %c0_306 = arith.constant 0 : index
    %276 = vector.load %arg15[%c0_305, %c0_306] : memref<2x768xf32, #tpu.memory_space<vmem>>, vector<1x48xf32>
    tpu.vector_store %arg15[%c0_305, %c0_306], %275 {strides = array<i32>} : memref<2x768xf32, #tpu.memory_space<vmem>>, vector<1x48xf32>,
    %277 = vector.extract_strided_slice %274 {offsets = [1, 0], sizes = [1, 48], strides = [1, 1]} : vector<24x48xf32> to vector<1x48xf32>
    %c0_307 = arith.constant 0 : index
    %c48 = arith.constant 48 : index
    %278 = vector.load %arg15[%c0_307, %c48] : memref<2x768xf32, #tpu.memory_space<vmem>>, vector<1x48xf32>
    tpu.vector_store %arg15[%c0_307, %c48], %277 {strides = array<i32>} : memref<2x768xf32, #tpu.memory_space<vmem>>, vector<1x48xf32>,
    %279 = vector.extract_strided_slice %274 {offsets = [2, 0], sizes = [1, 48], strides = [1, 1]} : vector<24x48xf32> to vector<1x48xf32>
    %c0_308 = arith.constant 0 : index
    %c96 = arith.constant 96 : index
    %280 = vector.load %arg15[%c0_308, %c96] : memref<2x768xf32, #tpu.memory_space<vmem>>, vector<1x48xf32>
    tpu.vector_store %arg15[%c0_308, %c96], %279 {strides = array<i32>} : memref<2x768xf32, #tpu.memory_space<vmem>>, vector<1x48xf32>,
    %281 = vector.extract_strided_slice %274 {offsets = [3, 0], sizes = [1, 48], strides = [1, 1]} : vector<24x48xf32> to vector<1x48xf32>
    %c0_309 = arith.constant 0 : index
    %c144 = arith.constant 144 : index
    %282 = vector.load %arg15[%c0_309, %c144] : memref<2x768xf32, #tpu.memory_space<vmem>>, vector<1x48xf32>
    tpu.vector_store %arg15[%c0_309, %c144], %281 {strides = array<i32>} : memref<2x768xf32, #tpu.memory_space<vmem>>, vector<1x48xf32>,
    %283 = vector.extract_strided_slice %274 {offsets = [6, 0], sizes = [1, 48], strides = [1, 1]} : vector<24x48xf32> to vector<1x48xf32>
    %c0_310 = arith.constant 0 : index
    %c192 = arith.constant 192 : index
    %284 = vector.load %arg15[%c0_310, %c192] : memref<2x768xf32, #tpu.memory_space<vmem>>, vector<1x48xf32>
    tpu.vector_store %arg15[%c0_310, %c192], %283 {strides = array<i32>} : memref<2x768xf32, #tpu.memory_space<vmem>>, vector<1x48xf32>,
    %285 = vector.extract_strided_slice %274 {offsets = [7, 0], sizes = [1, 48], strides = [1, 1]} : vector<24x48xf32> to vector<1x48xf32>
    %c0_311 = arith.constant 0 : index
    %c240 = arith.constant 240 : index
    %286 = vector.load %arg15[%c0_311, %c240] : memref<2x768xf32, #tpu.memory_space<vmem>>, vector<1x48xf32>
    tpu.vector_store %arg15[%c0_311, %c240], %285 {strides = array<i32>} : memref<2x768xf32, #tpu.memory_space<vmem>>, vector<1x48xf32>,
    %287 = vector.extract_strided_slice %274 {offsets = [8, 0], sizes = [1, 48], strides = [1, 1]} : vector<24x48xf32> to vector<1x48xf32>
    %c0_312 = arith.constant 0 : index
    %c288 = arith.constant 288 : index
    %288 = vector.load %arg15[%c0_312, %c288] : memref<2x768xf32, #tpu.memory_space<vmem>>, vector<1x48xf32>
    tpu.vector_store %arg15[%c0_312, %c288], %287 {strides = array<i32>} : memref<2x768xf32, #tpu.memory_space<vmem>>, vector<1x48xf32>,
    %289 = vector.extract_strided_slice %274 {offsets = [9, 0], sizes = [1, 48], strides = [1, 1]} : vector<24x48xf32> to vector<1x48xf32>
    %c0_313 = arith.constant 0 : index
    %c336 = arith.constant 336 : index
    %290 = vector.load %arg15[%c0_313, %c336] : memref<2x768xf32, #tpu.memory_space<vmem>>, vector<1x48xf32>
    tpu.vector_store %arg15[%c0_313, %c336], %289 {strides = array<i32>} : memref<2x768xf32, #tpu.memory_space<vmem>>, vector<1x48xf32>,
    %291 = vector.extract_strided_slice %274 {offsets = [12, 0], sizes = [1, 48], strides = [1, 1]} : vector<24x48xf32> to vector<1x48xf32>
    %c0_314 = arith.constant 0 : index
    %c384 = arith.constant 384 : index
    %292 = vector.load %arg15[%c0_314, %c384] : memref<2x768xf32, #tpu.memory_space<vmem>>, vector<1x48xf32>
    tpu.vector_store %arg15[%c0_314, %c384], %291 {strides = array<i32>} : memref<2x768xf32, #tpu.memory_space<vmem>>, vector<1x48xf32>,
    %293 = vector.extract_strided_slice %274 {offsets = [13, 0], sizes = [1, 48], strides = [1, 1]} : vector<24x48xf32> to vector<1x48xf32>
    %c0_315 = arith.constant 0 : index
    %c432 = arith.constant 432 : index
    %294 = vector.load %arg15[%c0_315, %c432] : memref<2x768xf32, #tpu.memory_space<vmem>>, vector<1x48xf32>
    tpu.vector_store %arg15[%c0_315, %c432], %293 {strides = array<i32>} : memref<2x768xf32, #tpu.memory_space<vmem>>, vector<1x48xf32>,
    %295 = vector.extract_strided_slice %274 {offsets = [14, 0], sizes = [1, 48], strides = [1, 1]} : vector<24x48xf32> to vector<1x48xf32>
    %c0_316 = arith.constant 0 : index
    %c480 = arith.constant 480 : index
    %296 = vector.load %arg15[%c0_316, %c480] : memref<2x768xf32, #tpu.memory_space<vmem>>, vector<1x48xf32>
    tpu.vector_store %arg15[%c0_316, %c480], %295 {strides = array<i32>} : memref<2x768xf32, #tpu.memory_space<vmem>>, vector<1x48xf32>,
    %297 = vector.extract_strided_slice %274 {offsets = [15, 0], sizes = [1, 48], strides = [1, 1]} : vector<24x48xf32> to vector<1x48xf32>
    %c0_317 = arith.constant 0 : index
    %c528 = arith.constant 528 : index
    %298 = vector.load %arg15[%c0_317, %c528] : memref<2x768xf32, #tpu.memory_space<vmem>>, vector<1x48xf32>
    tpu.vector_store %arg15[%c0_317, %c528], %297 {strides = array<i32>} : memref<2x768xf32, #tpu.memory_space<vmem>>, vector<1x48xf32>,
    %299 = vector.extract_strided_slice %274 {offsets = [18, 0], sizes = [1, 48], strides = [1, 1]} : vector<24x48xf32> to vector<1x48xf32>
    %c0_318 = arith.constant 0 : index
    %c576 = arith.constant 576 : index
    %300 = vector.load %arg15[%c0_318, %c576] : memref<2x768xf32, #tpu.memory_space<vmem>>, vector<1x48xf32>
    tpu.vector_store %arg15[%c0_318, %c576], %299 {strides = array<i32>} : memref<2x768xf32, #tpu.memory_space<vmem>>, vector<1x48xf32>,
    %301 = vector.extract_strided_slice %274 {offsets = [19, 0], sizes = [1, 48], strides = [1, 1]} : vector<24x48xf32> to vector<1x48xf32>
    %c0_319 = arith.constant 0 : index
    %c624 = arith.constant 624 : index
    %302 = vector.load %arg15[%c0_319, %c624] : memref<2x768xf32, #tpu.memory_space<vmem>>, vector<1x48xf32>
    tpu.vector_store %arg15[%c0_319, %c624], %301 {strides = array<i32>} : memref<2x768xf32, #tpu.memory_space<vmem>>, vector<1x48xf32>,
    %303 = vector.extract_strided_slice %274 {offsets = [20, 0], sizes = [1, 48], strides = [1, 1]} : vector<24x48xf32> to vector<1x48xf32>
    %c0_320 = arith.constant 0 : index
    %c672 = arith.constant 672 : index
    %304 = vector.load %arg15[%c0_320, %c672] : memref<2x768xf32, #tpu.memory_space<vmem>>, vector<1x48xf32>
    tpu.vector_store %arg15[%c0_320, %c672], %303 {strides = array<i32>} : memref<2x768xf32, #tpu.memory_space<vmem>>, vector<1x48xf32>,
    %305 = vector.extract_strided_slice %274 {offsets = [21, 0], sizes = [1, 48], strides = [1, 1]} : vector<24x48xf32> to vector<1x48xf32>
    %c0_321 = arith.constant 0 : index
    %c720 = arith.constant 720 : index
    %306 = vector.load %arg15[%c0_321, %c720] : memref<2x768xf32, #tpu.memory_space<vmem>>, vector<1x48xf32>
    tpu.vector_store %arg15[%c0_321, %c720], %305 {strides = array<i32>} : memref<2x768xf32, #tpu.memory_space<vmem>>, vector<1x48xf32>,
    %307 = vector.extract_strided_slice %273 {offsets = [0, 48], sizes = [24, 48], strides = [1, 1]} : vector<24x128xf32> to vector<24x48xf32>
    %308 = vector.extract_strided_slice %307 {offsets = [0, 0], sizes = [1, 48], strides = [1, 1]} : vector<24x48xf32> to vector<1x48xf32>
    %c1_322 = arith.constant 1 : index
    %c0_323 = arith.constant 0 : index
    %309 = vector.load %arg15[%c1_322, %c0_323] : memref<2x768xf32, #tpu.memory_space<vmem>>, vector<1x48xf32>
    tpu.vector_store %arg15[%c1_322, %c0_323], %308 {strides = array<i32>} : memref<2x768xf32, #tpu.memory_space<vmem>>, vector<1x48xf32>,
    %310 = vector.extract_strided_slice %307 {offsets = [1, 0], sizes = [1, 48], strides = [1, 1]} : vector<24x48xf32> to vector<1x48xf32>
    %c1_324 = arith.constant 1 : index
    %c48_325 = arith.constant 48 : index
    %311 = vector.load %arg15[%c1_324, %c48_325] : memref<2x768xf32, #tpu.memory_space<vmem>>, vector<1x48xf32>
    tpu.vector_store %arg15[%c1_324, %c48_325], %310 {strides = array<i32>} : memref<2x768xf32, #tpu.memory_space<vmem>>, vector<1x48xf32>,
    %312 = vector.extract_strided_slice %307 {offsets = [2, 0], sizes = [1, 48], strides = [1, 1]} : vector<24x48xf32> to vector<1x48xf32>
    %c1_326 = arith.constant 1 : index
    %c96_327 = arith.constant 96 : index
    %313 = vector.load %arg15[%c1_326, %c96_327] : memref<2x768xf32, #tpu.memory_space<vmem>>, vector<1x48xf32>
    tpu.vector_store %arg15[%c1_326, %c96_327], %312 {strides = array<i32>} : memref<2x768xf32, #tpu.memory_space<vmem>>, vector<1x48xf32>,
    %314 = vector.extract_strided_slice %307 {offsets = [3, 0], sizes = [1, 48], strides = [1, 1]} : vector<24x48xf32> to vector<1x48xf32>
    %c1_328 = arith.constant 1 : index
    %c144_329 = arith.constant 144 : index
    %315 = vector.load %arg15[%c1_328, %c144_329] : memref<2x768xf32, #tpu.memory_space<vmem>>, vector<1x48xf32>
    tpu.vector_store %arg15[%c1_328, %c144_329], %314 {strides = array<i32>} : memref<2x768xf32, #tpu.memory_space<vmem>>, vector<1x48xf32>,
    %316 = vector.extract_strided_slice %307 {offsets = [6, 0], sizes = [1, 48], strides = [1, 1]} : vector<24x48xf32> to vector<1x48xf32>
    %c1_330 = arith.constant 1 : index
    %c192_331 = arith.constant 192 : index
    %317 = vector.load %arg15[%c1_330, %c192_331] : memref<2x768xf32, #tpu.memory_space<vmem>>, vector<1x48xf32>
    tpu.vector_store %arg15[%c1_330, %c192_331], %316 {strides = array<i32>} : memref<2x768xf32, #tpu.memory_space<vmem>>, vector<1x48xf32>,
    %318 = vector.extract_strided_slice %307 {offsets = [7, 0], sizes = [1, 48], strides = [1, 1]} : vector<24x48xf32> to vector<1x48xf32>
    %c1_332 = arith.constant 1 : index
    %c240_333 = arith.constant 240 : index
    %319 = vector.load %arg15[%c1_332, %c240_333] : memref<2x768xf32, #tpu.memory_space<vmem>>, vector<1x48xf32>
    tpu.vector_store %arg15[%c1_332, %c240_333], %318 {strides = array<i32>} : memref<2x768xf32, #tpu.memory_space<vmem>>, vector<1x48xf32>,
    %320 = vector.extract_strided_slice %307 {offsets = [8, 0], sizes = [1, 48], strides = [1, 1]} : vector<24x48xf32> to vector<1x48xf32>
    %c1_334 = arith.constant 1 : index
    %c288_335 = arith.constant 288 : index
    %321 = vector.load %arg15[%c1_334, %c288_335] : memref<2x768xf32, #tpu.memory_space<vmem>>, vector<1x48xf32>
    tpu.vector_store %arg15[%c1_334, %c288_335], %320 {strides = array<i32>} : memref<2x768xf32, #tpu.memory_space<vmem>>, vector<1x48xf32>,
    %322 = vector.extract_strided_slice %307 {offsets = [9, 0], sizes = [1, 48], strides = [1, 1]} : vector<24x48xf32> to vector<1x48xf32>
    %c1_336 = arith.constant 1 : index
    %c336_337 = arith.constant 336 : index
    %323 = vector.load %arg15[%c1_336, %c336_337] : memref<2x768xf32, #tpu.memory_space<vmem>>, vector<1x48xf32>
    tpu.vector_store %arg15[%c1_336, %c336_337], %322 {strides = array<i32>} : memref<2x768xf32, #tpu.memory_space<vmem>>, vector<1x48xf32>,
    %324 = vector.extract_strided_slice %307 {offsets = [12, 0], sizes = [1, 48], strides = [1, 1]} : vector<24x48xf32> to vector<1x48xf32>
    %c1_338 = arith.constant 1 : index
    %c384_339 = arith.constant 384 : index
    %325 = vector.load %arg15[%c1_338, %c384_339] : memref<2x768xf32, #tpu.memory_space<vmem>>, vector<1x48xf32>
    tpu.vector_store %arg15[%c1_338, %c384_339], %324 {strides = array<i32>} : memref<2x768xf32, #tpu.memory_space<vmem>>, vector<1x48xf32>,
    %326 = vector.extract_strided_slice %307 {offsets = [13, 0], sizes = [1, 48], strides = [1, 1]} : vector<24x48xf32> to vector<1x48xf32>
    %c1_340 = arith.constant 1 : index
    %c432_341 = arith.constant 432 : index
    %327 = vector.load %arg15[%c1_340, %c432_341] : memref<2x768xf32, #tpu.memory_space<vmem>>, vector<1x48xf32>
    tpu.vector_store %arg15[%c1_340, %c432_341], %326 {strides = array<i32>} : memref<2x768xf32, #tpu.memory_space<vmem>>, vector<1x48xf32>,
    %328 = vector.extract_strided_slice %307 {offsets = [14, 0], sizes = [1, 48], strides = [1, 1]} : vector<24x48xf32> to vector<1x48xf32>
    %c1_342 = arith.constant 1 : index
    %c480_343 = arith.constant 480 : index
    %329 = vector.load %arg15[%c1_342, %c480_343] : memref<2x768xf32, #tpu.memory_space<vmem>>, vector<1x48xf32>
    tpu.vector_store %arg15[%c1_342, %c480_343], %328 {strides = array<i32>} : memref<2x768xf32, #tpu.memory_space<vmem>>, vector<1x48xf32>,
    %330 = vector.extract_strided_slice %307 {offsets = [15, 0], sizes = [1, 48], strides = [1, 1]} : vector<24x48xf32> to vector<1x48xf32>
    %c1_344 = arith.constant 1 : index
    %c528_345 = arith.constant 528 : index
    %331 = vector.load %arg15[%c1_344, %c528_345] : memref<2x768xf32, #tpu.memory_space<vmem>>, vector<1x48xf32>
    tpu.vector_store %arg15[%c1_344, %c528_345], %330 {strides = array<i32>} : memref<2x768xf32, #tpu.memory_space<vmem>>, vector<1x48xf32>,
    %332 = vector.extract_strided_slice %307 {offsets = [18, 0], sizes = [1, 48], strides = [1, 1]} : vector<24x48xf32> to vector<1x48xf32>
    %c1_346 = arith.constant 1 : index
    %c576_347 = arith.constant 576 : index
    %333 = vector.load %arg15[%c1_346, %c576_347] : memref<2x768xf32, #tpu.memory_space<vmem>>, vector<1x48xf32>
    tpu.vector_store %arg15[%c1_346, %c576_347], %332 {strides = array<i32>} : memref<2x768xf32, #tpu.memory_space<vmem>>, vector<1x48xf32>,
    %334 = vector.extract_strided_slice %307 {offsets = [19, 0], sizes = [1, 48], strides = [1, 1]} : vector<24x48xf32> to vector<1x48xf32>
    %c1_348 = arith.constant 1 : index
    %c624_349 = arith.constant 624 : index
    %335 = vector.load %arg15[%c1_348, %c624_349] : memref<2x768xf32, #tpu.memory_space<vmem>>, vector<1x48xf32>
    tpu.vector_store %arg15[%c1_348, %c624_349], %334 {strides = array<i32>} : memref<2x768xf32, #tpu.memory_space<vmem>>, vector<1x48xf32>,
    %336 = vector.extract_strided_slice %307 {offsets = [20, 0], sizes = [1, 48], strides = [1, 1]} : vector<24x48xf32> to vector<1x48xf32>
    %c1_350 = arith.constant 1 : index
    %c672_351 = arith.constant 672 : index
    %337 = vector.load %arg15[%c1_350, %c672_351] : memref<2x768xf32, #tpu.memory_space<vmem>>, vector<1x48xf32>
    tpu.vector_store %arg15[%c1_350, %c672_351], %336 {strides = array<i32>} : memref<2x768xf32, #tpu.memory_space<vmem>>, vector<1x48xf32>,
    %338 = vector.extract_strided_slice %307 {offsets = [21, 0], sizes = [1, 48], strides = [1, 1]} : vector<24x48xf32> to vector<1x48xf32>
    %c1_352 = arith.constant 1 : index
    %c720_353 = arith.constant 720 : index
    %339 = vector.load %arg15[%c1_352, %c720_353] : memref<2x768xf32, #tpu.memory_space<vmem>>, vector<1x48xf32>
    tpu.vector_store %arg15[%c1_352, %c720_353], %338 {strides = array<i32>} : memref<2x768xf32, #tpu.memory_space<vmem>>, vector<1x48xf32>,
    tpu.wait_dma2 semaphore(%arg17 : memref<!tpu.dma_semaphore, #tpu.memory_space<semaphore_mem>>) src(%arg7 : memref<768x1024xbf16, #tpu.memory_space<any>>) dst(%arg16 : memref<768x1024xbf16, #tpu.memory_space<vmem>>)
    %c0_354 = arith.constant 0 : index
    %c0_355 = arith.constant 0 : index
    %340 = vector.load %arg15[%c0_354, %c0_355] : memref<2x768xf32, #tpu.memory_space<vmem>>, vector<2x768xf32>
    %341 = arith.truncf %340 : vector<2x768xf32> to vector<2x768xbf16>
    %c0_356 = arith.constant 0 : index
    %c0_357 = arith.constant 0 : index
    %342 = vector.load %arg16[%c0_356, %c0_357] : memref<768x1024xbf16, #tpu.memory_space<vmem>>, vector<768x1024xbf16>
    %cst_358 = arith.constant dense<0.000000e+00> : vector<2x1024xf32>
    %343 = tpu.matmul %341, %342, %cst_358 {dimension_numbers = #tpu.dot_dimension_numbers<[1], [0], [0], [1], [0, 0, 1, 1], [], []>} : vector<2x768xbf16>, vector<768x1024xbf16>, vector<2x1024xf32> -> vector<2x1024xf32>
    %c0_359 = arith.constant 0 : index
    %c0_360 = arith.constant 0 : index
    %344 = vector.load %arg8[%c0_359, %c0_360] : memref<1x1024xf32, #tpu.memory_space<vmem>>, vector<1x1024xf32>
    %345 = vector.broadcast %344 : vector<1x1024xf32> to vector<2x1024xf32>
    %346 = arith.addf %343, %345 : vector<2x1024xf32>
    %c0_361 = arith.constant 0 : index
    %c0_362 = arith.constant 0 : index
    %347 = vector.load %arg12[%c0_361, %c0_362] : memref<2x1024xf32, #tpu.memory_space<vmem>>, vector<2x1024xf32>
    tpu.vector_store %arg12[%c0_361, %c0_362], %346 {strides = array<i32>} : memref<2x1024xf32, #tpu.memory_space<vmem>>, vector<2x1024xf32>,
    %cst_363 = arith.constant dense<0.000000e+00> : vector<2xf32>
    %348 = vector.multi_reduction <add>, %346, %cst_363 [1] : vector<2x1024xf32> to vector<2xf32>
    %349 = vector.shape_cast %348 : vector<2xf32> to vector<2x1xf32>
    %cst_364 = arith.constant 1.024000e+03 : f32
    %350 = vector.broadcast %cst_364 : f32 to vector<2x1xf32>
    %351 = arith.divf %349, %350 : vector<2x1xf32>
    %352 = vector.broadcast %351 : vector<2x1xf32> to vector<2x1024xf32>
    %353 = arith.subf %346, %352 : vector<2x1024xf32>
    %354 = arith.mulf %353, %353 : vector<2x1024xf32>
    %cst_365 = arith.constant dense<0.000000e+00> : vector<2xf32>
    %355 = vector.multi_reduction <add>, %354, %cst_365 [1] : vector<2x1024xf32> to vector<2xf32>
    %356 = vector.shape_cast %355 : vector<2xf32> to vector<2x1xf32>
    %cst_366 = arith.constant 1.024000e+03 : f32
    %357 = vector.broadcast %cst_366 : f32 to vector<2x1xf32>
    %358 = arith.divf %356, %357 : vector<2x1xf32>
    %359 = vector.broadcast %351 : vector<2x1xf32> to vector<2x1024xf32>
    %360 = arith.subf %346, %359 : vector<2x1024xf32>
    %cst_367 = arith.constant 9.99999974E-6 : f32
    %361 = vector.broadcast %cst_367 : f32 to vector<2x1xf32>
    %362 = arith.addf %358, %361 : vector<2x1xf32>
    %363 = math.rsqrt %362 : vector<2x1xf32>
    %364 = vector.broadcast %363 : vector<2x1xf32> to vector<2x1024xf32>
    %365 = arith.mulf %360, %364 : vector<2x1024xf32>
    %c0_368 = arith.constant 0 : index
    %c0_369 = arith.constant 0 : index
    %366 = vector.load %arg9[%c0_368, %c0_369] : memref<1x1024xf32, #tpu.memory_space<vmem>>, vector<1x1024xf32>
    %367 = vector.broadcast %366 : vector<1x1024xf32> to vector<2x1024xf32>
    %368 = arith.mulf %365, %367 : vector<2x1024xf32>
    %c0_370 = arith.constant 0 : index
    %c0_371 = arith.constant 0 : index
    %369 = vector.load %arg10[%c0_370, %c0_371] : memref<1x1024xf32, #tpu.memory_space<vmem>>, vector<1x1024xf32>
    %370 = vector.broadcast %369 : vector<1x1024xf32> to vector<2x1024xf32>
    %371 = arith.addf %368, %370 : vector<2x1024xf32>
    %c0_372 = arith.constant 0 : index
    %c0_373 = arith.constant 0 : index
    %372 = vector.load %arg11[%c0_372, %c0_373] : memref<2x1024xf32, #tpu.memory_space<vmem>>, vector<2x1024xf32>
    tpu.vector_store %arg11[%c0_372, %c0_373], %371 {strides = array<i32>} : memref<2x1024xf32, #tpu.memory_space<vmem>>, vector<2x1024xf32>,
    return
  }
}

</mosaic_0001>

<bundles_post_ra>
// kernel: simclr_encoder_forward.1
= control target key start
LH: loop header
LB: loop body
LE: loop exit
PB: predicated region body
PF: predicated region fallthrough
CT: control target
= control target key end

     0   :  { %18 = vsyncpa [#allocation8], 0  ;;  %s14835_s0 = inlined_call_operand.vmem [shape: f32[2,4,48,18], index: 0, kind: input, shape index: {}]   ;;  %s14836_s1 = inlined_call_operand.vmem [shape: f32[9,18,128], index: 1, kind: input, shape index: {}]   ;;  %s14837_s2 = inlined_call_operand.vmem [shape: f32[1,128], index: 2, kind: input, shape index: {}]   ;;  %s14838_s3 = inlined_call_operand.vmem [shape: f32[9,128,128], index: 3, kind: input, shape index: {}]   ;;  %s14839_s4 = inlined_call_operand.vmem [shape: f32[1,128], index: 4, kind: input, shape index: {}]   ;;  %s14840_s5 = inlined_call_operand.vmem [shape: f32[9,128,128], index: 5, kind: input, shape index: {}]   ;;  %s14841_s6 = inlined_call_operand.vmem [shape: f32[1,128], index: 6, kind: input, shape index: {}]   ;;  %s14842_s7 = inlined_call_operand.vmem [shape: bf16[768,1024], index: 7, kind: input, shape index: {}]   ;;  %s14843_s8 = inlined_call_operand.vmem [shape: f32[1,1024], index: 8, kind: input, shape index: {}]   ;;  %s14844_s9 = inlined_call_operand.vmem [shape: f32[1,1024], index: 9, kind: input, shape index: {}]   ;;  %s14845_s10 = inlined_call_operand.vmem [shape: f32[1,1024], index: 10, kind: input, shape index: {}]   ;;  %s14846_s11 = inlined_call_operand.hbm [shape: f32[2,1024], index: 11, kind: output, shape index: {0}]   ;;  %s14847_s12 = inlined_call_operand.hbm [shape: f32[2,1024], index: 12, kind: output, shape index: {1}]  }
   0x1   :  { %19 = vsyncpa [#allocation10], 0  ;;  %v10026_v0 = vld [vmem:[%s14842_s7] sm:$0xff]  ;;  %v10031_v1 = vld [vmem:[%s14842_s7 + $0x8] sm:$0xff]  ;;  %vm931_vm0 = vcmask 1041408   ;;  %vm900_vm1 = vcmask 146432  }
   0x2   :  { %15234 = vst [vmem:[#allocation15_spill] sm:$0xff] %v10026_v0  ;;  %15235 = vst [vmem:[#allocation16_spill] sm:$0xff] %v10031_v1  ;;  %v10036_v2 = vld [vmem:[%s14842_s7 + $0x10] sm:$0xff]  ;;  %v10041_v3 = vld [vmem:[%s14842_s7 + $0x18] sm:$0xff] }
   0x3   :  { %15236 = vst [vmem:[#allocation17_spill] sm:$0xff] %v10036_v2  ;;  %15237 = vst [vmem:[#allocation18_spill] sm:$0xff] %v10041_v3  ;;  %v10046_v4 = vld [vmem:[%s14842_s7 + $0x20] sm:$0xff]  ;;  %v10051_v5 = vld [vmem:[%s14842_s7 + $0x28] sm:$0xff] }
   0x4   :  { %15238 = vst [vmem:[#allocation19_spill] sm:$0xff] %v10046_v4  ;;  %15239 = vst [vmem:[#allocation20_spill] sm:$0xff] %v10051_v5  ;;  %v10056_v6 = vld [vmem:[%s14842_s7 + $0x30] sm:$0xff]  ;;  %v10061_v7 = vld [vmem:[%s14842_s7 + $0x38] sm:$0xff] }
   0x5   :  { %15240 = vst [vmem:[#allocation21_spill] sm:$0xff] %v10056_v6  ;;  %15241 = vst [vmem:[#allocation22_spill] sm:$0xff] %v10061_v7  ;;  %v10066_v8 = vld [vmem:[%s14842_s7 + $0x40] sm:$0xff]  ;;  %v10071_v9 = vld [vmem:[%s14842_s7 + $0x48] sm:$0xff] }
   0x6   :  { %15242 = vst [vmem:[#allocation23_spill] sm:$0xff] %v10066_v8  ;;  %15243 = vst [vmem:[#allocation24_spill] sm:$0xff] %v10071_v9  ;;  %v10076_v10 = vld [vmem:[%s14842_s7 + $0x50] sm:$0xff]  ;;  %v10081_v11 = vld [vmem:[%s14842_s7 + $0x58] sm:$0xff] }
   0x7   :  { %15244 = vst [vmem:[#allocation25_spill] sm:$0xff] %v10076_v10  ;;  %15245 = vst [vmem:[#allocation26_spill] sm:$0xff] %v10081_v11  ;;  %v10086_v12 = vld [vmem:[%s14842_s7 + $0x60] sm:$0xff]  ;;  %v10091_v13 = vld [vmem:[%s14842_s7 + $0x68] sm:$0xff] }
   0x8   :  { %15246 = vst [vmem:[#allocation27_spill] sm:$0xff] %v10086_v12  ;;  %15247 = vst [vmem:[#allocation28_spill] sm:$0xff] %v10091_v13  ;;  %v10096_v14 = vld [vmem:[%s14842_s7 + $0x70] sm:$0xff]  ;;  %v10101_v15 = vld [vmem:[%s14842_s7 + $0x78] sm:$0xff] }
   0x9   :  { %15248 = vst [vmem:[#allocation29_spill] sm:$0xff] %v10096_v14  ;;  %15249 = vst [vmem:[#allocation30_spill] sm:$0xff] %v10101_v15  ;;  %v10106_v16 = vld [vmem:[%s14842_s7 + $0x80] sm:$0xff]  ;;  %v10111_v17 = vld [vmem:[%s14842_s7 + $0x88] sm:$0xff] }
   0xa   :  { %15250 = vst [vmem:[#allocation31_spill] sm:$0xff] %v10106_v16  ;;  %15251 = vst [vmem:[#allocation32_spill] sm:$0xff] %v10111_v17  ;;  %v10116_v18 = vld [vmem:[%s14842_s7 + $0x90] sm:$0xff]  ;;  %v10121_v19 = vld [vmem:[%s14842_s7 + $0x98] sm:$0xff] }
   0xb   :  { %15252 = vst [vmem:[#allocation33_spill] sm:$0xff] %v10116_v18  ;;  %15253 = vst [vmem:[#allocation34_spill] sm:$0xff] %v10121_v19  ;;  %v10126_v20 = vld [vmem:[%s14842_s7 + $0xa0] sm:$0xff]  ;;  %v10131_v21 = vld [vmem:[%s14842_s7 + $0xa8] sm:$0xff] }
   0xc   :  { %15254 = vst [vmem:[#allocation35_spill] sm:$0xff] %v10126_v20  ;;  %15255 = vst [vmem:[#allocation36_spill] sm:$0xff] %v10131_v21  ;;  %v10136_v22 = vld [vmem:[%s14842_s7 + $0xb0] sm:$0xff]  ;;  %v10141_v23 = vld [vmem:[%s14842_s7 + $0xb8] sm:$0xff] }
   0xd   :  { %15256 = vst [vmem:[#allocation37_spill] sm:$0xff] %v10136_v22  ;;  %15257 = vst [vmem:[#allocation38_spill] sm:$0xff] %v10141_v23  ;;  %v10146_v24 = vld [vmem:[%s14842_s7 + $0xc0] sm:$0xff]  ;;  %v10151_v25 = vld [vmem:[%s14842_s7 + $0xc8] sm:$0xff] }
   0xe   :  { %15258 = vst [vmem:[#allocation39_spill] sm:$0xff] %v10146_v24  ;;  %15259 = vst [vmem:[#allocation40_spill] sm:$0xff] %v10151_v25  ;;  %v10156_v26 = vld [vmem:[%s14842_s7 + $0xd0] sm:$0xff]  ;;  %v10161_v27 = vld [vmem:[%s14842_s7 + $0xd8] sm:$0xff] }
   0xf   :  { %15260 = vst [vmem:[#allocation41_spill] sm:$0xff] %v10156_v26  ;;  %15261 = vst [vmem:[#allocation42_spill] sm:$0xff] %v10161_v27  ;;  %v10166_v28 = vld [vmem:[%s14842_s7 + $0xe0] sm:$0xff]  ;;  %v10171_v29 = vld [vmem:[%s14842_s7 + $0xe8] sm:$0xff] }
  0x10   :  { %15262 = vst [vmem:[#allocation43_spill] sm:$0xff] %v10166_v28  ;;  %15263 = vst [vmem:[#allocation44_spill] sm:$0xff] %v10171_v29  ;;  %v10176_v30 = vld [vmem:[%s14842_s7 + $0xf0] sm:$0xff]  ;;  %v10181_v31 = vld [vmem:[%s14842_s7 + $0xf8] sm:$0xff] }
  0x11   :  { %15264 = vst [vmem:[#allocation45_spill] sm:$0xff] %v10176_v30  ;;  %15265 = vst [vmem:[#allocation46_spill] sm:$0xff] %v10181_v31  ;;  %v10186_v32 = vld [vmem:[%s14842_s7 + $0x100] sm:$0xff]  ;;  %v10191_v33 = vld [vmem:[%s14842_s7 + $0x108] sm:$0xff] }
  0x12   :  { %15266 = vst [vmem:[#allocation47_spill] sm:$0xff] %v10186_v32  ;;  %15267 = vst [vmem:[#allocation48_spill] sm:$0xff] %v10191_v33  ;;  %v10196_v34 = vld [vmem:[%s14842_s7 + $0x110] sm:$0xff]  ;;  %v10201_v35 = vld [vmem:[%s14842_s7 + $0x118] sm:$0xff] }
  0x13   :  { %15268 = vst [vmem:[#allocation49_spill] sm:$0xff] %v10196_v34  ;;  %15269 = vst [vmem:[#allocation50_spill] sm:$0xff] %v10201_v35  ;;  %v10206_v36 = vld [vmem:[%s14842_s7 + $0x120] sm:$0xff]  ;;  %v10211_v37 = vld [vmem:[%s14842_s7 + $0x128] sm:$0xff] }
  0x14   :  { %15270 = vst [vmem:[#allocation51_spill] sm:$0xff] %v10206_v36  ;;  %15271 = vst [vmem:[#allocation52_spill] sm:$0xff] %v10211_v37  ;;  %v10216_v38 = vld [vmem:[%s14842_s7 + $0x130] sm:$0xff]  ;;  %v10221_v39 = vld [vmem:[%s14842_s7 + $0x138] sm:$0xff] }
  0x15   :  { %15272 = vst [vmem:[#allocation53_spill] sm:$0xff] %v10216_v38  ;;  %15273 = vst [vmem:[#allocation54_spill] sm:$0xff] %v10221_v39  ;;  %v10226_v40 = vld [vmem:[%s14842_s7 + $0x140] sm:$0xff]  ;;  %v10231_v41 = vld [vmem:[%s14842_s7 + $0x148] sm:$0xff] }
  0x16   :  { %15274 = vst [vmem:[#allocation55_spill] sm:$0xff] %v10226_v40  ;;  %15275 = vst [vmem:[#allocation56_spill] sm:$0xff] %v10231_v41  ;;  %v10236_v42 = vld [vmem:[%s14842_s7 + $0x150] sm:$0xff]  ;;  %v10241_v43 = vld [vmem:[%s14842_s7 + $0x158] sm:$0xff] }
  0x17   :  { %15276 = vst [vmem:[#allocation57_spill] sm:$0xff] %v10236_v42  ;;  %15277 = vst [vmem:[#allocation58_spill] sm:$0xff] %v10241_v43  ;;  %v10246_v44 = vld [vmem:[%s14842_s7 + $0x160] sm:$0xff]  ;;  %v10251_v45 = vld [vmem:[%s14842_s7 + $0x168] sm:$0xff] }
  0x18   :  { %15278 = vst [vmem:[#allocation59_spill] sm:$0xff] %v10246_v44  ;;  %15279 = vst [vmem:[#allocation60_spill] sm:$0xff] %v10251_v45  ;;  %v10256_v46 = vld [vmem:[%s14842_s7 + $0x170] sm:$0xff]  ;;  %v10261_v47 = vld [vmem:[%s14842_s7 + $0x178] sm:$0xff] }
  0x19   :  { %15280 = vst [vmem:[#allocation61_spill] sm:$0xff] %v10256_v46  ;;  %15281 = vst [vmem:[#allocation62_spill] sm:$0xff] %v10261_v47  ;;  %v10266_v48 = vld [vmem:[%s14842_s7 + $0x180] sm:$0xff]  ;;  %v10271_v49 = vld [vmem:[%s14842_s7 + $0x188] sm:$0xff] }
  0x1a   :  { %15282 = vst [vmem:[#allocation63_spill] sm:$0xff] %v10266_v48  ;;  %15283 = vst [vmem:[#allocation64_spill] sm:$0xff] %v10271_v49  ;;  %v10276_v50 = vld [vmem:[%s14842_s7 + $0x190] sm:$0xff]  ;;  %v10281_v51 = vld [vmem:[%s14842_s7 + $0x198] sm:$0xff] }
  0x1b   :  { %15284 = vst [vmem:[#allocation65_spill] sm:$0xff] %v10276_v50  ;;  %15285 = vst [vmem:[#allocation66_spill] sm:$0xff] %v10281_v51  ;;  %v10286_v52 = vld [vmem:[%s14842_s7 + $0x1a0] sm:$0xff]  ;;  %v10291_v53 = vld [vmem:[%s14842_s7 + $0x1a8] sm:$0xff] }
  0x1c   :  { %15286 = vst [vmem:[#allocation67_spill] sm:$0xff] %v10286_v52  ;;  %15287 = vst [vmem:[#allocation68_spill] sm:$0xff] %v10291_v53  ;;  %v10296_v54 = vld [vmem:[%s14842_s7 + $0x1b0] sm:$0xff]  ;;  %v10301_v55 = vld [vmem:[%s14842_s7 + $0x1b8] sm:$0xff] }
  0x1d   :  { %15288 = vst [vmem:[#allocation69_spill] sm:$0xff] %v10296_v54  ;;  %15289 = vst [vmem:[#allocation70_spill] sm:$0xff] %v10301_v55  ;;  %v10306_v56 = vld [vmem:[%s14842_s7 + $0x1c0] sm:$0xff]  ;;  %v10311_v57 = vld [vmem:[%s14842_s7 + $0x1c8] sm:$0xff] }
  0x1e   :  { %15290 = vst [vmem:[#allocation71_spill] sm:$0xff] %v10306_v56  ;;  %15291 = vst [vmem:[#allocation72_spill] sm:$0xff] %v10311_v57  ;;  %v10316_v58 = vld [vmem:[%s14842_s7 + $0x1d0] sm:$0xff]  ;;  %v10321_v59 = vld [vmem:[%s14842_s7 + $0x1d8] sm:$0xff] }
  0x1f   :  { %15292 = vst [vmem:[#allocation73_spill] sm:$0xff] %v10316_v58  ;;  %15293 = vst [vmem:[#allocation74_spill] sm:$0xff] %v10321_v59  ;;  %v10326_v60 = vld [vmem:[%s14842_s7 + $0x1e0] sm:$0xff]  ;;  %v10331_v61 = vld [vmem:[%s14842_s7 + $0x1e8] sm:$0xff] }
  0x20   :  { %15294 = vst [vmem:[#allocation75_spill] sm:$0xff] %v10326_v60  ;;  %15295 = vst [vmem:[#allocation76_spill] sm:$0xff] %v10331_v61  ;;  %v10336_v62 = vld [vmem:[%s14842_s7 + $0x1f0] sm:$0xff]  ;;  %v10341_v63 = vld [vmem:[%s14842_s7 + $0x1f8] sm:$0xff] }
  0x21   :  { %15296 = vst [vmem:[#allocation77_spill] sm:$0xff] %v10336_v62  ;;  %15297 = vst [vmem:[#allocation78_spill] sm:$0xff] %v10341_v63  ;;  %v10346_v3 = vld [vmem:[%s14842_s7 + $0x200] sm:$0xff]  ;;  %v10351_v7 = vld [vmem:[%s14842_s7 + $0x208] sm:$0xff] }
  0x22   :  { %15298 = vst [vmem:[#allocation79_spill] sm:$0xff] %v10346_v3  ;;  %15299 = vst [vmem:[#allocation80_spill] sm:$0xff] %v10351_v7  ;;  %v10356_v11 = vld [vmem:[%s14842_s7 + $0x210] sm:$0xff]  ;;  %v10361_v15 = vld [vmem:[%s14842_s7 + $0x218] sm:$0xff] }
  0x23   :  { %15300 = vst [vmem:[#allocation81_spill] sm:$0xff] %v10356_v11  ;;  %15301 = vst [vmem:[#allocation82_spill] sm:$0xff] %v10361_v15  ;;  %v10366_v19 = vld [vmem:[%s14842_s7 + $0x220] sm:$0xff]  ;;  %v10371_v23 = vld [vmem:[%s14842_s7 + $0x228] sm:$0xff] }
  0x24   :  { %15302 = vst [vmem:[#allocation83_spill] sm:$0xff] %v10366_v19  ;;  %15303 = vst [vmem:[#allocation84_spill] sm:$0xff] %v10371_v23  ;;  %v10376_v27 = vld [vmem:[%s14842_s7 + $0x230] sm:$0xff]  ;;  %v10381_v31 = vld [vmem:[%s14842_s7 + $0x238] sm:$0xff] }
  0x25   :  { %15304 = vst [vmem:[#allocation85_spill] sm:$0xff] %v10376_v27  ;;  %15305 = vst [vmem:[#allocation86_spill] sm:$0xff] %v10381_v31  ;;  %v10386_v15 = vld [vmem:[%s14842_s7 + $0x240] sm:$0xff]  ;;  %v10391_v35 = vld [vmem:[%s14842_s7 + $0x248] sm:$0xff] }
  0x26   :  { %15306 = vst [vmem:[#allocation87_spill] sm:$0xff] %v10386_v15  ;;  %15307 = vst [vmem:[#allocation88_spill] sm:$0xff] %v10391_v35  ;;  %v10396_v39 = vld [vmem:[%s14842_s7 + $0x250] sm:$0xff]  ;;  %v10401_v43 = vld [vmem:[%s14842_s7 + $0x258] sm:$0xff] }
  0x27   :  { %15308 = vst [vmem:[#allocation89_spill] sm:$0xff] %v10396_v39  ;;  %15309 = vst [vmem:[#allocation90_spill] sm:$0xff] %v10401_v43  ;;  %v10406_v31 = vld [vmem:[%s14842_s7 + $0x260] sm:$0xff]  ;;  %v10411_v47 = vld [vmem:[%s14842_s7 + $0x268] sm:$0xff] }
  0x28   :  { %15310 = vst [vmem:[#allocation91_spill] sm:$0xff] %v10406_v31  ;;  %15311 = vst [vmem:[#allocation92_spill] sm:$0xff] %v10411_v47  ;;  %v10416_v51 = vld [vmem:[%s14842_s7 + $0x270] sm:$0xff]  ;;  %v10421_v55 = vld [vmem:[%s14842_s7 + $0x278] sm:$0xff] }
  0x29   :  { %15312 = vst [vmem:[#allocation93_spill] sm:$0xff] %v10416_v51  ;;  %15313 = vst [vmem:[#allocation94_spill] sm:$0xff] %v10421_v55  ;;  %v10426_v43 = vld [vmem:[%s14842_s7 + $0x280] sm:$0xff]  ;;  %v10431_v59 = vld [vmem:[%s14842_s7 + $0x288] sm:$0xff] }
  0x2a   :  { %15314 = vst [vmem:[#allocation95_spill] sm:$0xff] %v10426_v43  ;;  %15315 = vst [vmem:[#allocation96_spill] sm:$0xff] %v10431_v59  ;;  %v10436_v63 = vld [vmem:[%s14842_s7 + $0x290] sm:$0xff]  ;;  %v10441_v11 = vld [vmem:[%s14842_s7 + $0x298] sm:$0xff] }
  0x2b   :  { %15316 = vst [vmem:[#allocation97_spill] sm:$0xff] %v10436_v63  ;;  %15317 = vst [vmem:[#allocation98_spill] sm:$0xff] %v10441_v11  ;;  %v10446_v55 = vld [vmem:[%s14842_s7 + $0x2a0] sm:$0xff]  ;;  %v10451_v27 = vld [vmem:[%s14842_s7 + $0x2a8] sm:$0xff] }
  0x2c   :  { %15318 = vst [vmem:[#allocation99_spill] sm:$0xff] %v10446_v55  ;;  %15319 = vst [vmem:[#allocation100_spill] sm:$0xff] %v10451_v27  ;;  %v10456_v39 = vld [vmem:[%s14842_s7 + $0x2b0] sm:$0xff]  ;;  %v10461_v51 = vld [vmem:[%s14842_s7 + $0x2b8] sm:$0xff] }
  0x2d   :  { %15320 = vst [vmem:[#allocation101_spill] sm:$0xff] %v10456_v39  ;;  %15321 = vst [vmem:[#allocation102_spill] sm:$0xff] %v10461_v51  ;;  %v10466_v11 = vld [vmem:[%s14842_s7 + $0x2c0] sm:$0xff]  ;;  %v10471_v63 = vld [vmem:[%s14842_s7 + $0x2c8] sm:$0xff] }
  0x2e   :  { %15322 = vst [vmem:[#allocation103_spill] sm:$0xff] %v10466_v11  ;;  %15323 = vst [vmem:[#allocation104_spill] sm:$0xff] %v10471_v63  ;;  %v10476_v2 = vld [vmem:[%s14842_s7 + $0x2d0] sm:$0xff]  ;;  %v10481_v39 = vld [vmem:[%s14842_s7 + $0x2d8] sm:$0xff] }
  0x2f   :  { %15324 = vst [vmem:[#allocation105_spill] sm:$0xff] %v10476_v2  ;;  %15325 = vst [vmem:[#allocation106_spill] sm:$0xff] %v10481_v39  ;;  %v10486_v51 = vld [vmem:[%s14842_s7 + $0x2e0] sm:$0xff]  ;;  %v10491_v6 = vld [vmem:[%s14842_s7 + $0x2e8] sm:$0xff] }
  0x30   :  { %15326 = vst [vmem:[#allocation107_spill] sm:$0xff] %v10486_v51  ;;  %15327 = vst [vmem:[#allocation108_spill] sm:$0xff] %v10491_v6  ;;  %v10496_v10 = vld [vmem:[%s14842_s7 + $0x2f0] sm:$0xff]  ;;  %v10501_v2 = vld [vmem:[%s14842_s7 + $0x2f8] sm:$0xff] }
  0x31   :  { %15328 = vst [vmem:[#allocation109_spill] sm:$0xff] %v10496_v10  ;;  %15329 = vst [vmem:[#allocation110_spill] sm:$0xff] %v10501_v2  ;;  %v10506_v39 = vld [vmem:[%s14842_s7 + $0x300] sm:$0xff]  ;;  %v10511_v14 = vld [vmem:[%s14842_s7 + $0x308] sm:$0xff] }
  0x32   :  { %15330 = vst [vmem:[#allocation111_spill] sm:$0xff] %v10506_v39  ;;  %15331 = vst [vmem:[#allocation112_spill] sm:$0xff] %v10511_v14  ;;  %v10516_v18 = vld [vmem:[%s14842_s7 + $0x310] sm:$0xff]  ;;  %v10521_v10 = vld [vmem:[%s14842_s7 + $0x318] sm:$0xff] }
  0x33   :  { %15332 = vst [vmem:[#allocation113_spill] sm:$0xff] %v10516_v18  ;;  %15333 = vst [vmem:[#allocation114_spill] sm:$0xff] %v10521_v10  ;;  %v10526_v2 = vld [vmem:[%s14842_s7 + $0x320] sm:$0xff]  ;;  %v10531_v22 = vld [vmem:[%s14842_s7 + $0x328] sm:$0xff] }
  0x34   :  { %15334 = vst [vmem:[#allocation115_spill] sm:$0xff] %v10526_v2  ;;  %15335 = vst [vmem:[#allocation116_spill] sm:$0xff] %v10531_v22  ;;  %v10536_v26 = vld [vmem:[%s14842_s7 + $0x330] sm:$0xff]  ;;  %v10541_v18 = vld [vmem:[%s14842_s7 + $0x338] sm:$0xff] }
  0x35   :  { %15336 = vst [vmem:[#allocation117_spill] sm:$0xff] %v10536_v26  ;;  %15337 = vst [vmem:[#allocation118_spill] sm:$0xff] %v10541_v18  ;;  %v10546_v10 = vld [vmem:[%s14842_s7 + $0x340] sm:$0xff]  ;;  %v10551_v30 = vld [vmem:[%s14842_s7 + $0x348] sm:$0xff] }
  0x36   :  { %15338 = vst [vmem:[#allocation119_spill] sm:$0xff] %v10546_v10  ;;  %15339 = vst [vmem:[#allocation120_spill] sm:$0xff] %v10551_v30  ;;  %v10556_v34 = vld [vmem:[%s14842_s7 + $0x350] sm:$0xff]  ;;  %v10561_v26 = vld [vmem:[%s14842_s7 + $0x358] sm:$0xff] }
  0x37   :  { %15340 = vst [vmem:[#allocation121_spill] sm:$0xff] %v10556_v34  ;;  %15341 = vst [vmem:[#allocation122_spill] sm:$0xff] %v10561_v26  ;;  %v10566_v18 = vld [vmem:[%s14842_s7 + $0x360] sm:$0xff]  ;;  %v10571_v38 = vld [vmem:[%s14842_s7 + $0x368] sm:$0xff] }
  0x38   :  { %15342 = vst [vmem:[#allocation123_spill] sm:$0xff] %v10566_v18  ;;  %15343 = vst [vmem:[#allocation124_spill] sm:$0xff] %v10571_v38  ;;  %v10576_v42 = vld [vmem:[%s14842_s7 + $0x370] sm:$0xff]  ;;  %v10581_v34 = vld [vmem:[%s14842_s7 + $0x378] sm:$0xff] }
  0x39   :  { %15344 = vst [vmem:[#allocation125_spill] sm:$0xff] %v10576_v42  ;;  %15345 = vst [vmem:[#allocation126_spill] sm:$0xff] %v10581_v34  ;;  %v10586_v26 = vld [vmem:[%s14842_s7 + $0x380] sm:$0xff]  ;;  %v10591_v46 = vld [vmem:[%s14842_s7 + $0x388] sm:$0xff] }
  0x3a   :  { %15346 = vst [vmem:[#allocation127_spill] sm:$0xff] %v10586_v26  ;;  %15347 = vst [vmem:[#allocation128_spill] sm:$0xff] %v10591_v46  ;;  %v10596_v50 = vld [vmem:[%s14842_s7 + $0x390] sm:$0xff]  ;;  %v10601_v42 = vld [vmem:[%s14842_s7 + $0x398] sm:$0xff] }
  0x3b   :  { %15348 = vst [vmem:[#allocation129_spill] sm:$0xff] %v10596_v50  ;;  %15349 = vst [vmem:[#allocation130_spill] sm:$0xff] %v10601_v42  ;;  %v10606_v34 = vld [vmem:[%s14842_s7 + $0x3a0] sm:$0xff]  ;;  %v10611_v54 = vld [vmem:[%s14842_s7 + $0x3a8] sm:$0xff] }
  0x3c   :  { %15350 = vst [vmem:[#allocation131_spill] sm:$0xff] %v10606_v34  ;;  %15351 = vst [vmem:[#allocation132_spill] sm:$0xff] %v10611_v54  ;;  %v10616_v58 = vld [vmem:[%s14842_s7 + $0x3b0] sm:$0xff]  ;;  %v10621_v50 = vld [vmem:[%s14842_s7 + $0x3b8] sm:$0xff] }
  0x3d   :  { %15352 = vst [vmem:[#allocation133_spill] sm:$0xff] %v10616_v58  ;;  %15353 = vst [vmem:[#allocation134_spill] sm:$0xff] %v10621_v50  ;;  %v10626_v42 = vld [vmem:[%s14842_s7 + $0x3c0] sm:$0xff]  ;;  %v10631_v62 = vld [vmem:[%s14842_s7 + $0x3c8] sm:$0xff] }
  0x3e   :  { %15354 = vst [vmem:[#allocation135_spill] sm:$0xff] %v10626_v42  ;;  %15355 = vst [vmem:[#allocation136_spill] sm:$0xff] %v10631_v62  ;;  %v10636_v7 = vld [vmem:[%s14842_s7 + $0x3d0] sm:$0xff]  ;;  %v10641_v58 = vld [vmem:[%s14842_s7 + $0x3d8] sm:$0xff] }
  0x3f   :  { %15356 = vst [vmem:[#allocation137_spill] sm:$0xff] %v10636_v7  ;;  %15357 = vst [vmem:[#allocation138_spill] sm:$0xff] %v10641_v58  ;;  %v10646_v50 = vld [vmem:[%s14842_s7 + $0x3e0] sm:$0xff]  ;;  %v10651_v23 = vld [vmem:[%s14842_s7 + $0x3e8] sm:$0xff] }
  0x40   :  { %15358 = vst [vmem:[#allocation139_spill] sm:$0xff] %v10646_v50  ;;  %15359 = vst [vmem:[#allocation140_spill] sm:$0xff] %v10651_v23  ;;  %v10656_v35 = vld [vmem:[%s14842_s7 + $0x3f0] sm:$0xff]  ;;  %v10661_v7 = vld [vmem:[%s14842_s7 + $0x3f8] sm:$0xff] }
  0x41   :  { %15360 = vst [vmem:[#allocation141_spill] sm:$0xff] %v10656_v35  ;;  %15361 = vst [vmem:[#allocation142_spill] sm:$0xff] %v10661_v7  ;;  %v10666_v58 = vld [vmem:[%s14842_s7 + $0x400] sm:$0xff]  ;;  %v10671_v47 = vld [vmem:[%s14842_s7 + $0x408] sm:$0xff] }
  0x42   :  { %15362 = vst [vmem:[#allocation143_spill] sm:$0xff] %v10666_v58  ;;  %15363 = vst [vmem:[#allocation144_spill] sm:$0xff] %v10671_v47  ;;  %v10676_v59 = vld [vmem:[%s14842_s7 + $0x410] sm:$0xff]  ;;  %v10681_v35 = vld [vmem:[%s14842_s7 + $0x418] sm:$0xff] }
  0x43   :  { %15364 = vst [vmem:[#allocation145_spill] sm:$0xff] %v10676_v59  ;;  %15365 = vst [vmem:[#allocation146_spill] sm:$0xff] %v10681_v35  ;;  %v10686_v7 = vld [vmem:[%s14842_s7 + $0x420] sm:$0xff]  ;;  %v10691_v27 = vld [vmem:[%s14842_s7 + $0x428] sm:$0xff] }
  0x44   :  { %15366 = vst [vmem:[#allocation147_spill] sm:$0xff] %v10686_v7  ;;  %15367 = vst [vmem:[#allocation148_spill] sm:$0xff] %v10691_v27  ;;  %v10696_v47 = vld [vmem:[%s14842_s7 + $0x430] sm:$0xff]  ;;  %v10701_v59 = vld [vmem:[%s14842_s7 + $0x438] sm:$0xff] }
  0x45   :  { %15368 = vst [vmem:[#allocation149_spill] sm:$0xff] %v10696_v47  ;;  %15369 = vst [vmem:[#allocation150_spill] sm:$0xff] %v10701_v59  ;;  %v10706_v35 = vld [vmem:[%s14842_s7 + $0x440] sm:$0xff]  ;;  %v10711_v63 = vld [vmem:[%s14842_s7 + $0x448] sm:$0xff] }
  0x46   :  { %15370 = vst [vmem:[#allocation151_spill] sm:$0xff] %v10706_v35  ;;  %15371 = vst [vmem:[#allocation152_spill] sm:$0xff] %v10711_v63  ;;  %v10716_v27 = vld [vmem:[%s14842_s7 + $0x450] sm:$0xff]  ;;  %v10721_v47 = vld [vmem:[%s14842_s7 + $0x458] sm:$0xff] }
  0x47   :  { %15372 = vst [vmem:[#allocation153_spill] sm:$0xff] %v10716_v27  ;;  %15373 = vst [vmem:[#allocation154_spill] sm:$0xff] %v10721_v47  ;;  %v10726_v59 = vld [vmem:[%s14842_s7 + $0x460] sm:$0xff]  ;;  %v10731_v6 = vld [vmem:[%s14842_s7 + $0x468] sm:$0xff] }
  0x48   :  { %15374 = vst [vmem:[#allocation155_spill] sm:$0xff] %v10726_v59  ;;  %15375 = vst [vmem:[#allocation156_spill] sm:$0xff] %v10731_v6  ;;  %v10736_v63 = vld [vmem:[%s14842_s7 + $0x470] sm:$0xff]  ;;  %v10741_v27 = vld [vmem:[%s14842_s7 + $0x478] sm:$0xff] }
  0x49   :  { %15376 = vst [vmem:[#allocation157_spill] sm:$0xff] %v10736_v63  ;;  %15377 = vst [vmem:[#allocation158_spill] sm:$0xff] %v10741_v27  ;;  %v10746_v47 = vld [vmem:[%s14842_s7 + $0x480] sm:$0xff]  ;;  %v10751_v14 = vld [vmem:[%s14842_s7 + $0x488] sm:$0xff] }
  0x4a   :  { %15378 = vst [vmem:[#allocation159_spill] sm:$0xff] %v10746_v47  ;;  %15379 = vst [vmem:[#allocation160_spill] sm:$0xff] %v10751_v14  ;;  %v10756_v6 = vld [vmem:[%s14842_s7 + $0x490] sm:$0xff]  ;;  %v10761_v63 = vld [vmem:[%s14842_s7 + $0x498] sm:$0xff] }
  0x4b   :  { %15380 = vst [vmem:[#allocation161_spill] sm:$0xff] %v10756_v6  ;;  %15381 = vst [vmem:[#allocation162_spill] sm:$0xff] %v10761_v63  ;;  %v10766_v27 = vld [vmem:[%s14842_s7 + $0x4a0] sm:$0xff]  ;;  %v10771_v22 = vld [vmem:[%s14842_s7 + $0x4a8] sm:$0xff] }
  0x4c   :  { %15382 = vst [vmem:[#allocation163_spill] sm:$0xff] %v10766_v27  ;;  %15383 = vst [vmem:[#allocation164_spill] sm:$0xff] %v10771_v22  ;;  %v10776_v14 = vld [vmem:[%s14842_s7 + $0x4b0] sm:$0xff]  ;;  %v10781_v6 = vld [vmem:[%s14842_s7 + $0x4b8] sm:$0xff] }
  0x4d   :  { %15384 = vst [vmem:[#allocation165_spill] sm:$0xff] %v10776_v14  ;;  %15385 = vst [vmem:[#allocation166_spill] sm:$0xff] %v10781_v6  ;;  %v10786_v63 = vld [vmem:[%s14842_s7 + $0x4c0] sm:$0xff]  ;;  %v10791_v30 = vld [vmem:[%s14842_s7 + $0x4c8] sm:$0xff] }
  0x4e   :  { %15386 = vst [vmem:[#allocation167_spill] sm:$0xff] %v10786_v63  ;;  %15387 = vst [vmem:[#allocation168_spill] sm:$0xff] %v10791_v30  ;;  %v10796_v22 = vld [vmem:[%s14842_s7 + $0x4d0] sm:$0xff]  ;;  %v10801_v14 = vld [vmem:[%s14842_s7 + $0x4d8] sm:$0xff] }
  0x4f   :  { %15388 = vst [vmem:[#allocation169_spill] sm:$0xff] %v10796_v22  ;;  %15389 = vst [vmem:[#allocation170_spill] sm:$0xff] %v10801_v14  ;;  %v10806_v6 = vld [vmem:[%s14842_s7 + $0x4e0] sm:$0xff]  ;;  %v10811_v38 = vld [vmem:[%s14842_s7 + $0x4e8] sm:$0xff] }
  0x50   :  { %15390 = vst [vmem:[#allocation171_spill] sm:$0xff] %v10806_v6  ;;  %15391 = vst [vmem:[#allocation172_spill] sm:$0xff] %v10811_v38  ;;  %v10816_v30 = vld [vmem:[%s14842_s7 + $0x4f0] sm:$0xff]  ;;  %v10821_v22 = vld [vmem:[%s14842_s7 + $0x4f8] sm:$0xff] }
  0x51   :  { %15392 = vst [vmem:[#allocation173_spill] sm:$0xff] %v10816_v30  ;;  %15393 = vst [vmem:[#allocation174_spill] sm:$0xff] %v10821_v22  ;;  %v10826_v14 = vld [vmem:[%s14842_s7 + $0x500] sm:$0xff]  ;;  %v10831_v46 = vld [vmem:[%s14842_s7 + $0x508] sm:$0xff] }
  0x52   :  { %15394 = vst [vmem:[#allocation175_spill] sm:$0xff] %v10826_v14  ;;  %15395 = vst [vmem:[#allocation176_spill] sm:$0xff] %v10831_v46  ;;  %v10836_v38 = vld [vmem:[%s14842_s7 + $0x510] sm:$0xff]  ;;  %v10841_v30 = vld [vmem:[%s14842_s7 + $0x518] sm:$0xff] }
  0x53   :  { %15396 = vst [vmem:[#allocation177_spill] sm:$0xff] %v10836_v38  ;;  %15397 = vst [vmem:[#allocation178_spill] sm:$0xff] %v10841_v30  ;;  %v10846_v22 = vld [vmem:[%s14842_s7 + $0x520] sm:$0xff]  ;;  %v10851_v54 = vld [vmem:[%s14842_s7 + $0x528] sm:$0xff] }
  0x54   :  { %15398 = vst [vmem:[#allocation179_spill] sm:$0xff] %v10846_v22  ;;  %15399 = vst [vmem:[#allocation180_spill] sm:$0xff] %v10851_v54  ;;  %v10856_v46 = vld [vmem:[%s14842_s7 + $0x530] sm:$0xff]  ;;  %v10861_v38 = vld [vmem:[%s14842_s7 + $0x538] sm:$0xff] }
  0x55   :  { %15400 = vst [vmem:[#allocation181_spill] sm:$0xff] %v10856_v46  ;;  %15401 = vst [vmem:[#allocation182_spill] sm:$0xff] %v10861_v38  ;;  %v10866_v30 = vld [vmem:[%s14842_s7 + $0x540] sm:$0xff]  ;;  %v10871_v62 = vld [vmem:[%s14842_s7 + $0x548] sm:$0xff] }
  0x56   :  { %15402 = vst [vmem:[#allocation183_spill] sm:$0xff] %v10866_v30  ;;  %15403 = vst [vmem:[#allocation184_spill] sm:$0xff] %v10871_v62  ;;  %v10876_v54 = vld [vmem:[%s14842_s7 + $0x550] sm:$0xff]  ;;  %v10881_v46 = vld [vmem:[%s14842_s7 + $0x558] sm:$0xff] }
  0x57   :  { %15404 = vst [vmem:[#allocation185_spill] sm:$0xff] %v10876_v54  ;;  %15405 = vst [vmem:[#allocation186_spill] sm:$0xff] %v10881_v46  ;;  %v10886_v38 = vld [vmem:[%s14842_s7 + $0x560] sm:$0xff]  ;;  %v10891_v23 = vld [vmem:[%s14842_s7 + $0x568] sm:$0xff] }
  0x58   :  { %15406 = vst [vmem:[#allocation187_spill] sm:$0xff] %v10886_v38  ;;  %15407 = vst [vmem:[#allocation188_spill] sm:$0xff] %v10891_v23  ;;  %v10896_v62 = vld [vmem:[%s14842_s7 + $0x570] sm:$0xff]  ;;  %v10901_v54 = vld [vmem:[%s14842_s7 + $0x578] sm:$0xff] }
  0x59   :  { %15408 = vst [vmem:[#allocation189_spill] sm:$0xff] %v10896_v62  ;;  %15409 = vst [vmem:[#allocation190_spill] sm:$0xff] %v10901_v54  ;;  %v10906_v46 = vld [vmem:[%s14842_s7 + $0x580] sm:$0xff]  ;;  %v10911_v1 = vld [vmem:[%s14842_s7 + $0x588] sm:$0xff] }
  0x5a   :  { %15410 = vst [vmem:[#allocation191_spill] sm:$0xff] %v10906_v46  ;;  %15411 = vst [vmem:[#allocation192_spill] sm:$0xff] %v10911_v1  ;;  %v10916_v23 = vld [vmem:[%s14842_s7 + $0x590] sm:$0xff]  ;;  %v10921_v62 = vld [vmem:[%s14842_s7 + $0x598] sm:$0xff] }
  0x5b   :  { %15412 = vst [vmem:[#allocation193_spill] sm:$0xff] %v10916_v23  ;;  %15413 = vst [vmem:[#allocation194_spill] sm:$0xff] %v10921_v62  ;;  %v10926_v54 = vld [vmem:[%s14842_s7 + $0x5a0] sm:$0xff]  ;;  %v10931_v5 = vld [vmem:[%s14842_s7 + $0x5a8] sm:$0xff] }
  0x5c   :  { %15414 = vst [vmem:[#allocation195_spill] sm:$0xff] %v10926_v54  ;;  %15415 = vst [vmem:[#allocation196_spill] sm:$0xff] %v10931_v5  ;;  %v10936_v1 = vld [vmem:[%s14842_s7 + $0x5b0] sm:$0xff]  ;;  %v10941_v23 = vld [vmem:[%s14842_s7 + $0x5b8] sm:$0xff] }
  0x5d   :  { %15416 = vst [vmem:[#allocation197_spill] sm:$0xff] %v10936_v1  ;;  %15417 = vst [vmem:[#allocation198_spill] sm:$0xff] %v10941_v23  ;;  %v10946_v62 = vld [vmem:[%s14842_s7 + $0x5c0] sm:$0xff]  ;;  %v10951_v9 = vld [vmem:[%s14842_s7 + $0x5c8] sm:$0xff] }
  0x5e   :  { %15418 = vst [vmem:[#allocation199_spill] sm:$0xff] %v10946_v62  ;;  %15419 = vst [vmem:[#allocation200_spill] sm:$0xff] %v10951_v9  ;;  %v10956_v5 = vld [vmem:[%s14842_s7 + $0x5d0] sm:$0xff]  ;;  %v10961_v1 = vld [vmem:[%s14842_s7 + $0x5d8] sm:$0xff] }
  0x5f   :  { %15420 = vst [vmem:[#allocation201_spill] sm:$0xff] %v10956_v5  ;;  %15421 = vst [vmem:[#allocation202_spill] sm:$0xff] %v10961_v1  ;;  %v10966_v23 = vld [vmem:[%s14842_s7 + $0x5e0] sm:$0xff]  ;;  %v10971_v13 = vld [vmem:[%s14842_s7 + $0x5e8] sm:$0xff] }
  0x60   :  { %15422 = vst [vmem:[#allocation203_spill] sm:$0xff] %v10966_v23  ;;  %15423 = vst [vmem:[#allocation204_spill] sm:$0xff] %v10971_v13  ;;  %v10976_v9 = vld [vmem:[%s14842_s7 + $0x5f0] sm:$0xff]  ;;  %v10981_v5 = vld [vmem:[%s14842_s7 + $0x5f8] sm:$0xff] }
  0x61   :  { %15424 = vst [vmem:[#allocation205_spill] sm:$0xff] %v10976_v9  ;;  %15425 = vst [vmem:[#allocation206_spill] sm:$0xff] %v10981_v5  ;;  %v10986_v1 = vld [vmem:[%s14842_s7 + $0x600] sm:$0xff]  ;;  %v10991_v17 = vld [vmem:[%s14842_s7 + $0x608] sm:$0xff] }
  0x62   :  { %15426 = vst [vmem:[#allocation207_spill] sm:$0xff] %v10986_v1  ;;  %15427 = vst [vmem:[#allocation208_spill] sm:$0xff] %v10991_v17  ;;  %v10996_v13 = vld [vmem:[%s14842_s7 + $0x610] sm:$0xff]  ;;  %v11001_v9 = vld [vmem:[%s14842_s7 + $0x618] sm:$0xff] }
  0x63   :  { %15428 = vst [vmem:[#allocation209_spill] sm:$0xff] %v10996_v13  ;;  %15429 = vst [vmem:[#allocation210_spill] sm:$0xff] %v11001_v9  ;;  %v11006_v5 = vld [vmem:[%s14842_s7 + $0x620] sm:$0xff]  ;;  %v11011_v21 = vld [vmem:[%s14842_s7 + $0x628] sm:$0xff] }
  0x64   :  { %15430 = vst [vmem:[#allocation211_spill] sm:$0xff] %v11006_v5  ;;  %15431 = vst [vmem:[#allocation212_spill] sm:$0xff] %v11011_v21  ;;  %v11016_v17 = vld [vmem:[%s14842_s7 + $0x630] sm:$0xff]  ;;  %v11021_v13 = vld [vmem:[%s14842_s7 + $0x638] sm:$0xff] }
  0x65   :  { %15432 = vst [vmem:[#allocation213_spill] sm:$0xff] %v11016_v17  ;;  %15433 = vst [vmem:[#allocation214_spill] sm:$0xff] %v11021_v13  ;;  %v11026_v9 = vld [vmem:[%s14842_s7 + $0x640] sm:$0xff]  ;;  %v11031_v25 = vld [vmem:[%s14842_s7 + $0x648] sm:$0xff] }
  0x66   :  { %15434 = vst [vmem:[#allocation215_spill] sm:$0xff] %v11026_v9  ;;  %15435 = vst [vmem:[#allocation216_spill] sm:$0xff] %v11031_v25  ;;  %v11036_v21 = vld [vmem:[%s14842_s7 + $0x650] sm:$0xff]  ;;  %v11041_v17 = vld [vmem:[%s14842_s7 + $0x658] sm:$0xff] }
  0x67   :  { %15436 = vst [vmem:[#allocation217_spill] sm:$0xff] %v11036_v21  ;;  %15437 = vst [vmem:[#allocation218_spill] sm:$0xff] %v11041_v17  ;;  %v11046_v13 = vld [vmem:[%s14842_s7 + $0x660] sm:$0xff]  ;;  %v11051_v29 = vld [vmem:[%s14842_s7 + $0x668] sm:$0xff] }
  0x68   :  { %15438 = vst [vmem:[#allocation219_spill] sm:$0xff] %v11046_v13  ;;  %15439 = vst [vmem:[#allocation220_spill] sm:$0xff] %v11051_v29  ;;  %v11056_v25 = vld [vmem:[%s14842_s7 + $0x670] sm:$0xff]  ;;  %v11061_v21 = vld [vmem:[%s14842_s7 + $0x678] sm:$0xff] }
  0x69   :  { %15440 = vst [vmem:[#allocation221_spill] sm:$0xff] %v11056_v25  ;;  %15441 = vst [vmem:[#allocation222_spill] sm:$0xff] %v11061_v21  ;;  %v11066_v17 = vld [vmem:[%s14842_s7 + $0x680] sm:$0xff]  ;;  %v11071_v33 = vld [vmem:[%s14842_s7 + $0x688] sm:$0xff] }
  0x6a   :  { %15442 = vst [vmem:[#allocation223_spill] sm:$0xff] %v11066_v17  ;;  %15443 = vst [vmem:[#allocation224_spill] sm:$0xff] %v11071_v33  ;;  %v11076_v29 = vld [vmem:[%s14842_s7 + $0x690] sm:$0xff]  ;;  %v11081_v25 = vld [vmem:[%s14842_s7 + $0x698] sm:$0xff] }
  0x6b   :  { %15444 = vst [vmem:[#allocation225_spill] sm:$0xff] %v11076_v29  ;;  %15445 = vst [vmem:[#allocation226_spill] sm:$0xff] %v11081_v25  ;;  %v11086_v21 = vld [vmem:[%s14842_s7 + $0x6a0] sm:$0xff]  ;;  %v11091_v37 = vld [vmem:[%s14842_s7 + $0x6a8] sm:$0xff] }
  0x6c   :  { %15446 = vst [vmem:[#allocation227_spill] sm:$0xff] %v11086_v21  ;;  %15447 = vst [vmem:[#allocation228_spill] sm:$0xff] %v11091_v37  ;;  %v11096_v33 = vld [vmem:[%s14842_s7 + $0x6b0] sm:$0xff]  ;;  %v11101_v29 = vld [vmem:[%s14842_s7 + $0x6b8] sm:$0xff] }
  0x6d   :  { %15448 = vst [vmem:[#allocation229_spill] sm:$0xff] %v11096_v33  ;;  %15449 = vst [vmem:[#allocation230_spill] sm:$0xff] %v11101_v29  ;;  %v11106_v25 = vld [vmem:[%s14842_s7 + $0x6c0] sm:$0xff]  ;;  %v11111_v41 = vld [vmem:[%s14842_s7 + $0x6c8] sm:$0xff] }
  0x6e   :  { %15450 = vst [vmem:[#allocation231_spill] sm:$0xff] %v11106_v25  ;;  %15451 = vst [vmem:[#allocation232_spill] sm:$0xff] %v11111_v41  ;;  %v11116_v37 = vld [vmem:[%s14842_s7 + $0x6d0] sm:$0xff]  ;;  %v11121_v33 = vld [vmem:[%s14842_s7 + $0x6d8] sm:$0xff] }
  0x6f   :  { %15452 = vst [vmem:[#allocation233_spill] sm:$0xff] %v11116_v37  ;;  %15453 = vst [vmem:[#allocation234_spill] sm:$0xff] %v11121_v33  ;;  %v11126_v29 = vld [vmem:[%s14842_s7 + $0x6e0] sm:$0xff]  ;;  %v11131_v45 = vld [vmem:[%s14842_s7 + $0x6e8] sm:$0xff] }
  0x70   :  { %15454 = vst [vmem:[#allocation235_spill] sm:$0xff] %v11126_v29  ;;  %15455 = vst [vmem:[#allocation236_spill] sm:$0xff] %v11131_v45  ;;  %v11136_v41 = vld [vmem:[%s14842_s7 + $0x6f0] sm:$0xff]  ;;  %v11141_v37 = vld [vmem:[%s14842_s7 + $0x6f8] sm:$0xff] }
  0x71   :  { %15456 = vst [vmem:[#allocation237_spill] sm:$0xff] %v11136_v41  ;;  %15457 = vst [vmem:[#allocation238_spill] sm:$0xff] %v11141_v37  ;;  %v11146_v33 = vld [vmem:[%s14842_s7 + $0x700] sm:$0xff]  ;;  %v11151_v49 = vld [vmem:[%s14842_s7 + $0x708] sm:$0xff] }
  0x72   :  { %15458 = vst [vmem:[#allocation239_spill] sm:$0xff] %v11146_v33  ;;  %15459 = vst [vmem:[#allocation240_spill] sm:$0xff] %v11151_v49  ;;  %v11156_v45 = vld [vmem:[%s14842_s7 + $0x710] sm:$0xff]  ;;  %v11161_v41 = vld [vmem:[%s14842_s7 + $0x718] sm:$0xff] }
  0x73   :  { %15460 = vst [vmem:[#allocation241_spill] sm:$0xff] %v11156_v45  ;;  %15461 = vst [vmem:[#allocation242_spill] sm:$0xff] %v11161_v41  ;;  %v11166_v37 = vld [vmem:[%s14842_s7 + $0x720] sm:$0xff]  ;;  %v11171_v53 = vld [vmem:[%s14842_s7 + $0x728] sm:$0xff] }
  0x74   :  { %15462 = vst [vmem:[#allocation243_spill] sm:$0xff] %v11166_v37  ;;  %15463 = vst [vmem:[#allocation244_spill] sm:$0xff] %v11171_v53  ;;  %v11176_v49 = vld [vmem:[%s14842_s7 + $0x730] sm:$0xff]  ;;  %v11181_v45 = vld [vmem:[%s14842_s7 + $0x738] sm:$0xff] }
  0x75   :  { %15464 = vst [vmem:[#allocation245_spill] sm:$0xff] %v11176_v49  ;;  %15465 = vst [vmem:[#allocation246_spill] sm:$0xff] %v11181_v45  ;;  %v11186_v41 = vld [vmem:[%s14842_s7 + $0x740] sm:$0xff]  ;;  %v11191_v57 = vld [vmem:[%s14842_s7 + $0x748] sm:$0xff] }
  0x76   :  { %15466 = vst [vmem:[#allocation247_spill] sm:$0xff] %v11186_v41  ;;  %15467 = vst [vmem:[#allocation248_spill] sm:$0xff] %v11191_v57  ;;  %v11196_v53 = vld [vmem:[%s14842_s7 + $0x750] sm:$0xff]  ;;  %v11201_v49 = vld [vmem:[%s14842_s7 + $0x758] sm:$0xff] }
  0x77   :  { %15468 = vst [vmem:[#allocation249_spill] sm:$0xff] %v11196_v53  ;;  %15469 = vst [vmem:[#allocation250_spill] sm:$0xff] %v11201_v49  ;;  %v11206_v45 = vld [vmem:[%s14842_s7 + $0x760] sm:$0xff]  ;;  %v11211_v61 = vld [vmem:[%s14842_s7 + $0x768] sm:$0xff] }
  0x78   :  { %15470 = vst [vmem:[#allocation251_spill] sm:$0xff] %v11206_v45  ;;  %15471 = vst [vmem:[#allocation252_spill] sm:$0xff] %v11211_v61  ;;  %v11216_v57 = vld [vmem:[%s14842_s7 + $0x770] sm:$0xff]  ;;  %v11221_v53 = vld [vmem:[%s14842_s7 + $0x778] sm:$0xff] }
  0x79   :  { %15472 = vst [vmem:[#allocation253_spill] sm:$0xff] %v11216_v57  ;;  %15473 = vst [vmem:[#allocation254_spill] sm:$0xff] %v11221_v53  ;;  %v11226_v49 = vld [vmem:[%s14842_s7 + $0x780] sm:$0xff]  ;;  %v11231_v1 = vld [vmem:[%s14842_s7 + $0x788] sm:$0xff] }
  0x7a   :  { %15474 = vst [vmem:[#allocation255_spill] sm:$0xff] %v11226_v49  ;;  %15475 = vst [vmem:[#allocation256_spill] sm:$0xff] %v11231_v1  ;;  %v11236_v61 = vld [vmem:[%s14842_s7 + $0x790] sm:$0xff]  ;;  %v11241_v57 = vld [vmem:[%s14842_s7 + $0x798] sm:$0xff] }
  0x7b   :  { %15476 = vst [vmem:[#allocation257_spill] sm:$0xff] %v11236_v61  ;;  %15477 = vst [vmem:[#allocation258_spill] sm:$0xff] %v11241_v57  ;;  %v11246_v53 = vld [vmem:[%s14842_s7 + $0x7a0] sm:$0xff]  ;;  %v11251_v5 = vld [vmem:[%s14842_s7 + $0x7a8] sm:$0xff] }
  0x7c   :  { %15478 = vst [vmem:[#allocation259_spill] sm:$0xff] %v11246_v53  ;;  %15479 = vst [vmem:[#allocation260_spill] sm:$0xff] %v11251_v5  ;;  %v11256_v1 = vld [vmem:[%s14842_s7 + $0x7b0] sm:$0xff]  ;;  %v11261_v61 = vld [vmem:[%s14842_s7 + $0x7b8] sm:$0xff] }
  0x7d   :  { %15480 = vst [vmem:[#allocation261_spill] sm:$0xff] %v11256_v1  ;;  %15481 = vst [vmem:[#allocation262_spill] sm:$0xff] %v11261_v61  ;;  %v11266_v57 = vld [vmem:[%s14842_s7 + $0x7c0] sm:$0xff]  ;;  %v11271_v3 = vld [vmem:[%s14842_s7 + $0x7c8] sm:$0xff] }
  0x7e   :  { %15482 = vst [vmem:[#allocation263_spill] sm:$0xff] %v11266_v57  ;;  %15483 = vst [vmem:[#allocation264_spill] sm:$0xff] %v11271_v3  ;;  %v11276_v5 = vld [vmem:[%s14842_s7 + $0x7d0] sm:$0xff]  ;;  %v11281_v1 = vld [vmem:[%s14842_s7 + $0x7d8] sm:$0xff] }
  0x7f   :  { %15484 = vst [vmem:[#allocation265_spill] sm:$0xff] %v11276_v5  ;;  %15485 = vst [vmem:[#allocation266_spill] sm:$0xff] %v11281_v1  ;;  %v11286_v61 = vld [vmem:[%s14842_s7 + $0x7e0] sm:$0xff]  ;;  %v11291_v19 = vld [vmem:[%s14842_s7 + $0x7e8] sm:$0xff] }
  0x80   :  { %15486 = vst [vmem:[#allocation267_spill] sm:$0xff] %v11286_v61  ;;  %15487 = vst [vmem:[#allocation268_spill] sm:$0xff] %v11291_v19  ;;  %v11296_v3 = vld [vmem:[%s14842_s7 + $0x7f0] sm:$0xff]  ;;  %v11301_v5 = vld [vmem:[%s14842_s7 + $0x7f8] sm:$0xff] }
  0x81   :  { %15488 = vst [vmem:[#allocation269_spill] sm:$0xff] %v11296_v3  ;;  %15489 = vst [vmem:[#allocation270_spill] sm:$0xff] %v11301_v5  ;;  %v11306_v1 = vld [vmem:[%s14842_s7 + $0x800] sm:$0xff]  ;;  %v11311_v9 = vld [vmem:[%s14842_s7 + $0x808] sm:$0xff] }
  0x82   :  { %15490 = vst [vmem:[#allocation271_spill] sm:$0xff] %v11306_v1  ;;  %15491 = vst [vmem:[#allocation272_spill] sm:$0xff] %v11311_v9  ;;  %v11316_v19 = vld [vmem:[%s14842_s7 + $0x810] sm:$0xff]  ;;  %v11321_v3 = vld [vmem:[%s14842_s7 + $0x818] sm:$0xff] }
  0x83   :  { %15492 = vst [vmem:[#allocation273_spill] sm:$0xff] %v11316_v19  ;;  %15493 = vst [vmem:[#allocation274_spill] sm:$0xff] %v11321_v3  ;;  %v11326_v5 = vld [vmem:[%s14842_s7 + $0x820] sm:$0xff]  ;;  %v11331_v1 = vld [vmem:[%s14842_s7 + $0x828] sm:$0xff] }
  0x84   :  { %15494 = vst [vmem:[#allocation275_spill] sm:$0xff] %v11326_v5  ;;  %15495 = vst [vmem:[#allocation276_spill] sm:$0xff] %v11331_v1  ;;  %v11336_v9 = vld [vmem:[%s14842_s7 + $0x830] sm:$0xff]  ;;  %v11341_v19 = vld [vmem:[%s14842_s7 + $0x838] sm:$0xff] }
  0x85   :  { %15496 = vst [vmem:[#allocation277_spill] sm:$0xff] %v11336_v9  ;;  %15497 = vst [vmem:[#allocation278_spill] sm:$0xff] %v11341_v19  ;;  %v11346_v3 = vld [vmem:[%s14842_s7 + $0x840] sm:$0xff]  ;;  %v11351_v5 = vld [vmem:[%s14842_s7 + $0x848] sm:$0xff] }
  0x86   :  { %15498 = vst [vmem:[#allocation279_spill] sm:$0xff] %v11346_v3  ;;  %15499 = vst [vmem:[#allocation280_spill] sm:$0xff] %v11351_v5  ;;  %v11356_v1 = vld [vmem:[%s14842_s7 + $0x850] sm:$0xff]  ;;  %v11361_v9 = vld [vmem:[%s14842_s7 + $0x858] sm:$0xff] }
  0x87   :  { %15500 = vst [vmem:[#allocation281_spill] sm:$0xff] %v11356_v1  ;;  %15501 = vst [vmem:[#allocation282_spill] sm:$0xff] %v11361_v9  ;;  %v11366_v19 = vld [vmem:[%s14842_s7 + $0x860] sm:$0xff]  ;;  %v11371_v3 = vld [vmem:[%s14842_s7 + $0x868] sm:$0xff] }
  0x88   :  { %15502 = vst [vmem:[#allocation283_spill] sm:$0xff] %v11366_v19  ;;  %15503 = vst [vmem:[#allocation284_spill] sm:$0xff] %v11371_v3  ;;  %v11376_v5 = vld [vmem:[%s14842_s7 + $0x870] sm:$0xff]  ;;  %v11381_v1 = vld [vmem:[%s14842_s7 + $0x878] sm:$0xff] }
  0x89   :  { %15504 = vst [vmem:[#allocation285_spill] sm:$0xff] %v11376_v5  ;;  %15505 = vst [vmem:[#allocation286_spill] sm:$0xff] %v11381_v1  ;;  %v11386_v9 = vld [vmem:[%s14842_s7 + $0x880] sm:$0xff]  ;;  %v11391_v19 = vld [vmem:[%s14842_s7 + $0x888] sm:$0xff] }
  0x8a   :  { %15506 = vst [vmem:[#allocation287_spill] sm:$0xff] %v11386_v9  ;;  %15507 = vst [vmem:[#allocation288_spill] sm:$0xff] %v11391_v19  ;;  %v11396_v3 = vld [vmem:[%s14842_s7 + $0x890] sm:$0xff]  ;;  %v11401_v5 = vld [vmem:[%s14842_s7 + $0x898] sm:$0xff] }
  0x8b   :  { %15508 = vst [vmem:[#allocation289_spill] sm:$0xff] %v11396_v3  ;;  %15509 = vst [vmem:[#allocation290_spill] sm:$0xff] %v11401_v5  ;;  %v11406_v1 = vld [vmem:[%s14842_s7 + $0x8a0] sm:$0xff]  ;;  %v11411_v9 = vld [vmem:[%s14842_s7 + $0x8a8] sm:$0xff] }
  0x8c   :  { %15510 = vst [vmem:[#allocation291_spill] sm:$0xff] %v11406_v1  ;;  %15511 = vst [vmem:[#allocation292_spill] sm:$0xff] %v11411_v9  ;;  %v11416_v19 = vld [vmem:[%s14842_s7 + $0x8b0] sm:$0xff]  ;;  %v11421_v3 = vld [vmem:[%s14842_s7 + $0x8b8] sm:$0xff] }
  0x8d   :  { %15512 = vst [vmem:[#allocation293_spill] sm:$0xff] %v11416_v19  ;;  %15513 = vst [vmem:[#allocation294_spill] sm:$0xff] %v11421_v3  ;;  %v11426_v5 = vld [vmem:[%s14842_s7 + $0x8c0] sm:$0xff]  ;;  %v11431_v1 = vld [vmem:[%s14842_s7 + $0x8c8] sm:$0xff] }
  0x8e   :  { %15514 = vst [vmem:[#allocation295_spill] sm:$0xff] %v11426_v5  ;;  %15515 = vst [vmem:[#allocation296_spill] sm:$0xff] %v11431_v1  ;;  %v11436_v9 = vld [vmem:[%s14842_s7 + $0x8d0] sm:$0xff]  ;;  %v11441_v19 = vld [vmem:[%s14842_s7 + $0x8d8] sm:$0xff] }
  0x8f   :  { %15516 = vst [vmem:[#allocation297_spill] sm:$0xff] %v11436_v9  ;;  %15517 = vst [vmem:[#allocation298_spill] sm:$0xff] %v11441_v19  ;;  %v11446_v3 = vld [vmem:[%s14842_s7 + $0x8e0] sm:$0xff]  ;;  %v11451_v5 = vld [vmem:[%s14842_s7 + $0x8e8] sm:$0xff] }
  0x90   :  { %15518 = vst [vmem:[#allocation299_spill] sm:$0xff] %v11446_v3  ;;  %15519 = vst [vmem:[#allocation300_spill] sm:$0xff] %v11451_v5  ;;  %v11456_v1 = vld [vmem:[%s14842_s7 + $0x8f0] sm:$0xff]  ;;  %v11461_v9 = vld [vmem:[%s14842_s7 + $0x8f8] sm:$0xff] }
  0x91   :  { %15520 = vst [vmem:[#allocation301_spill] sm:$0xff] %v11456_v1  ;;  %15521 = vst [vmem:[#allocation302_spill] sm:$0xff] %v11461_v9  ;;  %v11466_v19 = vld [vmem:[%s14842_s7 + $0x900] sm:$0xff]  ;;  %v11471_v3 = vld [vmem:[%s14842_s7 + $0x908] sm:$0xff] }
  0x92   :  { %15522 = vst [vmem:[#allocation303_spill] sm:$0xff] %v11466_v19  ;;  %15523 = vst [vmem:[#allocation304_spill] sm:$0xff] %v11471_v3  ;;  %v11476_v5 = vld [vmem:[%s14842_s7 + $0x910] sm:$0xff]  ;;  %v11481_v1 = vld [vmem:[%s14842_s7 + $0x918] sm:$0xff] }
  0x93   :  { %15524 = vst [vmem:[#allocation305_spill] sm:$0xff] %v11476_v5  ;;  %15525 = vst [vmem:[#allocation306_spill] sm:$0xff] %v11481_v1  ;;  %v11486_v9 = vld [vmem:[%s14842_s7 + $0x920] sm:$0xff]  ;;  %v11491_v19 = vld [vmem:[%s14842_s7 + $0x928] sm:$0xff] }
  0x94   :  { %15526 = vst [vmem:[#allocation307_spill] sm:$0xff] %v11486_v9  ;;  %15527 = vst [vmem:[#allocation308_spill] sm:$0xff] %v11491_v19  ;;  %v11496_v3 = vld [vmem:[%s14842_s7 + $0x930] sm:$0xff]  ;;  %v11501_v5 = vld [vmem:[%s14842_s7 + $0x938] sm:$0xff] }
  0x95   :  { %15528 = vst [vmem:[#allocation309_spill] sm:$0xff] %v11496_v3  ;;  %15529 = vst [vmem:[#allocation310_spill] sm:$0xff] %v11501_v5  ;;  %v11506_v1 = vld [vmem:[%s14842_s7 + $0x940] sm:$0xff]  ;;  %v11511_v9 = vld [vmem:[%s14842_s7 + $0x948] sm:$0xff] }
  0x96   :  { %15530 = vst [vmem:[#allocation311_spill] sm:$0xff] %v11506_v1  ;;  %15531 = vst [vmem:[#allocation312_spill] sm:$0xff] %v11511_v9  ;;  %v11516_v19 = vld [vmem:[%s14842_s7 + $0x950] sm:$0xff]  ;;  %v11521_v3 = vld [vmem:[%s14842_s7 + $0x958] sm:$0xff] }
  0x97   :  { %15532 = vst [vmem:[#allocation313_spill] sm:$0xff] %v11516_v19  ;;  %15533 = vst [vmem:[#allocation314_spill] sm:$0xff] %v11521_v3  ;;  %v11526_v5 = vld [vmem:[%s14842_s7 + $0x960] sm:$0xff]  ;;  %v11531_v1 = vld [vmem:[%s14842_s7 + $0x968] sm:$0xff] }
  0x98   :  { %15534 = vst [vmem:[#allocation315_spill] sm:$0xff] %v11526_v5  ;;  %15535 = vst [vmem:[#allocation316_spill] sm:$0xff] %v11531_v1  ;;  %v11536_v9 = vld [vmem:[%s14842_s7 + $0x970] sm:$0xff]  ;;  %v11541_v19 = vld [vmem:[%s14842_s7 + $0x978] sm:$0xff] }
  0x99   :  { %15536 = vst [vmem:[#allocation317_spill] sm:$0xff] %v11536_v9  ;;  %15537 = vst [vmem:[#allocation318_spill] sm:$0xff] %v11541_v19  ;;  %v11546_v3 = vld [vmem:[%s14842_s7 + $0x980] sm:$0xff]  ;;  %v11551_v5 = vld [vmem:[%s14842_s7 + $0x988] sm:$0xff] }
  0x9a   :  { %15538 = vst [vmem:[#allocation319_spill] sm:$0xff] %v11546_v3  ;;  %15539 = vst [vmem:[#allocation320_spill] sm:$0xff] %v11551_v5  ;;  %v11556_v1 = vld [vmem:[%s14842_s7 + $0x990] sm:$0xff]  ;;  %v11561_v9 = vld [vmem:[%s14842_s7 + $0x998] sm:$0xff] }
  0x9b   :  { %15540 = vst [vmem:[#allocation321_spill] sm:$0xff] %v11556_v1  ;;  %15541 = vst [vmem:[#allocation322_spill] sm:$0xff] %v11561_v9  ;;  %v11566_v19 = vld [vmem:[%s14842_s7 + $0x9a0] sm:$0xff]  ;;  %v11571_v3 = vld [vmem:[%s14842_s7 + $0x9a8] sm:$0xff] }
  0x9c   :  { %15542 = vst [vmem:[#allocation323_spill] sm:$0xff] %v11566_v19  ;;  %15543 = vst [vmem:[#allocation324_spill] sm:$0xff] %v11571_v3  ;;  %v11576_v5 = vld [vmem:[%s14842_s7 + $0x9b0] sm:$0xff]  ;;  %v11581_v1 = vld [vmem:[%s14842_s7 + $0x9b8] sm:$0xff] }
  0x9d   :  { %15544 = vst [vmem:[#allocation325_spill] sm:$0xff] %v11576_v5  ;;  %15545 = vst [vmem:[#allocation326_spill] sm:$0xff] %v11581_v1  ;;  %v11586_v9 = vld [vmem:[%s14842_s7 + $0x9c0] sm:$0xff]  ;;  %v11591_v19 = vld [vmem:[%s14842_s7 + $0x9c8] sm:$0xff] }
  0x9e   :  { %15546 = vst [vmem:[#allocation327_spill] sm:$0xff] %v11586_v9  ;;  %15547 = vst [vmem:[#allocation328_spill] sm:$0xff] %v11591_v19  ;;  %v11596_v3 = vld [vmem:[%s14842_s7 + $0x9d0] sm:$0xff]  ;;  %v11601_v5 = vld [vmem:[%s14842_s7 + $0x9d8] sm:$0xff] }
  0x9f   :  { %15548 = vst [vmem:[#allocation329_spill] sm:$0xff] %v11596_v3  ;;  %15549 = vst [vmem:[#allocation330_spill] sm:$0xff] %v11601_v5  ;;  %v11606_v1 = vld [vmem:[%s14842_s7 + $0x9e0] sm:$0xff]  ;;  %v11611_v9 = vld [vmem:[%s14842_s7 + $0x9e8] sm:$0xff] }
  0xa0   :  { %15550 = vst [vmem:[#allocation331_spill] sm:$0xff] %v11606_v1  ;;  %15551 = vst [vmem:[#allocation332_spill] sm:$0xff] %v11611_v9  ;;  %v11616_v19 = vld [vmem:[%s14842_s7 + $0x9f0] sm:$0xff]  ;;  %v11621_v3 = vld [vmem:[%s14842_s7 + $0x9f8] sm:$0xff] }
  0xa1   :  { %15552 = vst [vmem:[#allocation333_spill] sm:$0xff] %v11616_v19  ;;  %15553 = vst [vmem:[#allocation334_spill] sm:$0xff] %v11621_v3  ;;  %v11626_v5 = vld [vmem:[%s14842_s7 + $0xa00] sm:$0xff]  ;;  %v11631_v1 = vld [vmem:[%s14842_s7 + $0xa08] sm:$0xff] }
  0xa2   :  { %15554 = vst [vmem:[#allocation335_spill] sm:$0xff] %v11626_v5  ;;  %15555 = vst [vmem:[#allocation336_spill] sm:$0xff] %v11631_v1  ;;  %v11636_v9 = vld [vmem:[%s14842_s7 + $0xa10] sm:$0xff]  ;;  %v11641_v19 = vld [vmem:[%s14842_s7 + $0xa18] sm:$0xff] }
  0xa3   :  { %15556 = vst [vmem:[#allocation337_spill] sm:$0xff] %v11636_v9  ;;  %15557 = vst [vmem:[#allocation338_spill] sm:$0xff] %v11641_v19  ;;  %v11646_v3 = vld [vmem:[%s14842_s7 + $0xa20] sm:$0xff]  ;;  %v11651_v5 = vld [vmem:[%s14842_s7 + $0xa28] sm:$0xff] }
  0xa4   :  { %15558 = vst [vmem:[#allocation339_spill] sm:$0xff] %v11646_v3  ;;  %15559 = vst [vmem:[#allocation340_spill] sm:$0xff] %v11651_v5  ;;  %v11656_v1 = vld [vmem:[%s14842_s7 + $0xa30] sm:$0xff]  ;;  %v11661_v9 = vld [vmem:[%s14842_s7 + $0xa38] sm:$0xff] }
  0xa5   :  { %15560 = vst [vmem:[#allocation341_spill] sm:$0xff] %v11656_v1  ;;  %15561 = vst [vmem:[#allocation342_spill] sm:$0xff] %v11661_v9  ;;  %v11666_v19 = vld [vmem:[%s14842_s7 + $0xa40] sm:$0xff]  ;;  %v11671_v3 = vld [vmem:[%s14842_s7 + $0xa48] sm:$0xff] }
  0xa6   :  { %15562 = vst [vmem:[#allocation343_spill] sm:$0xff] %v11666_v19  ;;  %15563 = vst [vmem:[#allocation344_spill] sm:$0xff] %v11671_v3  ;;  %v11676_v5 = vld [vmem:[%s14842_s7 + $0xa50] sm:$0xff]  ;;  %v11681_v1 = vld [vmem:[%s14842_s7 + $0xa58] sm:$0xff] }
  0xa7   :  { %15564 = vst [vmem:[#allocation345_spill] sm:$0xff] %v11676_v5  ;;  %15565 = vst [vmem:[#allocation346_spill] sm:$0xff] %v11681_v1  ;;  %v11686_v9 = vld [vmem:[%s14842_s7 + $0xa60] sm:$0xff]  ;;  %v11691_v19 = vld [vmem:[%s14842_s7 + $0xa68] sm:$0xff] }
  0xa8   :  { %15566 = vst [vmem:[#allocation347_spill] sm:$0xff] %v11686_v9  ;;  %15567 = vst [vmem:[#allocation348_spill] sm:$0xff] %v11691_v19  ;;  %v11696_v3 = vld [vmem:[%s14842_s7 + $0xa70] sm:$0xff]  ;;  %v11701_v5 = vld [vmem:[%s14842_s7 + $0xa78] sm:$0xff] }
  0xa9   :  { %15568 = vst [vmem:[#allocation349_spill] sm:$0xff] %v11696_v3  ;;  %15569 = vst [vmem:[#allocation350_spill] sm:$0xff] %v11701_v5  ;;  %v11706_v1 = vld [vmem:[%s14842_s7 + $0xa80] sm:$0xff]  ;;  %v11711_v9 = vld [vmem:[%s14842_s7 + $0xa88] sm:$0xff] }
  0xaa   :  { %15570 = vst [vmem:[#allocation351_spill] sm:$0xff] %v11706_v1  ;;  %15571 = vst [vmem:[#allocation352_spill] sm:$0xff] %v11711_v9  ;;  %v11716_v19 = vld [vmem:[%s14842_s7 + $0xa90] sm:$0xff]  ;;  %v11721_v3 = vld [vmem:[%s14842_s7 + $0xa98] sm:$0xff] }
  0xab   :  { %15572 = vst [vmem:[#allocation353_spill] sm:$0xff] %v11716_v19  ;;  %15573 = vst [vmem:[#allocation354_spill] sm:$0xff] %v11721_v3  ;;  %v11726_v5 = vld [vmem:[%s14842_s7 + $0xaa0] sm:$0xff]  ;;  %v11731_v1 = vld [vmem:[%s14842_s7 + $0xaa8] sm:$0xff] }
  0xac   :  { %15574 = vst [vmem:[#allocation355_spill] sm:$0xff] %v11726_v5  ;;  %15575 = vst [vmem:[#allocation356_spill] sm:$0xff] %v11731_v1  ;;  %v11736_v9 = vld [vmem:[%s14842_s7 + $0xab0] sm:$0xff]  ;;  %v11741_v19 = vld [vmem:[%s14842_s7 + $0xab8] sm:$0xff] }
  0xad   :  { %15576 = vst [vmem:[#allocation357_spill] sm:$0xff] %v11736_v9  ;;  %15577 = vst [vmem:[#allocation358_spill] sm:$0xff] %v11741_v19  ;;  %v11746_v3 = vld [vmem:[%s14842_s7 + $0xac0] sm:$0xff]  ;;  %v11751_v5 = vld [vmem:[%s14842_s7 + $0xac8] sm:$0xff] }
  0xae   :  { %15578 = vst [vmem:[#allocation359_spill] sm:$0xff] %v11746_v3  ;;  %15579 = vst [vmem:[#allocation360_spill] sm:$0xff] %v11751_v5  ;;  %v11756_v1 = vld [vmem:[%s14842_s7 + $0xad0] sm:$0xff]  ;;  %v11761_v9 = vld [vmem:[%s14842_s7 + $0xad8] sm:$0xff] }
  0xaf   :  { %15580 = vst [vmem:[#allocation361_spill] sm:$0xff] %v11756_v1  ;;  %15581 = vst [vmem:[#allocation362_spill] sm:$0xff] %v11761_v9  ;;  %v11766_v19 = vld [vmem:[%s14842_s7 + $0xae0] sm:$0xff]  ;;  %v11771_v3 = vld [vmem:[%s14842_s7 + $0xae8] sm:$0xff] }
  0xb0   :  { %15582 = vst [vmem:[#allocation363_spill] sm:$0xff] %v11766_v19  ;;  %15583 = vst [vmem:[#allocation364_spill] sm:$0xff] %v11771_v3  ;;  %v11776_v5 = vld [vmem:[%s14842_s7 + $0xaf0] sm:$0xff]  ;;  %v11781_v1 = vld [vmem:[%s14842_s7 + $0xaf8] sm:$0xff] }
  0xb1   :  { %15584 = vst [vmem:[#allocation365_spill] sm:$0xff] %v11776_v5  ;;  %15585 = vst [vmem:[#allocation366_spill] sm:$0xff] %v11781_v1  ;;  %v11786_v9 = vld [vmem:[%s14842_s7 + $0xb00] sm:$0xff]  ;;  %v11791_v19 = vld [vmem:[%s14842_s7 + $0xb08] sm:$0xff] }
  0xb2   :  { %15586 = vst [vmem:[#allocation367_spill] sm:$0xff] %v11786_v9  ;;  %15587 = vst [vmem:[#allocation368_spill] sm:$0xff] %v11791_v19  ;;  %v11796_v3 = vld [vmem:[%s14842_s7 + $0xb10] sm:$0xff]  ;;  %v11801_v5 = vld [vmem:[%s14842_s7 + $0xb18] sm:$0xff] }
  0xb3   :  { %15588 = vst [vmem:[#allocation369_spill] sm:$0xff] %v11796_v3  ;;  %15589 = vst [vmem:[#allocation370_spill] sm:$0xff] %v11801_v5  ;;  %v11806_v1 = vld [vmem:[%s14842_s7 + $0xb20] sm:$0xff]  ;;  %v11811_v9 = vld [vmem:[%s14842_s7 + $0xb28] sm:$0xff] }
  0xb4   :  { %15590 = vst [vmem:[#allocation371_spill] sm:$0xff] %v11806_v1  ;;  %15591 = vst [vmem:[#allocation372_spill] sm:$0xff] %v11811_v9  ;;  %v11816_v19 = vld [vmem:[%s14842_s7 + $0xb30] sm:$0xff]  ;;  %v11821_v3 = vld [vmem:[%s14842_s7 + $0xb38] sm:$0xff] }
  0xb5   :  { %15592 = vst [vmem:[#allocation373_spill] sm:$0xff] %v11816_v19  ;;  %15593 = vst [vmem:[#allocation374_spill] sm:$0xff] %v11821_v3  ;;  %v11826_v5 = vld [vmem:[%s14842_s7 + $0xb40] sm:$0xff]  ;;  %v11831_v1 = vld [vmem:[%s14842_s7 + $0xb48] sm:$0xff] }
  0xb6   :  { %15594 = vst [vmem:[#allocation375_spill] sm:$0xff] %v11826_v5  ;;  %15595 = vst [vmem:[#allocation376_spill] sm:$0xff] %v11831_v1  ;;  %v11836_v9 = vld [vmem:[%s14842_s7 + $0xb50] sm:$0xff]  ;;  %v11841_v19 = vld [vmem:[%s14842_s7 + $0xb58] sm:$0xff] }
  0xb7   :  { %15596 = vst [vmem:[#allocation377_spill] sm:$0xff] %v11836_v9  ;;  %15597 = vst [vmem:[#allocation378_spill] sm:$0xff] %v11841_v19  ;;  %v11846_v3 = vld [vmem:[%s14842_s7 + $0xb60] sm:$0xff]  ;;  %v11851_v5 = vld [vmem:[%s14842_s7 + $0xb68] sm:$0xff] }
  0xb8   :  { %15598 = vst [vmem:[#allocation379_spill] sm:$0xff] %v11846_v3  ;;  %15599 = vst [vmem:[#allocation380_spill] sm:$0xff] %v11851_v5  ;;  %v11856_v1 = vld [vmem:[%s14842_s7 + $0xb70] sm:$0xff]  ;;  %v11861_v9 = vld [vmem:[%s14842_s7 + $0xb78] sm:$0xff] }
  0xb9   :  { %15600 = vst [vmem:[#allocation381_spill] sm:$0xff] %v11856_v1  ;;  %15601 = vst [vmem:[#allocation382_spill] sm:$0xff] %v11861_v9  ;;  %v11866_v19 = vld [vmem:[%s14842_s7 + $0xb80] sm:$0xff]  ;;  %v11871_v3 = vld [vmem:[%s14842_s7 + $0xb88] sm:$0xff] }
  0xba   :  { %15602 = vst [vmem:[#allocation383_spill] sm:$0xff] %v11866_v19  ;;  %15603 = vst [vmem:[#allocation384_spill] sm:$0xff] %v11871_v3  ;;  %v11876_v5 = vld [vmem:[%s14842_s7 + $0xb90] sm:$0xff]  ;;  %v11881_v1 = vld [vmem:[%s14842_s7 + $0xb98] sm:$0xff] }
  0xbb   :  { %15604 = vst [vmem:[#allocation385_spill] sm:$0xff] %v11876_v5  ;;  %15605 = vst [vmem:[#allocation386_spill] sm:$0xff] %v11881_v1  ;;  %v11886_v9 = vld [vmem:[%s14842_s7 + $0xba0] sm:$0xff]  ;;  %v11891_v19 = vld [vmem:[%s14842_s7 + $0xba8] sm:$0xff] }
  0xbc   :  { %15606 = vst [vmem:[#allocation387_spill] sm:$0xff] %v11886_v9  ;;  %15607 = vst [vmem:[#allocation388_spill] sm:$0xff] %v11891_v19  ;;  %v11896_v3 = vld [vmem:[%s14842_s7 + $0xbb0] sm:$0xff]  ;;  %v11901_v5 = vld [vmem:[%s14842_s7 + $0xbb8] sm:$0xff] }
  0xbd   :  { %15608 = vst [vmem:[#allocation389_spill] sm:$0xff] %v11896_v3  ;;  %15609 = vst [vmem:[#allocation390_spill] sm:$0xff] %v11901_v5  ;;  %v11906_v1 = vld [vmem:[%s14842_s7 + $0xbc0] sm:$0xff]  ;;  %v11911_v9 = vld [vmem:[%s14842_s7 + $0xbc8] sm:$0xff] }
  0xbe   :  { %15610 = vst [vmem:[#allocation391_spill] sm:$0xff] %v11906_v1  ;;  %15611 = vst [vmem:[#allocation392_spill] sm:$0xff] %v11911_v9  ;;  %v11916_v19 = vld [vmem:[%s14842_s7 + $0xbd0] sm:$0xff]  ;;  %v11921_v3 = vld [vmem:[%s14842_s7 + $0xbd8] sm:$0xff] }
  0xbf   :  { %15612 = vst [vmem:[#allocation393_spill] sm:$0xff] %v11916_v19  ;;  %15613 = vst [vmem:[#allocation394_spill] sm:$0xff] %v11921_v3  ;;  %v11926_v5 = vld [vmem:[%s14842_s7 + $0xbe0] sm:$0xff]  ;;  %v11931_v1 = vld [vmem:[%s14842_s7 + $0xbe8] sm:$0xff] }
  0xc0   :  { %15614 = vst [vmem:[#allocation395_spill] sm:$0xff] %v11926_v5  ;;  %15615 = vst [vmem:[#allocation396_spill] sm:$0xff] %v11931_v1  ;;  %v11936_v9 = vld [vmem:[%s14842_s7 + $0xbf0] sm:$0xff]  ;;  %v11941_v19 = vld [vmem:[%s14842_s7 + $0xbf8] sm:$0xff] }
  0xc1   :  { %15616 = vst [vmem:[#allocation397_spill] sm:$0xff] %v11936_v9  ;;  %15617 = vst [vmem:[#allocation398_spill] sm:$0xff] %v11941_v19  ;;  %v7676_v3 = vld [vmem:[%s14836_s1 + $0x28] sm:$0x3]  ;;  %v7675_v5 = vld [vmem:[%s14836_s1 + $0x20] sm:$0xff] }
  0xc2   :  { %9878 = vmatprep.subr.msk.mxu1 %vm931_vm0, %v7676_v3 }
  0xc3   :  { %848 = vsyncadd [#allocation6], 49152  ;;  %8951 = vmatprep.subr.msk.mxu0 %vm931_vm0, %v7676_v3  ;;  %v7681_v9 = vld [vmem:[%s14835_s0 + $0x50] sm:$0xff]  ;;  %9881 = vmatpush3.msk.msra.mxu1 %vm931_vm0, %v7676_v3  ;;  %v7674_v19 = vld [vmem:[%s14836_s1 + $0x18] sm:$0xff]  ;;  %vm9947_vm2 = vmmov 0   ;;  %vm4270_vm3 = vcmask 385024  }
  0xc4   :  { %8963 = vmatprep.mubr.msk.f32.mxu1 %vm900_vm1, %v7681_v9  ;;  %9879 = vmatprep.subr.mxu1 %v7675_v5  ;;  %v7682_v1 = vld [vmem:[%s14835_s0 + $0x90] sm:$0xff]  ;;  %v7683_v15 = vld [vmem:[%s14835_s0 + $0x98] sm:$0xff]  ;;  %v871_v9 = vld [vmem:[%s14836_s1 + $0x8] sm:$0xff]  ;;  %s9950_s16 = smov 48   ;;  %s9951_s17 = smov 96   ;;  %vm4285_vm4 = vcmask 778624  }
  0xc5   :  { %8952 = vmatpush3.msk.msra.mxu0 %vm931_vm0, %v7676_v3  ;;  %9882 = vmatpush3.msra.mxu1 %v7675_v5  ;;  %v872_v13 = vld [vmem:[%s14836_s1 + $0x10] sm:$0x3]  ;;  %v7684_v31 = vld [vmem:[%s14835_s0 + $0xa0] sm:$0xff]  ;;  %v7685_v17 = vld [vmem:[%s14835_s0 + $0xa8] sm:$0xff]  ;;  %s9952_s18 = smov 64   ;;  %s9953_s19 = smov 16  }
  0xc6   :  { %8953 = vmatprep.subr.mxu0 %v7675_v5  ;;  %9880 = vmatprep.subr.mxu1 %v7674_v19  ;;  %v7677_v3 = vld [vmem:[%s14835_s0 + $0x30] sm:$0xff]  ;;  %v7673_v21 = vld [vmem:[%s14835_s0 + $0x80] sm:$0xff]  ;;  %v7723_v43 = vld [vmem:[%s14836_s1 + $0x48] sm:$0xff]  ;;  %s9954_s20 = smov 32   ;;  %s9955_s7 = smov 112   ;;  %vm4294_vm5 = vcmask 1041152  }
  0xc7   :  { %8954 = vmatpush3.msra.mxu0 %v7675_v5  ;;  %9883 = vmatpush3.msra.mxu1 %v7674_v19  ;;  %v7678_v5 = vld [vmem:[%s14835_s0 + $0x38] sm:$0xff]  ;;  %vm4295_vm6 = vcmask 124930   ;;  %vm4428_vm7 = vcmask 392192   ;;  %vm4291_vm9 = vcmask 785408   ;;  %vm4303_vm10 = vcmask 516224  }
  0xc8   :  { %8955 = vmatprep.subr.mxu0 %v7674_v19  ;;  %8964 = vmatmul.mubr.msk.f32.vlgmr.msra.gmra.mxu1 %vm900_vm1, %v7682_v1  ;;  %v7711_v1 = vld [vmem:[%s14836_s1 + $0x40] sm:$0x3]  ;;  %v1204_v55 = vld [vmem:[%s14835_s0 + $0x11] sm:$0xff]  ;;  %vm13804_vm8 = vmor %vm4295_vm6, %vm4294_vm5  ;;  %vm4317_vm11 = vcmask 909824   ;;  %vm4327_vm12 = vcmask 1041280   ;;  %vm4328_vm13 = vcmask 256002  }
  0xc9   :  { %8972 = vmatprep.subr.msk.mxu1 %vm931_vm0, %v872_v13  ;;  %8966 = vmatprep.mubr.msk.f32.mxu1 %vm900_vm1, %v7683_v15  ;;  %v870_v15 = vld [vmem:[%s14836_s1] sm:$0xff]  ;;  %vm4324_vm14 = vcmask 916480   ;;  %vm13831_vm15 = vmor %vm4328_vm13, %vm4327_vm12 }
  0xca   :  { %8973 = vmatpush3.msk.msra.mxu1 %vm931_vm0, %v872_v13  ;;  %8956 = vmatpush3.msra.mxu0 %v7674_v19  ;;  %v7679_v13 = vld [vmem:[%s14835_s0 + $0x40] sm:$0xff]  ;;  %v7680_v19 = vld [vmem:[%s14835_s0 + $0x48] sm:$0xff] }
  0xcb   :  { %8957 = vmatprep.mubr.msk.f32.mxu0 %vm900_vm1, %v7677_v3  ;;  %8974 = vmatprep.subr.mxu1 %v871_v9  ;;  %v7686_v3 = vld [vmem:[%s14835_s0 + $0xb0] sm:$0xff] }
  0xcc   :  { %8958 = vmatmul.mubr.msk.f32.vlgmr.msra.gmra.mxu0 %vm900_vm1, %v7678_v5  ;;  %8967 = vmatmul.mubr.msk.f32.gmra.mxu1 %vm900_vm1, %v7684_v31  ;;  %v7710_v31 = vld [vmem:[%s14836_s1 + $0x38] sm:$0xff]  ;;  %v7669_v5 = vld [vmem:[%s14835_s0 + $0x60] sm:$0xff] }
  0xcd   :  { %8993 = vmatprep.subr.msk.mxu0 %vm931_vm0, %v7711_v1  ;;  %8975 = vmatpush3.msra.mxu1 %v871_v9  ;;  %v873_v9 = vld [vmem:[%s14835_s0] sm:$0xff] }
  0xce   :  { %8969 = vmatprep.mubr.msk.f32.mxu1 %vm900_vm1, %v7685_v17  ;;  %8994 = vmatpush3.msk.msra.mxu0 %vm931_vm0, %v7711_v1  ;;  %v7709_v17 = vld [vmem:[%s14836_s1 + $0x30] sm:$0xff]  ;;  %v874_v1 = vld [vmem:[%s14835_s0 + $0x8] sm:$0xff] }
  0xcf   :  { %8960 = vmatprep.mubr.msk.f32.mxu0 %vm900_vm1, %v7679_v13  ;;  %8976 = vmatprep.subr.mxu1 %v870_v15  ;;  %v7725_v13 = vld [vmem:[%s14836_s1 + $0x58] sm:$0x3] }
  0xd0   :  { %8961 = vmatmul.mubr.msk.f32.gmra.mxu0 %vm900_vm1, %v7680_v19  ;;  %8970 = vmatmul.mubr.msk.f32.gmra.mxu1 %vm900_vm1, %v7686_v3  ;;  %v7670_v19 = vld [vmem:[%s14835_s0 + $0x68] sm:$0xff]  ;;  %v875_v3 = vld [vmem:[%s14835_s0 + $0x10] sm:$0xff] }
  0xd1   :  { %8995 = vmatprep.subr.mxu0 %v7710_v31  ;;  %8977 = vmatpush3.msra.mxu1 %v870_v15  ;;  %v7749_v15 = vld [vmem:[%s14836_s1 + $0x70] sm:$0x3] }
  0xd2   :  { %8996 = vmatpush3.msra.mxu0 %v7710_v31  ;;  %8978 = vmatprep.mubr.msk.f32.mxu1 %vm900_vm1, %v873_v9  ;;  %v7671_v31 = vld [vmem:[%s14835_s0 + $0x70] sm:$0xff]  ;;  %v876_v9 = vld [vmem:[%s14835_s0 + $0x18] sm:$0xff] }
  0xd3   :  { %8997 = vmatprep.subr.mxu0 %v7709_v17  ;;  %8999 = vmatprep.mubr.msk.f32.mxu0 %vm900_vm1, %v7669_v5 }
  0xd4   :  { %8998 = vmatpush3.msra.mxu0 %v7709_v17  ;;  %8979 = vmatmul.mubr.msk.f32.vlgmr.msra.gmra.mxu1 %vm900_vm1, %v874_v1  ;;  %v7724_v17 = vld [vmem:[%s14836_s1 + $0x50] sm:$0xff]  ;;  %v7672_v1 = vld [vmem:[%s14835_s0 + $0x78] sm:$0xff] }
  0xd5   :  { %9014 = vmatprep.subr.msk.mxu1 %vm931_vm0, %v7725_v13  ;;  %9000 = vmatmul.mubr.msk.f32.vlgmr.msra.gmra.mxu0 %vm900_vm1, %v7670_v19 }
  0xd6   :  { %9015 = vmatpush3.msk.msra.mxu1 %vm931_vm0, %v7725_v13  ;;  %9035 = vmatprep.subr.msk.mxu0 %vm931_vm0, %v7749_v15  ;;  %v877_v13 = vld [vmem:[%s14835_s0 + $0x20] sm:$0xff] }
  0xd7   :  { %8981 = vmatprep.mubr.msk.f32.mxu1 %vm900_vm1, %v875_v3  ;;  %9036 = vmatpush3.msk.msra.mxu0 %vm931_vm0, %v7749_v15  ;;  %v7748_v3 = vld [vmem:[%s14836_s1 + $0x68] sm:$0xff] }
  0xd8   :  { %9002 = vmatprep.mubr.msk.f32.mxu0 %vm900_vm1, %v7671_v31  ;;  %8982 = vmatmul.mubr.msk.f32.gmra.mxu1 %vm900_vm1, %v876_v9  ;;  %v1202_v15 = vld [vmem:[%s14835_s0 + $0x1] sm:$0xff]  ;;  %v1203_v9 = vld [vmem:[%s14835_s0 + $0x9] sm:$0xff] }
  0xd9   :  { %9016 = vmatprep.subr.mxu1 %v7724_v17  ;;  %9003 = vmatmul.mubr.msk.f32.gmra.mxu0 %vm900_vm1, %v7672_v1 }
  0xda   :  { %8984 = vmatprep.mubr.msk.f32.mxu1 %vm900_vm1, %v877_v13  ;;  %9005 = vmatprep.mubr.msk.f32.mxu0 %vm900_vm1, %v7673_v21  ;;  %v7747_v13 = vld [vmem:[%s14836_s1 + $0x60] sm:$0xff] }
  0xdb   :  { %9017 = vmatpush3.msra.mxu1 %v7724_v17  ;;  %9037 = vmatprep.subr.mxu0 %v7748_v3  ;;  %v7773_v17 = vld [vmem:[%s14836_s1 + $0x88] sm:$0x3] }
  0xdc   :  { %9018 = vmatprep.subr.mxu1 %v7723_v43  ;;  %8985 = vmatmul.mubr.msk.f32.gmra.mxu1 %vm900_vm1, %v7669_v5  ;;  %v1205_v5 = vld [vmem:[%s14835_s0 + $0x19] sm:$0xff] }
  0xdd   :  { %9038 = vmatpush3.msra.mxu0 %v7748_v3  ;;  %8987 = vmatprep.mubr.msk.f32.mxu1 %vm900_vm1, %v7670_v19  ;;  %v7792_v3 = vld [vmem:[%s14836_s1 + $0xa0] sm:$0x3] }
  0xde   :  { %9006 = vmatmul.mubr.msk.f32.gmra.mxu0 %vm900_vm1, %v1202_v15  ;;  %9019 = vmatpush3.msra.mxu1 %v7723_v43  ;;  %v1206_v43 = vld [vmem:[%s14835_s0 + $0x21] sm:$0xff]  ;;  %v7728_v15 = vld [vmem:[%s14835_s0 + $0xd0] sm:$0xff] }
  0xdf   :  { %9008 = vmatprep.mubr.msk.f32.mxu0 %vm900_vm1, %v1203_v9  ;;  %9039 = vmatprep.subr.mxu0 %v7747_v13  ;;  %v7726_v19 = vld [vmem:[%s14835_s0 + $0xc0] sm:$0xff] }
  0xe0   :  { %9056 = vmatprep.subr.msk.mxu1 %vm931_vm0, %v7773_v17  ;;  %8988 = vmatmul.mubr.msk.f32.gmra.mxu1 %vm900_vm1, %v7671_v31  ;;  %v7750_v31 = vld [vmem:[%s14835_s0 + $0xf0] sm:$0xff]  ;;  %v7772_v9 = vld [vmem:[%s14836_s1 + $0x80] sm:$0xff] }
  0xe1   :  { %9040 = vmatpush3.msra.mxu0 %v7747_v13  ;;  %8990 = vmatprep.mubr.msk.f32.mxu1 %vm900_vm1, %v7672_v1  ;;  %v7751_v1 = vld [vmem:[%s14835_s0 + $0xf8] sm:$0xff] }
  0xe2   :  { %9009 = vmatmul.mubr.msk.f32.gmra.mxu0 %vm900_vm1, %v1204_v55  ;;  %9077 = vmatprep.subr.msk.mxu0 %vm931_vm0, %v7792_v3  ;;  %v7727_v55 = vld [vmem:[%s14835_s0 + $0xc8] sm:$0xff]  ;;  %v7729_v13 = vld [vmem:[%s14835_s0 + $0xd8] sm:$0xff] }
  0xe3   :  { %9011 = vmatprep.mubr.msk.f32.mxu0 %vm900_vm1, %v1205_v5  ;;  %v7791_v5 = vld [vmem:[%s14836_s1 + $0x98] sm:$0xff] }
  0xe4   :  { %8991 = vmatmul.mubr.msk.f32.gmra.mxu1 %vm900_vm1, %v7673_v21  ;;  %v7752_v21 = vld [vmem:[%s14835_s0 + $0x100] sm:$0xff] }
  0xe5   :  { %9020 = vmatprep.mubr.msk.f32.mxu1 %vm900_vm1, %v7726_v19  ;;  %v7754_v19 = vld [vmem:[%s14835_s0 + $0x110] sm:$0xff] }
  0xe6   :  { %9012 = vmatmul.mubr.msk.f32.gmra.mxu0 %vm900_vm1, %v1206_v43  ;;  %v7753_v43 = vld [vmem:[%s14835_s0 + $0x108] sm:$0xff] }
  0xe7   :  { %9041 = vmatprep.mubr.msk.f32.mxu0 %vm900_vm1, %v7750_v31  ;;  %v7731_v31 = vld [vmem:[%s14835_s0 + $0x120] sm:$0xff] }
  0xe8   :  { %9021 = vmatmul.mubr.msk.f32.vlgmr.msra.gmra.mxu1 %vm900_vm1, %v7727_v55  ;;  %v7790_v55 = vld [vmem:[%s14836_s1 + $0x90] sm:$0xff] }
  0xe9   :  { %9057 = vmatpush3.msk.msra.mxu1 %vm931_vm0, %v7773_v17  ;;  %9023 = vmatprep.mubr.msk.f32.mxu1 %vm900_vm1, %v7728_v15  ;;  %v7730_v17 = vld [vmem:[%s14835_s0 + $0xe0] sm:$0xff]  ;;  %v7732_v15 = vld [vmem:[%s14835_s0 + $0x128] sm:$0xff] }
  0xea   :  { %9042 = vmatmul.mubr.msk.f32.vlgmr.msra.gmra.mxu0 %vm900_vm1, %v7751_v1  ;;  %9058 = vmatprep.subr.mxu1 %v7772_v9  ;;  %v7755_v1 = vld [vmem:[%s14835_s0 + $0x150] sm:$0xff] }
  0xeb   :  { %9078 = vmatpush3.msk.msra.mxu0 %vm931_vm0, %v7792_v3  ;;  %9044 = vmatprep.mubr.msk.f32.mxu0 %vm900_vm1, %v7752_v21  ;;  %v7771_v3 = vld [vmem:[%s14836_s1 + $0x78] sm:$0xff] }
  0xec   :  { %9024 = vmatmul.mubr.msk.f32.gmra.mxu1 %vm900_vm1, %v7729_v13  ;;  %9079 = vmatprep.subr.mxu0 %v7791_v5  ;;  %v7756_v21 = vld [vmem:[%s14835_s0 + $0x158] sm:$0xff]  ;;  %v7733_v13 = vld [vmem:[%s14835_s0 + $0x130] sm:$0xff] }
  0xed   :  { %9026 = vmatprep.mubr.msk.f32.mxu1 %vm900_vm1, %v7730_v17  ;;  %9059 = vmatpush3.msra.mxu1 %v7772_v9  ;;  %v7811_v9 = vld [vmem:[%s14836_s1 + $0xb8] sm:$0x3] }
  0xee   :  { %9045 = vmatmul.mubr.msk.f32.gmra.mxu0 %vm900_vm1, %v7753_v43  ;;  %9060 = vmatprep.subr.mxu1 %v7771_v3  ;;  %v7757_v43 = vld [vmem:[%s14835_s0 + $0x160] sm:$0xff]  ;;  %v7734_v17 = vld [vmem:[%s14835_s0 + $0x138] sm:$0xff] }
  0xef   :  { %9047 = vmatprep.mubr.msk.f32.mxu0 %vm900_vm1, %v7754_v19  ;;  %9080 = vmatpush3.msra.mxu0 %v7791_v5  ;;  %v7835_v5 = vld [vmem:[%s14836_s1 + $0xd0] sm:$0x3]  ;;  %v7758_v19 = vld [vmem:[%s14835_s0 + $0x168] sm:$0xff] }
  0xf0   :  { %9027 = vmatmul.mubr.msk.f32.gmra.mxu1 %vm900_vm1, %v7731_v31  ;;  %9081 = vmatprep.subr.mxu0 %v7790_v55 }
  0xf1   :  { %9029 = vmatprep.mubr.msk.f32.mxu1 %vm900_vm1, %v7732_v15  ;;  %9061 = vmatpush3.msra.mxu1 %v7771_v3  ;;  %v7759_v3 = vld [vmem:[%s14835_s0 + $0x170] sm:$0xff] }
  0xf2   :  { %9048 = vmatmul.mubr.msk.f32.gmra.mxu0 %vm900_vm1, %v7755_v1  ;;  %9098 = vmatprep.subr.msk.mxu1 %vm931_vm0, %v7811_v9  ;;  %v7735_v1 = vld [vmem:[%s14835_s0 + $0x140] sm:$0xff] }
  0xf3   :  { %9050 = vmatprep.mubr.msk.f32.mxu0 %vm900_vm1, %v7756_v21  ;;  %9082 = vmatpush3.msra.mxu0 %v7790_v55  ;;  %v1854_v55 = vld [vmem:[%s14835_s0 + $0x5] sm:$0xff]  ;;  %v1855_v21 = vld [vmem:[%s14835_s0 + $0xd] sm:$0xff] }
  0xf4   :  { %9030 = vmatmul.mubr.msk.f32.gmra.mxu1 %vm900_vm1, %v7733_v13  ;;  %9119 = vmatprep.subr.msk.mxu0 %vm931_vm0, %v7835_v5 }
  0xf5   :  { %9032 = vmatprep.mubr.msk.f32.mxu1 %vm900_vm1, %v7734_v17 }
  0xf6   :  { %9051 = vmatmul.mubr.msk.f32.gmra.mxu0 %vm900_vm1, %v7757_v43  ;;  %v1856_v43 = vld [vmem:[%s14835_s0 + $0x15] sm:$0xff] }
  0xf7   :  { %9053 = vmatprep.mubr.msk.f32.mxu0 %vm900_vm1, %v7758_v19  ;;  %v7810_v19 = vld [vmem:[%s14836_s1 + $0xb0] sm:$0xff] }
  0xf8   :  { %9033 = vmatmul.mubr.msk.f32.gmra.mxu1 %vm900_vm1, %v7735_v1 }
  0xf9   :  { %9062 = vmatprep.mubr.msk.f32.mxu1 %vm900_vm1, %v7731_v31  ;;  %v7834_v31 = vld [vmem:[%s14836_s1 + $0xc8] sm:$0xff] }
  0xfa   :  { %9054 = vmatmul.mubr.msk.f32.gmra.mxu0 %vm900_vm1, %v7759_v3  ;;  %v1858_v3 = vld [vmem:[%s14835_s0 + $0x25] sm:$0xff] }
  0xfb   :  { %9083 = vmatprep.mubr.msk.f32.mxu0 %vm900_vm1, %v1854_v55  ;;  %v7775_v55 = vld [vmem:[%s14835_s0 + $0xc9] sm:$0xff] }
  0xfc   :  { %9063 = vmatmul.mubr.msk.f32.vlgmr.msra.gmra.mxu1 %vm900_vm1, %v7732_v15  ;;  %v1857_v15 = vld [vmem:[%s14835_s0 + $0x1d] sm:$0xff] }
  0xfd   :  { %9099 = vmatpush3.msk.msra.mxu1 %vm931_vm0, %v7811_v9  ;;  %9065 = vmatprep.mubr.msk.f32.mxu1 %vm900_vm1, %v7733_v13  ;;  %v7809_v9 = vld [vmem:[%s14836_s1 + $0xa8] sm:$0xff] }
  0xfe   :  { %9084 = vmatmul.mubr.msk.f32.vlgmr.msra.gmra.mxu0 %vm900_vm1, %v1855_v21  ;;  %9100 = vmatprep.subr.mxu1 %v7810_v19  ;;  %v7774_v13 = vld [vmem:[%s14835_s0 + $0xc1] sm:$0xff]  ;;  %v7776_v21 = vld [vmem:[%s14835_s0 + $0xd1] sm:$0xff] }
  0xff   :  { %9120 = vmatpush3.msk.msra.mxu0 %vm931_vm0, %v7835_v5  ;;  %9086 = vmatprep.mubr.msk.f32.mxu0 %vm900_vm1, %v1856_v43  ;;  %v7833_v5 = vld [vmem:[%s14836_s1 + $0xc0] sm:$0xff]  ;;  %v7795_v43 = vld [vmem:[%s14835_s0 + $0x75] sm:$0xff] }
 0x100   :  { %9066 = vmatmul.mubr.msk.f32.gmra.mxu1 %vm900_vm1, %v7734_v17  ;;  %9121 = vmatprep.subr.mxu0 %v7834_v31  ;;  %v7793_v17 = vld [vmem:[%s14835_s0 + $0x65] sm:$0xff] }
 0x101   :  { %9068 = vmatprep.mubr.msk.f32.mxu1 %vm900_vm1, %v7735_v1  ;;  %9101 = vmatpush3.msra.mxu1 %v7810_v19  ;;  %v7794_v1 = vld [vmem:[%s14835_s0 + $0x6d] sm:$0xff]  ;;  %v7777_v19 = vld [vmem:[%s14835_s0 + $0xd9] sm:$0xff] }
 0x102   :  { %9087 = vmatmul.mubr.msk.f32.gmra.mxu0 %vm900_vm1, %v1857_v15  ;;  %9102 = vmatprep.subr.mxu1 %v7809_v9  ;;  %v7778_v15 = vld [vmem:[%s14835_s0 + $0xe1] sm:$0xff] }
 0x103   :  { %9089 = vmatprep.mubr.msk.f32.mxu0 %vm900_vm1, %v1858_v3  ;;  %9122 = vmatpush3.msra.mxu0 %v7834_v31  ;;  %v7796_v31 = vld [vmem:[%s14835_s0 + $0x7d] sm:$0xff]  ;;  %v7797_v3 = vld [vmem:[%s14835_s0 + $0x85] sm:$0xff] }
 0x104   :  { %9069 = vmatmul.mubr.msk.f32.gmra.mxu1 %vm900_vm1, %v7774_v13  ;;  %9123 = vmatprep.subr.mxu0 %v7833_v5  ;;  %v7813_v13 = vld [vmem:[%s14835_s0 + $0x3d] sm:$0xff] }
 0x105   :  { %9071 = vmatprep.mubr.msk.f32.mxu1 %vm900_vm1, %v7775_v55  ;;  %9103 = vmatpush3.msra.mxu1 %v7809_v9  ;;  %v7812_v9 = vld [vmem:[%s14835_s0 + $0x35] sm:$0xff]  ;;  %v7815_v55 = vld [vmem:[%s14835_s0 + $0x4d] sm:$0xff] }
 0x106   :  { %9090 = vmatmul.mubr.msk.f32.gmra.mxu0 %vm900_vm1, %v7793_v17 }
 0x107   :  { %9092 = vmatprep.mubr.msk.f32.mxu0 %vm900_vm1, %v7794_v1  ;;  %9124 = vmatpush3.msra.mxu0 %v7833_v5  ;;  %v7814_v5 = vld [vmem:[%s14835_s0 + $0x45] sm:$0xff] }
 0x108   :  { %9072 = vmatmul.mubr.msk.f32.gmra.mxu1 %vm900_vm1, %v7776_v21  ;;  %v2198_v21 = vld [vmem:[%s14835_s0 + $0x6] sm:$0xff] }
 0x109   :  { %9074 = vmatprep.mubr.msk.f32.mxu1 %vm900_vm1, %v7777_v19  ;;  %v2199_v19 = vld [vmem:[%s14835_s0 + $0xe] sm:$0xff] }
 0x10a   :  { %9093 = vmatmul.mubr.msk.f32.gmra.mxu0 %vm900_vm1, %v7795_v43 }
 0x10b   :  { %9095 = vmatprep.mubr.msk.f32.mxu0 %vm900_vm1, %v7796_v31 }
 0x10c   :  { %9075 = vmatmul.mubr.msk.f32.gmra.mxu1 %vm900_vm1, %v7778_v15  ;;  %v2200_v15 = vld [vmem:[%s14835_s0 + $0x16] sm:$0xff] }
 0x10d   :  { %9104 = vmatprep.mubr.msk.f32.mxu1 %vm900_vm1, %v7812_v9  ;;  %v2201_v9 = vld [vmem:[%s14835_s0 + $0x1e] sm:$0xff] }
 0x10e   :  { %9096 = vmatmul.mubr.msk.f32.gmra.mxu0 %vm900_vm1, %v7797_v3 }
 0x10f   :  { %9125 = vmatprep.mubr.msk.f32.mxu0 %vm900_vm1, %v7793_v17  ;;  %v7816_v17 = vld [vmem:[%s14835_s0 + $0x55] sm:$0xff] }
 0x110   :  { %9105 = vmatmul.mubr.msk.f32.vlgmr.msra.gmra.mxu1 %vm900_vm1, %v7813_v13  ;;  %v7821_v13 = vld [vmem:[%s14835_s0 + $0xb5] sm:$0xff] }
 0x111   :  { %9107 = vmatprep.mubr.msk.f32.mxu1 %vm900_vm1, %v7814_v5  ;;  %v2202_v5 = vld [vmem:[%s14835_s0 + $0x26] sm:$0xff] }
 0x112   :  { %9126 = vmatmul.mubr.msk.f32.vlgmr.msra.gmra.mxu0 %vm900_vm1, %v7794_v1  ;;  %v7817_v1 = vld [vmem:[%s14835_s0 + $0x95] sm:$0xff] }
 0x113   :  { %9128 = vmatprep.mubr.msk.f32.mxu0 %vm900_vm1, %v7795_v43  ;;  %v7818_v43 = vld [vmem:[%s14835_s0 + $0x9d] sm:$0xff] }
 0x114   :  { %9108 = vmatmul.mubr.msk.f32.gmra.mxu1 %vm900_vm1, %v7815_v55  ;;  %v15182_v55 = vmov 0.0  }
 0x115   :  { %9110 = vmatprep.mubr.msk.f32.mxu1 %vm900_vm1, %v7816_v17  ;;  %9140 = vmatprep.subr.mxu1 %v15182_v55  ;;  %849 = vst [vmem:[#allocation2] sm:$0xff] %v15182_v55  ;;  %850 = vst [vmem:[#allocation2 + $0x8] sm:$0xff] %v15182_v55  ;;  %v7863_v17 = vld [vmem:[%s14838_s3 + $0xf8] sm:$0xff] }
 0x116   :  { %9129 = vmatmul.mubr.msk.f32.gmra.mxu0 %vm900_vm1, %v7796_v31  ;;  %v7819_v31 = vld [vmem:[%s14835_s0 + $0xa5] sm:$0xff]  ;;  %851 = vst [vmem:[#allocation2 + $0x10] sm:$0xff] %v15182_v55  ;;  %852 = vst [vmem:[#allocation2 + $0x18] sm:$0x3] %v15182_v55  ;;  %9181 = vmatprep.subr.mxu0 %v15182_v55 }
 0x117   :  { %9131 = vmatprep.mubr.msk.f32.mxu0 %vm900_vm1, %v7797_v3  ;;  %v7820_v3 = vld [vmem:[%s14835_s0 + $0xad] sm:$0xff]  ;;  %853 = vst [vmem:[#allocation2 + $0x20] sm:$0xff] %v15182_v55  ;;  %854 = vst [vmem:[#allocation2 + $0x28] sm:$0xff] %v15182_v55  ;;  %9141 = vmatpush3.msra.mxu1 %v7863_v17  ;;  %v7856_v17 = vld [vmem:[%s14838_s3 + $0xc0] sm:$0xff] }
 0x118   :  { %9111 = vmatmul.mubr.msk.f32.gmra.mxu1 %vm900_vm1, %v7817_v1  ;;  %855 = vst [vmem:[#allocation2 + $0x30] sm:$0xff] %v15182_v55  ;;  %856 = vst [vmem:[#allocation2 + $0x38] sm:$0x3] %v15182_v55  ;;  %9142 = vmatprep.subr.mxu1 %v15182_v55  ;;  %v7862_v1 = vld [vmem:[%s14838_s3 + $0xf0] sm:$0xff] }
 0x119   :  { %9113 = vmatprep.mubr.msk.f32.mxu1 %vm900_vm1, %v7818_v43  ;;  %857 = vst [vmem:[#allocation2 + $0x40] sm:$0xff] %v15182_v55  ;;  %858 = vst [vmem:[#allocation2 + $0x48] sm:$0xff] %v15182_v55  ;;  %9143 = vmatpush3.msra.mxu1 %v7862_v1  ;;  %v7860_v43 = vld [vmem:[%s14838_s3 + $0xe0] sm:$0xff]  ;;  %v2412_v1 = vld [vmem:[%s14838_s3 + $0x58] sm:$0xff] }
 0x11a   :  { %9132 = vmatmul.mubr.msk.f32.gmra.mxu0 %vm900_vm1, %v2198_v21  ;;  %859 = vst [vmem:[#allocation2 + $0x50] sm:$0xff] %v15182_v55  ;;  %861 = vst [vmem:[#allocation2 + $0x60] sm:$0xff] %v15182_v55  ;;  %9144 = vmatprep.subr.mxu1 %v15182_v55  ;;  %v7861_v21 = vld [vmem:[%s14838_s3 + $0xe8] sm:$0xff] }
 0x11b   :  { %9134 = vmatprep.mubr.msk.f32.mxu0 %vm900_vm1, %v2199_v19  ;;  %862 = vst [vmem:[#allocation2 + $0x68] sm:$0xff] %v15182_v55  ;;  %863 = vst [vmem:[#allocation2 + $0x70] sm:$0xff] %v15182_v55  ;;  %9145 = vmatpush3.msra.mxu1 %v7861_v21  ;;  %v2416_v19 = vld [vmem:[%s14838_s3 + $0x78] sm:$0xff] }
 0x11c   :  { %9114 = vmatmul.mubr.msk.f32.gmra.mxu1 %vm900_vm1, %v7819_v31  ;;  %865 = vst [vmem:[#allocation3] sm:$0xff] %v15182_v55  ;;  %866 = vst [vmem:[#allocation3 + $0x8] sm:$0xff] %v15182_v55  ;;  %9146 = vmatprep.subr.mxu1 %v15182_v55  ;;  %v7859_v31 = vld [vmem:[%s14838_s3 + $0xd8] sm:$0xff] }
 0x11d   :  { %9116 = vmatprep.mubr.msk.f32.mxu1 %vm900_vm1, %v7820_v3  ;;  %867 = vst [vmem:[#allocation3 + $0x10] sm:$0xff] %v15182_v55  ;;  %868 = vst [vmem:[#allocation3 + $0x18] sm:$0xff] %v15182_v55  ;;  %9147 = vmatpush3.msra.mxu1 %v7860_v43  ;;  %v7858_v3 = vld [vmem:[%s14838_s3 + $0xd0] sm:$0xff]  ;;  %v7855_v21 = vld [vmem:[%s14838_s3 + $0xb8] sm:$0xff] }
 0x11e   :  { %9135 = vmatmul.mubr.msk.f32.gmra.mxu0 %vm900_vm1, %v2200_v15  ;;  %869 = vst [vmem:[#allocation3 + $0x20] sm:$0x3f] %v15182_v55  ;;  %9148 = vmatprep.subr.mxu1 %v15182_v55  ;;  %v2415_v15 = vld [vmem:[%s14838_s3 + $0x70] sm:$0xff] }
 0x11f   :  { %9137 = vmatprep.mubr.msk.f32.mxu0 %vm900_vm1, %v2201_v9  ;;  %9182 = vmatpush3.msra.mxu0 %v2416_v19  ;;  %v2414_v9 = vld [vmem:[%s14838_s3 + $0x68] sm:$0xff]  ;;  %v2411_v43 = vld [vmem:[%s14838_s3 + $0x50] sm:$0xff] }
 0x120   :  { %9117 = vmatmul.mubr.msk.f32.gmra.mxu1 %vm900_vm1, %v7821_v13  ;;  %9183 = vmatprep.subr.mxu0 %v15182_v55  ;;  %v7857_v13 = vld [vmem:[%s14838_s3 + $0xc8] sm:$0xff]  ;;  %v7854_v19 = vld [vmem:[%s14838_s3 + $0xb0] sm:$0xff] }
 0x121   :  { %9149 = vmatpush3.msra.mxu1 %v7859_v31  ;;  %9184 = vmatpush3.msra.mxu0 %v2415_v15  ;;  %v2410_v31 = vld [vmem:[%s14838_s3 + $0x48] sm:$0xff] }
 0x122   :  { %9138 = vmatmul.mubr.msk.f32.gmra.mxu0 %vm900_vm1, %v2202_v5  ;;  %9150 = vmatprep.subr.mxu1 %v15182_v55  ;;  %v2413_v5 = vld [vmem:[%s14838_s3 + $0x60] sm:$0xff]  ;;  %v7853_v15 = vld [vmem:[%s14838_s3 + $0xa8] sm:$0xff]  ;;  %vm4342_vm1 = vcmask 647424  }
 0x123   :  { %9185 = vmatprep.subr.mxu0 %v15182_v55  ;;  %9151 = vmatpush3.msra.mxu1 %v7858_v3  ;;  %v2409_v3 = vld [vmem:[%s14838_s3 + $0x40] sm:$0xff] }
 0x124   :  { %9186 = vmatpush3.msra.mxu0 %v2414_v9  ;;  %9152 = vmatprep.subr.mxu1 %v15182_v55  ;;  %v7852_v9 = vld [vmem:[%s14838_s3 + $0xa0] sm:$0xff] }
 0x125   :  { %9187 = vmatprep.subr.mxu0 %v15182_v55  ;;  %9153 = vmatpush3.msra.mxu1 %v7857_v13  ;;  %v2408_v13 = vld [vmem:[%s14838_s3 + $0x38] sm:$0xff] }
 0x126   :  { %9188 = vmatpush3.msra.mxu0 %v2413_v5  ;;  %9154 = vmatprep.subr.mxu1 %v15182_v55  ;;  %v7851_v5 = vld [vmem:[%s14838_s3 + $0x98] sm:$0xff] }
 0x127   :  { %9189 = vmatprep.subr.mxu0 %v15182_v55  ;;  %9155 = vmatpush3.msra.mxu1 %v7856_v17  ;;  %v2407_v17 = vld [vmem:[%s14838_s3 + $0x30] sm:$0xff] }
 0x128   :  { %9190 = vmatpush3.msra.mxu0 %v2412_v1  ;;  %9156 = vmatprep.subr.mxu1 %v15182_v55  ;;  %v7850_v1 = vld [vmem:[%s14838_s3 + $0x90] sm:$0xff] }
 0x129   :  { %9191 = vmatprep.subr.mxu0 %v15182_v55  ;;  %9157 = vmatpush3.msra.mxu1 %v7855_v21  ;;  %v2406_v21 = vld [vmem:[%s14838_s3 + $0x28] sm:$0xff] }
 0x12a   :  { %9192 = vmatpush3.msra.mxu0 %v2411_v43  ;;  %9158 = vmatprep.subr.mxu1 %v15182_v55  ;;  %v7849_v43 = vld [vmem:[%s14838_s3 + $0x88] sm:$0xff] }
 0x12b   :  { %9193 = vmatprep.subr.mxu0 %v15182_v55  ;;  %9159 = vmatpush3.msra.mxu1 %v7854_v19  ;;  %v2405_v19 = vld [vmem:[%s14838_s3 + $0x20] sm:$0xff] }
 0x12c   :  { %9194 = vmatpush3.msra.mxu0 %v2410_v31  ;;  %9160 = vmatprep.subr.mxu1 %v15182_v55  ;;  %v7848_v31 = vld [vmem:[%s14838_s3 + $0x80] sm:$0xff] }
 0x12d   :  { %9195 = vmatprep.subr.mxu0 %v15182_v55  ;;  %9161 = vmatpush3.msra.mxu1 %v7853_v15  ;;  %v2404_v15 = vld [vmem:[%s14838_s3 + $0x18] sm:$0xff] }
 0x12e   :  { %9196 = vmatpush3.msra.mxu0 %v2409_v3  ;;  %9162 = vmatprep.subr.mxu1 %v15182_v55  ;;  %v2403_v3 = vld [vmem:[%s14838_s3 + $0x10] sm:$0xff] }
 0x12f   :  { %9197 = vmatprep.subr.mxu0 %v15182_v55  ;;  %9163 = vmatpush3.msra.mxu1 %v7852_v9  ;;  %v2402_v9 = vld [vmem:[%s14838_s3 + $0x8] sm:$0xff] }
 0x130   :  { %9198 = vmatpush3.msra.mxu0 %v2408_v13  ;;  %9164 = vmatprep.subr.mxu1 %v15182_v55  ;;  %v2401_v13 = vld [vmem:[%s14838_s3] sm:$0xff] }
 0x131   :  { %9199 = vmatprep.subr.mxu0 %v15182_v55  ;;  %9165 = vmatpush3.msra.mxu1 %v7851_v5 }
 0x132   :  { %9200 = vmatpush3.msra.mxu0 %v2407_v17  ;;  %9166 = vmatprep.subr.mxu1 %v15182_v55 }
 0x133   :  { %9201 = vmatprep.subr.mxu0 %v15182_v55  ;;  %9167 = vmatpush3.msra.mxu1 %v7850_v1 }
 0x134   :  { %9202 = vmatpush3.msra.mxu0 %v2406_v21  ;;  %9168 = vmatprep.subr.mxu1 %v15182_v55 }
 0x135   :  { %9203 = vmatprep.subr.mxu0 %v15182_v55  ;;  %9169 = vmatpush3.msra.mxu1 %v7849_v43 }
 0x136   :  { %9204 = vmatpush3.msra.mxu0 %v2405_v19  ;;  %9170 = vmatprep.subr.mxu1 %v15182_v55 }
 0x137   :  { %9205 = vmatprep.subr.mxu0 %v15182_v55  ;;  %9171 = vmatpush3.msra.mxu1 %v7848_v31 }
 0x138   :  { %9206 = vmatpush3.msra.mxu0 %v2404_v15  ;;  %9172 = vmatprep.mubr.msk.f32.mxu1 %vm9947_vm2, %v15182_v55 }
 0x139   :  { %9207 = vmatprep.subr.mxu0 %v15182_v55  ;;  %9222 = vmatprep.subr.mxu1 %v15182_v55 }
 0x13a   :  { %9208 = vmatpush3.msra.mxu0 %v2403_v3  ;;  %9213 = vmatprep.mubr.msk.f32.mxu0 %vm9947_vm2, %v15182_v55 }
 0x13b   :  { %9209 = vmatprep.subr.mxu0 %v15182_v55 }
 0x13c   :  { %9210 = vmatpush3.msra.mxu0 %v2402_v9 }
 0x13d   :  { %9211 = vmatprep.subr.mxu0 %v15182_v55 }
 0x13e   :  { %9212 = vmatpush3.msra.mxu0 %v2401_v13 }
 0x13f   :  { %9263 = vmatprep.subr.mxu0 %v15182_v55 }
 0x188   :  { %v12512_v5 = vpop.f32.mrf.mxu1 }
 0x18a   :  { %v12514_v17 = vpop.f32.mrf.mxu1 }
 0x18c   :  { %v8959_v1 = vpop.f32.mrf.mxu0  ;;  %v12516_v21 = vpop.f32.mrf.mxu1 }
 0x18e   :  { %v1001_v43 = vpop.f32.mrf.mxu0  ;;  %v12518_v19 = vpop.f32.mrf.mxu1 }
 0x190   :  { %v8962_v31 = vpop.f32.mrf.mxu0  ;;  %v12520_v15 = vpop.f32.mrf.mxu1 }
 0x192   :  { %v1011_v3 = vpop.f32.mrf.mxu0  ;;  %v12522_v9 = vpop.f32.mrf.mxu1 }
 0x194   :  { %v8980_v25 = vpop.f32.mrf.mxu1 }
 0x195   :  { %v9001_v13 = vpop.f32.mrf.mxu0  ;;  %v1155_v38 = vadd.f32 %v8980_v25, %v8959_v1 }
 0x196   :  { %v1149_v29 = vpop.f32.mrf.mxu1 }
 0x197   :  { %v1291_v55 = vpop.f32.mrf.mxu0  ;;  %v1150_v46 = vadd.f32 %v1149_v29, %v1001_v43  ;;  %v1341_v52 = vadd.f32 %v9001_v13, %v1155_v38 }
 0x198   :  { %v8983_v11 = vpop.f32.mrf.mxu1 }
 0x199   :  { %v9004_v51 = vpop.f32.mrf.mxu0  ;;  %v1165_v62 = vadd.f32 %v8983_v11, %v8962_v31  ;;  %v1340_v60 = vadd.f32 %v1291_v55, %v1150_v46 }
 0x19a   :  { %v1159_v33 = vpop.f32.mrf.mxu1 }
 0x19b   :  { %v1301_v37 = vpop.f32.mrf.mxu0 }
 0x19c   :  { %v8986_v39 = vpop.f32.mrf.mxu1 }
 0x19e   :  { %v9007_v2 = vpop.f32.mrf.mxu0  ;;  %v1169_v41 = vpop.f32.mrf.mxu1 }
 0x19f   :  { %v1170_v29 = vadd.f32 %v1169_v41, %v12514_v17 }
 0x1a0   :  { %v12524_v45 = vpop.f32.mrf.mxu0  ;;  %v8989_v10 = vpop.f32.mrf.mxu1 }
 0x1a2   :  { %v12526_v18 = vpop.f32.mrf.mxu0  ;;  %v1179_v49 = vpop.f32.mrf.mxu1 }
 0x1a4   :  { %v12528_v53 = vpop.f32.mrf.mxu0  ;;  %v12530_v26 = vpop.f32.mrf.mxu1 }
 0x1a6   :  { %v12532_v34 = vpop.f32.mrf.mxu0  ;;  %v12534_v57 = vpop.f32.mrf.mxu1 }
 0x1a8   :  { %v12536_v61 = vpop.f32.mrf.mxu0  ;;  %v9022_v42 = vpop.f32.mrf.mxu1 }
 0x1aa   :  { %v9043_v50 = vpop.f32.mrf.mxu0  ;;  %v1465_v58 = vpop.f32.mrf.mxu1 }
 0x1ab   :  { %v1514_v25 = vadd.f32 %v1465_v58, %v1340_v60  ;;  %v1180_v58 = vadd.f32 %v1179_v49, %v12518_v19 }
 0x1ac   :  { %v1639_v7 = vpop.f32.mrf.mxu0  ;;  %v9025_v0 = vpop.f32.mrf.mxu1 }
 0x1ae   :  { %v9046_v4 = vpop.f32.mrf.mxu0  ;;  %v1475_v35 = vpop.f32.mrf.mxu1 }
 0x1b0   :  { %v1649_v59 = vpop.f32.mrf.mxu0  ;;  %v9028_v8 = vpop.f32.mrf.mxu1 }
 0x1b2   :  { %v12538_v12 = vpop.f32.mrf.mxu0  ;;  %v1485_v47 = vpop.f32.mrf.mxu1 }
 0x1b4   :  { %v12540_v27 = vpop.f32.mrf.mxu0  ;;  %v9031_v16 = vpop.f32.mrf.mxu1 }
 0x1b6   :  { %v12542_v20 = vpop.f32.mrf.mxu0  ;;  %v12544_v63 = vpop.f32.mrf.mxu1 }
 0x1b7   :  { %15618 = vst [vmem:[#allocation399_spill] sm:$0xff] %v12542_v20  ;;  %v1343_v20 = vadd.f32 %v9004_v51, %v1165_v62  ;;  %v1344_v51 = vadd.f32 %v12524_v45, %v1170_v29 }
 0x1b8   :  { %v12546_v6 = vpop.f32.mrf.mxu0  ;;  %v12548_v24 = vpop.f32.mrf.mxu1 }
 0x1b9   :  { %15619 = vst [vmem:[#allocation400_spill] sm:$0xff] %v12546_v6  ;;  %15620 = vst [vmem:[#allocation401_spill] sm:$0xff] %v12548_v24  ;;  %v1515_v6 = vadd.f32 %v9022_v42, %v1341_v52  ;;  %v1517_v31 = vadd.f32 %v9025_v0, %v1343_v20  ;;  %v1688_v52 = vadd.f32 %v1639_v7, %v1514_v25 }
 0x1ba   :  { %v12550_v28 = vpop.f32.mrf.mxu0  ;;  %v12552_v14 = vpop.f32.mrf.mxu1  ;;  %v1195_v7 = vadd.f32 %v12530_v26, %v12520_v15 }
 0x1bb   :  { %15621 = vst [vmem:[#allocation402_spill] sm:$0xff] %v12550_v28  ;;  %15622 = vst [vmem:[#allocation403_spill] sm:$0xff] %v12552_v14  ;;  %v1160_v28 = vadd.f32 %v1159_v33, %v1011_v3  ;;  %v1689_v11 = vadd.f32 %v9043_v50, %v1515_v6  ;;  %v1185_v33 = vadd.f32 %v8989_v10, %v12516_v21 }
 0x1bc   :  { %v12554_v22 = vpop.f32.mrf.mxu0  ;;  %v9064_v32 = vpop.f32.mrf.mxu1  ;;  %v1691_v6 = vadd.f32 %v9046_v4, %v1517_v31  ;;  %v1518_v10 = vadd.f32 %v1485_v47, %v1344_v51  ;;  %v1190_v4 = vadd.f32 %v12534_v57, %v12522_v9  ;;  %v1349_v62 = vadd.f32 %v12532_v34, %v1195_v7 }
 0x1bd   :  { %15623 = vst [vmem:[#allocation404_spill] sm:$0xff] %v12554_v22  ;;  %v1175_v22 = vadd.f32 %v8986_v39, %v12512_v5  ;;  %v1342_v38 = vadd.f32 %v1301_v37, %v1160_v28  ;;  %v1841_v39 = vadd.f32 %v9064_v32, %v1689_v11 }
 0x1be   :  { %v9085_v36 = vpop.f32.mrf.mxu0  ;;  %v1791_v30 = vpop.f32.mrf.mxu1  ;;  %v15624_v21 = vld [vmem:[#allocation399_spill] sm:$0xff] }
 0x1bf   :  { %v1345_v46 = vadd.f32 %v9007_v2, %v1175_v22  ;;  %v1516_v55 = vadd.f32 %v1475_v35, %v1342_v38  ;;  %v1840_v0 = vadd.f32 %v1791_v30, %v1688_v52  ;;  %v1347_v2 = vadd.f32 %v12526_v18, %v1185_v33 }
 0x1c0   :  { %v1963_v40 = vpop.f32.mrf.mxu0  ;;  %v9067_v44 = vpop.f32.mrf.mxu1  ;;  %v2013_v32 = vadd.f32 %v9085_v36, %v1841_v39  ;;  %v1692_v36 = vadd.f32 %v12540_v27, %v1518_v10  ;;  %v15625_v34 = vld [vmem:[#allocation401_spill] sm:$0xff]  ;;  %v15626_v38 = vld [vmem:[#allocation400_spill] sm:$0xff] }
 0x1c1   :  { %v1519_v41 = vadd.f32 %v9028_v8, %v1345_v46  ;;  %v1690_v28 = vadd.f32 %v1649_v59, %v1516_v55  ;;  %v1843_v35 = vadd.f32 %v9067_v44, %v1691_v6  ;;  %v1346_v8 = vadd.f32 %v12528_v53, %v1180_v58  ;;  %v12592_v53 = vld [vmem:[%s14837_s2] ss:$0 sm:$0xff] }
 0x1c2   :  { %v9088_v54 = vpop.f32.mrf.mxu0  ;;  %v1801_v48 = vpop.f32.mrf.mxu1  ;;  %v1521_v45 = vadd.f32 %v9031_v16, %v1347_v2  ;;  %v2012_v49 = vadd.f32 %v1963_v40, %v1840_v0  ;;  %v1523_v15 = vadd.f32 %v15625_v34, %v1349_v62  ;;  %v15627_v11 = vld [vmem:[#allocation403_spill] sm:$0xff] }
 0x1c3   :  { %v1693_v30 = vadd.f32 %v12538_v12, %v1519_v41  ;;  %v1842_v50 = vadd.f32 %v1801_v48, %v1690_v28  ;;  %v1520_v44 = vadd.f32 %v12544_v63, %v1346_v8  ;;  %v2015_v12 = vadd.f32 %v9088_v54, %v1843_v35 }
 0x1c4   :  { %v12556_v23 = vpop.f32.mrf.mxu0  ;;  %v9070_v56 = vpop.f32.mrf.mxu1  ;;  %v1348_v48 = vadd.f32 %v12536_v61, %v1190_v4  ;;  %v1695_v19 = vadd.f32 %v15624_v21, %v1521_v45  ;;  %v15629_v28 = vld [vmem:[#allocation404_spill] sm:$0xff] }
 0x1c5   :  { %v1845_v59 = vadd.f32 %v9070_v56, %v1693_v30  ;;  %v2014_v56 = vadd.f32 %v12556_v23, %v1842_v50  ;;  %v1694_v54 = vadd.f32 %v15626_v38, %v1520_v44  ;;  %v15628_v23 = vld [vmem:[#allocation402_spill] sm:$0xff]  ;;  %v15630_v38 = vmov 0.0  }
 0x1c6   :  { %v12558_v14 = vpop.f32.mrf.mxu0  ;;  %v1811_v24 = vpop.f32.mrf.mxu1  ;;  %v1522_v31 = vadd.f32 %v15627_v11, %v1348_v48  ;;  %v1697_v58 = vadd.f32 %v15628_v23, %v1523_v15  ;;  %v7875_v23 = vld [vmem:[%s14838_s3 + $0x158] sm:$0xff] }
 0x1c7   :  { %v1844_v27 = vadd.f32 %v1811_v24, %v1692_v36  ;;  %v2017_v46 = vadd.f32 %v12558_v14, %v1845_v59 }
 0x1c8   :  { %v12561_v1 = vpop.f32.mrf.mxu0  ;;  %v9073_v43 = vpop.f32.mrf.mxu1 }
 0x1c9   :  { %v1847_v61 = vadd.f32 %v9073_v43, %v1695_v19  ;;  %v2016_v41 = vadd.f32 %v12561_v1, %v1844_v27 }
 0x1ca   :  { %v12564_v13 = vpop.f32.mrf.mxu0  ;;  %v1821_v42 = vpop.f32.mrf.mxu1 }
 0x1cb   :  { %v1846_v6 = vadd.f32 %v1821_v42, %v1694_v54  ;;  %v2019_v35 = vadd.f32 %v12564_v13, %v1847_v61 }
 0x1cc   :  { %v12567_v5 = vpop.f32.mrf.mxu0  ;;  %v12571_v60 = vpop.f32.mrf.mxu1 }
 0x1cd   :  { %v1849_v8 = vadd.f32 %v12571_v60, %v1697_v58 }
 0x1ce   :  { %v12573_v20 = vpop.f32.mrf.mxu0  ;;  %v12578_v22 = vpop.f32.mrf.mxu1 }
 0x1cf   :  { %v2021_v44 = vadd.f32 %v12573_v20, %v1849_v8  ;;  %v7879_v20 = vld [vmem:[%s14838_s3 + $0x178] sm:$0xff]  ;;  %v7889_v8 = vld [vmem:[%s14838_s3 + $0x1c8] sm:$0xff] }
 0x1d0   :  { %v12580_v37 = vpop.f32.mrf.mxu0  ;;  %v9106_v18 = vpop.f32.mrf.mxu1 }
 0x1d1   :  { %v2185_v26 = vadd.f32 %v9106_v18, %v2013_v32  ;;  %v1696_v32 = vadd.f32 %v15629_v28, %v1522_v31  ;;  %v7871_v28 = vld [vmem:[%s14838_s3 + $0x138] sm:$0xff] }
 0x1d2   :  { %v9127_v47 = vpop.f32.mrf.mxu0  ;;  %v2135_v57 = vpop.f32.mrf.mxu1 }
 0x1d3   :  { %v2337_v16 = vadd.f32 %v9127_v47, %v2185_v26  ;;  %v2184_v17 = vadd.f32 %v2135_v57, %v2012_v49  ;;  %v2018_v49 = vadd.f32 %v12567_v5, %v1846_v6  ;;  %v1848_v50 = vadd.f32 %v12578_v22, %v1696_v32  ;;  %v7874_v6 = vld [vmem:[%s14838_s3 + $0x150] sm:$0xff] }
 0x1d4   :  { %v2287_v40 = vpop.f32.mrf.mxu0  ;;  %v9109_v3 = vpop.f32.mrf.mxu1  ;;  %v7890_v32 = vld [vmem:[%s14838_s3 + $0x1d0] sm:$0xff] }
 0x1d5   :  { %v2354_v63 = vadd.f32 %v12592_v53, %v2337_v16  ;;  %v2336_v9 = vadd.f32 %v2287_v40, %v2184_v17  ;;  %v2187_v25 = vadd.f32 %v9109_v3, %v2015_v12  ;;  %v2020_v17 = vadd.f32 %v12580_v37, %v1848_v50  ;;  %v7885_v50 = vld [vmem:[%s14838_s3 + $0x1a8] sm:$0xff] }
 0x1d6   :  { %v9130_v29 = vpop.f32.mrf.mxu0  ;;  %v2145_v33 = vpop.f32.mrf.mxu1 }
 0x1d7   :  { %v2364_v52 = vmax.f32 %v2354_v63, 0.0  ;;  %v2353_v55 = vadd.f32 %v12592_v53, %v2336_v9  ;;  %v2186_v24 = vadd.f32 %v2145_v33, %v2014_v56  ;;  %v2339_v39 = vadd.f32 %v9130_v29, %v2187_v25  ;;  %v7878_v29 = vld [vmem:[%s14838_s3 + $0x170] sm:$0xff] }
 0x1d8   :  { %v2297_v51 = vpop.f32.mrf.mxu0  ;;  %v9112_v0 = vpop.f32.mrf.mxu1 }
 0x1d9   :  { %2379 = vst [vmem:[#allocation2 + $0x28] sm:$0x1] %v2364_v52  ;;  %2384 = vst [vmem:[#allocation2 + $0x23] sm:$0x80] %v2364_v52  ;;  %v2363_v2 = vmax.f32 %v2353_v55, 0.0  ;;  %v2356_v14 = vadd.f32 %v12592_v53, %v2339_v39  ;;  %v2189_v43 = vadd.f32 %v9112_v0, %v2017_v46  ;;  %v2338_v7 = vadd.f32 %v2297_v51, %v2186_v24  ;;  %v7877_v46 = vld [vmem:[%s14838_s3 + $0x168] sm:$0xff] }
 0x1da   :  { %2382 = vst [vmem:[#allocation2 + $0x63] sm:$0x3c] %v2364_v52  ;;  %v9133_v10 = vpop.f32.mrf.mxu0  ;;  %v2155_v4 = vpop.f32.mrf.mxu1  ;;  %v7876_v55 = vld [vmem:[%s14838_s3 + $0x160] sm:$0xff]  ;;  %v7895_v24 = vld [vmem:[%s14838_s3 + $0x1f8] sm:$0xff] }
 0x1db   :  { %2374 = vst [vmem:[#allocation2 + $0x60] ss:$-60 sps:$4 sm:$0xef] %v2363_v2   ;;  %v2366_v1 = vmax.f32 %v2356_v14, 0.0  ;;  %v2355_v42 = vadd.f32 %v12592_v53, %v2338_v7  ;;  %v2188_v30 = vadd.f32 %v2155_v4, %v2016_v41  ;;  %v2341_v45 = vadd.f32 %v9133_v10, %v2189_v43  ;;  %v7893_v41 = vld [vmem:[%s14838_s3 + $0x1e8] sm:$0xff]  ;;  %v7892_v14 = vld [vmem:[%s14838_s3 + $0x1e0] sm:$0xff] }
 0x1dc   :  { %v2307_v18 = vpop.f32.mrf.mxu0  ;;  %v9115_v26 = vpop.f32.mrf.mxu1  ;;  %v7873_v2 = vld [vmem:[%s14838_s3 + $0x148] sm:$0xff]  ;;  %v7872_v43 = vld [vmem:[%s14838_s3 + $0x140] sm:$0xff]  ;;  %v7891_v7 = vld [vmem:[%s14838_s3 + $0x1d8] sm:$0xff] }
 0x1dd   :  { %2390 = vst [vmem:[#allocation2 + $0x2e] sm:$0x1e] %v2366_v1  ;;  %2392 = vst [vmem:[#allocation2 + $0x69] sm:$0xc0] %v2366_v1  ;;  %v2365_v47 = vmax.f32 %v2355_v42, 0.0  ;;  %v2358_v13 = vadd.f32 %v12592_v53, %v2341_v45  ;;  %v2191_v62 = vadd.f32 %v9115_v26, %v2019_v35  ;;  %v2340_v60 = vadd.f32 %v2307_v18, %v2188_v30  ;;  %v7870_v35 = vld [vmem:[%s14838_s3 + $0x130] sm:$0xff] }
 0x1de   :  { %v9136_v36 = vpop.f32.mrf.mxu0  ;;  %v2165_v59 = vpop.f32.mrf.mxu1  ;;  %v7869_v4 = vld [vmem:[%s14838_s3 + $0x128] sm:$0xff]  ;;  %v7888_v1 = vld [vmem:[%s14838_s3 + $0x1c0] sm:$0xff]  ;;  %v7887_v30 = vld [vmem:[%s14838_s3 + $0x1b8] sm:$0xff] }
 0x1df   :  { %2385 = vst [vmem:[#allocation2 + $0x2b] sm:$0x7] %v2365_v47  ;;  %2388 = vst [vmem:[#allocation2 + $0x66] sm:$0xf0] %v2365_v47  ;;  %v2368_v57 = vmax.f32 %v2358_v13, 0.0  ;;  %v2357_v12 = vadd.f32 %v12592_v53, %v2340_v60  ;;  %v2190_v5 = vadd.f32 %v2165_v59, %v2018_v49  ;;  %v2343_v16 = vadd.f32 %v9136_v36, %v2191_v62  ;;  %v7868_v42 = vld [vmem:[%s14838_s3 + $0x120] sm:$0xff] }
 0x1e0   :  { %v2317_v22 = vpop.f32.mrf.mxu0  ;;  %v9118_v40 = vpop.f32.mrf.mxu1  ;;  %v7867_v45 = vld [vmem:[%s14838_s3 + $0x118] sm:$0xff]  ;;  %v7886_v18 = vld [vmem:[%s14838_s3 + $0x1b0] sm:$0xff]  ;;  %v7865_v26 = vld [vmem:[%s14838_s3 + $0x108] sm:$0xff] }
 0x1e1   :  { %2376 = vst [vmem:[#allocation2 + $0x41] ss:$-60 sps:$4 sm:$0xef] %v2368_v57   ;;  %v2367_v48 = vmax.f32 %v2357_v12, 0.0  ;;  %v2360_v21 = vadd.f32 %v12592_v53, %v2343_v16  ;;  %v2193_v19 = vadd.f32 %v9118_v40, %v2021_v44  ;;  %v2342_v34 = vadd.f32 %v2317_v22, %v2190_v5  ;;  %v7866_v49 = vld [vmem:[%s14838_s3 + $0x110] sm:$0xff]  ;;  %v7884_v47 = vld [vmem:[%s14838_s3 + $0x1a0] sm:$0xff] }
 0x1e2   :  { %v9139_v15 = vpop.f32.mrf.mxu0  ;;  %v2175_v27 = vpop.f32.mrf.mxu1  ;;  %v2417_v3 = vld [vmem:[#allocation2 + $0x20] sm:$0xff]  ;;  %v7883_v62 = vld [vmem:[%s14838_s3 + $0x198] sm:$0xff]  ;;  %v7882_v60 = vld [vmem:[%s14838_s3 + $0x190] sm:$0xff] }
 0x1e3   :  { %2393 = vst [vmem:[#allocation2 + $0x71] sm:$0x3] %v2367_v48  ;;  %2396 = vst [vmem:[#allocation2 + $0x31] sm:$0x78] %v2367_v48  ;;  %v2370_v56 = vmax.f32 %v2360_v21, 0.0  ;;  %v2359_v63 = vadd.f32 %v12592_v53, %v2342_v34  ;;  %v2192_v37 = vadd.f32 %v2175_v27, %v2020_v17  ;;  %v2345_v9 = vadd.f32 %v9139_v15, %v2193_v19  ;;  %v7864_v13 = vld [vmem:[%s14838_s3 + $0x100] sm:$0xff] }
 0x1e4   :  { %9173 = vmatmul.mubr.f32.vlgmr.msra.gmra.mxu1 %v2417_v3  ;;  %v2327_v25 = vpop.f32.mrf.mxu0  ;;  %v2419_v58 = vld [vmem:[#allocation2 + $0x30] sm:$0xf]  ;;  %v7911_v44 = vld [vmem:[%s14838_s3 + $0x278] sm:$0xff]  ;;  %v7881_v59 = vld [vmem:[%s14838_s3 + $0x188] sm:$0xff] }
 0x1e5   :  { %9223 = vmatpush3.msra.mxu1 %v7879_v20  ;;  %9175 = vmatprep.mubr.msk.f32.mxu1 %vm9947_vm2, %v15630_v38  ;;  %2387 = vst [vmem:[#allocation2 + $0xc] sm:$0x7] %v2370_v56  ;;  %2389 = vst [vmem:[#allocation2 + $0x47] sm:$0xf0] %v2370_v56  ;;  %v2369_v54 = vmax.f32 %v2359_v63, 0.0  ;;  %v2362_v11 = vadd.f32 %v12592_v53, %v2345_v9  ;;  %v2344_v31 = vadd.f32 %v2327_v25, %v2192_v37  ;;  %v7910_v57 = vld [vmem:[%s14838_s3 + $0x270] sm:$0xff] }
 0x1e6   :  { %9224 = vmatprep.subr.mxu1 %v15630_v38  ;;  %v2418_v61 = vld [vmem:[#allocation2 + $0x28] sm:$0xff]  ;;  %v7880_v12 = vld [vmem:[%s14838_s3 + $0x180] sm:$0xff]  ;;  %v7927_v40 = vld [vmem:[%s14838_s3 + $0x2f8] sm:$0xff] }
 0x1e7   :  { %9225 = vmatpush3.msra.mxu1 %v7878_v29  ;;  %2381 = vst [vmem:[#allocation2 + $0x9] sm:$0x1] %v2369_v54  ;;  %2383 = vst [vmem:[#allocation2 + $0x44] sm:$0x3c] %v2369_v54  ;;  %v2372_v33 = vmax.f32 %v2362_v11, 0.0  ;;  %v2361_v52 = vadd.f32 %v12592_v53, %v2344_v31  ;;  %v7894_v53 = vld [vmem:[%s14838_s3 + $0x1f0] sm:$0xff] }
 0x1e8   :  { %2386 = vst [vmem:[#allocation2 + $0x4] sm:$0x80] %v2369_v54  ;;  %9226 = vmatprep.subr.mxu1 %v15630_v38  ;;  %9176 = vmatmul.mubr.f32.gmra.mxu1 %v2418_v61  ;;  %v2398_v39 = vld [vmem:[#allocation2] sm:$0xff]  ;;  %v7909_v16 = vld [vmem:[%s14838_s3 + $0x268] sm:$0xff]  ;;  %v7907_v21 = vld [vmem:[%s14838_s3 + $0x258] sm:$0xff] }
 0x1e9   :  { %9227 = vmatpush3.msra.mxu1 %v7877_v46  ;;  %9178 = vmatprep.mubr.msk.f32.mxu1 %vm9947_vm2, %v15630_v38  ;;  %2395 = vst [vmem:[#allocation2 + $0x52] sm:$0x3] %v2372_v33  ;;  %2397 = vst [vmem:[#allocation2 + $0x12] sm:$0x78] %v2372_v33  ;;  %v2371_v51 = vmax.f32 %v2361_v52, 0.0  ;;  %v2597_v36 = vld [vmem:[#allocation2 + $0x1] sm:$0xff] }
 0x1ea   :  { %9228 = vmatprep.subr.mxu1 %v15630_v38  ;;  %9214 = vmatmul.mubr.f32.vlgmr.msra.gmra.mxu0 %v2398_v39  ;;  %v7908_v17 = vld [vmem:[%s14838_s3 + $0x260] sm:$0xff]  ;;  %v7926_v19 = vld [vmem:[%s14838_s3 + $0x2f0] sm:$0xff]  ;;  %v7925_v20 = vld [vmem:[%s14838_s3 + $0x2e8] sm:$0xff] }
 0x1eb   :  { %9229 = vmatpush3.msra.mxu1 %v7876_v55  ;;  %9264 = vmatpush3.msra.mxu0 %v7895_v24  ;;  %2391 = vst [vmem:[#allocation2 + $0xf] sm:$0x1e] %v2371_v51  ;;  %2394 = vst [vmem:[#allocation2 + $0x4a] sm:$0xc0] %v2371_v51  ;;  %v7906_v34 = vld [vmem:[%s14838_s3 + $0x250] sm:$0xff]  ;;  %v7905_v27 = vld [vmem:[%s14838_s3 + $0x248] sm:$0xff] }
 0x1ec   :  { %9230 = vmatprep.subr.mxu1 %v15630_v38  ;;  %9265 = vmatprep.subr.mxu0 %v15630_v38  ;;  %v7924_v3 = vld [vmem:[%s14838_s3 + $0x2e0] sm:$0xff]  ;;  %v7923_v37 = vld [vmem:[%s14838_s3 + $0x2d8] sm:$0xff]  ;;  %v7922_v25 = vld [vmem:[%s14838_s3 + $0x2d0] sm:$0xff] }
 0x1ed   :  { %9179 = vmatmul.mubr.f32.gmra.mxu1 %v2419_v58  ;;  %9266 = vmatpush3.msra.mxu0 %v7894_v53  ;;  %v7904_v56 = vld [vmem:[%s14838_s3 + $0x240] sm:$0xff]  ;;  %v7903_v9 = vld [vmem:[%s14838_s3 + $0x238] sm:$0xff]  ;;  %v7902_v29 = vld [vmem:[%s14838_s3 + $0x230] sm:$0xff] }
 0x1ee   :  { %9231 = vmatpush3.msra.mxu1 %v7875_v23  ;;  %9267 = vmatprep.subr.mxu0 %v15630_v38  ;;  %v2700_v22 = vld [vmem:[#allocation2 + $0x40] sm:$0xff]  ;;  %v2701_v15 = vld [vmem:[#allocation2 + $0x48] sm:$0xff]  ;;  %v7919_v61 = vld [vmem:[%s14838_s3 + $0x2b8] sm:$0xff] }
 0x1ef   :  { %9232 = vmatprep.subr.mxu1 %v15630_v38  ;;  %9268 = vmatpush3.msra.mxu0 %v7893_v41  ;;  %v2399_v0 = vld [vmem:[#allocation2 + $0x8] sm:$0xff]  ;;  %v7920_v31 = vld [vmem:[%s14838_s3 + $0x2c0] sm:$0xff]  ;;  %v7899_v33 = vld [vmem:[%s14838_s3 + $0x218] sm:$0xff] }
 0x1f0   :  { %9233 = vmatpush3.msra.mxu1 %v7874_v6  ;;  %9216 = vmatprep.mubr.msk.f32.mxu0 %vm9947_vm2, %v15630_v38  ;;  %v7921_v54 = vld [vmem:[%s14838_s3 + $0x2c8] sm:$0xff]  ;;  %v7900_v46 = vld [vmem:[%s14838_s3 + $0x220] sm:$0xff]  ;;  %v7918_v52 = vld [vmem:[%s14838_s3 + $0x2b0] sm:$0xff] }
 0x1f1   :  { %9234 = vmatprep.subr.mxu1 %v15630_v38  ;;  %9269 = vmatprep.subr.mxu0 %v15630_v38  ;;  %v7901_v11 = vld [vmem:[%s14838_s3 + $0x228] sm:$0xff]  ;;  %v7898_v55 = vld [vmem:[%s14838_s3 + $0x210] sm:$0xff]  ;;  %v12864_v39 = vld [vmem:[#allocation3] sm:$0xff] }
 0x1f2   :  { %9217 = vmatmul.mubr.f32.gmra.mxu0 %v2399_v0  ;;  %9235 = vmatpush3.msra.mxu1 %v7873_v2  ;;  %v2400_v10 = vld [vmem:[#allocation2 + $0x10] sm:$0xf]  ;;  %v7917_v24 = vld [vmem:[%s14838_s3 + $0x2a8] sm:$0xff]  ;;  %v7896_v53 = vld [vmem:[%s14838_s3 + $0x200] sm:$0xff] }
 0x1f3   :  { %9270 = vmatpush3.msra.mxu0 %v7892_v14  ;;  %9236 = vmatprep.subr.mxu1 %v15630_v38  ;;  %v2598_v5 = vld [vmem:[#allocation2 + $0x9] sm:$0xff]  ;;  %v2599_v48 = vld [vmem:[#allocation2 + $0x11] sm:$0xf]  ;;  %v7915_v23 = vld [vmem:[%s14838_s3 + $0x298] sm:$0xff] }
 0x1f4   :  { %9271 = vmatprep.subr.mxu0 %v15630_v38  ;;  %9237 = vmatpush3.msra.mxu1 %v7872_v43  ;;  %v2702_v63 = vld [vmem:[#allocation2 + $0x50] sm:$0xf]  ;;  %v7897_v51 = vld [vmem:[%s14838_s3 + $0x208] sm:$0xff]  ;;  %v2803_v41 = vld [vmem:[#allocation2 + $0x60] sm:$0xff] }
 0x1f5   :  { %9272 = vmatpush3.msra.mxu0 %v7891_v7  ;;  %9219 = vmatprep.mubr.msk.f32.mxu0 %vm9947_vm2, %v15630_v38  ;;  %v7914_v58 = vld [vmem:[%s14838_s3 + $0x290] sm:$0xff]  ;;  %v7943_v6 = vld [vmem:[%s14838_s3 + $0x378] sm:$0xff]  ;;  %v7913_v0 = vld [vmem:[%s14838_s3 + $0x288] sm:$0xff] }
 0x1f6   :  { %9238 = vmatprep.subr.mxu1 %v15630_v38  ;;  %9273 = vmatprep.subr.mxu0 %v15630_v38  ;;  %v7942_v2 = vld [vmem:[%s14838_s3 + $0x370] sm:$0xff]  ;;  %v7912_v14 = vld [vmem:[%s14838_s3 + $0x280] sm:$0xff]  ;;  %v2804_v43 = vld [vmem:[#allocation2 + $0x68] sm:$0xff] }
 0x1f7   :  { %9220 = vmatmul.mubr.f32.gmra.mxu0 %v2400_v10  ;;  %9239 = vmatpush3.msra.mxu1 %v7871_v28  ;;  %v7941_v7 = vld [vmem:[%s14838_s3 + $0x368] sm:$0xff]  ;;  %v7940_v28 = vld [vmem:[%s14838_s3 + $0x360] sm:$0xff] }
 0x1f8   :  { %9274 = vmatpush3.msra.mxu0 %v7890_v32  ;;  %9240 = vmatprep.subr.mxu1 %v15630_v38  ;;  %v2906_v10 = vld [vmem:[#allocation2 + $0x41] sm:$0xff]  ;;  %v7959_v32 = vld [vmem:[%s14838_s3 + $0x3f8] sm:$0xff] }
 0x1f9   :  { %9275 = vmatprep.subr.mxu0 %v15630_v38  ;;  %9241 = vmatpush3.msra.mxu1 %v7870_v35  ;;  %v2805_v35 = vld [vmem:[#allocation2 + $0x70] sm:$0xf] }
 0x1fa   :  { %9276 = vmatpush3.msra.mxu0 %v7889_v8  ;;  %9242 = vmatprep.subr.mxu1 %v15630_v38  ;;  %v7939_v8 = vld [vmem:[%s14838_s3 + $0x358] sm:$0xff] }
 0x1fb   :  { %9277 = vmatprep.subr.mxu0 %v15630_v38  ;;  %9243 = vmatpush3.msra.mxu1 %v7869_v4  ;;  %v7958_v4 = vld [vmem:[%s14838_s3 + $0x3f0] sm:$0xff] }
 0x1fc   :  { %9278 = vmatpush3.msra.mxu0 %v7888_v1  ;;  %9244 = vmatprep.subr.mxu1 %v15630_v38  ;;  %v7938_v1 = vld [vmem:[%s14838_s3 + $0x350] sm:$0xff] }
 0x1fd   :  { %9279 = vmatprep.subr.mxu0 %v15630_v38  ;;  %9245 = vmatpush3.msra.mxu1 %v7868_v42  ;;  %v2907_v42 = vld [vmem:[#allocation2 + $0x49] sm:$0xff] }
 0x1fe   :  { %9280 = vmatpush3.msra.mxu0 %v7887_v30  ;;  %9246 = vmatprep.subr.mxu1 %v15630_v38  ;;  %v7957_v30 = vld [vmem:[%s14838_s3 + $0x3e8] sm:$0xff] }
 0x1ff   :  { %9281 = vmatprep.subr.mxu0 %v15630_v38  ;;  %9247 = vmatpush3.msra.mxu1 %v7867_v45  ;;  %v7937_v45 = vld [vmem:[%s14838_s3 + $0x348] sm:$0xff] }
 0x200   :  { %9282 = vmatpush3.msra.mxu0 %v7886_v18  ;;  %9248 = vmatprep.subr.mxu1 %v15630_v38  ;;  %v7956_v18 = vld [vmem:[%s14838_s3 + $0x3e0] sm:$0xff] }
 0x201   :  { %9283 = vmatprep.subr.mxu0 %v15630_v38  ;;  %9249 = vmatpush3.msra.mxu1 %v7866_v49  ;;  %v7936_v49 = vld [vmem:[%s14838_s3 + $0x340] sm:$0xff] }
 0x202   :  { %9284 = vmatpush3.msra.mxu0 %v7885_v50  ;;  %9250 = vmatprep.subr.mxu1 %v15630_v38  ;;  %v2908_v50 = vld [vmem:[#allocation2 + $0x51] sm:$0xf] }
 0x203   :  { %9285 = vmatprep.subr.mxu0 %v15630_v38  ;;  %9251 = vmatpush3.msra.mxu1 %v7865_v26  ;;  %v7955_v26 = vld [vmem:[%s14838_s3 + $0x3d8] sm:$0xff] }
 0x204   :  { %9286 = vmatpush3.msra.mxu0 %v7884_v47  ;;  %9252 = vmatprep.subr.mxu1 %v15630_v38  ;;  %v7935_v47 = vld [vmem:[%s14838_s3 + $0x338] sm:$0xff] }
 0x205   :  { %9287 = vmatprep.subr.mxu0 %v15630_v38  ;;  %9253 = vmatpush3.msra.mxu1 %v7864_v13  ;;  %v7954_v13 = vld [vmem:[%s14838_s3 + $0x3d0] sm:$0xff] }
 0x206   :  { %9254 = vmatprep.mubr.msk.f32.mxu1 %vm9947_vm2, %v15630_v38  ;;  %9288 = vmatpush3.msra.mxu0 %v7883_v62  ;;  %v7934_v62 = vld [vmem:[%s14838_s3 + $0x330] sm:$0xff] }
 0x207   :  { %9255 = vmatmul.mubr.f32.vlgmr.msra.gmra.mxu1 %v2597_v36  ;;  %9289 = vmatprep.subr.mxu0 %v15630_v38  ;;  %v7933_v36 = vld [vmem:[%s14838_s3 + $0x328] sm:$0xff] }
 0x208   :  { %9304 = vmatprep.subr.mxu1 %v15630_v38  ;;  %9290 = vmatpush3.msra.mxu0 %v7882_v60  ;;  %v7953_v60 = vld [vmem:[%s14838_s3 + $0x3c8] sm:$0xff] }
 0x209   :  { %9305 = vmatpush3.msra.mxu1 %v7911_v44  ;;  %9291 = vmatprep.subr.mxu0 %v15630_v38  ;;  %v7952_v44 = vld [vmem:[%s14838_s3 + $0x3c0] sm:$0xff] }
 0x20a   :  { %9306 = vmatprep.subr.mxu1 %v15630_v38  ;;  %9257 = vmatprep.mubr.msk.f32.mxu1 %vm9947_vm2, %v15630_v38 }
 0x20b   :  { %9292 = vmatpush3.msra.mxu0 %v7881_v59  ;;  %9307 = vmatpush3.msra.mxu1 %v7910_v57  ;;  %v7932_v59 = vld [vmem:[%s14838_s3 + $0x320] sm:$0xff]  ;;  %v7951_v57 = vld [vmem:[%s14838_s3 + $0x3b8] sm:$0xff] }
 0x20c   :  { %9258 = vmatmul.mubr.f32.gmra.mxu1 %v2598_v5  ;;  %9293 = vmatprep.subr.mxu0 %v15630_v38  ;;  %v7950_v5 = vld [vmem:[%s14838_s3 + $0x3b0] sm:$0xff] }
 0x20d   :  { %9308 = vmatprep.subr.mxu1 %v15630_v38  ;;  %9294 = vmatpush3.msra.mxu0 %v7880_v12  ;;  %v7931_v12 = vld [vmem:[%s14838_s3 + $0x318] sm:$0xff] }
 0x20e   :  { %9295 = vmatprep.mubr.msk.f32.mxu0 %vm9947_vm2, %v15630_v38  ;;  %9309 = vmatpush3.msra.mxu1 %v7909_v16  ;;  %v7930_v16 = vld [vmem:[%s14838_s3 + $0x310] sm:$0xff] }
 0x20f   :  { %9296 = vmatmul.mubr.f32.vlgmr.msra.gmra.mxu0 %v2700_v22  ;;  %9310 = vmatprep.subr.mxu1 %v15630_v38  ;;  %v7949_v22 = vld [vmem:[%s14838_s3 + $0x3a8] sm:$0xff] }
 0x210   :  { %9345 = vmatprep.subr.mxu0 %v15630_v38  ;;  %9260 = vmatprep.mubr.msk.f32.mxu1 %vm9947_vm2, %v15630_v38 }
 0x211   :  { %9311 = vmatpush3.msra.mxu1 %v7908_v17  ;;  %9346 = vmatpush3.msra.mxu0 %v7927_v40  ;;  %v7929_v17 = vld [vmem:[%s14838_s3 + $0x308] sm:$0xff]  ;;  %v7948_v40 = vld [vmem:[%s14838_s3 + $0x3a0] sm:$0xff] }
 0x212   :  { %9261 = vmatmul.mubr.f32.gmra.mxu1 %v2599_v48  ;;  %9312 = vmatprep.subr.mxu1 %v15630_v38  ;;  %v7928_v48 = vld [vmem:[%s14838_s3 + $0x300] sm:$0xff] }
 0x213   :  { %9347 = vmatprep.subr.mxu0 %v15630_v38  ;;  %9298 = vmatprep.mubr.msk.f32.mxu0 %vm9947_vm2, %v15630_v38 }
 0x214   :  { %9313 = vmatpush3.msra.mxu1 %v7907_v21  ;;  %9348 = vmatpush3.msra.mxu0 %v7926_v19  ;;  %v7947_v21 = vld [vmem:[%s14838_s3 + $0x398] sm:$0xff]  ;;  %v7946_v19 = vld [vmem:[%s14838_s3 + $0x390] sm:$0xff] }
 0x215   :  { %9299 = vmatmul.mubr.f32.gmra.mxu0 %v2701_v15  ;;  %9314 = vmatprep.subr.mxu1 %v15630_v38  ;;  %v7975_v15 = vld [vmem:[%s14838_s3 + $0x478] sm:$0xff] }
 0x216   :  { %9349 = vmatprep.subr.mxu0 %v15630_v38  ;;  %9315 = vmatpush3.msra.mxu1 %v7906_v34  ;;  %v3009_v34 = vld [vmem:[#allocation2 + $0x5] sm:$0xff] }
 0x217   :  { %9350 = vmatpush3.msra.mxu0 %v7925_v20  ;;  %9316 = vmatprep.subr.mxu1 %v15630_v38  ;;  %v7945_v20 = vld [vmem:[%s14838_s3 + $0x388] sm:$0xff] }
 0x218   :  { %9351 = vmatprep.subr.mxu0 %v15630_v38  ;;  %9301 = vmatprep.mubr.msk.f32.mxu0 %vm9947_vm2, %v15630_v38 }
 0x219   :  { %9317 = vmatpush3.msra.mxu1 %v7905_v27  ;;  %9352 = vmatpush3.msra.mxu0 %v7924_v3  ;;  %v7974_v27 = vld [vmem:[%s14838_s3 + $0x470] sm:$0xff]  ;;  %v7944_v3 = vld [vmem:[%s14838_s3 + $0x380] sm:$0xff] }
 0x21a   :  { %9302 = vmatmul.mubr.f32.gmra.mxu0 %v2702_v63  ;;  %9318 = vmatprep.subr.mxu1 %v15630_v38  ;;  %v7973_v63 = vld [vmem:[%s14838_s3 + $0x468] sm:$0xff] }
 0x21b   :  { %9353 = vmatprep.subr.mxu0 %v15630_v38  ;;  %9319 = vmatpush3.msra.mxu1 %v7904_v56  ;;  %v3010_v56 = vld [vmem:[#allocation2 + $0xd] sm:$0xff] }
 0x21c   :  { %9354 = vmatpush3.msra.mxu0 %v7923_v37  ;;  %9320 = vmatprep.subr.mxu1 %v15630_v38  ;;  %v7972_v37 = vld [vmem:[%s14838_s3 + $0x460] sm:$0xff] }
 0x21d   :  { %9355 = vmatprep.subr.mxu0 %v15630_v38  ;;  %9321 = vmatpush3.msra.mxu1 %v7903_v9  ;;  %v3112_v9 = vld [vmem:[#allocation2 + $0x25] sm:$0xff] }
 0x21e   :  { %9356 = vmatpush3.msra.mxu0 %v7922_v25  ;;  %9322 = vmatprep.subr.mxu1 %v15630_v38  ;;  %v7971_v25 = vld [vmem:[%s14838_s3 + $0x458] sm:$0xff] }
 0x21f   :  { %9357 = vmatprep.subr.mxu0 %v15630_v38  ;;  %9323 = vmatpush3.msra.mxu1 %v7902_v29  ;;  %v3011_v29 = vld [vmem:[#allocation2 + $0x15] sm:$0xf] }
 0x220   :  { %9358 = vmatpush3.msra.mxu0 %v7921_v54  ;;  %9324 = vmatprep.subr.mxu1 %v15630_v38  ;;  %v7970_v54 = vld [vmem:[%s14838_s3 + $0x450] sm:$0xff] }
 0x221   :  { %9359 = vmatprep.subr.mxu0 %v15630_v38  ;;  %9325 = vmatpush3.msra.mxu1 %v7901_v11  ;;  %v3113_v11 = vld [vmem:[#allocation2 + $0x2d] sm:$0xff] }
 0x222   :  { %9360 = vmatpush3.msra.mxu0 %v7920_v31  ;;  %9326 = vmatprep.subr.mxu1 %v15630_v38  ;;  %v7969_v31 = vld [vmem:[%s14838_s3 + $0x448] sm:$0xff] }
 0x223   :  { %9361 = vmatprep.subr.mxu0 %v15630_v38  ;;  %9327 = vmatpush3.msra.mxu1 %v7900_v46  ;;  %v7968_v46 = vld [vmem:[%s14838_s3 + $0x440] sm:$0xff] }
 0x224   :  { %9362 = vmatpush3.msra.mxu0 %v7919_v61  ;;  %9328 = vmatprep.subr.mxu1 %v15630_v38  ;;  %v3114_v61 = vld [vmem:[#allocation2 + $0x35] sm:$0xf] }
 0x225   :  { %9363 = vmatprep.subr.mxu0 %v15630_v38  ;;  %9329 = vmatpush3.msra.mxu1 %v7899_v33  ;;  %v7916_v38 = vld [vmem:[%s14838_s3 + $0x2a0] sm:$0xff]  ;;  %v7967_v33 = vld [vmem:[%s14838_s3 + $0x438] sm:$0xff] }
 0x226   :  { %9364 = vmatpush3.msra.mxu0 %v7918_v52  ;;  %9330 = vmatprep.subr.mxu1 %v12864_v39  ;;  %v7966_v52 = vld [vmem:[%s14838_s3 + $0x430] sm:$0xff] }
 0x227   :  { %9365 = vmatprep.subr.mxu0 %v12864_v39  ;;  %9331 = vmatpush3.msra.mxu1 %v7898_v55  ;;  %v7965_v55 = vld [vmem:[%s14838_s3 + $0x428] sm:$0xff] }
 0x228   :  { %9366 = vmatpush3.msra.mxu0 %v7917_v24  ;;  %9332 = vmatprep.subr.mxu1 %v12864_v39  ;;  %v7964_v24 = vld [vmem:[%s14838_s3 + $0x420] sm:$0xff] }
 0x229   :  { %9367 = vmatprep.subr.mxu0 %v12864_v39  ;;  %9333 = vmatpush3.msra.mxu1 %v7897_v51  ;;  %v7963_v51 = vld [vmem:[%s14838_s3 + $0x418] sm:$0xff] }
 0x22a   :  { %9368 = vmatpush3.msra.mxu0 %v7916_v38  ;;  %9334 = vmatprep.subr.mxu1 %v12864_v39  ;;  %v7962_v38 = vld [vmem:[%s14838_s3 + $0x410] sm:$0xff] }
 0x22b   :  { %9369 = vmatprep.subr.mxu0 %v12864_v39  ;;  %9335 = vmatpush3.msra.mxu1 %v7896_v53  ;;  %v7961_v53 = vld [vmem:[%s14838_s3 + $0x408] sm:$0xff] }
 0x22c   :  { %9336 = vmatprep.mubr.msk.f32.mxu1 %vm9947_vm2, %v12864_v39  ;;  %9370 = vmatpush3.msra.mxu0 %v7915_v23  ;;  %v7960_v23 = vld [vmem:[%s14838_s3 + $0x400] sm:$0xff] }
 0x22d   :  { %9337 = vmatmul.mubr.f32.vlgmr.msra.gmra.mxu1 %v2803_v41  ;;  %9371 = vmatprep.subr.mxu0 %v12864_v39  ;;  %v3216_v41 = vld [vmem:[#allocation2 + $0xe] sm:$0xff] }
 0x22e   :  { %9386 = vmatprep.subr.mxu1 %v12864_v39  ;;  %9372 = vmatpush3.msra.mxu0 %v7914_v58  ;;  %v3215_v58 = vld [vmem:[#allocation2 + $0x6] sm:$0xff] }
 0x22f   :  { %9387 = vmatpush3.msra.mxu1 %v7943_v6  ;;  %9373 = vmatprep.subr.mxu0 %v12864_v39  ;;  %v3217_v6 = vld [vmem:[#allocation2 + $0x16] sm:$0xf] }
 0x230   :  { %9388 = vmatprep.subr.mxu1 %v12864_v39  ;;  %9339 = vmatprep.mubr.msk.f32.mxu1 %vm9947_vm2, %v12864_v39 }
 0x231   :  { %9374 = vmatpush3.msra.mxu0 %v7913_v0  ;;  %9389 = vmatpush3.msra.mxu1 %v7942_v2  ;;  %v7992_v0 = vld [vmem:[%s14840_s5 + $0xf8] sm:$0xff] }
 0x232   :  { %9340 = vmatmul.mubr.f32.gmra.mxu1 %v2804_v43  ;;  %9375 = vmatprep.subr.mxu0 %v12864_v39  ;;  %v3355_v2 = vld [vmem:[%s14840_s5 + $0x78] sm:$0xff]  ;;  %v7991_v43 = vld [vmem:[%s14840_s5 + $0xf0] sm:$0xff] }
 0x233   :  { %9390 = vmatprep.subr.mxu1 %v12864_v39  ;;  %9376 = vmatpush3.msra.mxu0 %v7912_v14 }
 0x234   :  { %9377 = vmatprep.mubr.msk.f32.mxu0 %vm9947_vm2, %v12864_v39  ;;  %9391 = vmatpush3.msra.mxu1 %v7941_v7  ;;  %v3354_v7 = vld [vmem:[%s14840_s5 + $0x70] sm:$0xff] }
 0x235   :  { %9378 = vmatmul.mubr.f32.vlgmr.msra.gmra.mxu0 %v2906_v10  ;;  %9392 = vmatprep.subr.mxu1 %v12864_v39  ;;  %v7990_v10 = vld [vmem:[%s14840_s5 + $0xe8] sm:$0xff] }
 0x236   :  { %9427 = vmatprep.subr.mxu0 %v12864_v39  ;;  %9342 = vmatprep.mubr.msk.f32.mxu1 %vm9947_vm2, %v12864_v39 }
 0x237   :  { %9393 = vmatpush3.msra.mxu1 %v7940_v28  ;;  %9428 = vmatpush3.msra.mxu0 %v7959_v32  ;;  %v3353_v32 = vld [vmem:[%s14840_s5 + $0x68] sm:$0xff] }
 0x238   :  { %9343 = vmatmul.mubr.f32.gmra.mxu1 %v2805_v35  ;;  %9394 = vmatprep.subr.mxu1 %v12864_v39  ;;  %v7989_v35 = vld [vmem:[%s14840_s5 + $0xe0] sm:$0xff] }
 0x239   :  { %9429 = vmatprep.subr.mxu0 %v12864_v39  ;;  %9380 = vmatprep.mubr.msk.f32.mxu0 %vm9947_vm2, %v12864_v39 }
 0x23a   :  { %9395 = vmatpush3.msra.mxu1 %v7939_v8  ;;  %9430 = vmatpush3.msra.mxu0 %v7958_v4  ;;  %v3352_v8 = vld [vmem:[%s14840_s5 + $0x60] sm:$0xff] }
 0x23b   :  { %9381 = vmatmul.mubr.f32.gmra.mxu0 %v2907_v42  ;;  %9396 = vmatprep.subr.mxu1 %v12864_v39  ;;  %v3351_v42 = vld [vmem:[%s14840_s5 + $0x58] sm:$0xff] }
 0x23c   :  { %9431 = vmatprep.subr.mxu0 %v12864_v39  ;;  %9397 = vmatpush3.msra.mxu1 %v7938_v1  ;;  %v7988_v1 = vld [vmem:[%s14840_s5 + $0xd8] sm:$0xff] }
 0x23d   :  { %9432 = vmatpush3.msra.mxu0 %v7957_v30  ;;  %9398 = vmatprep.subr.mxu1 %v12864_v39 }
 0x23e   :  { %9433 = vmatprep.subr.mxu0 %v12864_v39  ;;  %9383 = vmatprep.mubr.msk.f32.mxu0 %vm9947_vm2, %v12864_v39 }
 0x23f   :  { %9399 = vmatpush3.msra.mxu1 %v7937_v45  ;;  %9434 = vmatpush3.msra.mxu0 %v7956_v18 }
 0x240   :  { %9384 = vmatmul.mubr.f32.gmra.mxu0 %v2908_v50  ;;  %9400 = vmatprep.subr.mxu1 %v12864_v39  ;;  %v3350_v50 = vld [vmem:[%s14840_s5 + $0x50] sm:$0xff] }
 0x241   :  { %9435 = vmatprep.subr.mxu0 %v12864_v39  ;;  %9401 = vmatpush3.msra.mxu1 %v7936_v49  ;;  %v7987_v49 = vld [vmem:[%s14840_s5 + $0xd0] sm:$0xff] }
 0x242   :  { %9436 = vmatpush3.msra.mxu0 %v7955_v26  ;;  %9402 = vmatprep.subr.mxu1 %v12864_v39 }
 0x243   :  { %9437 = vmatprep.subr.mxu0 %v12864_v39  ;;  %9403 = vmatpush3.msra.mxu1 %v7935_v47 }
 0x244   :  { %9438 = vmatpush3.msra.mxu0 %v7954_v13  ;;  %9404 = vmatprep.subr.mxu1 %v12864_v39  ;;  %v7986_v13 = vld [vmem:[%s14840_s5 + $0xc8] sm:$0xff] }
 0x245   :  { %9439 = vmatprep.subr.mxu0 %v12864_v39  ;;  %9405 = vmatpush3.msra.mxu1 %v7934_v62  ;;  %v3349_v62 = vld [vmem:[%s14840_s5 + $0x48] sm:$0xff] }
 0x246   :  { %9440 = vmatpush3.msra.mxu0 %v7953_v60  ;;  %9406 = vmatprep.subr.mxu1 %v12864_v39 }
 0x247   :  { %9441 = vmatprep.subr.mxu0 %v12864_v39  ;;  %9407 = vmatpush3.msra.mxu1 %v7933_v36  ;;  %v7985_v36 = vld [vmem:[%s14840_s5 + $0xc0] sm:$0xff] }
 0x248   :  { %9442 = vmatpush3.msra.mxu0 %v7952_v44  ;;  %9408 = vmatprep.subr.mxu1 %v12864_v39  ;;  %v3348_v44 = vld [vmem:[%s14840_s5 + $0x40] sm:$0xff] }
 0x249   :  { %9443 = vmatprep.subr.mxu0 %v12864_v39  ;;  %9409 = vmatpush3.msra.mxu1 %v7932_v59  ;;  %v7984_v59 = vld [vmem:[%s14840_s5 + $0xb8] sm:$0xff] }
 0x24a   :  { %9444 = vmatpush3.msra.mxu0 %v7951_v57  ;;  %9410 = vmatprep.subr.mxu1 %v12864_v39  ;;  %v3347_v57 = vld [vmem:[%s14840_s5 + $0x38] sm:$0xff] }
 0x24b   :  { %9445 = vmatprep.subr.mxu0 %v12864_v39  ;;  %9411 = vmatpush3.msra.mxu1 %v7931_v12 }
 0x24c   :  { %9446 = vmatpush3.msra.mxu0 %v7950_v5  ;;  %9412 = vmatprep.subr.mxu1 %v12864_v39 }
 0x24d   :  { %9447 = vmatprep.subr.mxu0 %v12864_v39  ;;  %9413 = vmatpush3.msra.mxu1 %v7930_v16 }
 0x24e   :  { %9448 = vmatpush3.msra.mxu0 %v7949_v22  ;;  %9414 = vmatprep.subr.mxu1 %v12864_v39  ;;  %v7983_v22 = vld [vmem:[%s14840_s5 + $0xb0] sm:$0xff] }
 0x24f   :  { %9449 = vmatprep.subr.mxu0 %v12864_v39  ;;  %9415 = vmatpush3.msra.mxu1 %v7929_v17  ;;  %v3346_v17 = vld [vmem:[%s14840_s5 + $0x30] sm:$0xff] }
 0x250   :  { %9450 = vmatpush3.msra.mxu0 %v7948_v40  ;;  %9416 = vmatprep.subr.mxu1 %v12864_v39 }
 0x251   :  { %9451 = vmatprep.subr.mxu0 %v12864_v39  ;;  %9417 = vmatpush3.msra.mxu1 %v7928_v48  ;;  %v7982_v48 = vld [vmem:[%s14840_s5 + $0xa8] sm:$0xff] }
 0x252   :  { %9418 = vmatprep.mubr.msk.f32.mxu1 %vm9947_vm2, %v12864_v39  ;;  %9452 = vmatpush3.msra.mxu0 %v7947_v21  ;;  %v3345_v21 = vld [vmem:[%s14840_s5 + $0x28] sm:$0xff] }
 0x253   :  { %9419 = vmatmul.mubr.f32.vlgmr.msra.gmra.mxu1 %v3009_v34  ;;  %9453 = vmatprep.subr.mxu0 %v12864_v39 }
 0x254   :  { %9468 = vmatprep.subr.mxu1 %v12864_v39  ;;  %9454 = vmatpush3.msra.mxu0 %v7946_v19 }
 0x255   :  { %9469 = vmatpush3.msra.mxu1 %v7975_v15  ;;  %9455 = vmatprep.subr.mxu0 %v12864_v39  ;;  %v7981_v15 = vld [vmem:[%s14840_s5 + $0xa0] sm:$0xff] }
 0x256   :  { %9470 = vmatprep.subr.mxu1 %v12864_v39  ;;  %9421 = vmatprep.mubr.msk.f32.mxu1 %vm9947_vm2, %v12864_v39 }
 0x257   :  { %9456 = vmatpush3.msra.mxu0 %v7945_v20  ;;  %9471 = vmatpush3.msra.mxu1 %v7974_v27  ;;  %v3344_v20 = vld [vmem:[%s14840_s5 + $0x20] sm:$0xff]  ;;  %v7980_v27 = vld [vmem:[%s14840_s5 + $0x98] sm:$0xff] }
 0x258   :  { %9422 = vmatmul.mubr.f32.gmra.mxu1 %v3010_v56  ;;  %9457 = vmatprep.subr.mxu0 %v12864_v39  ;;  %v7979_v56 = vld [vmem:[%s14840_s5 + $0x90] sm:$0xff] }
 0x259   :  { %9472 = vmatprep.subr.mxu1 %v12864_v39  ;;  %9458 = vmatpush3.msra.mxu0 %v7944_v3  ;;  %v3343_v3 = vld [vmem:[%s14840_s5 + $0x18] sm:$0xff] }
 0x25a   :  { %9459 = vmatprep.mubr.msk.f32.mxu0 %vm9947_vm2, %v12864_v39  ;;  %9473 = vmatpush3.msra.mxu1 %v7973_v63  ;;  %v3342_v63 = vld [vmem:[%s14840_s5 + $0x10] sm:$0xff] }
 0x25b   :  { %9460 = vmatmul.mubr.f32.vlgmr.msra.gmra.mxu0 %v3112_v9  ;;  %9474 = vmatprep.subr.mxu1 %v12864_v39  ;;  %v3341_v9 = vld [vmem:[%s14840_s5 + $0x8] sm:$0xff] }
 0x25c   :  { %9424 = vmatprep.mubr.msk.f32.mxu1 %vm9947_vm2, %v12864_v39  ;;  %9475 = vmatpush3.msra.mxu1 %v7972_v37  ;;  %v7978_v37 = vld [vmem:[%s14840_s5 + $0x88] sm:$0xff] }
 0x25d   :  { %9425 = vmatmul.mubr.f32.gmra.mxu1 %v3011_v29  ;;  %9476 = vmatprep.subr.mxu1 %v12864_v39  ;;  %v3340_v29 = vld [vmem:[%s14840_s5] sm:$0xff] }
 0x25e   :  { %9462 = vmatprep.mubr.msk.f32.mxu0 %vm9947_vm2, %v12864_v39  ;;  %9477 = vmatpush3.msra.mxu1 %v7971_v25  ;;  %v7977_v25 = vld [vmem:[%s14840_s5 + $0x80] sm:$0xff] }
 0x25f   :  { %9463 = vmatmul.mubr.f32.gmra.mxu0 %v3113_v11  ;;  %9478 = vmatprep.subr.mxu1 %v12864_v39 }
 0x260   :  { %9479 = vmatpush3.msra.mxu1 %v7970_v54  ;;  %9465 = vmatprep.mubr.msk.f32.mxu0 %vm9947_vm2, %v12864_v39 }
 0x261   :  { %9480 = vmatprep.subr.mxu1 %v12864_v39  ;;  %9500 = vmatprep.mubr.msk.f32.mxu1 %vm9947_vm2, %v12864_v39 }
 0x262   :  { %9481 = vmatpush3.msra.mxu1 %v7969_v31  ;;  %9509 = vmatprep.subr.mxu0 %v12864_v39 }
 0x263   :  { %9466 = vmatmul.mubr.f32.gmra.mxu0 %v3114_v61  ;;  %9482 = vmatprep.subr.mxu1 %v12864_v39 }
 0x264   :  { %9483 = vmatpush3.msra.mxu1 %v7968_v46  ;;  %9541 = vmatprep.mubr.msk.f32.mxu0 %vm9947_vm2, %v12864_v39 }
 0x265   :  { %9484 = vmatprep.subr.mxu1 %v12864_v39  ;;  %9510 = vmatpush3.msra.mxu0 %v7992_v0 }
 0x266   :  { %9485 = vmatpush3.msra.mxu1 %v7967_v33  ;;  %9511 = vmatprep.subr.mxu0 %v12864_v39 }
 0x267   :  { %9486 = vmatprep.subr.mxu1 %v12864_v39  ;;  %9512 = vmatpush3.msra.mxu0 %v7991_v43 }
 0x268   :  { %9487 = vmatpush3.msra.mxu1 %v7966_v52  ;;  %9513 = vmatprep.subr.mxu0 %v12864_v39 }
 0x269   :  { %9488 = vmatprep.subr.mxu1 %v12864_v39  ;;  %9514 = vmatpush3.msra.mxu0 %v7990_v10 }
 0x26a   :  { %9489 = vmatpush3.msra.mxu1 %v7965_v55  ;;  %9515 = vmatprep.subr.mxu0 %v12864_v39 }
 0x26b   :  { %9490 = vmatprep.subr.mxu1 %v12864_v39  ;;  %9516 = vmatpush3.msra.mxu0 %v7989_v35 }
 0x26c   :  { %9491 = vmatpush3.msra.mxu1 %v7964_v24  ;;  %9517 = vmatprep.subr.mxu0 %v12864_v39 }
 0x26d   :  { %9492 = vmatprep.subr.mxu1 %v12864_v39  ;;  %9518 = vmatpush3.msra.mxu0 %v7988_v1 }
 0x26e   :  { %9493 = vmatpush3.msra.mxu1 %v7963_v51  ;;  %9519 = vmatprep.subr.mxu0 %v12864_v39 }
 0x26f   :  { %9494 = vmatprep.subr.mxu1 %v12864_v39  ;;  %9520 = vmatpush3.msra.mxu0 %v7987_v49 }
 0x270   :  { %9495 = vmatpush3.msra.mxu1 %v7962_v38  ;;  %9521 = vmatprep.subr.mxu0 %v12864_v39 }
 0x271   :  { %9496 = vmatprep.subr.mxu1 %v12864_v39  ;;  %9522 = vmatpush3.msra.mxu0 %v7986_v13 }
 0x272   :  { %9497 = vmatpush3.msra.mxu1 %v7961_v53  ;;  %9523 = vmatprep.subr.mxu0 %v12864_v39 }
 0x273   :  { %9498 = vmatprep.subr.mxu1 %v12864_v39  ;;  %9524 = vmatpush3.msra.mxu0 %v7985_v36 }
 0x274   :  { %9499 = vmatpush3.msra.mxu1 %v7960_v23  ;;  %9525 = vmatprep.subr.mxu0 %v12864_v39 }
 0x275   :  { %9501 = vmatmul.mubr.f32.vlgmr.msra.gmra.mxu1 %v3215_v58  ;;  %9550 = vmatprep.subr.mxu1 %v12864_v39 }
 0x276   :  { %9503 = vmatprep.mubr.msk.f32.mxu1 %vm9947_vm2, %v12864_v39  ;;  %9551 = vmatpush3.msra.mxu1 %v3355_v2 }
 0x277   :  { %9552 = vmatprep.subr.mxu1 %v12864_v39  ;;  %9526 = vmatpush3.msra.mxu0 %v7984_v59 }
 0x278   :  { %9553 = vmatpush3.msra.mxu1 %v3354_v7  ;;  %9527 = vmatprep.subr.mxu0 %v12864_v39 }
 0x279   :  { %9504 = vmatmul.mubr.f32.gmra.mxu1 %v3216_v41  ;;  %9554 = vmatprep.subr.mxu1 %v12864_v39 }
 0x27a   :  { %9506 = vmatprep.mubr.msk.f32.mxu1 %vm9947_vm2, %v12864_v39  ;;  %9555 = vmatpush3.msra.mxu1 %v3353_v32 }
 0x27b   :  { %9556 = vmatprep.subr.mxu1 %v12864_v39  ;;  %9528 = vmatpush3.msra.mxu0 %v7983_v22 }
 0x27c   :  { %9557 = vmatpush3.msra.mxu1 %v3352_v8  ;;  %9529 = vmatprep.subr.mxu0 %v12864_v39 }
 0x27d   :  { %9507 = vmatmul.mubr.f32.gmra.mxu1 %v3217_v6  ;;  %9558 = vmatprep.subr.mxu1 %v12864_v39 }
 0x27e   :  { %9582 = vmatprep.mubr.msk.f32.mxu1 %vm9947_vm2, %v12864_v39  ;;  %9559 = vmatpush3.msra.mxu1 %v3351_v42 }
 0x27f   :  { %9560 = vmatprep.subr.mxu1 %v12864_v39  ;;  %9530 = vmatpush3.msra.mxu0 %v7982_v48  ;;  %v7976_v48 = vld [vmem:[%s14839_s4] ss:$0 sm:$0xff] }
 0x280   :  { %9561 = vmatpush3.msra.mxu1 %v3350_v50  ;;  %9531 = vmatprep.subr.mxu0 %v12864_v39 }
 0x281   :  { %9562 = vmatprep.subr.mxu1 %v12864_v39  ;;  %9532 = vmatpush3.msra.mxu0 %v7981_v15 }
 0x282   :  { %9563 = vmatpush3.msra.mxu1 %v3349_v62  ;;  %9533 = vmatprep.subr.mxu0 %v12864_v39 }
 0x283   :  { %9564 = vmatprep.subr.mxu1 %v12864_v39  ;;  %9534 = vmatpush3.msra.mxu0 %v7980_v27 }
 0x284   :  { %9565 = vmatpush3.msra.mxu1 %v3348_v44  ;;  %9535 = vmatprep.subr.mxu0 %v12864_v39 }
 0x285   :  { %9566 = vmatprep.subr.mxu1 %v12864_v39  ;;  %9536 = vmatpush3.msra.mxu0 %v7979_v56 }
 0x286   :  { %9567 = vmatpush3.msra.mxu1 %v3347_v57  ;;  %9537 = vmatprep.subr.mxu0 %v12864_v39 }
 0x287   :  { %9568 = vmatprep.subr.mxu1 %v12864_v39  ;;  %9538 = vmatpush3.msra.mxu0 %v7978_v37 }
 0x288   :  { %9569 = vmatpush3.msra.mxu1 %v3346_v17  ;;  %9539 = vmatprep.subr.mxu0 %v12864_v39 }
 0x289   :  { %9570 = vmatprep.subr.mxu1 %v12864_v39  ;;  %9540 = vmatpush3.msra.mxu0 %v7977_v25 }
 0x28a   :  { %9571 = vmatpush3.msra.mxu1 %v3345_v21  ;;  %9591 = vmatprep.subr.mxu0 %v12864_v39 }
 0x28b   :  { %9572 = vmatprep.subr.mxu1 %v12864_v39 }
 0x28c   :  { %9573 = vmatpush3.msra.mxu1 %v3344_v20 }
 0x28d   :  { %9574 = vmatprep.subr.mxu1 %v12864_v39 }
 0x28e   :  { %9575 = vmatpush3.msra.mxu1 %v3343_v3 }
 0x28f   :  { %9576 = vmatprep.subr.mxu1 %v12864_v39 }
 0x290   :  { %9577 = vmatpush3.msra.mxu1 %v3342_v63 }
 0x291   :  { %9578 = vmatprep.subr.mxu1 %v12864_v39 }
 0x292   :  { %9579 = vmatpush3.msra.mxu1 %v3341_v9 }
 0x293   :  { %9580 = vmatprep.subr.mxu1 %v12864_v39 }
 0x294   :  { %9581 = vmatpush3.msra.mxu1 %v3340_v29 }
 0x295   :  { %9632 = vmatprep.subr.mxu1 %v12864_v39 }
 0x2a4   :  { %v2503_v14 = vpop.f32.mrf.mxu1 }
 0x2a6   :  { %v9174_v28 = vpop.f32.mrf.mxu1 }
 0x2a8   :  { %v2508_v4 = vpop.f32.mrf.mxu1 }
 0x2aa   :  { %v9177_v30 = vpop.f32.mrf.mxu1  ;;  %v2583_v45 = vpop.f32.mrf.mxu0 }
 0x2ab   :  { %v13160_v18 = vadd.f32 %v2583_v45, %v2503_v14 }
 0x2ac   :  { %v9215_v26 = vpop.f32.mrf.mxu0 }
 0x2ad   :  { %v2513_v47 = vpop.f32.mrf.mxu1 }
 0x2af   :  { %v9180_v60 = vpop.f32.mrf.mxu1 }
 0x2b2   :  { %v2588_v12 = vpop.f32.mrf.mxu0 }
 0x2b3   :  { %v2589_v5 = vadd.f32 %v2588_v12, %v2508_v4 }
 0x2b4   :  { %v9218_v16 = vpop.f32.mrf.mxu0 }
 0x2b7   :  { %v2593_v40 = vpop.f32.mrf.mxu0 }
 0x2b8   :  { %v2594_v19 = vadd.f32 %v2593_v40, %v2513_v47 }
 0x2b9   :  { %v9221_v34 = vpop.f32.mrf.mxu0 }
 0x2c7   :  { %v2683_v54 = vpop.f32.mrf.mxu1 }
 0x2c8   :  { %v2697_v11 = vadd.f32 %v2683_v54, %v13160_v18 }
 0x2c9   :  { %v9256_v31 = vpop.f32.mrf.mxu1 }
 0x2cc   :  { %v2688_v46 = vpop.f32.mrf.mxu1 }
 0x2cd   :  { %v2698_v61 = vadd.f32 %v2688_v46, %v2589_v5 }
 0x2ce   :  { %v9259_v33 = vpop.f32.mrf.mxu1 }
 0x2cf   :  { %v2786_v52 = vpop.f32.mrf.mxu0 }
 0x2d0   :  { %v2800_v55 = vadd.f32 %v2786_v52, %v2697_v11 }
 0x2d1   :  { %v9297_v24 = vpop.f32.mrf.mxu0 }
 0x2d2   :  { %v2693_v51 = vpop.f32.mrf.mxu1  ;;  %v8024_v24 = vld [vmem:[%s14840_s5 + $0x1f8] sm:$0xff] }
 0x2d3   :  { %v2699_v38 = vadd.f32 %v2693_v51, %v2594_v19 }
 0x2d4   :  { %v9262_v53 = vpop.f32.mrf.mxu1 }
 0x2d5   :  { %v2791_v23 = vpop.f32.mrf.mxu0  ;;  %v8007_v53 = vld [vmem:[%s14840_s5 + $0x170] sm:$0xff] }
 0x2d6   :  { %v2801_v58 = vadd.f32 %v2791_v23, %v2698_v61  ;;  %v8023_v23 = vld [vmem:[%s14840_s5 + $0x1f0] sm:$0xff] }
 0x2d7   :  { %v9300_v41 = vpop.f32.mrf.mxu0 }
 0x2d8   :  { %v8006_v41 = vld [vmem:[%s14840_s5 + $0x168] sm:$0xff] }
 0x2da   :  { %v2796_v6 = vpop.f32.mrf.mxu0 }
 0x2db   :  { %v2802_v0 = vadd.f32 %v2796_v6, %v2699_v38  ;;  %v8022_v6 = vld [vmem:[%s14840_s5 + $0x1e8] sm:$0xff] }
 0x2dc   :  { %v9303_v2 = vpop.f32.mrf.mxu0 }
 0x2dd   :  { %v8005_v2 = vld [vmem:[%s14840_s5 + $0x160] sm:$0xff] }
 0x2ed   :  { %v2889_v14 = vpop.f32.mrf.mxu1 }
 0x2ee   :  { %v2903_v43 = vadd.f32 %v2889_v14, %v2800_v55  ;;  %v8008_v55 = vld [vmem:[%s14840_s5 + $0x178] sm:$0xff]  ;;  %v8021_v14 = vld [vmem:[%s14840_s5 + $0x1e0] sm:$0xff] }
 0x2ef   :  { %v9338_v7 = vpop.f32.mrf.mxu1 }
 0x2f0   :  { %v8020_v7 = vld [vmem:[%s14840_s5 + $0x1d8] sm:$0xff] }
 0x2f2   :  { %v2894_v10 = vpop.f32.mrf.mxu1 }
 0x2f3   :  { %v2904_v5 = vadd.f32 %v2894_v10, %v2801_v58 }
 0x2f4   :  { %v9341_v28 = vpop.f32.mrf.mxu1 }
 0x2f5   :  { %v2992_v32 = vpop.f32.mrf.mxu0 }
 0x2f6   :  { %v3006_v12 = vadd.f32 %v2992_v32, %v2903_v43  ;;  %v8004_v43 = vld [vmem:[%s14840_s5 + $0x158] sm:$0xff]  ;;  %v8003_v32 = vld [vmem:[%s14840_s5 + $0x150] sm:$0xff] }
 0x2f7   :  { %v9379_v35 = vpop.f32.mrf.mxu0 }
 0x2f8   :  { %v2899_v8 = vpop.f32.mrf.mxu1  ;;  %v8019_v35 = vld [vmem:[%s14840_s5 + $0x1d0] sm:$0xff] }
 0x2f9   :  { %v2905_v21 = vadd.f32 %v2899_v8, %v2802_v0  ;;  %v8002_v8 = vld [vmem:[%s14840_s5 + $0x148] sm:$0xff] }
 0x2fa   :  { %v9344_v4 = vpop.f32.mrf.mxu1 }
 0x2fb   :  { %v2997_v1 = vpop.f32.mrf.mxu0  ;;  %v8018_v4 = vld [vmem:[%s14840_s5 + $0x1c8] sm:$0xff] }
 0x2fc   :  { %v3007_v22 = vadd.f32 %v2997_v1, %v2904_v5  ;;  %v8001_v1 = vld [vmem:[%s14840_s5 + $0x140] sm:$0xff] }
 0x2fd   :  { %v9382_v42 = vpop.f32.mrf.mxu0  ;;  %v8009_v5 = vld [vmem:[%s14840_s5 + $0x180] sm:$0xff] }
 0x2fe   :  { %v8017_v42 = vld [vmem:[%s14840_s5 + $0x1c0] sm:$0xff] }
 0x300   :  { %v3002_v30 = vpop.f32.mrf.mxu0 }
 0x301   :  { %v3008_v20 = vadd.f32 %v3002_v30, %v2905_v21  ;;  %v8000_v30 = vld [vmem:[%s14840_s5 + $0x138] sm:$0xff]  ;;  %v8055_v21 = vld [vmem:[%s14840_s5 + $0x2f0] sm:$0xff] }
 0x302   :  { %v9385_v45 = vpop.f32.mrf.mxu0 }
 0x303   :  { %v8016_v45 = vld [vmem:[%s14840_s5 + $0x1b8] sm:$0xff] }
 0x313   :  { %v3095_v18 = vpop.f32.mrf.mxu1 }
 0x314   :  { %v3109_v16 = vadd.f32 %v3095_v18, %v3006_v12  ;;  %v7999_v18 = vld [vmem:[%s14840_s5 + $0x130] sm:$0xff]  ;;  %v7993_v12 = vld [vmem:[%s14840_s5 + $0x100] sm:$0xff] }
 0x315   :  { %v9420_v49 = vpop.f32.mrf.mxu1 }
 0x316   :  { %v8015_v49 = vld [vmem:[%s14840_s5 + $0x1b0] sm:$0xff] }
 0x318   :  { %v3100_v50 = vpop.f32.mrf.mxu1 }
 0x319   :  { %v3110_v19 = vadd.f32 %v3100_v50, %v3007_v22  ;;  %v7998_v50 = vld [vmem:[%s14840_s5 + $0x128] sm:$0xff] }
 0x31a   :  { %v9423_v26 = vpop.f32.mrf.mxu1 }
 0x31b   :  { %v3198_v47 = vpop.f32.mrf.mxu0  ;;  %v8014_v26 = vld [vmem:[%s14840_s5 + $0x1a8] sm:$0xff] }
 0x31c   :  { %v3212_v17 = vadd.f32 %v3198_v47, %v3109_v16  ;;  %v7997_v47 = vld [vmem:[%s14840_s5 + $0x120] sm:$0xff]  ;;  %v8040_v16 = vld [vmem:[%s14840_s5 + $0x278] sm:$0xff] }
 0x31d   :  { %v3105_v13 = vpop.f32.mrf.mxu1  ;;  %v9461_v62 = vpop.f32.mrf.mxu0 }
 0x31e   :  { %v3111_v63 = vadd.f32 %v3105_v13, %v3008_v20  ;;  %v8013_v13 = vld [vmem:[%s14840_s5 + $0x1a0] sm:$0xff]  ;;  %v7996_v62 = vld [vmem:[%s14840_s5 + $0x118] sm:$0xff]  ;;  %v8054_v20 = vld [vmem:[%s14840_s5 + $0x2e8] sm:$0xff] }
 0x31f   :  { %v9426_v60 = vpop.f32.mrf.mxu1  ;;  %v3203_v36 = vpop.f32.mrf.mxu0 }
 0x320   :  { %v3213_v27 = vadd.f32 %v3203_v36, %v3110_v19  ;;  %v8012_v60 = vld [vmem:[%s14840_s5 + $0x198] sm:$0xff]  ;;  %v7995_v36 = vld [vmem:[%s14840_s5 + $0x110] sm:$0xff]  ;;  %v8038_v19 = vld [vmem:[%s14840_s5 + $0x268] sm:$0xff] }
 0x321   :  { %v9464_v44 = vpop.f32.mrf.mxu0 }
 0x322   :  { %v8011_v44 = vld [vmem:[%s14840_s5 + $0x190] sm:$0xff] }
 0x323   :  { %v3208_v59 = vpop.f32.mrf.mxu0 }
 0x324   :  { %v3214_v29 = vadd.f32 %v3208_v59, %v3111_v63  ;;  %v7994_v59 = vld [vmem:[%s14840_s5 + $0x108] sm:$0xff] }
 0x325   :  { %v9467_v57 = vpop.f32.mrf.mxu0 }
 0x326   :  { %v8010_v57 = vld [vmem:[%s14840_s5 + $0x188] sm:$0xff] }
 0x335   :  { %v3301_v40 = vpop.f32.mrf.mxu1 }
 0x336   :  { %v3315_v34 = vadd.f32 %v3301_v40, %v3212_v17  ;;  %v8056_v40 = vld [vmem:[%s14840_s5 + $0x2f8] sm:$0xff] }
 0x337   :  { %v9502_v15 = vpop.f32.mrf.mxu1 }
 0x338   :  { %v3325_v3 = vadd.f32 %v7976_v48, %v3315_v34 }
 0x339   :  { %v3306_v56 = vpop.f32.mrf.mxu1 }
 0x33a   :  { %v3328_v37 = vmax.f32 %v3325_v3, 0.0  ;;  %v3316_v9 = vadd.f32 %v3306_v56, %v3213_v27  ;;  %v8037_v27 = vld [vmem:[%s14840_s5 + $0x260] sm:$0xff]  ;;  %v8036_v56 = vld [vmem:[%s14840_s5 + $0x258] sm:$0xff] }
 0x33b   :  { %v9505_v25 = vpop.f32.mrf.mxu1  ;;  %v8053_v3 = vld [vmem:[%s14840_s5 + $0x2e0] sm:$0xff] }
 0x33c   :  { %3331 = vst [vmem:[#allocation3 + $0x7] ss:$5 sps:$4 sm:$0xef] %v3328_v37   ;;  %v3326_v54 = vadd.f32 %v7976_v48, %v3316_v9  ;;  %v8052_v9 = vld [vmem:[%s14840_s5 + $0x2d8] sm:$0xff]  ;;  %v8035_v25 = vld [vmem:[%s14840_s5 + $0x250] sm:$0xff] }
 0x33d   :  { %v3311_v11 = vpop.f32.mrf.mxu1 }
 0x33e   :  { %v3329_v31 = vmax.f32 %v3326_v54, 0.0  ;;  %v3317_v46 = vadd.f32 %v3311_v11, %v3214_v29  ;;  %v8051_v29 = vld [vmem:[%s14840_s5 + $0x2d0] sm:$0xff]  ;;  %v8034_v54 = vld [vmem:[%s14840_s5 + $0x248] sm:$0xff] }
 0x33f   :  { %v9508_v61 = vpop.f32.mrf.mxu1  ;;  %v8050_v11 = vld [vmem:[%s14840_s5 + $0x2c8] sm:$0xff] }
 0x340   :  { %3333 = vst [vmem:[#allocation3 + $0x10] ss:$6 sps:$4 sm:$0x81] %v3329_v31   ;;  %3334 = vst [vmem:[#allocation3 + $0x11] sm:$0x3c] %v3329_v31  ;;  %v3327_v33 = vadd.f32 %v7976_v48, %v3317_v46  ;;  %v8039_v48 = vld [vmem:[%s14840_s5 + $0x270] sm:$0xff] }
 0x341   :  { %v8033_v31 = vld [vmem:[%s14840_s5 + $0x240] sm:$0xff]  ;;  %v8032_v61 = vld [vmem:[%s14840_s5 + $0x238] sm:$0xff] }
 0x342   :  { %v3330_v52 = vmax.f32 %v3327_v33, 0.0  ;;  %v8049_v46 = vld [vmem:[%s14840_s5 + $0x2c0] sm:$0xff]  ;;  %v8048_v33 = vld [vmem:[%s14840_s5 + $0x2b8] sm:$0xff] }
 0x343   :  { %v3356_v51 = vld [vmem:[#allocation3 + $0x1] sm:$0xff] }
 0x344   :  { %v3337_v38 = vld [vmem:[#allocation3] sm:$0xff]  ;;  %3336 = vst [vmem:[#allocation3 + $0x1a] sm:$0x7] %v3330_v52  ;;  %9542 = vmatmul.mubr.f32.vlgmr.msra.gmra.mxu0 %v3356_v51  ;;  %v13284_v0 = vld [vmem:[#allocation3 + $0x8] sm:$0xff]  ;;  %v8031_v52 = vld [vmem:[%s14840_s5 + $0x230] sm:$0xff] }
 0x345   :  { %9583 = vmatmul.mubr.f32.vlgmr.msra.gmra.mxu1 %v3337_v38  ;;  %9592 = vmatpush3.msra.mxu0 %v8008_v55  ;;  %v3536_v22 = vld [vmem:[#allocation3 + $0x2] sm:$0xff]  ;;  %v8047_v55 = vld [vmem:[%s14840_s5 + $0x2b0] sm:$0xff] }
 0x346   :  { %9633 = vmatpush3.msra.mxu1 %v8024_v24  ;;  %9593 = vmatprep.subr.mxu0 %v12864_v39  ;;  %v3639_v17 = vld [vmem:[#allocation3 + $0x6] sm:$0xff] }
 0x347   :  { %9634 = vmatprep.subr.mxu1 %v12864_v39  ;;  %9594 = vmatpush3.msra.mxu0 %v8007_v53  ;;  %v3357_v58 = vld [vmem:[#allocation3 + $0x9] sm:$0xff]  ;;  %v3358_v10 = vld [vmem:[#allocation3 + $0x11] sm:$0xff]  ;;  %v8029_v38 = vld [vmem:[%s14840_s5 + $0x220] sm:$0xff] }
 0x348   :  { %9635 = vmatpush3.msra.mxu1 %v8023_v23  ;;  %9544 = vmatprep.mubr.msk.f32.mxu0 %vm9947_vm2, %v12864_v39  ;;  %v13307_v28 = vld [vmem:[#allocation3 + $0x10] sm:$0xff]  ;;  %v8030_v24 = vld [vmem:[%s14840_s5 + $0x228] sm:$0xff]  ;;  %v8045_v53 = vld [vmem:[%s14840_s5 + $0x2a0] sm:$0xff] }
 0x349   :  { %9585 = vmatprep.mubr.msk.f32.mxu1 %vm9947_vm2, %v12864_v39  ;;  %9595 = vmatprep.subr.mxu0 %v12864_v39  ;;  %v3537_v34 = vld [vmem:[#allocation3 + $0xa] sm:$0xff]  ;;  %v3538_v63 = vld [vmem:[#allocation3 + $0x12] sm:$0xff] }
 0x34a   :  { %9636 = vmatprep.subr.mxu1 %v12864_v39  ;;  %9545 = vmatmul.mubr.f32.gmra.mxu0 %v3357_v58  ;;  %v13425_v15 = vld [vmem:[#allocation3 + $0xe] sm:$0xff]  ;;  %v8028_v23 = vld [vmem:[%s14840_s5 + $0x218] sm:$0xff] }
 0x34b   :  { %9586 = vmatmul.mubr.f32.gmra.mxu1 %v13284_v0  ;;  %9596 = vmatpush3.msra.mxu0 %v8006_v41  ;;  %v13448_v37 = vld [vmem:[#allocation3 + $0x16] sm:$0xff]  ;;  %v8046_v51 = vld [vmem:[%s14840_s5 + $0x2a8] sm:$0xff] }
 0x34c   :  { %9637 = vmatpush3.msra.mxu1 %v8022_v6  ;;  %9597 = vmatprep.subr.mxu0 %v12864_v39  ;;  %v8044_v58 = vld [vmem:[%s14840_s5 + $0x298] sm:$0xff]  ;;  %v8027_v41 = vld [vmem:[%s14840_s5 + $0x210] sm:$0xff] }
 0x34d   :  { %9638 = vmatprep.subr.mxu1 %v12864_v39  ;;  %9598 = vmatpush3.msra.mxu0 %v8005_v2  ;;  %v8043_v6 = vld [vmem:[%s14840_s5 + $0x290] sm:$0xff]  ;;  %v8026_v2 = vld [vmem:[%s14840_s5 + $0x208] sm:$0xff] }
 0x34e   :  { %9639 = vmatpush3.msra.mxu1 %v8021_v14  ;;  %9547 = vmatprep.mubr.msk.f32.mxu0 %vm9947_vm2, %v12864_v39  ;;  %v8042_v14 = vld [vmem:[%s14840_s5 + $0x288] sm:$0xff] }
 0x34f   :  { %9588 = vmatprep.mubr.msk.f32.mxu1 %vm9947_vm2, %v12864_v39  ;;  %9599 = vmatprep.subr.mxu0 %v12864_v39 }
 0x350   :  { %9640 = vmatprep.subr.mxu1 %v12864_v39  ;;  %9548 = vmatmul.mubr.f32.gmra.mxu0 %v3358_v10  ;;  %v3742_v10 = vld [vmem:[#allocation3 + $0x7] sm:$0xff] }
 0x351   :  { %9589 = vmatmul.mubr.f32.gmra.mxu1 %v13307_v28  ;;  %9600 = vmatpush3.msra.mxu0 %v8004_v43  ;;  %v8025_v43 = vld [vmem:[%s14840_s5 + $0x200] sm:$0xff] }
 0x352   :  { %9641 = vmatpush3.msra.mxu1 %v8020_v7  ;;  %9601 = vmatprep.subr.mxu0 %v12864_v39  ;;  %v8041_v7 = vld [vmem:[%s14840_s5 + $0x280] sm:$0xff] }
 0x353   :  { %9642 = vmatprep.subr.mxu1 %v12864_v39  ;;  %9602 = vmatpush3.msra.mxu0 %v8003_v32  ;;  %v8072_v32 = vld [vmem:[%s14840_s5 + $0x378] sm:$0xff] }
 0x354   :  { %9643 = vmatpush3.msra.mxu1 %v8019_v35  ;;  %9603 = vmatprep.subr.mxu0 %v12864_v39  ;;  %v8088_v35 = vld [vmem:[%s14840_s5 + $0x3f8] sm:$0xff] }
 0x355   :  { %9644 = vmatprep.subr.mxu1 %v12864_v39  ;;  %9604 = vmatpush3.msra.mxu0 %v8002_v8  ;;  %v8071_v8 = vld [vmem:[%s14840_s5 + $0x370] sm:$0xff] }
 0x356   :  { %9645 = vmatpush3.msra.mxu1 %v8018_v4  ;;  %9605 = vmatprep.subr.mxu0 %v12864_v39  ;;  %v8087_v4 = vld [vmem:[%s14840_s5 + $0x3f0] sm:$0xff] }
 0x357   :  { %9646 = vmatprep.subr.mxu1 %v12864_v39  ;;  %9606 = vmatpush3.msra.mxu0 %v8001_v1  ;;  %v8070_v1 = vld [vmem:[%s14840_s5 + $0x368] sm:$0xff] }
 0x358   :  { %9647 = vmatpush3.msra.mxu1 %v8017_v42  ;;  %9607 = vmatprep.subr.mxu0 %v12864_v39  ;;  %v8086_v42 = vld [vmem:[%s14840_s5 + $0x3e8] sm:$0xff] }
 0x359   :  { %9648 = vmatprep.subr.mxu1 %v12864_v39  ;;  %9608 = vmatpush3.msra.mxu0 %v8000_v30  ;;  %v8069_v30 = vld [vmem:[%s14840_s5 + $0x360] sm:$0xff] }
 0x35a   :  { %9649 = vmatpush3.msra.mxu1 %v8016_v45  ;;  %9609 = vmatprep.subr.mxu0 %v12864_v39  ;;  %v8085_v45 = vld [vmem:[%s14840_s5 + $0x3e0] sm:$0xff] }
 0x35b   :  { %9650 = vmatprep.subr.mxu1 %v12864_v39  ;;  %9610 = vmatpush3.msra.mxu0 %v7999_v18  ;;  %v3744_v18 = vld [vmem:[#allocation3 + $0x17] sm:$0xff] }
 0x35c   :  { %9651 = vmatpush3.msra.mxu1 %v8015_v49  ;;  %9611 = vmatprep.subr.mxu0 %v12864_v39  ;;  %v3847_v49 = vld [vmem:[#allocation3 + $0x18] sm:$0xff] }
 0x35d   :  { %9652 = vmatprep.subr.mxu1 %v12864_v39  ;;  %9612 = vmatpush3.msra.mxu0 %v7998_v50  ;;  %v8084_v50 = vld [vmem:[%s14840_s5 + $0x3d8] sm:$0xff] }
 0x35e   :  { %9653 = vmatpush3.msra.mxu1 %v8014_v26  ;;  %9613 = vmatprep.subr.mxu0 %v12864_v39  ;;  %v8067_v26 = vld [vmem:[%s14840_s5 + $0x350] sm:$0xff] }
 0x35f   :  { %9654 = vmatprep.subr.mxu1 %v12864_v39  ;;  %9614 = vmatpush3.msra.mxu0 %v7997_v47  ;;  %v8083_v47 = vld [vmem:[%s14840_s5 + $0x3d0] sm:$0xff] }
 0x360   :  { %9655 = vmatpush3.msra.mxu1 %v8013_v13  ;;  %9615 = vmatprep.subr.mxu0 %v12864_v39  ;;  %v8066_v13 = vld [vmem:[%s14840_s5 + $0x348] sm:$0xff] }
 0x361   :  { %9656 = vmatprep.subr.mxu1 %v12864_v39  ;;  %9616 = vmatpush3.msra.mxu0 %v7996_v62  ;;  %v8082_v62 = vld [vmem:[%s14840_s5 + $0x3c8] sm:$0xff] }
 0x362   :  { %9657 = vmatpush3.msra.mxu1 %v8012_v60  ;;  %9617 = vmatprep.subr.mxu0 %v12864_v39  ;;  %v8065_v60 = vld [vmem:[%s14840_s5 + $0x340] sm:$0xff] }
 0x363   :  { %9658 = vmatprep.subr.mxu1 %v12864_v39  ;;  %9618 = vmatpush3.msra.mxu0 %v7995_v36  ;;  %v8081_v36 = vld [vmem:[%s14840_s5 + $0x3c0] sm:$0xff] }
 0x364   :  { %9659 = vmatpush3.msra.mxu1 %v8011_v44  ;;  %9619 = vmatprep.subr.mxu0 %v12864_v39  ;;  %v8064_v44 = vld [vmem:[%s14840_s5 + $0x338] sm:$0xff] }
 0x365   :  { %9660 = vmatprep.subr.mxu1 %v12864_v39  ;;  %9620 = vmatpush3.msra.mxu0 %v7994_v59  ;;  %v8080_v59 = vld [vmem:[%s14840_s5 + $0x3b8] sm:$0xff] }
 0x366   :  { %9661 = vmatpush3.msra.mxu1 %v8010_v57  ;;  %9621 = vmatprep.subr.mxu0 %v12864_v39  ;;  %v8063_v57 = vld [vmem:[%s14840_s5 + $0x330] sm:$0xff] }
 0x367   :  { %9662 = vmatprep.subr.mxu1 %v12864_v39  ;;  %9622 = vmatpush3.msra.mxu0 %v7993_v12  ;;  %v8079_v12 = vld [vmem:[%s14840_s5 + $0x3b0] sm:$0xff] }
 0x368   :  { %9623 = vmatprep.mubr.msk.f32.mxu0 %vm9947_vm2, %v12864_v39  ;;  %9663 = vmatpush3.msra.mxu1 %v8009_v5  ;;  %v8062_v5 = vld [vmem:[%s14840_s5 + $0x328] sm:$0xff] }
 0x369   :  { %9664 = vmatprep.mubr.msk.f32.mxu1 %vm9947_vm2, %v12864_v39  ;;  %9624 = vmatmul.mubr.f32.vlgmr.msra.gmra.mxu0 %v3536_v22  ;;  %v8061_v22 = vld [vmem:[%s14840_s5 + $0x320] sm:$0xff] }
 0x36a   :  { %9665 = vmatmul.mubr.f32.vlgmr.msra.gmra.mxu1 %v3639_v17  ;;  %9673 = vmatprep.subr.mxu0 %v12864_v39  ;;  %v8077_v17 = vld [vmem:[%s14840_s5 + $0x3a0] sm:$0xff] }
 0x36b   :  { %9714 = vmatprep.subr.mxu1 %v12864_v39  ;;  %9674 = vmatpush3.msra.mxu0 %v8040_v16  ;;  %v8078_v16 = vld [vmem:[%s14840_s5 + $0x3a8] sm:$0xff] }
 0x36c   :  { %9715 = vmatpush3.msra.mxu1 %v8056_v40  ;;  %9675 = vmatprep.subr.mxu0 %v12864_v39  ;;  %v8060_v40 = vld [vmem:[%s14840_s5 + $0x318] sm:$0xff] }
 0x36d   :  { %9716 = vmatprep.subr.mxu1 %v12864_v39  ;;  %9626 = vmatprep.mubr.msk.f32.mxu0 %vm9947_vm2, %v12864_v39 }
 0x36e   :  { %9667 = vmatprep.mubr.msk.f32.mxu1 %vm9947_vm2, %v12864_v39  ;;  %9676 = vmatpush3.msra.mxu0 %v8039_v48  ;;  %v8076_v48 = vld [vmem:[%s14840_s5 + $0x398] sm:$0xff] }
 0x36f   :  { %9717 = vmatpush3.msra.mxu1 %v8055_v21  ;;  %9627 = vmatmul.mubr.f32.gmra.mxu0 %v3537_v34  ;;  %v8059_v21 = vld [vmem:[%s14840_s5 + $0x310] sm:$0xff]  ;;  %v8058_v34 = vld [vmem:[%s14840_s5 + $0x308] sm:$0xff] }
 0x370   :  { %9668 = vmatmul.mubr.f32.gmra.mxu1 %v13425_v15  ;;  %9677 = vmatprep.subr.mxu0 %v12864_v39 }
 0x371   :  { %9718 = vmatprep.subr.mxu1 %v12864_v39  ;;  %9678 = vmatpush3.msra.mxu0 %v8038_v19  ;;  %v8075_v19 = vld [vmem:[%s14840_s5 + $0x390] sm:$0xff] }
 0x372   :  { %9719 = vmatpush3.msra.mxu1 %v8054_v20  ;;  %9679 = vmatprep.subr.mxu0 %v12864_v39  ;;  %v8074_v20 = vld [vmem:[%s14840_s5 + $0x388] sm:$0xff] }
 0x373   :  { %9720 = vmatprep.subr.mxu1 %v12864_v39  ;;  %9629 = vmatprep.mubr.msk.f32.mxu0 %vm9947_vm2, %v12864_v39 }
 0x374   :  { %9670 = vmatprep.mubr.msk.f32.mxu1 %vm9947_vm2, %v12864_v39  ;;  %9680 = vmatpush3.msra.mxu0 %v8037_v27  ;;  %v8057_v27 = vld [vmem:[%s14840_s5 + $0x300] sm:$0xff] }
 0x375   :  { %9721 = vmatpush3.msra.mxu1 %v8053_v3  ;;  %9630 = vmatmul.mubr.f32.gmra.mxu0 %v3538_v63  ;;  %v8073_v3 = vld [vmem:[%s14840_s5 + $0x380] sm:$0xff]  ;;  %v4051_v63 = vld [vmem:[#allocation3 + $0xd] sm:$0xff] }
 0x376   :  { %9671 = vmatmul.mubr.f32.gmra.mxu1 %v13448_v37  ;;  %9681 = vmatprep.subr.mxu0 %v12864_v39 }
 0x377   :  { %9722 = vmatprep.subr.mxu1 %v12864_v39  ;;  %9682 = vmatpush3.msra.mxu0 %v8036_v56  ;;  %v3948_v56 = vld [vmem:[#allocation3 + $0xc] sm:$0xff] }
 0x378   :  { %9723 = vmatpush3.msra.mxu1 %v8052_v9  ;;  %9683 = vmatprep.subr.mxu0 %v12864_v39  ;;  %v8104_v9 = vld [vmem:[%s14840_s5 + $0x478] sm:$0xff] }
 0x379   :  { %9724 = vmatprep.subr.mxu1 %v12864_v39  ;;  %9684 = vmatpush3.msra.mxu0 %v8035_v25  ;;  %v8103_v25 = vld [vmem:[%s14840_s5 + $0x470] sm:$0xff] }
 0x37a   :  { %9725 = vmatpush3.msra.mxu1 %v8051_v29  ;;  %9685 = vmatprep.subr.mxu0 %v12864_v39  ;;  %v4052_v29 = vld [vmem:[#allocation3 + $0x15] sm:$0xff] }
 0x37b   :  { %9726 = vmatprep.subr.mxu1 %v12864_v39  ;;  %9686 = vmatpush3.msra.mxu0 %v8034_v54  ;;  %v8102_v54 = vld [vmem:[%s14840_s5 + $0x468] sm:$0xff] }
 0x37c   :  { %9727 = vmatpush3.msra.mxu1 %v8050_v11  ;;  %9687 = vmatprep.subr.mxu0 %v12864_v39  ;;  %v3949_v11 = vld [vmem:[#allocation3 + $0x14] sm:$0xff] }
 0x37d   :  { %9728 = vmatprep.subr.mxu1 %v12864_v39  ;;  %9688 = vmatpush3.msra.mxu0 %v8033_v31  ;;  %v8101_v31 = vld [vmem:[%s14840_s5 + $0x460] sm:$0xff] }
 0x37e   :  { %9729 = vmatpush3.msra.mxu1 %v8049_v46  ;;  %9689 = vmatprep.subr.mxu0 %v12864_v39  ;;  %v4053_v46 = vld [vmem:[#allocation3 + $0x1d] sm:$0xff] }
 0x37f   :  { %9730 = vmatprep.subr.mxu1 %v12864_v39  ;;  %9690 = vmatpush3.msra.mxu0 %v8032_v61  ;;  %v8100_v61 = vld [vmem:[%s14840_s5 + $0x458] sm:$0xff] }
 0x380   :  { %9731 = vmatpush3.msra.mxu1 %v8048_v33  ;;  %9691 = vmatprep.subr.mxu0 %v12864_v39  ;;  %v3950_v33 = vld [vmem:[#allocation3 + $0x1c] sm:$0xff] }
 0x381   :  { %9732 = vmatprep.subr.mxu1 %v12864_v39  ;;  %9692 = vmatpush3.msra.mxu0 %v8031_v52  ;;  %v8099_v52 = vld [vmem:[%s14840_s5 + $0x450] sm:$0xff] }
 0x382   :  { %9733 = vmatpush3.msra.mxu1 %v8047_v55  ;;  %9693 = vmatprep.subr.mxu0 %v12864_v39  ;;  %v8098_v55 = vld [vmem:[%s14840_s5 + $0x448] sm:$0xff] }
 0x383   :  { %9734 = vmatprep.subr.mxu1 %v12864_v39  ;;  %9694 = vmatpush3.msra.mxu0 %v8030_v24  ;;  %v8097_v24 = vld [vmem:[%s14840_s5 + $0x440] sm:$0xff] }
 0x384   :  { %9735 = vmatpush3.msra.mxu1 %v8046_v51  ;;  %9695 = vmatprep.subr.mxu0 %v12864_v39  ;;  %v8096_v51 = vld [vmem:[%s14840_s5 + $0x438] sm:$0xff] }
 0x385   :  { %9736 = vmatprep.subr.mxu1 %v12864_v39  ;;  %9696 = vmatpush3.msra.mxu0 %v8029_v38  ;;  %v8095_v38 = vld [vmem:[%s14840_s5 + $0x430] sm:$0xff] }
 0x386   :  { %9737 = vmatpush3.msra.mxu1 %v8045_v53  ;;  %9697 = vmatprep.subr.mxu0 %v12864_v39  ;;  %v8094_v53 = vld [vmem:[%s14840_s5 + $0x428] sm:$0xff] }
 0x387   :  { %9738 = vmatprep.subr.mxu1 %v12864_v39  ;;  %9698 = vmatpush3.msra.mxu0 %v8028_v23  ;;  %v8093_v23 = vld [vmem:[%s14840_s5 + $0x420] sm:$0xff] }
 0x388   :  { %9739 = vmatpush3.msra.mxu1 %v8044_v58  ;;  %9699 = vmatprep.subr.mxu0 %v12864_v39  ;;  %v8092_v58 = vld [vmem:[%s14840_s5 + $0x418] sm:$0xff] }
 0x389   :  { %9740 = vmatprep.subr.mxu1 %v12864_v39  ;;  %9700 = vmatpush3.msra.mxu0 %v8027_v41  ;;  %v8091_v41 = vld [vmem:[%s14840_s5 + $0x410] sm:$0xff] }
 0x38a   :  { %9741 = vmatpush3.msra.mxu1 %v8043_v6  ;;  %9701 = vmatprep.subr.mxu0 %v12864_v39  ;;  %v8090_v6 = vld [vmem:[%s14840_s5 + $0x408] sm:$0xff] }
 0x38b   :  { %9742 = vmatprep.subr.mxu1 %v12864_v39  ;;  %9702 = vmatpush3.msra.mxu0 %v8026_v2  ;;  %v8089_v2 = vld [vmem:[%s14840_s5 + $0x400] sm:$0xff] }
 0x38c   :  { %9743 = vmatpush3.msra.mxu1 %v8042_v14  ;;  %9703 = vmatprep.subr.mxu0 %v12864_v39  ;;  %v4156_v14 = vld [vmem:[#allocation3 + $0x1e] sm:$0xff] }
 0x38d   :  { %9744 = vmatprep.subr.mxu1 %v12864_v39  ;;  %9704 = vmatpush3.msra.mxu0 %v8025_v43 }
 0x38e   :  { %9705 = vmatprep.mubr.msk.f32.mxu0 %vm9947_vm2, %v12864_v39  ;;  %9745 = vmatpush3.msra.mxu1 %v8041_v7 }
 0x38f   :  { %9746 = vmatprep.mubr.msk.f32.mxu1 %vm9947_vm2, %v12864_v39  ;;  %9706 = vmatmul.mubr.f32.vlgmr.msra.gmra.mxu0 %v3742_v10 }
 0x390   :  { %9747 = vmatmul.mubr.f32.vlgmr.msra.gmra.mxu1 %v13284_v0  ;;  %9755 = vmatprep.subr.mxu0 %v12864_v39  ;;  %v3743_v0 = vld [vmem:[#allocation3 + $0xf] sm:$0xff] }
 0x391   :  { %9796 = vmatprep.subr.mxu1 %v12864_v39  ;;  %9756 = vmatpush3.msra.mxu0 %v8072_v32 }
 0x392   :  { %9797 = vmatpush3.msra.mxu1 %v8088_v35  ;;  %9757 = vmatprep.subr.mxu0 %v12864_v39 }
 0x393   :  { %9798 = vmatprep.subr.mxu1 %v12864_v39  ;;  %9708 = vmatprep.mubr.msk.f32.mxu0 %vm9947_vm2, %v12864_v39 }
 0x394   :  { %9749 = vmatprep.mubr.msk.f32.mxu1 %vm9947_vm2, %v12864_v39  ;;  %9758 = vmatpush3.msra.mxu0 %v8071_v8 }
 0x395   :  { %9799 = vmatpush3.msra.mxu1 %v8087_v4  ;;  %9709 = vmatmul.mubr.f32.gmra.mxu0 %v3743_v0 }
 0x396   :  { %9750 = vmatmul.mubr.f32.gmra.mxu1 %v13307_v28  ;;  %9759 = vmatprep.subr.mxu0 %v12864_v39  ;;  %v8068_v28 = vld [vmem:[%s14840_s5 + $0x358] sm:$0xff] }
 0x397   :  { %9800 = vmatprep.subr.mxu1 %v12864_v39  ;;  %9760 = vmatpush3.msra.mxu0 %v8070_v1 }
 0x398   :  { %9801 = vmatpush3.msra.mxu1 %v8086_v42  ;;  %9761 = vmatprep.subr.mxu0 %v12864_v39 }
 0x399   :  { %9802 = vmatprep.subr.mxu1 %v12864_v39  ;;  %9711 = vmatprep.mubr.msk.f32.mxu0 %vm9947_vm2, %v12864_v39 }
 0x39a   :  { %9752 = vmatprep.mubr.msk.f32.mxu1 %vm9947_vm2, %v12864_v39  ;;  %9762 = vmatpush3.msra.mxu0 %v8069_v30 }
 0x39b   :  { %9803 = vmatpush3.msra.mxu1 %v8085_v45  ;;  %9712 = vmatmul.mubr.f32.gmra.mxu0 %v3744_v18 }
 0x39c   :  { %9753 = vmatmul.mubr.f32.gmra.mxu1 %v3847_v49  ;;  %9763 = vmatprep.subr.mxu0 %v12864_v39 }
 0x39d   :  { %9804 = vmatprep.subr.mxu1 %v12864_v39  ;;  %9764 = vmatpush3.msra.mxu0 %v8068_v28 }
 0x39e   :  { %9805 = vmatpush3.msra.mxu1 %v8084_v50  ;;  %9765 = vmatprep.subr.mxu0 %v12864_v39 }
 0x39f   :  { %9806 = vmatprep.subr.mxu1 %v12864_v39  ;;  %9766 = vmatpush3.msra.mxu0 %v8067_v26 }
 0x3a0   :  { %9807 = vmatpush3.msra.mxu1 %v8083_v47  ;;  %9767 = vmatprep.subr.mxu0 %v12864_v39 }
 0x3a1   :  { %9808 = vmatprep.subr.mxu1 %v12864_v39  ;;  %9768 = vmatpush3.msra.mxu0 %v8066_v13 }
 0x3a2   :  { %9809 = vmatpush3.msra.mxu1 %v8082_v62  ;;  %9769 = vmatprep.subr.mxu0 %v12864_v39 }
 0x3a3   :  { %9810 = vmatprep.subr.mxu1 %v12864_v39  ;;  %9770 = vmatpush3.msra.mxu0 %v8065_v60 }
 0x3a4   :  { %9811 = vmatpush3.msra.mxu1 %v8081_v36  ;;  %9771 = vmatprep.subr.mxu0 %v12864_v39 }
 0x3a5   :  { %9812 = vmatprep.subr.mxu1 %v12864_v39  ;;  %9772 = vmatpush3.msra.mxu0 %v8064_v44 }
 0x3a6   :  { %9813 = vmatpush3.msra.mxu1 %v8080_v59  ;;  %9773 = vmatprep.subr.mxu0 %v12864_v39 }
 0x3a7   :  { %9814 = vmatprep.subr.mxu1 %v12864_v39  ;;  %9774 = vmatpush3.msra.mxu0 %v8063_v57 }
 0x3a8   :  { %9815 = vmatpush3.msra.mxu1 %v8079_v12  ;;  %9775 = vmatprep.subr.mxu0 %v12864_v39 }
 0x3a9   :  { %9816 = vmatprep.subr.mxu1 %v12864_v39  ;;  %9776 = vmatpush3.msra.mxu0 %v8062_v5 }
 0x3aa   :  { %9817 = vmatpush3.msra.mxu1 %v8078_v16  ;;  %9777 = vmatprep.subr.mxu0 %v12864_v39 }
 0x3ab   :  { %9818 = vmatprep.subr.mxu1 %v12864_v39  ;;  %9778 = vmatpush3.msra.mxu0 %v8061_v22 }
 0x3ac   :  { %9819 = vmatpush3.msra.mxu1 %v8077_v17  ;;  %9779 = vmatprep.subr.mxu0 %v12864_v39 }
 0x3ad   :  { %9820 = vmatprep.subr.mxu1 %v12864_v39  ;;  %9780 = vmatpush3.msra.mxu0 %v8060_v40 }
 0x3ae   :  { %9821 = vmatpush3.msra.mxu1 %v8076_v48  ;;  %9781 = vmatprep.subr.mxu0 %v12864_v39 }
 0x3af   :  { %9822 = vmatprep.subr.mxu1 %v12864_v39  ;;  %9782 = vmatpush3.msra.mxu0 %v8059_v21 }
 0x3b0   :  { %9823 = vmatpush3.msra.mxu1 %v8075_v19  ;;  %9783 = vmatprep.subr.mxu0 %v12864_v39 }
 0x3b1   :  { %9824 = vmatprep.subr.mxu1 %v12864_v39  ;;  %9784 = vmatpush3.msra.mxu0 %v8058_v34 }
 0x3b2   :  { %9825 = vmatpush3.msra.mxu1 %v8074_v20  ;;  %9785 = vmatprep.subr.mxu0 %v12864_v39 }
 0x3b3   :  { %9826 = vmatprep.subr.mxu1 %v12864_v39  ;;  %9786 = vmatpush3.msra.mxu0 %v8057_v27 }
 0x3b4   :  { %9787 = vmatprep.mubr.msk.f32.mxu0 %vm9947_vm2, %v12864_v39  ;;  %9827 = vmatpush3.msra.mxu1 %v8073_v3 }
 0x3b5   :  { %9828 = vmatprep.mubr.msk.f32.mxu1 %vm9947_vm2, %v12864_v39  ;;  %9788 = vmatmul.mubr.f32.vlgmr.msra.gmra.mxu0 %v3948_v56 }
 0x3b6   :  { %9829 = vmatmul.mubr.f32.vlgmr.msra.gmra.mxu1 %v4051_v63  ;;  %9837 = vmatprep.subr.mxu0 %v12864_v39 }
 0x3b7   :  { %9790 = vmatprep.mubr.msk.f32.mxu0 %vm9947_vm2, %v12864_v39  ;;  %9838 = vmatpush3.msra.mxu0 %v8104_v9 }
 0x3b8   :  { %9831 = vmatprep.mubr.msk.f32.mxu1 %vm9947_vm2, %v12864_v39  ;;  %9839 = vmatprep.subr.mxu0 %v12864_v39 }
 0x3b9   :  { %9840 = vmatpush3.msra.mxu0 %v8103_v25 }
 0x3ba   :  { %9832 = vmatmul.mubr.f32.gmra.mxu1 %v4052_v29  ;;  %9791 = vmatmul.mubr.f32.gmra.mxu0 %v3949_v11 }
 0x3bb   :  { %9841 = vmatprep.subr.mxu0 %v12864_v39  ;;  %9793 = vmatprep.mubr.msk.f32.mxu0 %vm9947_vm2, %v12864_v39 }
 0x3bc   :  { %9842 = vmatpush3.msra.mxu0 %v8102_v54  ;;  %9834 = vmatprep.mubr.msk.f32.mxu1 %vm9947_vm2, %v12864_v39 }
 0x3bd   :  { %9843 = vmatprep.subr.mxu0 %v12864_v39 }
 0x3be   :  { %9844 = vmatpush3.msra.mxu0 %v8101_v31  ;;  %9835 = vmatmul.mubr.f32.gmra.mxu1 %v4053_v46 }
 0x3bf   :  { %9794 = vmatmul.mubr.f32.gmra.mxu0 %v3950_v33  ;;  %9845 = vmatprep.subr.mxu0 %v12864_v39 }
 0x3c0   :  { %9846 = vmatpush3.msra.mxu0 %v8100_v61  ;;  %9869 = vmatprep.mubr.msk.f32.mxu0 %vm9947_vm2, %v12864_v39 }
 0x3c1   :  { %9847 = vmatprep.subr.mxu0 %v12864_v39 }
 0x3c2   :  { %9848 = vmatpush3.msra.mxu0 %v8099_v52 }
 0x3c3   :  { %9849 = vmatprep.subr.mxu0 %v12864_v39 }
 0x3c4   :  { %9850 = vmatpush3.msra.mxu0 %v8098_v55 }
 0x3c5   :  { %9851 = vmatprep.subr.mxu0 %v12864_v39 }
 0x3c6   :  { %9852 = vmatpush3.msra.mxu0 %v8097_v24 }
 0x3c7   :  { %9853 = vmatprep.subr.mxu0 %v12864_v39 }
 0x3c8   :  { %9854 = vmatpush3.msra.mxu0 %v8096_v51 }
 0x3c9   :  { %9855 = vmatprep.subr.mxu0 %v12864_v39 }
 0x3ca   :  { %9856 = vmatpush3.msra.mxu0 %v8095_v38 }
 0x3cb   :  { %9857 = vmatprep.subr.mxu0 %v12864_v39 }
 0x3cc   :  { %9858 = vmatpush3.msra.mxu0 %v8094_v53 }
 0x3cd   :  { %9859 = vmatprep.subr.mxu0 %v12864_v39 }
 0x3ce   :  { %9860 = vmatpush3.msra.mxu0 %v8093_v23 }
 0x3cf   :  { %9861 = vmatprep.subr.mxu0 %v12864_v39 }
 0x3d0   :  { %9862 = vmatpush3.msra.mxu0 %v8092_v58 }
 0x3d1   :  { %9863 = vmatprep.subr.mxu0 %v12864_v39 }
 0x3d2   :  { %9864 = vmatpush3.msra.mxu0 %v8091_v41 }
 0x3d3   :  { %9865 = vmatprep.subr.mxu0 %v12864_v39 }
 0x3d4   :  { %9866 = vmatpush3.msra.mxu0 %v8090_v6 }
 0x3d5   :  { %9867 = vmatprep.subr.mxu0 %v12864_v39 }
 0x3d6   :  { %9868 = vmatpush3.msra.mxu0 %v8089_v2 }
 0x3d7   :  { %9870 = vmatmul.mubr.f32.vlgmr.msra.gmra.mxu0 %v13425_v15 }
 0x3d8   :  { %9872 = vmatprep.mubr.msk.f32.mxu0 %vm9947_vm2, %v12864_v39 }
 0x3db   :  { %9873 = vmatmul.mubr.f32.gmra.mxu0 %v13448_v37 }
 0x3dc   :  { %9875 = vmatprep.mubr.msk.f32.mxu0 %vm9947_vm2, %v12864_v39  ;;  %vm4443_vm2 = vcmask 523264  }
 0x3df   :  { %9876 = vmatmul.mubr.f32.gmra.mxu0 %v4156_v14  ;;  %v9948_v14 = vmov 1983009808  }
 0x404   :  { %v3442_v43 = vpop.f32.mrf.mxu0 }
 0x405   :  { %v3522_v7 = vpop.f32.mrf.mxu1 }
 0x406   :  { %v3523_v10 = vadd.f32 %v3522_v7, %v3442_v43  ;;  %v9543_v32 = vpop.f32.mrf.mxu0  ;;  %v4274_v43 = vunpack.c.l.s4 %v9948_v14  ;;  %v4276_v7 = vlaneseq }
 0x407   :  { %v9584_v35 = vpop.f32.mrf.mxu1 }
 0x40a   :  { %v3447_v8 = vpop.f32.mrf.mxu0 }
 0x40b   :  { %v3527_v4 = vpop.f32.mrf.mxu1 }
 0x40c   :  { %v3528_v0 = vadd.f32 %v3527_v4, %v3447_v8  ;;  %v9546_v1 = vpop.f32.mrf.mxu0  ;;  %v4275_v8 = vunpack.c.0.s8 %v4274_v43  ;;  %v13770_v4 = vshrl.u32 %v4276_v7, 7 }
 0x40d   :  { %v9587_v15 = vpop.f32.mrf.mxu1  ;;  %v8105_v1 = vld [vmem:[%s14841_s6] ss:$0 sm:$0xff]  ;;  %s9949_s6 = smov 80  }
 0x410   :  { %v3452_v42 = vpop.f32.mrf.mxu0 }
 0x411   :  { %v3532_v30 = vpop.f32.mrf.mxu1 }
 0x412   :  { %v3533_v45 = vadd.f32 %v3532_v30, %v3452_v42  ;;  %v9549_v28 = vpop.f32.mrf.mxu0 }
 0x413   :  { %v9590_v37 = vpop.f32.mrf.mxu1 }
 0x414   :  { %v13776_v37 = vsub.s32 %v4275_v8, %v13770_v4 }
 0x429   :  { %v3622_v18 = vpop.f32.mrf.mxu0 }
 0x42a   :  { %v3725_v49 = vpop.f32.mrf.mxu1  ;;  %v3636_v39 = vadd.f32 %v3622_v18, %v3523_v10 }
 0x42b   :  { %v9625_v50 = vpop.f32.mrf.mxu0 }
 0x42c   :  { %v9666_v26 = vpop.f32.mrf.mxu1  ;;  %v3739_v47 = vadd.f32 %v3725_v49, %v3636_v39 }
 0x42f   :  { %v3627_v13 = vpop.f32.mrf.mxu0 }
 0x430   :  { %v3730_v62 = vpop.f32.mrf.mxu1  ;;  %v3637_v60 = vadd.f32 %v3627_v13, %v3528_v0 }
 0x431   :  { %v9628_v36 = vpop.f32.mrf.mxu0 }
 0x432   :  { %v9669_v44 = vpop.f32.mrf.mxu1  ;;  %v3740_v59 = vadd.f32 %v3730_v62, %v3637_v60 }
 0x435   :  { %v3632_v57 = vpop.f32.mrf.mxu0 }
 0x436   :  { %v3735_v12 = vpop.f32.mrf.mxu1  ;;  %v3638_v5 = vadd.f32 %v3632_v57, %v3533_v45 }
 0x437   :  { %v9631_v16 = vpop.f32.mrf.mxu0 }
 0x438   :  { %v9672_v22 = vpop.f32.mrf.mxu1  ;;  %v3741_v17 = vadd.f32 %v3735_v12, %v3638_v5 }
 0x44f   :  { %v3828_v40 = vpop.f32.mrf.mxu0 }
 0x450   :  { %v3931_v48 = vpop.f32.mrf.mxu1  ;;  %v3842_v21 = vadd.f32 %v3828_v40, %v3739_v47 }
 0x451   :  { %v9707_v19 = vpop.f32.mrf.mxu0 }
 0x452   :  { %v9748_v34 = vpop.f32.mrf.mxu1  ;;  %v3945_v20 = vadd.f32 %v3931_v48, %v3842_v21 }
 0x455   :  { %v3833_v27 = vpop.f32.mrf.mxu0 }
 0x456   :  { %v3936_v3 = vpop.f32.mrf.mxu1  ;;  %v3843_v6 = vadd.f32 %v3833_v27, %v3740_v59 }
 0x457   :  { %v9710_v56 = vpop.f32.mrf.mxu0 }
 0x458   :  { %v9751_v63 = vpop.f32.mrf.mxu1  ;;  %v3946_v10 = vadd.f32 %v3936_v3, %v3843_v6 }
 0x45b   :  { %v3838_v9 = vpop.f32.mrf.mxu0 }
 0x45c   :  { %v3941_v25 = vpop.f32.mrf.mxu1  ;;  %v3844_v29 = vadd.f32 %v3838_v9, %v3741_v17 }
 0x45d   :  { %v9713_v54 = vpop.f32.mrf.mxu0 }
 0x45e   :  { %v9754_v11 = vpop.f32.mrf.mxu1  ;;  %v3947_v31 = vadd.f32 %v3941_v25, %v3844_v29 }
 0x475   :  { %v4034_v46 = vpop.f32.mrf.mxu0 }
 0x476   :  { %v4137_v61 = vpop.f32.mrf.mxu1  ;;  %v4048_v2 = vadd.f32 %v4034_v46, %v3945_v20 }
 0x477   :  { %v9789_v33 = vpop.f32.mrf.mxu0 }
 0x478   :  { %v9830_v52 = vpop.f32.mrf.mxu1  ;;  %v4151_v32 = vadd.f32 %v4137_v61, %v4048_v2 }
 0x47a   :  { %v4142_v55 = vpop.f32.mrf.mxu1  ;;  %v4039_v24 = vpop.f32.mrf.mxu0 }
 0x47b   :  { %v4049_v35 = vadd.f32 %v4039_v24, %v3946_v10 }
 0x47c   :  { %v9833_v51 = vpop.f32.mrf.mxu1  ;;  %v9792_v38 = vpop.f32.mrf.mxu0 }
 0x47d   :  { %v4152_v30 = vadd.f32 %v4142_v55, %v4049_v35 }
 0x47e   :  { %v4147_v53 = vpop.f32.mrf.mxu1 }
 0x47f   :  { %v4044_v23 = vpop.f32.mrf.mxu0 }
 0x480   :  { %v9836_v58 = vpop.f32.mrf.mxu1  ;;  %v4050_v45 = vadd.f32 %v4044_v23, %v3947_v31 }
 0x481   :  { %v9795_v41 = vpop.f32.mrf.mxu0 }
 0x482   :  { %v4153_v26 = vadd.f32 %v4147_v53, %v4050_v45 }
 0x497   :  { %v4240_v0 = vpop.f32.mrf.mxu0 }
 0x498   :  { %v4254_v15 = vadd.f32 %v4240_v0, %v4151_v32 }
 0x499   :  { %v9871_v42 = vpop.f32.mrf.mxu0 }
 0x49a   :  { %v4264_v28 = vadd.f32 %v8105_v1, %v4254_v15 }
 0x49b   :  { %v4245_v18 = vpop.f32.mrf.mxu0 }
 0x49c   :  { %v4267_v49 = vmax.f32 %v4264_v28, 0.0  ;;  %v4255_v39 = vadd.f32 %v4245_v18, %v4152_v30 }
 0x49d   :  { %v9874_v50 = vpop.f32.mrf.mxu0 }
 0x49e   :  { %v4265_v47 = vadd.f32 %v8105_v1, %v4255_v39  ;;  %v4279_v13 = vrot.slane %v4267_v49, %v13776_v37  ;;  %4271 = vst.msk [vmem:[#allocation4] sm:$0x1] %vm4270_vm3, %v4267_v49  ;;  %v4305_v5 = vcombine.high %v4267_v49, %v4267_v49 }
 0x49f   :  { %v4250_v62 = vpop.f32.mrf.mxu0 }
 0x4a0   :  { %v4268_v60 = vmax.f32 %v4265_v47, 0.0  ;;  %v4256_v36 = vadd.f32 %v4250_v62, %v4153_v26  ;;  %4419 = vrot.lane.b32.xlu0 %v4279_v13, %s9949_s6  ;;  %v4287_v44 = vcombine.high %v4279_v13, %v4279_v13  ;;  %v4280_v12 = vrot.slane %v4279_v13, 7 }
 0x4a1   :  { %v9877_v59 = vpop.f32.mrf.mxu0  ;;  %v4312_v40 = vrot.slane %v4305_v5, %v13776_v37 }
 0x4a2   :  { %v4351_v57 = vcombine.high %v4268_v60, %v4268_v60  ;;  %4425 = vrot.lane.b32.xlu1 %v4287_v44, %s9950_s16  ;;  %v4266_v22 = vadd.f32 %v8105_v1, %v4256_v36  ;;  %v4281_v17 = vrot.slane %v4280_v12, 2  ;;  %v4338_v56 = vrot.slane %v4268_v60, %v13776_v37 }
 0x4a3   :  { %v4313_v34 = vcombine.high %v4312_v40, %v4312_v40  ;;  %v4298_v9 = vrot.slane %v4287_v44, 7 }
 0x4a4   :  { %v4358_v16 = vrot.slane %v4351_v57, %v13776_v37  ;;  %4288 = vrot.lane.b32.xlu0 %v4287_v44, %s9951_s17  ;;  %v4269_v48 = vmax.f32 %v4266_v22, 0.0  ;;  %v4344_v52 = vrot.slane %v4338_v56, 7 }
 0x4a5   :  { %v4299_v29 = vrot.slane %v4298_v9, 2  ;;  %v4319_v31 = vrot.slane %v4313_v34, 7  ;;  %v15637_v9 = vld [vmem:[#allocation203_spill] sm:$0xff] }
 0x4a6   :  { %4455 = vrot.lane.b32.xlu1 %v4358_v16, %s9949_s6  ;;  %4360 = vst.msk [vmem:[#allocation4 + $0x6] sm:$0x1] %vm4270_vm3, %v4358_v16  ;;  %v4367_v21 = vcombine.high %v4358_v16, %v4358_v16  ;;  %v4361_v19 = vrot.slane %v4358_v16, 7  ;;  %v4387_v27 = vrot.slane %v4269_v48, %v13776_v37  ;;  %v4401_v63 = vcombine.high %v4269_v48, %v4269_v48 }
 0x4a7   :  { %v4320_v61 = vrot.slane %v4319_v31, 2  ;;  %v4345_v24 = vrot.slane %v4344_v52, 2 }
 0x4a8   :  { %4282 = vrot.lane.b32.xlu0 %v4281_v17, %s9950_s16  ;;  %v4362_v20 = vrot.slane %v4361_v19, 2  ;;  %v4388_v3 = vcombine.high %v4387_v27, %v4387_v27  ;;  %v4408_v25 = vrot.slane %v4401_v63, %v13776_v37  ;;  %v4374_v54 = vrot.slane %v4367_v21, 7 }
 0x4aa   :  { %4461 = vrot.lane.b32.xlu1 %v4367_v21, %s9950_s16  ;;  %v4375_v11 = vrot.slane %v4374_v54, 2  ;;  %v4393_v46 = vrot.slane %v4388_v3, 7  ;;  %v4413_v55 = vrot.slane %v4408_v25, 7 }
 0x4ac   :  { %4314 = vrot.lane.b32.xlu0 %v4313_v34, %s9952_s18  ;;  %v4394_v33 = vrot.slane %v4393_v46, 2  ;;  %v4414_v51 = vrot.slane %v4413_v55, 2 }
 0x4ae   :  { %4363 = vrot.lane.b32.xlu1 %v4362_v20, %s9950_s16 }
 0x4b0   :  { %4436 = vrot.lane.b32.xlu0 %v4313_v34, %s9953_s19 }
 0x4b2   :  { %4389 = vrot.lane.b32.xlu1 %v4388_v3, %s9952_s18 }
 0x4b4   :  { %4339 = vrot.lane.b32.xlu0 %v4338_v56, %s9954_s20 }
 0x4b6   :  { %4471 = vrot.lane.b32.xlu1 %v4388_v3, %s9953_s19  ;;  %v15635_v3 = vld [vmem:[#allocation75_spill] sm:$0xff] }
 0x4b8   :  { %4447 = vrot.lane.b32.xlu0 %v4338_v56, %s9955_s7  ;;  %v15636_v56 = vld [vmem:[#allocation71_spill] sm:$0xff] }
 0x4b9   :  { %v8164_v63 = vcombine.high %v15636_v56, %v15635_v3  ;;  %v8163_v54 = vcombine.low %v15636_v56, %v15635_v3 }
 0x4ba   :  { %4409 = vrot.lane.b32.xlu1 %v4408_v25, %s9954_s20 }
 0x4bc   :  { %4300 = vrot.lane.b32.xlu0 %v4299_v29, %s9953_s19 }
 0x4be   :  { %4481 = vrot.lane.b32.xlu1 %v4408_v25, %s9955_s7  ;;  %v15638_v25 = vld [vmem:[#allocation199_spill] sm:$0xff] }
 0x4c0   :  { %4432 = vrot.lane.b32.xlu0 %v4299_v29, %s9951_s17  ;;  %v8292_v29 = vcombine.high %v15638_v25, %v15637_v9 }
 0x4c2   :  { %4376 = vrot.lane.b32.xlu1 %v4375_v11, %s9953_s19 }
 0x4c4   :  { %4368 = vrot.lane.b32.xlu0 %v4367_v21, %s9951_s17 }
 0x4c6   :  { %4467 = vrot.lane.b32.xlu1 %v4375_v11, %s9951_s17  ;;  %v8291_v11 = vcombine.low %v15638_v25, %v15637_v9 }
 0x4c8   :  { %4321 = vrot.lane.b32.xlu0 %v4320_v61, %s9955_s7 }
 0x4ca   :  { %4395 = vrot.lane.b32.xlu1 %v4394_v33, %s9955_s7 }
 0x4cc   :  { %4440 = vrot.lane.b32.xlu0 %v4320_v61, %s9952_s18 }
 0x4ce   :  { %4475 = vrot.lane.b32.xlu1 %v4394_v33, %s9952_s18 }
 0x4d0   :  { %4346 = vrot.lane.b32.xlu0 %v4345_v24, %s9949_s6 }
 0x4d2   :  { %4415 = vrot.lane.b32.xlu1 %v4414_v51, %s9949_s6 }
 0x4d4   :  { %4451 = vrot.lane.b32.xlu0 %v4345_v24, %s9954_s20 }
 0x4d6   :  { %4485 = vrot.lane.b32.xlu1 %v4414_v51, %s9954_s20 }
 0x512   :  { %v4420_v38 = vpop.permute.xlu0 %4419 }
 0x513   :  { %4422 = vst.msk [vmem:[#allocation4 + $0x1] sm:$0x1] %vm4270_vm3, %v4420_v38 }
 0x514   :  { %4424 = vst.msk [vmem:[#allocation4 + $0x1] sm:$0x1] %vm4285_vm4, %v4281_v17  ;;  %v4426_v53 = vpop.permute.xlu1 %4425 }
 0x515   :  { %v4427_v23 = vrot.slane %v4426_v53, 6 }
 0x516   :  { %v4289_v41 = vpop.permute.xlu0 %4288 }
 0x517   :  { %v4429_v6 = vsel %vm4428_vm7, %v4427_v23, %v4426_v53  ;;  %v4290_v2 = vrot.slane %v4289_v41, 6 }
 0x518   :  { %v4456_v14 = vpop.permute.xlu1 %4455  ;;  %4431 = vst.msk [vmem:[#allocation4 + $0x1] sm:$0x5] %vm13804_vm8, %v4429_v6 }
 0x519   :  { %4458 = vst.msk [vmem:[#allocation4 + $0x7] sm:$0x1] %vm4270_vm3, %v4456_v14  ;;  %v4292_v7 = vsel %vm4291_vm9, %v4290_v2, %v4289_v41  ;;  %vm4349_vm3 = vcmask 1041024  }
 0x51a   :  { %4460 = vst.msk [vmem:[#allocation4 + $0x7] sm:$0x1] %vm4285_vm4, %v4362_v20  ;;  %v4283_v43 = vpop.permute.xlu0 %4282 }
 0x51b   :  { %4286 = vst.msk [vmem:[#allocation4] sm:$0x1] %vm4285_vm4, %v4283_v43 }
 0x51c   :  { %v4462_v10 = vpop.permute.xlu1 %4461  ;;  %4297 = vst.msk [vmem:[#allocation4] sm:$0x5] %vm13804_vm8, %v4292_v7 }
 0x51d   :  { %v4463_v32 = vrot.slane %v4462_v10, 6 }
 0x51e   :  { %v4315_v35 = vpop.permute.xlu0 %4314 }
 0x51f   :  { %v4464_v8 = vsel %vm4428_vm7, %v4463_v32, %v4462_v10 }
 0x520   :  { %v4364_v0 = vpop.permute.xlu1 %4363  ;;  %4466 = vst.msk [vmem:[#allocation4 + $0x7] sm:$0x5] %vm13804_vm8, %v4464_v8 }
 0x521   :  { %4366 = vst.msk [vmem:[#allocation4 + $0x6] sm:$0x1] %vm4285_vm4, %v4364_v0 }
 0x522   :  { %v4437_v1 = vpop.permute.xlu0 %4436 }
 0x524   :  { %v4390_v15 = vpop.permute.xlu1 %4389 }
 0x526   :  { %v4340_v42 = vpop.permute.xlu0 %4339 }
 0x528   :  { %v4472_v30 = vpop.permute.xlu1 %4471 }
 0x52a   :  { %v4448_v45 = vpop.permute.xlu0 %4447 }
 0x52c   :  { %v4410_v28 = vpop.permute.xlu1 %4409 }
 0x52e   :  { %v4301_v18 = vpop.permute.xlu0 %4300 }
 0x52f   :  { %4304 = vst.msk [vmem:[#allocation4 + $0x2] sm:$0x1] %vm4303_vm10, %v4301_v18 }
 0x530   :  { %4318 = vst.msk [vmem:[#allocation4 + $0x2] sm:$0x1] %vm4317_vm11, %v4315_v35  ;;  %v4482_v49 = vpop.permute.xlu1 %4481 }
 0x532   :  { %v4433_v39 = vpop.permute.xlu0 %4432 }
 0x533   :  { %4435 = vst.msk [vmem:[#allocation4 + $0x3] sm:$0x1] %vm4303_vm10, %v4433_v39 }
 0x534   :  { %4439 = vst.msk [vmem:[#allocation4 + $0x3] sm:$0x1] %vm4317_vm11, %v4437_v1  ;;  %v4377_v50 = vpop.permute.xlu1 %4376 }
 0x536   :  { %v4369_v26 = vpop.permute.xlu0 %4368 }
 0x537   :  { %v4370_v47 = vrot.slane %v4369_v26, 6 }
 0x538   :  { %v4468_v13 = vpop.permute.xlu1 %4467 }
 0x539   :  { %v4371_v62 = vsel %vm4291_vm9, %v4370_v47, %v4369_v26  ;;  %4470 = vst.msk [vmem:[#allocation4 + $0x9] sm:$0x1] %vm4303_vm10, %v4468_v13 }
 0x53a   :  { %4373 = vst.msk [vmem:[#allocation4 + $0x6] sm:$0x5] %vm13804_vm8, %v4371_v62  ;;  %v4322_v60 = vpop.permute.xlu0 %4321 }
 0x53b   :  { %4474 = vst.msk [vmem:[#allocation4 + $0x9] sm:$0x1] %vm4317_vm11, %v4472_v30  ;;  %v4323_v44 = vrot.slane %v4322_v60, 6 }
 0x53c   :  { %4379 = vst.msk [vmem:[#allocation4 + $0x8] sm:$0x1] %vm4303_vm10, %v4377_v50  ;;  %v4396_v59 = vpop.permute.xlu1 %4395 }
 0x53d   :  { %4392 = vst.msk [vmem:[#allocation4 + $0x8] sm:$0x1] %vm4317_vm11, %v4390_v15  ;;  %v4325_v57 = vsel %vm4324_vm14, %v4323_v44, %v4322_v60  ;;  %v4397_v12 = vrot.slane %v4396_v59, 6 }
 0x53e   :  { %4330 = vst.msk [vmem:[#allocation4 + $0x2] sm:$0x5] %vm13831_vm15, %v4325_v57  ;;  %v4441_v5 = vpop.permute.xlu0 %4440 }
 0x53f   :  { %v4398_v16 = vsel %vm4324_vm14, %v4397_v12, %v4396_v59  ;;  %v4442_v22 = vrot.slane %v4441_v5, 6  ;;  %4343 = vst.msk [vmem:[#allocation4 + $0x4] sm:$0x1] %vm4342_vm1, %v4340_v42 }
 0x540   :  { %4400 = vst.msk [vmem:[#allocation4 + $0x8] sm:$0x5] %vm13831_vm15, %v4398_v16  ;;  %v4476_v17 = vpop.permute.xlu1 %4475 }
 0x541   :  { %v4444_v40 = vsel %vm4443_vm2, %v4442_v22, %v4441_v5  ;;  %v4477_v48 = vrot.slane %v4476_v17, 6  ;;  %4412 = vst.msk [vmem:[#allocation4 + $0xa] sm:$0x1] %vm4342_vm1, %v4410_v28 }
 0x542   :  { %4446 = vst.msk [vmem:[#allocation4 + $0x3] sm:$0x5] %vm13831_vm15, %v4444_v40  ;;  %v4347_v21 = vpop.permute.xlu0 %4346 }
 0x543   :  { %v4478_v19 = vsel %vm4443_vm2, %v4477_v48, %v4476_v17  ;;  %4350 = vst.msk [vmem:[#allocation4 + $0x4] sm:$0x1] %vm4349_vm3, %v4347_v21 }
 0x544   :  { %4450 = vst.msk [vmem:[#allocation4 + $0x5] sm:$0x1] %vm4342_vm1, %v4448_v45  ;;  %v4416_v34 = vpop.permute.xlu1 %4415 }
 0x545   :  { %4480 = vst.msk [vmem:[#allocation4 + $0x9] sm:$0x5] %vm13831_vm15, %v4478_v19 }
 0x546   :  { %4484 = vst.msk [vmem:[#allocation4 + $0xb] sm:$0x1] %vm4342_vm1, %v4482_v49  ;;  %v4452_v20 = vpop.permute.xlu0 %4451 }
 0x547   :  { %4418 = vst.msk [vmem:[#allocation4 + $0xa] sm:$0x1] %vm4349_vm3, %v4416_v34  ;;  %4454 = vst.msk [vmem:[#allocation4 + $0x5] sm:$0x1] %vm4349_vm3, %v4452_v20 }
 0x548   :  { %v4486_v27 = vpop.permute.xlu1 %4485 }
 0x549   :  { %4488 = vst.msk [vmem:[#allocation4 + $0xb] sm:$0x1] %vm4349_vm3, %v4486_v27 }
 0x54a   :  { %9940 = dma.done.wait [#allocation6], 49152 }
 0x54b   :  { %9941 = vsyncadd [#allocation6], 4294918144  ;;  %v15639_v31 = vld [vmem:[#allocation67_spill] sm:$0xff]  ;;  %6880 = vmatprep.subr.bf16.mxu1 %v8164_v63  ;;  %6921 = vmatprep.subr.bf16.mxu0 %v8292_v29 }
 0x54c   :  { %v15640_v46 = vld [vmem:[#allocation63_spill] sm:$0xff]  ;;  %6881 = vmatpush1.bf16.msra.mxu1 %v8163_v54  ;;  %6922 = vmatpush1.bf16.msra.mxu0 %v8291_v11 }
 0x54d   :  { %v8156_v61 = vcombine.high %v15640_v46, %v15639_v31  ;;  %v15641_v33 = vld [vmem:[#allocation195_spill] sm:$0xff]  ;;  %v8155_v24 = vcombine.low %v15640_v46, %v15639_v31 }
 0x54e   :  { %v15642_v52 = vld [vmem:[#allocation191_spill] sm:$0xff]  ;;  %v4493_v50 = vld [vmem:[#allocation4] sm:$0xff] }
 0x54f   :  { %v8284_v55 = vcombine.high %v15642_v52, %v15641_v33  ;;  %v8283_v51 = vcombine.low %v15642_v52, %v15641_v33  ;;  %6882 = vmatprep.subr.bf16.mxu1 %v8156_v61  ;;  %v15643_v38 = vld [vmem:[#allocation59_spill] sm:$0xff]  ;;  %v13897_v44 = vrot.slane %v4493_v50, %v13776_v37  ;;  %v4497_v59 = vcombine.high %v4493_v50, %v4493_v50 }
 0x550   :  { %v15644_v53 = vld [vmem:[#allocation55_spill] sm:$0xff]  ;;  %6883 = vmatpush1.bf16.msra.mxu1 %v8155_v24 }
 0x551   :  { %6923 = vmatprep.subr.bf16.mxu0 %v8284_v55  ;;  %v8148_v23 = vcombine.high %v15644_v53, %v15643_v38  ;;  %v15645_v58 = vld [vmem:[#allocation187_spill] sm:$0xff]  ;;  %v8147_v2 = vcombine.low %v15644_v53, %v15643_v38  ;;  %v4512_v21 = vcombine.high %v13897_v44, %v13897_v44  ;;  %v13910_v19 = vrot.slane %v4497_v59, %v13776_v37 }
 0x552   :  { %v15646_v41 = vld [vmem:[#allocation183_spill] sm:$0xff]  ;;  %6924 = vmatpush1.bf16.msra.mxu0 %v8283_v51 }
 0x553   :  { %v8276_v6 = vcombine.high %v15646_v41, %v15645_v58  ;;  %v8275_v14 = vcombine.low %v15646_v41, %v15645_v58  ;;  %6884 = vmatprep.subr.bf16.mxu1 %v8148_v23  ;;  %v15647_v43 = vld [vmem:[#allocation51_spill] sm:$0xff]  ;;  %v13912_v34 = vpack.c.bf16 %v4512_v21, %v4512_v21  ;;  %v4513_v20 = vcombine.high %v13910_v19, %v13910_v19 }
 0x554   :  { %v15648_v7 = vld [vmem:[#allocation47_spill] sm:$0xff]  ;;  %6885 = vmatpush1.bf16.msra.mxu1 %v8147_v2 }
 0x555   :  { %6925 = vmatprep.subr.bf16.mxu0 %v8276_v6  ;;  %v8140_v10 = vcombine.high %v15648_v7, %v15647_v43  ;;  %v15649_v32 = vld [vmem:[#allocation179_spill] sm:$0xff]  ;;  %v8139_v0 = vcombine.low %v15648_v7, %v15647_v43  ;;  %v13924_v11 = vpack.c.bf16 %v4513_v20, %v4513_v20  ;;  %6912 = vmatprep.mubr.bf16.mxu1 %v13912_v34 }
 0x556   :  { %v15650_v35 = vld [vmem:[#allocation175_spill] sm:$0xff]  ;;  %6926 = vmatpush1.bf16.msra.mxu0 %v8275_v14 }
 0x557   :  { %v8268_v8 = vcombine.high %v15650_v35, %v15649_v32  ;;  %v8267_v1 = vcombine.low %v15650_v35, %v15649_v32  ;;  %6886 = vmatprep.subr.bf16.mxu1 %v8140_v10  ;;  %v15651_v15 = vld [vmem:[#allocation43_spill] sm:$0xff]  ;;  %6953 = vmatprep.mubr.bf16.mxu0 %v13924_v11 }
 0x558   :  { %v15652_v42 = vld [vmem:[#allocation39_spill] sm:$0xff]  ;;  %6887 = vmatpush1.bf16.msra.mxu1 %v8139_v0 }
 0x559   :  { %6927 = vmatprep.subr.bf16.mxu0 %v8268_v8  ;;  %v8132_v30 = vcombine.high %v15652_v42, %v15651_v15  ;;  %v15653_v45 = vld [vmem:[#allocation171_spill] sm:$0xff]  ;;  %v8131_v49 = vcombine.low %v15652_v42, %v15651_v15 }
 0x55a   :  { %v15654_v28 = vld [vmem:[#allocation167_spill] sm:$0xff]  ;;  %6928 = vmatpush1.bf16.msra.mxu0 %v8267_v1 }
 0x55b   :  { %v8260_v18 = vcombine.high %v15654_v28, %v15653_v45  ;;  %v8259_v39 = vcombine.low %v15654_v28, %v15653_v45  ;;  %6888 = vmatprep.subr.bf16.mxu1 %v8132_v30  ;;  %v15655_v26 = vld [vmem:[#allocation35_spill] sm:$0xff] }
 0x55c   :  { %v15656_v47 = vld [vmem:[#allocation31_spill] sm:$0xff]  ;;  %6889 = vmatpush1.bf16.msra.mxu1 %v8131_v49 }
 0x55d   :  { %6929 = vmatprep.subr.bf16.mxu0 %v8260_v18  ;;  %v8124_v13 = vcombine.high %v15656_v47, %v15655_v26  ;;  %v15657_v62 = vld [vmem:[#allocation163_spill] sm:$0xff]  ;;  %v8123_v57 = vcombine.low %v15656_v47, %v15655_v26 }
 0x55e   :  { %v15658_v60 = vld [vmem:[#allocation159_spill] sm:$0xff]  ;;  %6930 = vmatpush1.bf16.msra.mxu0 %v8259_v39 }
 0x55f   :  { %v8252_v36 = vcombine.high %v15658_v60, %v15657_v62  ;;  %v8251_v12 = vcombine.low %v15658_v60, %v15657_v62  ;;  %v15659_v5 = vld [vmem:[#allocation27_spill] sm:$0xff]  ;;  %6890 = vmatprep.subr.bf16.mxu1 %v8124_v13 }
 0x560   :  { %v15660_v16 = vld [vmem:[#allocation23_spill] sm:$0xff]  ;;  %6891 = vmatpush1.bf16.msra.mxu1 %v8123_v57 }
 0x561   :  { %v8116_v22 = vcombine.high %v15660_v16, %v15659_v5  ;;  %6931 = vmatprep.subr.bf16.mxu0 %v8252_v36  ;;  %v15661_v17 = vld [vmem:[#allocation155_spill] sm:$0xff]  ;;  %v8115_v27 = vcombine.low %v15660_v16, %v15659_v5 }
 0x562   :  { %v15662_v40 = vld [vmem:[#allocation151_spill] sm:$0xff]  ;;  %6932 = vmatpush1.bf16.msra.mxu0 %v8251_v12 }
 0x563   :  { %v8244_v48 = vcombine.high %v15662_v40, %v15661_v17  ;;  %v8243_v3 = vcombine.low %v15662_v40, %v15661_v17  ;;  %6892 = vmatprep.subr.bf16.mxu1 %v8116_v22  ;;  %v15663_v56 = vld [vmem:[#allocation19_spill] sm:$0xff] }
 0x564   :  { %v15664_v63 = vld [vmem:[#allocation15_spill] sm:$0xff]  ;;  %6893 = vmatpush1.bf16.msra.mxu1 %v8115_v27 }
 0x565   :  { %6933 = vmatprep.subr.bf16.mxu0 %v8244_v48  ;;  %v8108_v9 = vcombine.high %v15664_v63, %v15663_v56  ;;  %v15665_v25 = vld [vmem:[#allocation147_spill] sm:$0xff]  ;;  %v8107_v31 = vcombine.low %v15664_v63, %v15663_v56 }
 0x566   :  { %v15666_v29 = vld [vmem:[#allocation143_spill] sm:$0xff]  ;;  %6934 = vmatpush1.bf16.msra.mxu0 %v8243_v3 }
 0x567   :  { %v8236_v54 = vcombine.high %v15666_v29, %v15665_v25  ;;  %v8235_v46 = vcombine.low %v15666_v29, %v15665_v25  ;;  %6894 = vmatprep.subr.bf16.mxu1 %v8108_v9  ;;  %v15667_v61 = vld [vmem:[#allocation139_spill] sm:$0xff] }
 0x568   :  { %v15668_v33 = vld [vmem:[#allocation135_spill] sm:$0xff]  ;;  %6895 = vmatpush1.bf16.msra.mxu1 %v8107_v31 }
 0x569   :  { %6935 = vmatprep.subr.bf16.mxu0 %v8236_v54  ;;  %v8228_v52 = vcombine.high %v15668_v33, %v15667_v61  ;;  %v15669_v55 = vld [vmem:[#allocation267_spill] sm:$0xff]  ;;  %v8227_v38 = vcombine.low %v15668_v33, %v15667_v61 }
 0x56a   :  { %v15670_v24 = vld [vmem:[#allocation263_spill] sm:$0xff]  ;;  %6936 = vmatpush1.bf16.msra.mxu0 %v8235_v46 }
 0x56b   :  { %v8356_v51 = vcombine.high %v15670_v24, %v15669_v55  ;;  %v8355_v53 = vcombine.low %v15670_v24, %v15669_v55  ;;  %6896 = vmatprep.subr.bf16.mxu1 %v8228_v52  ;;  %v15671_v23 = vld [vmem:[#allocation131_spill] sm:$0xff]  ;;  %v13992_v24 = vld.sshfl [vmem:[#allocation4 + $0x8] sm:$0x33 pattern:$0x76325410] }
 0x56c   :  { %v15672_v58 = vld [vmem:[#allocation127_spill] sm:$0xff]  ;;  %6897 = vmatpush2.bf16.msra.mxu1 %v8227_v38 }
 0x56d   :  { %6937 = vmatprep.subr.bf16.mxu0 %v8356_v51  ;;  %v8220_v41 = vcombine.high %v15672_v58, %v15671_v23  ;;  %v15673_v6 = vld [vmem:[#allocation259_spill] sm:$0xff]  ;;  %v8219_v43 = vcombine.low %v15672_v58, %v15671_v23 }
 0x56e   :  { %v15674_v2 = vld [vmem:[#allocation255_spill] sm:$0xff]  ;;  %6938 = vmatpush2.bf16.msra.mxu0 %v8355_v53 }
 0x56f   :  { %v8348_v14 = vcombine.high %v15674_v2, %v15673_v6  ;;  %v8347_v7 = vcombine.low %v15674_v2, %v15673_v6  ;;  %6898 = vmatprep.subr.bf16.mxu1 %v8220_v41  ;;  %v15675_v10 = vld [vmem:[#allocation123_spill] sm:$0xff]  ;;  %v15701_v41 = vld [vmem:[#allocation76_spill] sm:$0xff] }
 0x570   :  { %v15676_v32 = vld [vmem:[#allocation119_spill] sm:$0xff]  ;;  %6899 = vmatpush2.bf16.msra.mxu1 %v8219_v43  ;;  %v15702_v6 = vld [vmem:[#allocation72_spill] sm:$0xff]  ;;  %v14006_v43 = vpack.c.bf16 %v13897_v44, %v13897_v44 }
 0x571   :  { %6939 = vmatprep.subr.bf16.mxu0 %v8348_v14  ;;  %v8212_v35 = vcombine.high %v15676_v32, %v15675_v10  ;;  %v15677_v8 = vld [vmem:[#allocation251_spill] sm:$0xff]  ;;  %v8211_v15 = vcombine.low %v15676_v32, %v15675_v10  ;;  %v8166_v2 = vcombine.high %v15702_v6, %v15701_v41  ;;  %v4521_v14 = vcombine.high %v13992_v24, %v13992_v24  ;;  %v15706_v44 = vld [vmem:[#allocation64_spill] sm:$0xff] }
 0x572   :  { %v15678_v0 = vld [vmem:[#allocation247_spill] sm:$0xff]  ;;  %6940 = vmatpush2.bf16.msra.mxu0 %v8347_v7  ;;  %v14010_v7 = vpack.c.bf16 %v13910_v19, %v13910_v19  ;;  %v8165_v32 = vcombine.low %v15702_v6, %v15701_v41  ;;  %v15729_v6 = vld [vmem:[#allocation20_spill] sm:$0xff] }
 0x573   :  { %v8340_v1 = vcombine.high %v15678_v0, %v15677_v8  ;;  %v8339_v42 = vcombine.low %v15678_v0, %v15677_v8  ;;  %6900 = vmatprep.subr.bf16.mxu1 %v8212_v35  ;;  %v15679_v30 = vld [vmem:[#allocation115_spill] sm:$0xff] }
 0x574   :  { %v15680_v45 = vld [vmem:[#allocation111_spill] sm:$0xff]  ;;  %6901 = vmatpush2.bf16.msra.mxu1 %v8211_v15 }
 0x575   :  { %6941 = vmatprep.subr.bf16.mxu0 %v8340_v1  ;;  %v8204_v28 = vcombine.high %v15680_v45, %v15679_v30  ;;  %v15681_v18 = vld [vmem:[#allocation243_spill] sm:$0xff]  ;;  %v8203_v50 = vcombine.low %v15680_v45, %v15679_v30  ;;  %v15705_v1 = vld [vmem:[#allocation68_spill] sm:$0xff] }
 0x576   :  { %v15682_v49 = vld [vmem:[#allocation239_spill] sm:$0xff]  ;;  %6942 = vmatpush2.bf16.msra.mxu0 %v8339_v42  ;;  %v8158_v15 = vcombine.high %v15706_v44, %v15705_v1  ;;  %v14020_v42 = vpack.c.bf16 %v4521_v14, %v4521_v14  ;;  %v8157_v30 = vcombine.low %v15706_v44, %v15705_v1  ;;  %v15733_v1 = vld [vmem:[#allocation140_spill] sm:$0xff] }
 0x577   :  { %v8332_v39 = vcombine.high %v15682_v49, %v15681_v18  ;;  %v8331_v26 = vcombine.low %v15682_v49, %v15681_v18  ;;  %6902 = vmatprep.subr.bf16.mxu1 %v8204_v28  ;;  %v15683_v47 = vld [vmem:[#allocation107_spill] sm:$0xff]  ;;  %v15709_v49 = vld [vmem:[#allocation60_spill] sm:$0xff] }
 0x578   :  { %v15684_v13 = vld [vmem:[#allocation103_spill] sm:$0xff]  ;;  %6903 = vmatpush2.bf16.msra.mxu1 %v8203_v50  ;;  %v15734_v44 = vld [vmem:[#allocation136_spill] sm:$0xff] }
 0x579   :  { %6943 = vmatprep.subr.bf16.mxu0 %v8332_v39  ;;  %v8196_v62 = vcombine.high %v15684_v13, %v15683_v47  ;;  %v15685_v60 = vld [vmem:[#allocation235_spill] sm:$0xff]  ;;  %v8195_v57 = vcombine.low %v15684_v13, %v15683_v47  ;;  %v15710_v39 = vld [vmem:[#allocation56_spill] sm:$0xff] }
 0x57a   :  { %v15686_v36 = vld [vmem:[#allocation231_spill] sm:$0xff]  ;;  %6944 = vmatpush2.bf16.msra.mxu0 %v8331_v26  ;;  %v8150_v50 = vcombine.high %v15710_v39, %v15709_v49  ;;  %v8149_v47 = vcombine.low %v15710_v39, %v15709_v49  ;;  %v15737_v49 = vld [vmem:[#allocation132_spill] sm:$0xff] }
 0x57b   :  { %v8324_v59 = vcombine.high %v15686_v36, %v15685_v60  ;;  %v8323_v12 = vcombine.low %v15686_v36, %v15685_v60  ;;  %6904 = vmatprep.subr.bf16.mxu1 %v8196_v62  ;;  %v15687_v5 = vld [vmem:[#allocation99_spill] sm:$0xff]  ;;  %v15713_v36 = vld [vmem:[#allocation52_spill] sm:$0xff] }
 0x57c   :  { %v15688_v16 = vld [vmem:[#allocation95_spill] sm:$0xff]  ;;  %6905 = vmatpush2.bf16.msra.mxu1 %v8195_v57  ;;  %v15738_v39 = vld [vmem:[#allocation128_spill] sm:$0xff] }
 0x57d   :  { %6945 = vmatprep.subr.bf16.mxu0 %v8324_v59  ;;  %v8188_v22 = vcombine.high %v15688_v16, %v15687_v5  ;;  %v15689_v17 = vld [vmem:[#allocation227_spill] sm:$0xff]  ;;  %v8187_v21 = vcombine.low %v15688_v16, %v15687_v5  ;;  %v15714_v59 = vld [vmem:[#allocation48_spill] sm:$0xff] }
 0x57e   :  { %v15690_v40 = vld [vmem:[#allocation223_spill] sm:$0xff]  ;;  %6946 = vmatpush2.bf16.msra.mxu0 %v8323_v12  ;;  %v8142_v57 = vcombine.high %v15714_v59, %v15713_v36  ;;  %v8141_v5 = vcombine.low %v15714_v59, %v15713_v36  ;;  %v15741_v36 = vld [vmem:[#allocation124_spill] sm:$0xff] }
 0x57f   :  { %v8316_v48 = vcombine.high %v15690_v40, %v15689_v17  ;;  %v8315_v20 = vcombine.low %v15690_v40, %v15689_v17  ;;  %6906 = vmatprep.subr.bf16.mxu1 %v8188_v22  ;;  %v15691_v27 = vld [vmem:[#allocation91_spill] sm:$0xff]  ;;  %v15717_v40 = vld [vmem:[#allocation44_spill] sm:$0xff] }
 0x580   :  { %v15692_v3 = vld [vmem:[#allocation87_spill] sm:$0xff]  ;;  %6907 = vmatpush2.bf16.msra.mxu1 %v8187_v21  ;;  %v15742_v59 = vld [vmem:[#allocation120_spill] sm:$0xff] }
 0x581   :  { %6947 = vmatprep.subr.bf16.mxu0 %v8316_v48  ;;  %v8180_v56 = vcombine.high %v15692_v3, %v15691_v27  ;;  %v15693_v63 = vld [vmem:[#allocation219_spill] sm:$0xff]  ;;  %v8179_v29 = vcombine.low %v15692_v3, %v15691_v27  ;;  %v15718_v48 = vld [vmem:[#allocation40_spill] sm:$0xff] }
 0x582   :  { %v15694_v9 = vld [vmem:[#allocation215_spill] sm:$0xff]  ;;  %6948 = vmatpush2.bf16.msra.mxu0 %v8315_v20  ;;  %v8134_v21 = vcombine.high %v15718_v48, %v15717_v40  ;;  %v8133_v27 = vcombine.low %v15718_v48, %v15717_v40  ;;  %v15745_v40 = vld [vmem:[#allocation116_spill] sm:$0xff] }
 0x583   :  { %v8308_v25 = vcombine.high %v15694_v9, %v15693_v63  ;;  %v8307_v54 = vcombine.low %v15694_v9, %v15693_v63  ;;  %6908 = vmatprep.subr.bf16.mxu1 %v8180_v56  ;;  %v15695_v31 = vld [vmem:[#allocation83_spill] sm:$0xff]  ;;  %v15721_v9 = vld [vmem:[#allocation36_spill] sm:$0xff] }
 0x584   :  { %v15696_v46 = vld [vmem:[#allocation79_spill] sm:$0xff]  ;;  %6909 = vmatpush2.bf16.msra.mxu1 %v8179_v29  ;;  %v15746_v48 = vld [vmem:[#allocation112_spill] sm:$0xff] }
 0x585   :  { %6949 = vmatprep.subr.bf16.mxu0 %v8308_v25  ;;  %v8172_v61 = vcombine.high %v15696_v46, %v15695_v31  ;;  %v15697_v33 = vld [vmem:[#allocation211_spill] sm:$0xff]  ;;  %v8171_v51 = vcombine.low %v15696_v46, %v15695_v31  ;;  %v15722_v25 = vld [vmem:[#allocation32_spill] sm:$0xff] }
 0x586   :  { %v15698_v52 = vld [vmem:[#allocation207_spill] sm:$0xff]  ;;  %6950 = vmatpush2.bf16.msra.mxu0 %v8307_v54  ;;  %v8126_v29 = vcombine.high %v15722_v25, %v15721_v9  ;;  %v8125_v31 = vcombine.low %v15722_v25, %v15721_v9  ;;  %v15749_v9 = vld [vmem:[#allocation108_spill] sm:$0xff] }
 0x587   :  { %v8300_v55 = vcombine.high %v15698_v52, %v15697_v33  ;;  %v8299_v38 = vcombine.low %v15698_v52, %v15697_v33  ;;  %6910 = vmatprep.subr.bf16.mxu1 %v8172_v61  ;;  %v15699_v53 = vld [vmem:[#allocation331_spill] sm:$0xff]  ;;  %v15725_v52 = vld [vmem:[#allocation28_spill] sm:$0xff] }
 0x588   :  { %v15700_v23 = vld [vmem:[#allocation327_spill] sm:$0xff]  ;;  %6911 = vmatpush2.bf16.msra.mxu1 %v8171_v51  ;;  %v15750_v25 = vld [vmem:[#allocation104_spill] sm:$0xff] }
 0x589   :  { %6951 = vmatprep.subr.bf16.mxu0 %v8300_v55  ;;  %v8420_v58 = vcombine.high %v15700_v23, %v15699_v53  ;;  %v8419_v10 = vcombine.low %v15700_v23, %v15699_v53  ;;  %v15703_v35 = vld [vmem:[#allocation323_spill] sm:$0xff]  ;;  %v15726_v55 = vld [vmem:[#allocation24_spill] sm:$0xff] }
 0x58a   :  { %6952 = vmatpush2.bf16.msra.mxu0 %v8299_v38  ;;  %v15704_v8 = vld [vmem:[#allocation319_spill] sm:$0xff]  ;;  %v8118_v51 = vcombine.high %v15726_v55, %v15725_v52  ;;  %v8117_v53 = vcombine.low %v15726_v55, %v15725_v52  ;;  %v15753_v52 = vld [vmem:[#allocation100_spill] sm:$0xff] }
 0x58b   :  { %6962 = vmatprep.subr.bf16.mxu1 %v8420_v58  ;;  %7003 = vmatprep.subr.bf16.mxu0 %v8166_v2  ;;  %v8412_v0 = vcombine.high %v15704_v8, %v15703_v35  ;;  %v8411_v19 = vcombine.low %v15704_v8, %v15703_v35  ;;  %v15707_v45 = vld [vmem:[#allocation315_spill] sm:$0xff]  ;;  %v15730_v2 = vld [vmem:[#allocation16_spill] sm:$0xff] }
 0x58c   :  { %6913 = vmatmul.mubr.bf16.vlgmr.msra.gmra.mxu1 %v14006_v43  ;;  %v15708_v28 = vld [vmem:[#allocation311_spill] sm:$0xff]  ;;  %v8110_v14 = vcombine.high %v15730_v2, %v15729_v6  ;;  %v15754_v55 = vld [vmem:[#allocation96_spill] sm:$0xff] }
 0x58d   :  { %6954 = vmatmul.mubr.bf16.vlgmr.msra.gmra.mxu0 %v14010_v7  ;;  %6963 = vmatpush1.bf16.msra.mxu1 %v8419_v10  ;;  %v8404_v18 = vcombine.high %v15708_v28, %v15707_v45  ;;  %v8403_v26 = vcombine.low %v15708_v28, %v15707_v45  ;;  %v15711_v13 = vld [vmem:[#allocation307_spill] sm:$0xff] }
 0x58e   :  { %7004 = vmatpush1.bf16.msra.mxu0 %v8165_v32  ;;  %6964 = vmatprep.subr.bf16.mxu1 %v8412_v0  ;;  %v15712_v62 = vld [vmem:[#allocation303_spill] sm:$0xff]  ;;  %v8109_v32 = vcombine.low %v15730_v2, %v15729_v6  ;;  %v15757_v6 = vld [vmem:[#allocation92_spill] sm:$0xff] }
 0x58f   :  { %7005 = vmatprep.subr.bf16.mxu0 %v8158_v15  ;;  %6994 = vmatprep.mubr.bf16.mxu1 %v14020_v42  ;;  %v8396_v60 = vcombine.high %v15712_v62, %v15711_v13  ;;  %v8395_v12 = vcombine.low %v15712_v62, %v15711_v13  ;;  %v15715_v16 = vld [vmem:[#allocation299_spill] sm:$0xff]  ;;  %v8230_v15 = vcombine.high %v15734_v44, %v15733_v1  ;;  %v15758_v2 = vld [vmem:[#allocation88_spill] sm:$0xff] }
 0x590   :  { %7035 = vmatprep.mubr.bf16.mxu0 %v13912_v34  ;;  %v15716_v22 = vld [vmem:[#allocation295_spill] sm:$0xff] }
 0x591   :  { %6965 = vmatpush1.bf16.msra.mxu1 %v8411_v19  ;;  %v8388_v17 = vcombine.high %v15716_v22, %v15715_v16  ;;  %v8387_v20 = vcombine.low %v15716_v22, %v15715_v16  ;;  %v15719_v3 = vld [vmem:[#allocation291_spill] sm:$0xff] }
 0x592   :  { %7006 = vmatpush1.bf16.msra.mxu0 %v8157_v30  ;;  %6966 = vmatprep.subr.bf16.mxu1 %v8404_v18  ;;  %v15720_v56 = vld [vmem:[#allocation287_spill] sm:$0xff]  ;;  %v8229_v30 = vcombine.low %v15734_v44, %v15733_v1  ;;  %v15761_v1 = vld [vmem:[#allocation84_spill] sm:$0xff] }
 0x593   :  { %7007 = vmatprep.subr.bf16.mxu0 %v8150_v50  ;;  %v8380_v63 = vcombine.high %v15720_v56, %v15719_v3  ;;  %v8379_v54 = vcombine.low %v15720_v56, %v15719_v3  ;;  %v15723_v46 = vld [vmem:[#allocation283_spill] sm:$0xff]  ;;  %v8222_v50 = vcombine.high %v15738_v39, %v15737_v49  ;;  %v15762_v44 = vld [vmem:[#allocation80_spill] sm:$0xff] }
 0x594   :  { %v15724_v61 = vld [vmem:[#allocation279_spill] sm:$0xff] }
 0x595   :  { %6967 = vmatpush1.bf16.msra.mxu1 %v8403_v26  ;;  %v8372_v33 = vcombine.high %v15724_v61, %v15723_v46  ;;  %v8371_v38 = vcombine.low %v15724_v61, %v15723_v46  ;;  %v15727_v23 = vld [vmem:[#allocation275_spill] sm:$0xff] }
 0x596   :  { %7008 = vmatpush1.bf16.msra.mxu0 %v8149_v47  ;;  %6968 = vmatprep.subr.bf16.mxu1 %v8396_v60  ;;  %v15728_v58 = vld [vmem:[#allocation271_spill] sm:$0xff]  ;;  %v8221_v47 = vcombine.low %v15738_v39, %v15737_v49  ;;  %v15765_v49 = vld [vmem:[#allocation332_spill] sm:$0xff] }
 0x597   :  { %7009 = vmatprep.subr.bf16.mxu0 %v8142_v57  ;;  %v8364_v41 = vcombine.high %v15728_v58, %v15727_v23  ;;  %v8363_v10 = vcombine.low %v15728_v58, %v15727_v23  ;;  %v15731_v35 = vld [vmem:[#allocation395_spill] sm:$0xff]  ;;  %v8214_v57 = vcombine.high %v15742_v59, %v15741_v36  ;;  %v15766_v39 = vld [vmem:[#allocation328_spill] sm:$0xff] }
 0x598   :  { %v15732_v8 = vld [vmem:[#allocation391_spill] sm:$0xff] }
 0x599   :  { %6969 = vmatpush1.bf16.msra.mxu1 %v8395_v12  ;;  %v8484_v0 = vcombine.high %v15732_v8, %v15731_v35  ;;  %v8483_v19 = vcombine.low %v15732_v8, %v15731_v35  ;;  %v15735_v45 = vld [vmem:[#allocation387_spill] sm:$0xff] }
 0x59a   :  { %7010 = vmatpush1.bf16.msra.mxu0 %v8141_v5  ;;  %6970 = vmatprep.subr.bf16.mxu1 %v8388_v17  ;;  %v15736_v28 = vld [vmem:[#allocation383_spill] sm:$0xff]  ;;  %v8213_v5 = vcombine.low %v15742_v59, %v15741_v36  ;;  %v15769_v59 = vld [vmem:[#allocation324_spill] sm:$0xff] }
 0x59b   :  { %7011 = vmatprep.subr.bf16.mxu0 %v8134_v21  ;;  %v8476_v18 = vcombine.high %v15736_v28, %v15735_v45  ;;  %v8475_v26 = vcombine.low %v15736_v28, %v15735_v45  ;;  %v15739_v13 = vld [vmem:[#allocation379_spill] sm:$0xff]  ;;  %v8206_v21 = vcombine.high %v15746_v48, %v15745_v40  ;;  %v15763_v45 = vld [vmem:[#allocation204_spill] sm:$0xff] }
 0x59c   :  { %v15740_v62 = vld [vmem:[#allocation375_spill] sm:$0xff]  ;;  %v15764_v28 = vld [vmem:[#allocation200_spill] sm:$0xff] }
 0x59d   :  { %6971 = vmatpush1.bf16.msra.mxu1 %v8387_v20  ;;  %v8468_v60 = vcombine.high %v15740_v62, %v15739_v13  ;;  %v8467_v12 = vcombine.low %v15740_v62, %v15739_v13  ;;  %v15743_v16 = vld [vmem:[#allocation371_spill] sm:$0xff]  ;;  %v8421_v13 = vcombine.low %v15766_v39, %v15765_v49  ;;  %v15767_v62 = vld [vmem:[#allocation196_spill] sm:$0xff] }
 0x59e   :  { %7012 = vmatpush1.bf16.msra.mxu0 %v8133_v27  ;;  %6972 = vmatprep.subr.bf16.mxu1 %v8380_v63  ;;  %v15744_v22 = vld [vmem:[#allocation367_spill] sm:$0xff]  ;;  %v8205_v27 = vcombine.low %v15746_v48, %v15745_v40  ;;  %v15773_v40 = vld [vmem:[#allocation316_spill] sm:$0xff] }
 0x59f   :  { %7013 = vmatprep.subr.bf16.mxu0 %v8126_v29  ;;  %v8460_v17 = vcombine.high %v15744_v22, %v15743_v16  ;;  %v8459_v20 = vcombine.low %v15744_v22, %v15743_v16  ;;  %v15747_v3 = vld [vmem:[#allocation363_spill] sm:$0xff]  ;;  %v8198_v29 = vcombine.high %v15750_v25, %v15749_v9  ;;  %v15771_v16 = vld [vmem:[#allocation188_spill] sm:$0xff] }
 0x5a0   :  { %v15748_v56 = vld [vmem:[#allocation359_spill] sm:$0xff]  ;;  %v15772_v22 = vld [vmem:[#allocation184_spill] sm:$0xff] }
 0x5a1   :  { %6973 = vmatpush1.bf16.msra.mxu1 %v8379_v54  ;;  %v8452_v63 = vcombine.high %v15748_v56, %v15747_v3  ;;  %v8451_v54 = vcombine.low %v15748_v56, %v15747_v3  ;;  %v15751_v46 = vld [vmem:[#allocation355_spill] sm:$0xff]  ;;  %v15774_v48 = vld [vmem:[#allocation312_spill] sm:$0xff] }
 0x5a2   :  { %7014 = vmatpush1.bf16.msra.mxu0 %v8125_v31  ;;  %6974 = vmatprep.subr.bf16.mxu1 %v8372_v33  ;;  %v8197_v31 = vcombine.low %v15750_v25, %v15749_v9  ;;  %v15752_v61 = vld [vmem:[#allocation351_spill] sm:$0xff]  ;;  %v15775_v3 = vld [vmem:[#allocation180_spill] sm:$0xff] }
 0x5a3   :  { %7015 = vmatprep.subr.bf16.mxu0 %v8118_v51  ;;  %v8444_v33 = vcombine.high %v15752_v61, %v15751_v46  ;;  %v8190_v51 = vcombine.high %v15754_v55, %v15753_v52  ;;  %v15755_v23 = vld [vmem:[#allocation347_spill] sm:$0xff]  ;;  %v15776_v56 = vld [vmem:[#allocation176_spill] sm:$0xff] }
 0x5a4   :  { %v15756_v58 = vld [vmem:[#allocation343_spill] sm:$0xff]  ;;  %v15777_v9 = vld [vmem:[#allocation308_spill] sm:$0xff] }
 0x5a5   :  { %6975 = vmatpush1.bf16.msra.mxu1 %v8371_v38  ;;  %v8443_v38 = vcombine.low %v15752_v61, %v15751_v46  ;;  %v15759_v35 = vld [vmem:[#allocation339_spill] sm:$0xff]  ;;  %v15778_v25 = vld [vmem:[#allocation304_spill] sm:$0xff] }
 0x5a6   :  { %7016 = vmatpush1.bf16.msra.mxu0 %v8117_v53  ;;  %6976 = vmatprep.subr.bf16.mxu1 %v8364_v41  ;;  %v8189_v53 = vcombine.low %v15754_v55, %v15753_v52  ;;  %v8436_v41 = vcombine.high %v15756_v58, %v15755_v23  ;;  %v15760_v8 = vld [vmem:[#allocation335_spill] sm:$0xff]  ;;  %v15779_v46 = vld [vmem:[#allocation172_spill] sm:$0xff] }
 0x5a7   :  { %7017 = vmatprep.subr.bf16.mxu0 %v8110_v14  ;;  %v8182_v14 = vcombine.high %v15758_v2, %v15757_v6  ;;  %v15780_v61 = vld [vmem:[#allocation168_spill] sm:$0xff] }
 0x5a8   :  { %v15781_v52 = vld [vmem:[#allocation300_spill] sm:$0xff] }
 0x5a9   :  { %6977 = vmatpush1.bf16.msra.mxu1 %v8363_v10  ;;  %v8435_v10 = vcombine.low %v15756_v58, %v15755_v23  ;;  %v15782_v55 = vld [vmem:[#allocation296_spill] sm:$0xff] }
 0x5aa   :  { %7018 = vmatpush1.bf16.msra.mxu0 %v8109_v32  ;;  %6978 = vmatprep.subr.bf16.mxu1 %v8484_v0  ;;  %v8181_v32 = vcombine.low %v15758_v2, %v15757_v6  ;;  %v8428_v0 = vcombine.high %v15760_v8, %v15759_v35  ;;  %v15783_v23 = vld [vmem:[#allocation164_spill] sm:$0xff] }
 0x5ab   :  { %7019 = vmatprep.subr.bf16.mxu0 %v8230_v15  ;;  %v8174_v15 = vcombine.high %v15762_v44, %v15761_v1  ;;  %v15784_v58 = vld [vmem:[#allocation160_spill] sm:$0xff] }
 0x5ac   :  { %v15785_v6 = vld [vmem:[#allocation292_spill] sm:$0xff] }
 0x5ad   :  { %6979 = vmatpush2.bf16.msra.mxu1 %v8483_v19  ;;  %v8427_v19 = vcombine.low %v15760_v8, %v15759_v35  ;;  %v15786_v2 = vld [vmem:[#allocation288_spill] sm:$0xff] }
 0x5ae   :  { %7020 = vmatpush2.bf16.msra.mxu0 %v8229_v30  ;;  %6980 = vmatprep.subr.bf16.mxu1 %v8476_v18  ;;  %v8173_v30 = vcombine.low %v15762_v44, %v15761_v1  ;;  %v8294_v18 = vcombine.high %v15764_v28, %v15763_v45  ;;  %v15787_v35 = vld [vmem:[#allocation156_spill] sm:$0xff] }
 0x5af   :  { %7021 = vmatprep.subr.bf16.mxu0 %v8222_v50  ;;  %v8422_v50 = vcombine.high %v15766_v39, %v15765_v49  ;;  %v15788_v8 = vld [vmem:[#allocation152_spill] sm:$0xff] }
 0x5b0   :  { %v15789_v1 = vld [vmem:[#allocation284_spill] sm:$0xff] }
 0x5b1   :  { %6981 = vmatpush2.bf16.msra.mxu1 %v8475_v26  ;;  %v14148_v26 = vpack.c.bf16 %v13992_v24, %v13992_v24  ;;  %v15790_v44 = vld [vmem:[#allocation280_spill] sm:$0xff] }
 0x5b2   :  { %7022 = vmatpush2.bf16.msra.mxu0 %v8221_v47  ;;  %6982 = vmatprep.subr.bf16.mxu1 %v8468_v60  ;;  %v8293_v47 = vcombine.low %v15764_v28, %v15763_v45  ;;  %v15768_v60 = vld [vmem:[#allocation192_spill] sm:$0xff] }
 0x5b3   :  { %7023 = vmatprep.subr.bf16.mxu0 %v8214_v57  ;;  %v8286_v36 = vcombine.high %v15768_v60, %v15767_v62  ;;  %v15770_v57 = vld [vmem:[#allocation320_spill] sm:$0xff]  ;;  %v8285_v24 = vcombine.low %v15768_v60, %v15767_v62 }
 0x5b4   :  { %v15791_v45 = vld [vmem:[#allocation148_spill] sm:$0xff] }
 0x5b5   :  { %6983 = vmatpush2.bf16.msra.mxu1 %v8467_v12  ;;  %v8414_v12 = vcombine.high %v15770_v57, %v15769_v59  ;;  %v15792_v28 = vld [vmem:[#allocation144_spill] sm:$0xff] }
 0x5b6   :  { %7024 = vmatpush2.bf16.msra.mxu0 %v8213_v5  ;;  %6984 = vmatprep.subr.bf16.mxu1 %v8460_v17  ;;  %v8413_v5 = vcombine.low %v15770_v57, %v15769_v59  ;;  %v8278_v17 = vcombine.high %v15772_v22, %v15771_v16  ;;  %v15793_v49 = vld [vmem:[#allocation276_spill] sm:$0xff] }
 0x5b7   :  { %7025 = vmatprep.subr.bf16.mxu0 %v8206_v21  ;;  %v8406_v21 = vcombine.high %v15774_v48, %v15773_v40  ;;  %v15794_v39 = vld [vmem:[#allocation272_spill] sm:$0xff] }
 0x5b8   :  { %v15795_v62 = vld [vmem:[#allocation268_spill] sm:$0xff] }
 0x5b9   :  { %6985 = vmatpush2.bf16.msra.mxu1 %v8459_v20  ;;  %v8277_v20 = vcombine.low %v15772_v22, %v15771_v16  ;;  %v15796_v60 = vld [vmem:[#allocation264_spill] sm:$0xff] }
 0x5ba   :  { %7026 = vmatpush2.bf16.msra.mxu0 %v8205_v27  ;;  %6986 = vmatprep.subr.bf16.mxu1 %v8452_v63  ;;  %v8405_v27 = vcombine.low %v15774_v48, %v15773_v40  ;;  %v8270_v63 = vcombine.high %v15776_v56, %v15775_v3  ;;  %v15797_v59 = vld [vmem:[#allocation396_spill] sm:$0xff] }
 0x5bb   :  { %7027 = vmatprep.subr.bf16.mxu0 %v8198_v29  ;;  %v8398_v29 = vcombine.high %v15778_v25, %v15777_v9  ;;  %v15798_v57 = vld [vmem:[#allocation392_spill] sm:$0xff] }
 0x5bc   :  { %v15799_v16 = vld [vmem:[#allocation260_spill] sm:$0xff] }
 0x5bd   :  { %6987 = vmatpush2.bf16.msra.mxu1 %v8451_v54  ;;  %v8269_v54 = vcombine.low %v15776_v56, %v15775_v3  ;;  %v15800_v22 = vld [vmem:[#allocation256_spill] sm:$0xff] }
 0x5be   :  { %7028 = vmatpush2.bf16.msra.mxu0 %v8197_v31  ;;  %6988 = vmatprep.subr.bf16.mxu1 %v8444_v33  ;;  %v8397_v31 = vcombine.low %v15778_v25, %v15777_v9  ;;  %v8262_v33 = vcombine.high %v15780_v61, %v15779_v46  ;;  %v15801_v40 = vld [vmem:[#allocation388_spill] sm:$0xff] }
 0x5bf   :  { %7029 = vmatprep.subr.bf16.mxu0 %v8190_v51  ;;  %v8390_v51 = vcombine.high %v15782_v55, %v15781_v52  ;;  %v15802_v48 = vld [vmem:[#allocation384_spill] sm:$0xff] }
 0x5c0   :  { %v15803_v3 = vld [vmem:[#allocation252_spill] sm:$0xff] }
 0x5c1   :  { %6989 = vmatpush2.bf16.msra.mxu1 %v8443_v38  ;;  %v8261_v38 = vcombine.low %v15780_v61, %v15779_v46  ;;  %v15804_v56 = vld [vmem:[#allocation248_spill] sm:$0xff] }
 0x5c2   :  { %7030 = vmatpush2.bf16.msra.mxu0 %v8189_v53  ;;  %6990 = vmatprep.subr.bf16.mxu1 %v8436_v41  ;;  %v8389_v53 = vcombine.low %v15782_v55, %v15781_v52  ;;  %v8254_v41 = vcombine.high %v15784_v58, %v15783_v23  ;;  %v15805_v9 = vld [vmem:[#allocation380_spill] sm:$0xff] }
 0x5c3   :  { %7031 = vmatprep.subr.bf16.mxu0 %v8182_v14  ;;  %v8382_v14 = vcombine.high %v15786_v2, %v15785_v6  ;;  %v15806_v25 = vld [vmem:[#allocation376_spill] sm:$0xff] }
 0x5c4   :  { %v15807_v46 = vld [vmem:[#allocation244_spill] sm:$0xff] }
 0x5c5   :  { %6991 = vmatpush2.bf16.msra.mxu1 %v8435_v10  ;;  %v8253_v10 = vcombine.low %v15784_v58, %v15783_v23  ;;  %v15808_v61 = vld [vmem:[#allocation240_spill] sm:$0xff] }
 0x5c6   :  { %7032 = vmatpush2.bf16.msra.mxu0 %v8181_v32  ;;  %6992 = vmatprep.subr.bf16.mxu1 %v8428_v0  ;;  %v8381_v32 = vcombine.low %v15786_v2, %v15785_v6  ;;  %v8246_v0 = vcombine.high %v15788_v8, %v15787_v35  ;;  %v15809_v52 = vld [vmem:[#allocation372_spill] sm:$0xff] }
 0x5c7   :  { %7033 = vmatprep.subr.bf16.mxu0 %v8174_v15  ;;  %v8374_v15 = vcombine.high %v15790_v44, %v15789_v1  ;;  %v15810_v55 = vld [vmem:[#allocation368_spill] sm:$0xff] }
 0x5c8   :  { %v15811_v23 = vld [vmem:[#allocation236_spill] sm:$0xff] }
 0x5c9   :  { %6993 = vmatpush2.bf16.msra.mxu1 %v8427_v19  ;;  %v8245_v19 = vcombine.low %v15788_v8, %v15787_v35  ;;  %v15812_v58 = vld [vmem:[#allocation232_spill] sm:$0xff] }
 0x5ca   :  { %7034 = vmatpush2.bf16.msra.mxu0 %v8173_v30  ;;  %7044 = vmatprep.subr.bf16.mxu1 %v8294_v18  ;;  %v8373_v30 = vcombine.low %v15790_v44, %v15789_v1  ;;  %v8238_v18 = vcombine.high %v15792_v28, %v15791_v45  ;;  %v15813_v6 = vld [vmem:[#allocation364_spill] sm:$0xff] }
 0x5cb   :  { %7085 = vmatprep.subr.bf16.mxu0 %v8422_v50  ;;  %v8366_v50 = vcombine.high %v15794_v39, %v15793_v49  ;;  %v15814_v2 = vld [vmem:[#allocation360_spill] sm:$0xff] }
 0x5cc   :  { %6995 = vmatmul.mubr.bf16.vlgmr.msra.gmra.mxu1 %v14148_v26  ;;  %v15815_v35 = vld [vmem:[#allocation228_spill] sm:$0xff] }
 0x5cd   :  { %7036 = vmatmul.mubr.bf16.vlgmr.msra.gmra.mxu0 %v14006_v43  ;;  %7045 = vmatpush1.bf16.msra.mxu1 %v8293_v47  ;;  %v8237_v47 = vcombine.low %v15792_v28, %v15791_v45  ;;  %v15816_v8 = vld [vmem:[#allocation224_spill] sm:$0xff] }
 0x5ce   :  { %7086 = vmatpush1.bf16.msra.mxu0 %v8421_v13  ;;  %7046 = vmatprep.subr.bf16.mxu1 %v8286_v36  ;;  %v8365_v13 = vcombine.low %v15794_v39, %v15793_v49  ;;  %v8358_v36 = vcombine.high %v15796_v60, %v15795_v62  ;;  %v15817_v1 = vld [vmem:[#allocation356_spill] sm:$0xff] }
 0x5cf   :  { %7087 = vmatprep.subr.bf16.mxu0 %v8414_v12  ;;  %7076 = vmatprep.mubr.bf16.mxu1 %v13924_v11  ;;  %v8486_v12 = vcombine.high %v15798_v57, %v15797_v59  ;;  %v15818_v44 = vld [vmem:[#allocation352_spill] sm:$0xff] }
 0x5d0   :  { %7117 = vmatprep.mubr.bf16.mxu0 %v14020_v42  ;;  %v15819_v45 = vld [vmem:[#allocation220_spill] sm:$0xff] }
 0x5d1   :  { %7047 = vmatpush1.bf16.msra.mxu1 %v8285_v24  ;;  %v8357_v24 = vcombine.low %v15796_v60, %v15795_v62  ;;  %v15820_v28 = vld [vmem:[#allocation216_spill] sm:$0xff] }
 0x5d2   :  { %7088 = vmatpush1.bf16.msra.mxu0 %v8413_v5  ;;  %7048 = vmatprep.subr.bf16.mxu1 %v8278_v17  ;;  %v8485_v5 = vcombine.low %v15798_v57, %v15797_v59  ;;  %v8350_v17 = vcombine.high %v15800_v22, %v15799_v16  ;;  %v15821_v49 = vld [vmem:[#allocation348_spill] sm:$0xff] }
 0x5d3   :  { %7089 = vmatprep.subr.bf16.mxu0 %v8406_v21  ;;  %v8478_v21 = vcombine.high %v15802_v48, %v15801_v40  ;;  %v15822_v39 = vld [vmem:[#allocation344_spill] sm:$0xff] }
 0x5d4   :  { %v15823_v62 = vld [vmem:[#allocation212_spill] sm:$0xff] }
 0x5d5   :  { %7049 = vmatpush1.bf16.msra.mxu1 %v8277_v20  ;;  %v8349_v20 = vcombine.low %v15800_v22, %v15799_v16  ;;  %v15824_v60 = vld [vmem:[#allocation208_spill] sm:$0xff]  ;;  %v15827_v16 = vld [vmem:[#allocation77_spill] sm:$0xff] }
 0x5d6   :  { %7090 = vmatpush1.bf16.msra.mxu0 %v8405_v27  ;;  %7050 = vmatprep.subr.bf16.mxu1 %v8270_v63  ;;  %v8477_v27 = vcombine.low %v15802_v48, %v15801_v40  ;;  %v8342_v63 = vcombine.high %v15804_v56, %v15803_v3  ;;  %v15825_v59 = vld [vmem:[#allocation340_spill] sm:$0xff]  ;;  %v15828_v22 = vld [vmem:[#allocation73_spill] sm:$0xff] }
 0x5d7   :  { %7091 = vmatprep.subr.bf16.mxu0 %v8398_v29  ;;  %v8470_v29 = vcombine.high %v15806_v25, %v15805_v9  ;;  %v15826_v57 = vld [vmem:[#allocation336_spill] sm:$0xff]  ;;  %v15829_v40 = vld [vmem:[#allocation205_spill] sm:$0xff] }
 0x5d8   :  { %v15830_v48 = vld [vmem:[#allocation201_spill] sm:$0xff] }
 0x5d9   :  { %7051 = vmatpush1.bf16.msra.mxu1 %v8269_v54  ;;  %v8341_v54 = vcombine.low %v15804_v56, %v15803_v3  ;;  %v15831_v3 = vld [vmem:[#allocation69_spill] sm:$0xff] }
 0x5da   :  { %7092 = vmatpush1.bf16.msra.mxu0 %v8397_v31  ;;  %7052 = vmatprep.subr.bf16.mxu1 %v8262_v33  ;;  %v8469_v31 = vcombine.low %v15806_v25, %v15805_v9  ;;  %v8334_v33 = vcombine.high %v15808_v61, %v15807_v46  ;;  %v15832_v56 = vld [vmem:[#allocation65_spill] sm:$0xff] }
 0x5db   :  { %7093 = vmatprep.subr.bf16.mxu0 %v8390_v51  ;;  %v8462_v51 = vcombine.high %v15810_v55, %v15809_v52  ;;  %v15833_v9 = vld [vmem:[#allocation197_spill] sm:$0xff] }
 0x5dc   :  { %v15834_v25 = vld [vmem:[#allocation193_spill] sm:$0xff] }
 0x5dd   :  { %7053 = vmatpush1.bf16.msra.mxu1 %v8261_v38  ;;  %v8333_v38 = vcombine.low %v15808_v61, %v15807_v46  ;;  %v15835_v46 = vld [vmem:[#allocation61_spill] sm:$0xff] }
 0x5de   :  { %7094 = vmatpush1.bf16.msra.mxu0 %v8389_v53  ;;  %7054 = vmatprep.subr.bf16.mxu1 %v8254_v41  ;;  %v8461_v53 = vcombine.low %v15810_v55, %v15809_v52  ;;  %v8326_v41 = vcombine.high %v15812_v58, %v15811_v23  ;;  %v15836_v61 = vld [vmem:[#allocation57_spill] sm:$0xff] }
 0x5df   :  { %7095 = vmatprep.subr.bf16.mxu0 %v8382_v14  ;;  %v8454_v14 = vcombine.high %v15814_v2, %v15813_v6  ;;  %v15837_v52 = vld [vmem:[#allocation189_spill] sm:$0xff] }
 0x5e0   :  { %v15838_v55 = vld [vmem:[#allocation185_spill] sm:$0xff] }
 0x5e1   :  { %7055 = vmatpush1.bf16.msra.mxu1 %v8253_v10  ;;  %v8325_v10 = vcombine.low %v15812_v58, %v15811_v23  ;;  %v15839_v23 = vld [vmem:[#allocation53_spill] sm:$0xff] }
 0x5e2   :  { %7096 = vmatpush1.bf16.msra.mxu0 %v8381_v32  ;;  %7056 = vmatprep.subr.bf16.mxu1 %v8246_v0  ;;  %v8453_v32 = vcombine.low %v15814_v2, %v15813_v6  ;;  %v8318_v0 = vcombine.high %v15816_v8, %v15815_v35  ;;  %v15840_v58 = vld [vmem:[#allocation49_spill] sm:$0xff] }
 0x5e3   :  { %7097 = vmatprep.subr.bf16.mxu0 %v8374_v15  ;;  %v8446_v15 = vcombine.high %v15818_v44, %v15817_v1  ;;  %v15841_v6 = vld [vmem:[#allocation181_spill] sm:$0xff] }
 0x5e4   :  { %v15842_v2 = vld [vmem:[#allocation177_spill] sm:$0xff] }
 0x5e5   :  { %7057 = vmatpush1.bf16.msra.mxu1 %v8245_v19  ;;  %v8317_v19 = vcombine.low %v15816_v8, %v15815_v35  ;;  %v15843_v35 = vld [vmem:[#allocation45_spill] sm:$0xff] }
 0x5e6   :  { %7098 = vmatpush1.bf16.msra.mxu0 %v8373_v30  ;;  %7058 = vmatprep.subr.bf16.mxu1 %v8238_v18  ;;  %v8445_v30 = vcombine.low %v15818_v44, %v15817_v1  ;;  %v8310_v18 = vcombine.high %v15820_v28, %v15819_v45  ;;  %v15844_v8 = vld [vmem:[#allocation41_spill] sm:$0xff] }
 0x5e7   :  { %7099 = vmatprep.subr.bf16.mxu0 %v8366_v50  ;;  %v8438_v50 = vcombine.high %v15822_v39, %v15821_v49  ;;  %v15845_v1 = vld [vmem:[#allocation173_spill] sm:$0xff] }
 0x5e8   :  { %v15846_v44 = vld [vmem:[#allocation169_spill] sm:$0xff] }
 0x5e9   :  { %7059 = vmatpush1.bf16.msra.mxu1 %v8237_v47  ;;  %v8309_v47 = vcombine.low %v15820_v28, %v15819_v45  ;;  %v15847_v45 = vld [vmem:[#allocation37_spill] sm:$0xff] }
 0x5ea   :  { %7100 = vmatpush1.bf16.msra.mxu0 %v8365_v13  ;;  %7060 = vmatprep.subr.bf16.mxu1 %v8358_v36  ;;  %v8437_v13 = vcombine.low %v15822_v39, %v15821_v49  ;;  %v8302_v36 = vcombine.high %v15824_v60, %v15823_v62  ;;  %v15848_v28 = vld [vmem:[#allocation33_spill] sm:$0xff] }
 0x5eb   :  { %7101 = vmatprep.subr.bf16.mxu0 %v8486_v12  ;;  %v8430_v12 = vcombine.high %v15826_v57, %v15825_v59  ;;  %v15849_v49 = vld [vmem:[#allocation165_spill] sm:$0xff] }
 0x5ec   :  { %v15850_v39 = vld [vmem:[#allocation161_spill] sm:$0xff] }
 0x5ed   :  { %7061 = vmatpush2.bf16.msra.mxu1 %v8357_v24  ;;  %v8301_v24 = vcombine.low %v15824_v60, %v15823_v62  ;;  %v15851_v62 = vld [vmem:[#allocation29_spill] sm:$0xff] }
 0x5ee   :  { %7102 = vmatpush2.bf16.msra.mxu0 %v8485_v5  ;;  %7062 = vmatprep.subr.bf16.mxu1 %v8350_v17  ;;  %v8429_v5 = vcombine.low %v15826_v57, %v15825_v59  ;;  %v8168_v17 = vcombine.high %v15828_v22, %v15827_v16  ;;  %v15852_v60 = vld [vmem:[#allocation25_spill] sm:$0xff] }
 0x5ef   :  { %7103 = vmatprep.subr.bf16.mxu0 %v8478_v21  ;;  %v8296_v21 = vcombine.high %v15830_v48, %v15829_v40  ;;  %v15853_v59 = vld [vmem:[#allocation157_spill] sm:$0xff] }
 0x5f0   :  { %v15854_v57 = vld [vmem:[#allocation153_spill] sm:$0xff] }
 0x5f1   :  { %7063 = vmatpush2.bf16.msra.mxu1 %v8349_v20  ;;  %v8167_v20 = vcombine.low %v15828_v22, %v15827_v16  ;;  %v15855_v16 = vld [vmem:[#allocation21_spill] sm:$0xff] }
 0x5f2   :  { %7104 = vmatpush2.bf16.msra.mxu0 %v8477_v27  ;;  %7064 = vmatprep.subr.bf16.mxu1 %v8342_v63  ;;  %v8295_v27 = vcombine.low %v15830_v48, %v15829_v40  ;;  %v8160_v63 = vcombine.high %v15832_v56, %v15831_v3  ;;  %v15856_v22 = vld [vmem:[#allocation17_spill] sm:$0xff] }
 0x5f3   :  { %7105 = vmatprep.subr.bf16.mxu0 %v8470_v29  ;;  %v8288_v29 = vcombine.high %v15834_v25, %v15833_v9  ;;  %v15857_v40 = vld [vmem:[#allocation149_spill] sm:$0xff] }
 0x5f4   :  { %v15858_v48 = vld [vmem:[#allocation145_spill] sm:$0xff] }
 0x5f5   :  { %7065 = vmatpush2.bf16.msra.mxu1 %v8341_v54  ;;  %v8159_v54 = vcombine.low %v15832_v56, %v15831_v3  ;;  %v15859_v3 = vld [vmem:[#allocation141_spill] sm:$0xff] }
 0x5f6   :  { %7106 = vmatpush2.bf16.msra.mxu0 %v8469_v31  ;;  %7066 = vmatprep.subr.bf16.mxu1 %v8334_v33  ;;  %v8287_v31 = vcombine.low %v15834_v25, %v15833_v9  ;;  %v8152_v33 = vcombine.high %v15836_v61, %v15835_v46  ;;  %v15860_v56 = vld [vmem:[#allocation137_spill] sm:$0xff] }
 0x5f7   :  { %7107 = vmatprep.subr.bf16.mxu0 %v8462_v51  ;;  %v8280_v51 = vcombine.high %v15838_v55, %v15837_v52  ;;  %v15861_v9 = vld [vmem:[#allocation269_spill] sm:$0xff] }
 0x5f8   :  { %v15862_v25 = vld [vmem:[#allocation265_spill] sm:$0xff] }
 0x5f9   :  { %7067 = vmatpush2.bf16.msra.mxu1 %v8333_v38  ;;  %v8151_v38 = vcombine.low %v15836_v61, %v15835_v46  ;;  %v15863_v46 = vld [vmem:[#allocation133_spill] sm:$0xff] }
 0x5fa   :  { %7108 = vmatpush2.bf16.msra.mxu0 %v8461_v53  ;;  %7068 = vmatprep.subr.bf16.mxu1 %v8326_v41  ;;  %v8279_v53 = vcombine.low %v15838_v55, %v15837_v52  ;;  %v8144_v41 = vcombine.high %v15840_v58, %v15839_v23  ;;  %v15864_v61 = vld [vmem:[#allocation129_spill] sm:$0xff] }
 0x5fb   :  { %7109 = vmatprep.subr.bf16.mxu0 %v8454_v14  ;;  %v8272_v14 = vcombine.high %v15842_v2, %v15841_v6  ;;  %v15865_v52 = vld [vmem:[#allocation261_spill] sm:$0xff] }
 0x5fc   :  { %v15866_v55 = vld [vmem:[#allocation257_spill] sm:$0xff] }
 0x5fd   :  { %7069 = vmatpush2.bf16.msra.mxu1 %v8325_v10  ;;  %v8143_v10 = vcombine.low %v15840_v58, %v15839_v23  ;;  %v15867_v23 = vld [vmem:[#allocation125_spill] sm:$0xff] }
 0x5fe   :  { %7110 = vmatpush2.bf16.msra.mxu0 %v8453_v32  ;;  %7070 = vmatprep.subr.bf16.mxu1 %v8318_v0  ;;  %v8271_v32 = vcombine.low %v15842_v2, %v15841_v6  ;;  %v8136_v0 = vcombine.high %v15844_v8, %v15843_v35  ;;  %v15868_v58 = vld [vmem:[#allocation121_spill] sm:$0xff] }
 0x5ff   :  { %7111 = vmatprep.subr.bf16.mxu0 %v8446_v15  ;;  %v8264_v15 = vcombine.high %v15846_v44, %v15845_v1  ;;  %v15869_v6 = vld [vmem:[#allocation253_spill] sm:$0xff] }
 0x600   :  { %v15870_v2 = vld [vmem:[#allocation249_spill] sm:$0xff] }
 0x601   :  { %7071 = vmatpush2.bf16.msra.mxu1 %v8317_v19  ;;  %v8135_v19 = vcombine.low %v15844_v8, %v15843_v35  ;;  %v15871_v35 = vld [vmem:[#allocation117_spill] sm:$0xff] }
 0x602   :  { %7112 = vmatpush2.bf16.msra.mxu0 %v8445_v30  ;;  %7072 = vmatprep.subr.bf16.mxu1 %v8310_v18  ;;  %v8263_v30 = vcombine.low %v15846_v44, %v15845_v1  ;;  %v8128_v18 = vcombine.high %v15848_v28, %v15847_v45  ;;  %v15872_v8 = vld [vmem:[#allocation113_spill] sm:$0xff] }
 0x603   :  { %7113 = vmatprep.subr.bf16.mxu0 %v8438_v50  ;;  %v8256_v50 = vcombine.high %v15850_v39, %v15849_v49  ;;  %v15873_v1 = vld [vmem:[#allocation245_spill] sm:$0xff] }
 0x604   :  { %v15874_v44 = vld [vmem:[#allocation241_spill] sm:$0xff] }
 0x605   :  { %7073 = vmatpush2.bf16.msra.mxu1 %v8309_v47  ;;  %v8127_v47 = vcombine.low %v15848_v28, %v15847_v45  ;;  %v15875_v45 = vld [vmem:[#allocation109_spill] sm:$0xff] }
 0x606   :  { %7114 = vmatpush2.bf16.msra.mxu0 %v8437_v13  ;;  %7074 = vmatprep.subr.bf16.mxu1 %v8302_v36  ;;  %v8255_v13 = vcombine.low %v15850_v39, %v15849_v49  ;;  %v8120_v36 = vcombine.high %v15852_v60, %v15851_v62  ;;  %v15876_v28 = vld [vmem:[#allocation105_spill] sm:$0xff] }
 0x607   :  { %7115 = vmatprep.subr.bf16.mxu0 %v8430_v12  ;;  %v8248_v12 = vcombine.high %v15854_v57, %v15853_v59  ;;  %v15877_v49 = vld [vmem:[#allocation237_spill] sm:$0xff] }
 0x608   :  { %v15878_v39 = vld [vmem:[#allocation233_spill] sm:$0xff] }
 0x609   :  { %7075 = vmatpush2.bf16.msra.mxu1 %v8301_v24  ;;  %v8119_v24 = vcombine.low %v15852_v60, %v15851_v62  ;;  %v15879_v62 = vld [vmem:[#allocation101_spill] sm:$0xff] }
 0x60a   :  { %7116 = vmatpush2.bf16.msra.mxu0 %v8429_v5  ;;  %7126 = vmatprep.subr.bf16.mxu1 %v8168_v17  ;;  %v8247_v5 = vcombine.low %v15854_v57, %v15853_v59  ;;  %v8112_v17 = vcombine.high %v15856_v22, %v15855_v16  ;;  %v15880_v60 = vld [vmem:[#allocation97_spill] sm:$0xff] }
 0x60b   :  { %7167 = vmatprep.subr.bf16.mxu0 %v8296_v21  ;;  %v8240_v21 = vcombine.high %v15858_v48, %v15857_v40  ;;  %v15881_v59 = vld [vmem:[#allocation229_spill] sm:$0xff] }
 0x60c   :  { %7077 = vmatmul.mubr.bf16.vlgmr.msra.gmra.mxu1 %v14010_v7  ;;  %v15882_v57 = vld [vmem:[#allocation225_spill] sm:$0xff] }
 0x60d   :  { %7118 = vmatmul.mubr.bf16.vlgmr.msra.gmra.mxu0 %v14148_v26  ;;  %7127 = vmatpush1.bf16.msra.mxu1 %v8167_v20  ;;  %v8111_v20 = vcombine.low %v15856_v22, %v15855_v16  ;;  %v15883_v16 = vld [vmem:[#allocation93_spill] sm:$0xff] }
 0x60e   :  { %7168 = vmatpush1.bf16.msra.mxu0 %v8295_v27  ;;  %7128 = vmatprep.subr.bf16.mxu1 %v8160_v63  ;;  %v8239_v27 = vcombine.low %v15858_v48, %v15857_v40  ;;  %v8232_v63 = vcombine.high %v15860_v56, %v15859_v3  ;;  %v15884_v22 = vld [vmem:[#allocation89_spill] sm:$0xff] }
 0x60f   :  { %7169 = vmatprep.subr.bf16.mxu0 %v8288_v29  ;;  %7158 = vmatprep.mubr.bf16.mxu1 %v13912_v34  ;;  %v8360_v29 = vcombine.high %v15862_v25, %v15861_v9  ;;  %v15885_v40 = vld [vmem:[#allocation221_spill] sm:$0xff] }
 0x610   :  { %7199 = vmatprep.mubr.bf16.mxu0 %v13924_v11  ;;  %v15886_v48 = vld [vmem:[#allocation217_spill] sm:$0xff] }
 0x611   :  { %7129 = vmatpush1.bf16.msra.mxu1 %v8159_v54  ;;  %v8231_v54 = vcombine.low %v15860_v56, %v15859_v3  ;;  %v15887_v3 = vld [vmem:[#allocation85_spill] sm:$0xff] }
 0x612   :  { %7170 = vmatpush1.bf16.msra.mxu0 %v8287_v31  ;;  %7130 = vmatprep.subr.bf16.mxu1 %v8152_v33  ;;  %v8359_v31 = vcombine.low %v15862_v25, %v15861_v9  ;;  %v8224_v33 = vcombine.high %v15864_v61, %v15863_v46  ;;  %v15888_v56 = vld [vmem:[#allocation81_spill] sm:$0xff] }
 0x613   :  { %7171 = vmatprep.subr.bf16.mxu0 %v8280_v51  ;;  %v8352_v51 = vcombine.high %v15866_v55, %v15865_v52  ;;  %v15889_v9 = vld [vmem:[#allocation213_spill] sm:$0xff] }
 0x614   :  { %v15890_v25 = vld [vmem:[#allocation209_spill] sm:$0xff] }
 0x615   :  { %7131 = vmatpush1.bf16.msra.mxu1 %v8151_v38  ;;  %v8223_v38 = vcombine.low %v15864_v61, %v15863_v46  ;;  %v14411_v46 = vsub.s32 0, %v13770_v4  ;;  %v14416_v61 = vld [vmem:[%s14843_s8] sm:$0xff]  ;;  %s9956_s8 = smov [#allocation9]  }
 0x616   :  { %7172 = vmatpush1.bf16.msra.mxu0 %v8279_v53  ;;  %7132 = vmatprep.subr.bf16.mxu1 %v8144_v41  ;;  %v8351_v53 = vcombine.low %v15866_v55, %v15865_v52  ;;  %v8216_v41 = vcombine.high %v15868_v58, %v15867_v23  ;;  %v15892_v52 = vld [vmem:[#allocation329_spill] sm:$0xff]  ;;  %s7643_s23 = sshll.u32 %s9956_s8, 4  ;;  %s7644_s23 = int_to_ptr.vmem [resolvable:$true] %s7643_s23 }
 0x617   :  { %7173 = vmatprep.subr.bf16.mxu0 %v8272_v14  ;;  %v8344_v14 = vcombine.high %v15870_v2, %v15869_v6  ;;  %s9900_s1 = scalar_lea.vmem %s7644_s23, 256  ;;  %p9905_p1 = scmp.lt.s32.totalorder %s7644_s23, %s7644_s23 }
 0x618   :  { %p9901_p0 = scmp.ne.s32.totalorder %s7644_s23, %s9900_s1  ;;  %p9906_p2 = scmp.lt.s32.totalorder %s9900_s1, %s9900_s1 }
 0x619   :  { %7133 = vmatpush1.bf16.msra.mxu1 %v8143_v10  ;;  %v8215_v10 = vcombine.low %v15868_v58, %v15867_v23  ;;  %v14423_v23 = vsub.s32 1, %v13770_v4  ;;  %v4923_v58 = vrot.slane %v14416_v61, %v14411_v46 }
 0x61a   :  { %7174 = vmatpush1.bf16.msra.mxu0 %v8271_v32  ;;  %7134 = vmatprep.subr.bf16.mxu1 %v8136_v0  ;;  %v8343_v32 = vcombine.low %v15870_v2, %v15869_v6  ;;  %v8208_v0 = vcombine.high %v15872_v8, %v15871_v35  ;;  %v15895_v2 = vld [vmem:[#allocation325_spill] sm:$0xff]  ;;  %p9907_p3 = por %p9906_p2, %p9905_p1 }
 0x61b   :  { %7175 = vmatprep.subr.bf16.mxu0 %v8264_v15  ;;  %v8336_v15 = vcombine.high %v15874_v44, %v15873_v1 }
 0x61c   :  { %p9908_p4 = pnand %p9907_p3, %p9901_p0 }
 0x61d   :  { %7135 = vmatpush1.bf16.msra.mxu1 %v8135_v19  ;;  %v8207_v19 = vcombine.low %v15872_v8, %v15871_v35  ;;  %v15898_v35 = vld [vmem:[#allocation66_spill] sm:$0xff] }
 0x61e   :  { %7176 = vmatpush1.bf16.msra.mxu0 %v8263_v30  ;;  %7136 = vmatprep.subr.bf16.mxu1 %v8128_v18  ;;  %v8335_v30 = vcombine.low %v15874_v44, %v15873_v1  ;;  %v8200_v18 = vcombine.high %v15876_v28, %v15875_v45 }
 0x61f   :  { %7177 = vmatprep.subr.bf16.mxu0 %v8256_v50  ;;  %v8328_v50 = vcombine.high %v15878_v39, %v15877_v49 }
 0x621   :  { %7137 = vmatpush1.bf16.msra.mxu1 %v8127_v47  ;;  %v8199_v47 = vcombine.low %v15876_v28, %v15875_v45 }
 0x622   :  { %7178 = vmatpush1.bf16.msra.mxu0 %v8255_v13  ;;  %7138 = vmatprep.subr.bf16.mxu1 %v8120_v36  ;;  %v8327_v13 = vcombine.low %v15878_v39, %v15877_v49  ;;  %v8192_v36 = vcombine.high %v15880_v60, %v15879_v62  ;;  %v15900_v49 = vld [vmem:[#allocation313_spill] sm:$0xff] }
 0x623   :  { %7179 = vmatprep.subr.bf16.mxu0 %v8248_v12  ;;  %v8320_v12 = vcombine.high %v15882_v57, %v15881_v59 }
 0x625   :  { %7139 = vmatpush1.bf16.msra.mxu1 %v8119_v24  ;;  %v8191_v24 = vcombine.low %v15880_v60, %v15879_v62 }
 0x626   :  { %7180 = vmatpush1.bf16.msra.mxu0 %v8247_v5  ;;  %7140 = vmatprep.subr.bf16.mxu1 %v8112_v17  ;;  %v8319_v5 = vcombine.low %v15882_v57, %v15881_v59  ;;  %v8184_v17 = vcombine.high %v15884_v22, %v15883_v16 }
 0x627   :  { %7181 = vmatprep.subr.bf16.mxu0 %v8240_v21  ;;  %v8312_v21 = vcombine.high %v15886_v48, %v15885_v40 }
 0x629   :  { %7141 = vmatpush1.bf16.msra.mxu1 %v8111_v20  ;;  %v8183_v20 = vcombine.low %v15884_v22, %v15883_v16  ;;  %v15903_v22 = vld [vmem:[#allocation309_spill] sm:$0xff] }
 0x62a   :  { %7182 = vmatpush1.bf16.msra.mxu0 %v8239_v27  ;;  %7142 = vmatprep.subr.bf16.mxu1 %v8232_v63  ;;  %v8311_v27 = vcombine.low %v15886_v48, %v15885_v40  ;;  %v8176_v63 = vcombine.high %v15888_v56, %v15887_v3  ;;  %v15906_v48 = vld [vmem:[#allocation50_spill] sm:$0xff] }
 0x62b   :  { %7183 = vmatprep.subr.bf16.mxu0 %v8360_v29  ;;  %v8304_v29 = vcombine.high %v15890_v25, %v15889_v9 }
 0x62d   :  { %7143 = vmatpush2.bf16.msra.mxu1 %v8231_v54  ;;  %v8175_v54 = vcombine.low %v15888_v56, %v15887_v3  ;;  %v15907_v3 = vld [vmem:[#allocation301_spill] sm:$0xff] }
 0x62e   :  { %7184 = vmatpush2.bf16.msra.mxu0 %v8359_v31  ;;  %7144 = vmatprep.subr.bf16.mxu1 %v8224_v33  ;;  %v8303_v31 = vcombine.low %v15890_v25, %v15889_v9  ;;  %v15891_v33 = vld [vmem:[#allocation333_spill] sm:$0xff]  ;;  %v15909_v9 = vld [vmem:[#allocation46_spill] sm:$0xff] }
 0x62f   :  { %7185 = vmatprep.subr.bf16.mxu0 %v8352_v51  ;;  %v8424_v55 = vcombine.high %v15892_v52, %v15891_v33  ;;  %v15893_v51 = vld [vmem:[#allocation78_spill] sm:$0xff]  ;;  %v15908_v56 = vld [vmem:[#allocation297_spill] sm:$0xff] }
 0x630   :  { %v15910_v25 = vld [vmem:[#allocation42_spill] sm:$0xff] }
 0x631   :  { %7145 = vmatpush2.bf16.msra.mxu1 %v8223_v38  ;;  %v15894_v38 = vld [vmem:[#allocation74_spill] sm:$0xff] }
 0x632   :  { %7186 = vmatpush2.bf16.msra.mxu0 %v8351_v53  ;;  %7146 = vmatprep.subr.bf16.mxu1 %v8216_v41  ;;  %v8170_v53 = vcombine.high %v15894_v38, %v15893_v51  ;;  %v8423_v41 = vcombine.low %v15892_v52, %v15891_v33  ;;  %v8169_v6 = vcombine.low %v15894_v38, %v15893_v51  ;;  %v15911_v33 = vld [vmem:[#allocation293_spill] sm:$0xff]  ;;  %v15913_v51 = vld [vmem:[#allocation38_spill] sm:$0xff] }
 0x633   :  { %7187 = vmatprep.subr.bf16.mxu0 %v8344_v14  ;;  %v15896_v14 = vld [vmem:[#allocation321_spill] sm:$0xff]  ;;  %v15914_v38 = vld [vmem:[#allocation34_spill] sm:$0xff] }
 0x634   :  { %v15912_v52 = vld [vmem:[#allocation289_spill] sm:$0xff] }
 0x635   :  { %7147 = vmatpush2.bf16.msra.mxu1 %v8215_v10  ;;  %v8416_v10 = vcombine.high %v15896_v14, %v15895_v2 }
 0x636   :  { %7188 = vmatpush2.bf16.msra.mxu0 %v8343_v32  ;;  %7148 = vmatprep.subr.bf16.mxu1 %v8208_v0  ;;  %v15897_v32 = vld [vmem:[#allocation70_spill] sm:$0xff]  ;;  %v4927_v0 = vrot.slane %v14416_v61, %v14423_v23 }
 0x637   :  { %7189 = vmatprep.subr.bf16.mxu0 %v8336_v15  ;;  %v8162_v8 = vcombine.high %v15898_v35, %v15897_v32 }
 0x639   :  { %7149 = vmatpush2.bf16.msra.mxu1 %v8207_v19  ;;  %v8415_v19 = vcombine.low %v15896_v14, %v15895_v2  ;;  %v15916_v2 = vld [vmem:[#allocation281_spill] sm:$0xff] }
 0x63a   :  { %7190 = vmatpush2.bf16.msra.mxu0 %v8335_v30  ;;  %7150 = vmatprep.subr.bf16.mxu1 %v8200_v18  ;;  %v8161_v30 = vcombine.low %v15898_v35, %v15897_v32  ;;  %v15899_v18 = vld [vmem:[#allocation317_spill] sm:$0xff]  ;;  %v15918_v32 = vld [vmem:[#allocation26_spill] sm:$0xff] }
 0x63b   :  { %7191 = vmatprep.subr.bf16.mxu0 %v8328_v50  ;;  %v8408_v39 = vcombine.high %v15900_v49, %v15899_v18  ;;  %v15901_v50 = vld [vmem:[#allocation62_spill] sm:$0xff] }
 0x63d   :  { %7151 = vmatpush2.bf16.msra.mxu1 %v8199_v47  ;;  %v15902_v47 = vld [vmem:[#allocation58_spill] sm:$0xff] }
 0x63e   :  { %7192 = vmatpush2.bf16.msra.mxu0 %v8327_v13  ;;  %7152 = vmatprep.subr.bf16.mxu1 %v8192_v36  ;;  %v8154_v13 = vcombine.high %v15902_v47, %v15901_v50 }
 0x63f   :  { %7193 = vmatprep.subr.bf16.mxu0 %v8320_v12  ;;  %v8407_v12 = vcombine.low %v15900_v49, %v15899_v18  ;;  %v15923_v49 = vld [vmem:[#allocation397_spill] sm:$0xff] }
 0x641   :  { %7153 = vmatpush2.bf16.msra.mxu1 %v8191_v24  ;;  %v8153_v24 = vcombine.low %v15902_v47, %v15901_v50  ;;  %v15925_v47 = vld [vmem:[#allocation142_spill] sm:$0xff] }
 0x642   :  { %7194 = vmatpush2.bf16.msra.mxu0 %v8319_v5  ;;  %7154 = vmatprep.subr.bf16.mxu1 %v8184_v17  ;;  %v15904_v17 = vld [vmem:[#allocation305_spill] sm:$0xff] }
 0x643   :  { %7195 = vmatprep.subr.bf16.mxu0 %v8312_v21  ;;  %v8400_v40 = vcombine.high %v15904_v17, %v15903_v22 }
 0x645   :  { %7155 = vmatpush2.bf16.msra.mxu1 %v8183_v20  ;;  %v8399_v20 = vcombine.low %v15904_v17, %v15903_v22  ;;  %v15930_v22 = vld [vmem:[#allocation130_spill] sm:$0xff] }
 0x646   :  { %7196 = vmatpush2.bf16.msra.mxu0 %v8311_v27  ;;  %7156 = vmatprep.subr.bf16.mxu1 %v8176_v63  ;;  %v8392_v63 = vcombine.high %v15908_v56, %v15907_v3 }
 0x647   :  { %7197 = vmatprep.subr.bf16.mxu0 %v8304_v29  ;;  %v8138_v29 = vcombine.high %v15910_v25, %v15909_v9 }
 0x649   :  { %7157 = vmatpush2.bf16.msra.mxu1 %v8175_v54  ;;  %v8391_v54 = vcombine.low %v15908_v56, %v15907_v3  ;;  %v15934_v3 = vld [vmem:[#allocation122_spill] sm:$0xff] }
 0x64a   :  { %7198 = vmatpush2.bf16.msra.mxu0 %v8303_v31  ;;  %7208 = vmatprep.subr.bf16.mxu1 %v8424_v55  ;;  %v8137_v31 = vcombine.low %v15910_v25, %v15909_v9  ;;  %v8384_v55 = vcombine.high %v15912_v52, %v15911_v33  ;;  %v15935_v25 = vld [vmem:[#allocation373_spill] sm:$0xff] }
 0x64b   :  { %7249 = vmatprep.subr.bf16.mxu0 %v8170_v53  ;;  %v8130_v53 = vcombine.high %v15914_v38, %v15913_v51 }
 0x64c   :  { %v6914_v1 = vpop.f32.mrf.mxu1  ;;  %7159 = vmatmul.mubr.bf16.vlgmr.msra.gmra.mxu1 %v14006_v43 }
 0x64d   :  { %v6955_v44 = vpop.f32.mrf.mxu0  ;;  %7200 = vmatmul.mubr.bf16.vlgmr.msra.gmra.mxu0 %v14010_v7  ;;  %v6915_v15 = vadd.f32 %v6914_v1, %v4923_v58  ;;  %7209 = vmatpush1.bf16.msra.mxu1 %v8423_v41  ;;  %v8383_v58 = vcombine.low %v15912_v52, %v15911_v33  ;;  %v8129_v41 = vcombine.low %v15914_v38, %v15913_v51  ;;  %v15919_v1 = vld [vmem:[#allocation277_spill] sm:$0xff]  ;;  %v15938_v33 = vld [vmem:[#allocation114_spill] sm:$0xff] }
 0x64e   :  { %7250 = vmatpush1.bf16.msra.mxu0 %v8169_v6  ;;  %v6916_v45 = vpop.f32.mrf.mxu1  ;;  %7210 = vmatprep.subr.bf16.mxu1 %v8416_v10  ;;  %v15915_v6 = vld [vmem:[#allocation285_spill] sm:$0xff]  ;;  %v15917_v10 = vld [vmem:[#allocation30_spill] sm:$0xff] }
 0x64f   :  { %v6957_v28 = vpop.f32.mrf.mxu0  ;;  %7251 = vmatprep.subr.bf16.mxu0 %v8162_v8  ;;  %v14447_v62 = vadd.f32 %v6955_v44, %v6915_v15  ;;  %v6917_v60 = vadd.f32 %v6916_v45, %v4927_v0  ;;  %7240 = vmatprep.mubr.bf16.mxu1 %v14020_v42  ;;  %v8376_v14 = vcombine.high %v15916_v2, %v15915_v6  ;;  %v15920_v44 = vld [vmem:[#allocation273_spill] sm:$0xff] }
 0x650   :  { %7281 = vmatprep.mubr.bf16.mxu0 %v13912_v34  ;;  %v6918_v36 = vpop.f32.mrf.mxu1  ;;  %v15905_v34 = vld [vmem:[#allocation54_spill] sm:$0xff]  ;;  %v8122_v35 = vcombine.high %v15918_v32, %v15917_v10  ;;  %v8375_v8 = vcombine.low %v15916_v2, %v15915_v6  ;;  %v8121_v0 = vcombine.low %v15918_v32, %v15917_v10  ;;  %v8368_v15 = vcombine.high %v15920_v44, %v15919_v1  ;;  %v15939_v38 = vld [vmem:[#allocation365_spill] sm:$0xff] }
 0x651   :  { %v6959_v59 = vpop.f32.mrf.mxu0  ;;  %v14451_v57 = vadd.f32 %v6957_v28, %v6917_v60  ;;  %7211 = vmatpush1.bf16.msra.mxu1 %v8415_v19  ;;  %v8146_v21 = vcombine.high %v15906_v48, %v15905_v34  ;;  %v8145_v27 = vcombine.low %v15906_v48, %v15905_v34  ;;  %v15921_v19 = vld [vmem:[#allocation22_spill] sm:$0xff]  ;;  %v8367_v28 = vcombine.low %v15920_v44, %v15919_v1  ;;  %v15931_v48 = vld [vmem:[#allocation381_spill] sm:$0xff] }
 0x652   :  { %7252 = vmatpush1.bf16.msra.mxu0 %v8161_v30  ;;  %v6919_v5 = vpop.f32.mrf.mxu1  ;;  %7212 = vmatprep.subr.bf16.mxu1 %v8408_v39  ;;  %v15922_v30 = vld [vmem:[#allocation18_spill] sm:$0xff]  ;;  %v15924_v39 = vld [vmem:[#allocation393_spill] sm:$0xff] }
 0x653   :  { %v6960_v16 = vpop.f32.mrf.mxu0  ;;  %7253 = vmatprep.subr.bf16.mxu0 %v8154_v13  ;;  %v8114_v45 = vcombine.high %v15922_v30, %v15921_v19  ;;  %v8113_v18 = vcombine.low %v15922_v30, %v15921_v19  ;;  %v8488_v50 = vcombine.high %v15924_v39, %v15923_v49  ;;  %v15926_v13 = vld [vmem:[#allocation138_spill] sm:$0xff]  ;;  %v8487_v36 = vcombine.low %v15924_v39, %v15923_v49  ;;  %v15943_v32 = vld [vmem:[#allocation357_spill] sm:$0xff] }
 0x654   :  { %v8234_v60 = vcombine.high %v15926_v13, %v15925_v47  ;;  %v8233_v59 = vcombine.low %v15926_v13, %v15925_v47  ;;  %v15929_v16 = vld [vmem:[#allocation134_spill] sm:$0xff]  ;;  %v15947_v30 = vld [vmem:[#allocation349_spill] sm:$0xff] }
 0x655   :  { %7213 = vmatpush1.bf16.msra.mxu1 %v8407_v12  ;;  %v15927_v12 = vld [vmem:[#allocation389_spill] sm:$0xff]  ;;  %v8226_v17 = vcombine.high %v15930_v22, %v15929_v16  ;;  %v8225_v34 = vcombine.low %v15930_v22, %v15929_v16  ;;  %v15942_v6 = vld [vmem:[#allocation106_spill] sm:$0xff] }
 0x656   :  { %7254 = vmatpush1.bf16.msra.mxu0 %v8153_v24  ;;  %7214 = vmatprep.subr.bf16.mxu1 %v8400_v40  ;;  %v15928_v24 = vld [vmem:[#allocation385_spill] sm:$0xff]  ;;  %v15946_v1 = vld [vmem:[#allocation98_spill] sm:$0xff] }
 0x657   :  { %7255 = vmatprep.subr.bf16.mxu0 %v8146_v21  ;;  %v8480_v5 = vcombine.high %v15928_v24, %v15927_v12  ;;  %v8479_v40 = vcombine.low %v15928_v24, %v15927_v12  ;;  %v15932_v21 = vld [vmem:[#allocation377_spill] sm:$0xff]  ;;  %v15950_v49 = vld [vmem:[#allocation90_spill] sm:$0xff] }
 0x658   :  { %v15951_v13 = vld [vmem:[#allocation341_spill] sm:$0xff]  ;;  %v15954_v12 = vld [vmem:[#allocation82_spill] sm:$0xff] }
 0x659   :  { %7215 = vmatpush1.bf16.msra.mxu1 %v8399_v20  ;;  %v8472_v20 = vcombine.high %v15932_v21, %v15931_v48  ;;  %v15955_v22 = vld [vmem:[#allocation206_spill] sm:$0xff] }
 0x65a   :  { %7256 = vmatpush1.bf16.msra.mxu0 %v8145_v27  ;;  %7216 = vmatprep.subr.bf16.mxu1 %v8392_v63  ;;  %v15933_v27 = vld [vmem:[#allocation126_spill] sm:$0xff]  ;;  %v8471_v63 = vcombine.low %v15932_v21, %v15931_v48 }
 0x65b   :  { %7257 = vmatprep.subr.bf16.mxu0 %v8138_v29  ;;  %v8218_v56 = vcombine.high %v15934_v3, %v15933_v27  ;;  %v8217_v9 = vcombine.low %v15934_v3, %v15933_v27  ;;  %v15936_v29 = vld [vmem:[#allocation369_spill] sm:$0xff]  ;;  %v15958_v48 = vld [vmem:[#allocation330_spill] sm:$0xff] }
 0x65c   :  { %v15959_v3 = vld [vmem:[#allocation198_spill] sm:$0xff] }
 0x65d   :  { %7217 = vmatpush1.bf16.msra.mxu1 %v8391_v54  ;;  %v8464_v54 = vcombine.high %v15936_v29, %v15935_v25 }
 0x65e   :  { %7258 = vmatpush1.bf16.msra.mxu0 %v8137_v31  ;;  %7218 = vmatprep.subr.bf16.mxu1 %v8384_v55  ;;  %v15937_v31 = vld [vmem:[#allocation118_spill] sm:$0xff]  ;;  %v8463_v55 = vcombine.low %v15936_v29, %v15935_v25 }
 0x65f   :  { %7259 = vmatprep.subr.bf16.mxu0 %v8130_v53  ;;  %v8210_v52 = vcombine.high %v15938_v33, %v15937_v31  ;;  %v8209_v51 = vcombine.low %v15938_v33, %v15937_v31  ;;  %v15940_v53 = vld [vmem:[#allocation361_spill] sm:$0xff]  ;;  %v15962_v25 = vld [vmem:[#allocation322_spill] sm:$0xff] }
 0x661   :  { %7219 = vmatpush1.bf16.msra.mxu1 %v8383_v58  ;;  %v8456_v58 = vcombine.high %v15940_v53, %v15939_v38 }
 0x662   :  { %7260 = vmatpush1.bf16.msra.mxu0 %v8129_v41  ;;  %7220 = vmatprep.subr.bf16.mxu1 %v8376_v14  ;;  %v15941_v41 = vld [vmem:[#allocation110_spill] sm:$0xff]  ;;  %v8455_v14 = vcombine.low %v15940_v53, %v15939_v38 }
 0x663   :  { %7261 = vmatprep.subr.bf16.mxu0 %v8122_v35  ;;  %v8202_v2 = vcombine.high %v15942_v6, %v15941_v41  ;;  %v8201_v10 = vcombine.low %v15942_v6, %v15941_v41  ;;  %v15944_v35 = vld [vmem:[#allocation353_spill] sm:$0xff]  ;;  %v15963_v53 = vld [vmem:[#allocation190_spill] sm:$0xff] }
 0x664   :  { %v15966_v6 = vld [vmem:[#allocation314_spill] sm:$0xff] }
 0x665   :  { %7221 = vmatpush1.bf16.msra.mxu1 %v8375_v8  ;;  %v8448_v8 = vcombine.high %v15944_v35, %v15943_v32 }
 0x666   :  { %7262 = vmatpush1.bf16.msra.mxu0 %v8121_v0  ;;  %7222 = vmatprep.subr.bf16.mxu1 %v8368_v15  ;;  %v15945_v0 = vld [vmem:[#allocation102_spill] sm:$0xff]  ;;  %v8447_v15 = vcombine.low %v15944_v35, %v15943_v32 }
 0x667   :  { %7263 = vmatprep.subr.bf16.mxu0 %v8114_v45  ;;  %v8194_v44 = vcombine.high %v15946_v1, %v15945_v0  ;;  %v8193_v19 = vcombine.low %v15946_v1, %v15945_v0  ;;  %v15948_v45 = vld [vmem:[#allocation345_spill] sm:$0xff]  ;;  %v15968_v1 = vld [vmem:[#allocation178_spill] sm:$0xff] }
 0x669   :  { %7223 = vmatpush1.bf16.msra.mxu1 %v8367_v28  ;;  %v8440_v28 = vcombine.high %v15948_v45, %v15947_v30 }
 0x66a   :  { %7264 = vmatpush1.bf16.msra.mxu0 %v8113_v18  ;;  %7224 = vmatprep.subr.bf16.mxu1 %v8488_v50  ;;  %v15949_v18 = vld [vmem:[#allocation94_spill] sm:$0xff]  ;;  %v8439_v50 = vcombine.low %v15948_v45, %v15947_v30 }
 0x66b   :  { %7265 = vmatprep.subr.bf16.mxu0 %v8234_v60  ;;  %v8186_v39 = vcombine.high %v15950_v49, %v15949_v18  ;;  %v8185_v47 = vcombine.low %v15950_v49, %v15949_v18  ;;  %v15952_v60 = vld [vmem:[#allocation337_spill] sm:$0xff]  ;;  %v15971_v45 = vld [vmem:[#allocation174_spill] sm:$0xff] }
 0x66c   :  { %v15973_v49 = vld [vmem:[#allocation302_spill] sm:$0xff] }
 0x66d   :  { %7225 = vmatpush2.bf16.msra.mxu1 %v8487_v36  ;;  %v8432_v36 = vcombine.high %v15952_v60, %v15951_v13 }
 0x66e   :  { %7266 = vmatpush2.bf16.msra.mxu0 %v8233_v59  ;;  %7226 = vmatprep.subr.bf16.mxu1 %v8480_v5  ;;  %v15953_v59 = vld [vmem:[#allocation86_spill] sm:$0xff]  ;;  %v8431_v5 = vcombine.low %v15952_v60, %v15951_v13 }
 0x66f   :  { %7267 = vmatprep.subr.bf16.mxu0 %v8226_v17  ;;  %v8178_v24 = vcombine.high %v15954_v12, %v15953_v59  ;;  %v8177_v16 = vcombine.low %v15954_v12, %v15953_v59  ;;  %v15956_v17 = vld [vmem:[#allocation202_spill] sm:$0xff] }
 0x670   :  { %v15975_v60 = vld [vmem:[#allocation166_spill] sm:$0xff] }
 0x671   :  { %7227 = vmatpush2.bf16.msra.mxu1 %v8479_v40  ;;  %v8298_v40 = vcombine.high %v15956_v17, %v15955_v22  ;;  %v15977_v12 = vld [vmem:[#allocation294_spill] sm:$0xff] }
 0x672   :  { %7268 = vmatpush2.bf16.msra.mxu0 %v8225_v34  ;;  %7228 = vmatprep.subr.bf16.mxu1 %v8472_v20  ;;  %v15957_v34 = vld [vmem:[#allocation334_spill] sm:$0xff]  ;;  %v8297_v20 = vcombine.low %v15956_v17, %v15955_v22 }
 0x673   :  { %7269 = vmatprep.subr.bf16.mxu0 %v8218_v56  ;;  %v8426_v21 = vcombine.high %v15958_v48, %v15957_v34  ;;  %v8425_v27 = vcombine.low %v15958_v48, %v15957_v34  ;;  %v15960_v56 = vld [vmem:[#allocation194_spill] sm:$0xff] }
 0x674   :  { %v15979_v17 = vld [vmem:[#allocation158_spill] sm:$0xff] }
 0x675   :  { %7229 = vmatpush2.bf16.msra.mxu1 %v8471_v63  ;;  %v8290_v63 = vcombine.high %v15960_v56, %v15959_v3  ;;  %v15981_v48 = vld [vmem:[#allocation286_spill] sm:$0xff] }
 0x676   :  { %7270 = vmatpush2.bf16.msra.mxu0 %v8217_v9  ;;  %7230 = vmatprep.subr.bf16.mxu1 %v8464_v54  ;;  %v15961_v9 = vld [vmem:[#allocation326_spill] sm:$0xff] }
 0x677   :  { %7271 = vmatprep.subr.bf16.mxu0 %v8210_v52  ;;  %v8418_v29 = vcombine.high %v15962_v25, %v15961_v9  ;;  %v8289_v52 = vcombine.low %v15960_v56, %v15959_v3  ;;  %v15983_v56 = vld [vmem:[#allocation150_spill] sm:$0xff] }
 0x679   :  { %7231 = vmatpush2.bf16.msra.mxu1 %v8463_v55  ;;  %v8417_v55 = vcombine.low %v15962_v25, %v15961_v9  ;;  %v15985_v25 = vld [vmem:[#allocation278_spill] sm:$0xff] }
 0x67a   :  { %7272 = vmatpush2.bf16.msra.mxu0 %v8209_v51  ;;  %7232 = vmatprep.subr.bf16.mxu1 %v8456_v58  ;;  %v15964_v58 = vld [vmem:[#allocation186_spill] sm:$0xff] }
 0x67b   :  { %7273 = vmatprep.subr.bf16.mxu0 %v8202_v2  ;;  %v8282_v41 = vcombine.high %v15964_v58, %v15963_v53  ;;  %v8281_v32 = vcombine.low %v15964_v58, %v15963_v53  ;;  %v15988_v53 = vld [vmem:[#allocation266_spill] sm:$0xff] }
 0x67d   :  { %7233 = vmatpush2.bf16.msra.mxu1 %v8455_v14 }
 0x67e   :  { %7274 = vmatpush2.bf16.msra.mxu0 %v8201_v10  ;;  %7234 = vmatprep.subr.bf16.mxu1 %v8448_v8 }
 0x67f   :  { %7275 = vmatprep.subr.bf16.mxu0 %v8194_v44 }
 0x681   :  { %7235 = vmatpush2.bf16.msra.mxu1 %v8447_v15  ;;  %v15970_v15 = vld [vmem:[#allocation306_spill] sm:$0xff] }
 0x682   :  { %7276 = vmatpush2.bf16.msra.mxu0 %v8193_v19  ;;  %7236 = vmatprep.subr.bf16.mxu1 %v8440_v28  ;;  %v15972_v28 = vld [vmem:[#allocation170_spill] sm:$0xff] }
 0x683   :  { %7277 = vmatprep.subr.bf16.mxu0 %v8186_v39  ;;  %v8266_v18 = vcombine.high %v15972_v28, %v15971_v45  ;;  %v15974_v39 = vld [vmem:[#allocation298_spill] sm:$0xff] }
 0x684   :  { %v8393_v13 = vcombine.low %v15974_v39, %v15973_v49 }
 0x685   :  { %7237 = vmatpush2.bf16.msra.mxu1 %v8439_v50  ;;  %v8394_v50 = vcombine.high %v15974_v39, %v15973_v49  ;;  %v15999_v49 = vld [vmem:[#allocation246_spill] sm:$0xff] }
 0x686   :  { %7278 = vmatpush2.bf16.msra.mxu0 %v8185_v47  ;;  %7238 = vmatprep.subr.bf16.mxu1 %v8432_v36  ;;  %v8265_v47 = vcombine.low %v15972_v28, %v15971_v45  ;;  %v15976_v36 = vld [vmem:[#allocation162_spill] sm:$0xff] }
 0x687   :  { %7279 = vmatprep.subr.bf16.mxu0 %v8178_v24  ;;  %v8258_v59 = vcombine.high %v15976_v36, %v15975_v60  ;;  %v15978_v24 = vld [vmem:[#allocation290_spill] sm:$0xff] }
 0x688   :  { %v8385_v22 = vcombine.low %v15978_v24, %v15977_v12  ;;  %v16000_v39 = vld [vmem:[#allocation242_spill] sm:$0xff] }
 0x689   :  { %7239 = vmatpush2.bf16.msra.mxu1 %v8431_v5  ;;  %v8386_v5 = vcombine.high %v15978_v24, %v15977_v12  ;;  %v16003_v12 = vld [vmem:[#allocation238_spill] sm:$0xff] }
 0x68a   :  { %7280 = vmatpush2.bf16.msra.mxu0 %v8177_v16  ;;  %7290 = vmatprep.subr.bf16.mxu1 %v8298_v40  ;;  %v8257_v16 = vcombine.low %v15976_v36, %v15975_v60  ;;  %v15980_v40 = vld [vmem:[#allocation154_spill] sm:$0xff]  ;;  %v8337_v36 = vcombine.low %v16000_v39, %v15999_v49 }
 0x68b   :  { %7331 = vmatprep.subr.bf16.mxu0 %v8426_v21  ;;  %v8250_v34 = vcombine.high %v15980_v40, %v15979_v17  ;;  %v15982_v21 = vld [vmem:[#allocation282_spill] sm:$0xff] }
 0x68c   :  { %v6996_v54 = vpop.f32.mrf.mxu1  ;;  %7241 = vmatmul.mubr.bf16.vlgmr.msra.gmra.mxu1 %v14148_v26  ;;  %v8377_v3 = vcombine.low %v15982_v21, %v15981_v48  ;;  %v16004_v24 = vld [vmem:[#allocation234_spill] sm:$0xff] }
 0x68d   :  { %v14573_v31 = vpop.f32.mrf.mxu0  ;;  %7282 = vmatmul.mubr.bf16.vlgmr.msra.gmra.mxu0 %v14006_v43  ;;  %v14578_v33 = vadd.f32 %v6996_v54, %v14447_v62  ;;  %7291 = vmatpush1.bf16.msra.mxu1 %v8297_v20  ;;  %v15965_v43 = vld [vmem:[#allocation318_spill] sm:$0xff]  ;;  %v8378_v20 = vcombine.high %v15982_v21, %v15981_v48 }
 0x68e   :  { %7332 = vmatpush1.bf16.msra.mxu0 %v8425_v27  ;;  %v6998_v51 = vpop.f32.mrf.mxu1  ;;  %7292 = vmatprep.subr.bf16.mxu1 %v8290_v63  ;;  %v8410_v62 = vcombine.high %v15966_v6, %v15965_v43  ;;  %v8409_v35 = vcombine.low %v15966_v6, %v15965_v43  ;;  %v8249_v27 = vcombine.low %v15980_v40, %v15979_v17  ;;  %v15984_v63 = vld [vmem:[#allocation146_spill] sm:$0xff] }
 0x68f   :  { %v14584_v38 = vpop.f32.mrf.mxu0  ;;  %7333 = vmatprep.subr.bf16.mxu0 %v8418_v29  ;;  %v14591_v2 = vadd.f32 %v6998_v51, %v14451_v57  ;;  %7322 = vmatprep.mubr.bf16.mxu1 %v13924_v11  ;;  %v15967_v57 = vld [vmem:[#allocation182_spill] sm:$0xff]  ;;  %v8242_v9 = vcombine.high %v15984_v63, %v15983_v56  ;;  %v8329_v40 = vcombine.low %v16004_v24, %v16003_v12 }
 0x690   :  { %7363 = vmatprep.mubr.bf16.mxu0 %v14020_v42  ;;  %v7000_v14 = vpop.f32.mrf.mxu1  ;;  %v8274_v44 = vcombine.high %v15968_v1, %v15967_v57  ;;  %v15969_v11 = vld [vmem:[#allocation310_spill] sm:$0xff]  ;;  %v8273_v19 = vcombine.low %v15968_v1, %v15967_v57 }
 0x691   :  { %v7041_v10 = vpop.f32.mrf.mxu0  ;;  %7293 = vmatpush1.bf16.msra.mxu1 %v8289_v52  ;;  %v8402_v42 = vcombine.high %v15970_v15, %v15969_v11  ;;  %v8401_v30 = vcombine.low %v15970_v15, %v15969_v11  ;;  %v15986_v29 = vld [vmem:[#allocation274_spill] sm:$0xff]  ;;  %v8241_v52 = vcombine.low %v15984_v63, %v15983_v56 }
 0x692   :  { %7334 = vmatpush1.bf16.msra.mxu0 %v8417_v55  ;;  %v7001_v8 = vpop.f32.mrf.mxu1  ;;  %7294 = vmatprep.subr.bf16.mxu1 %v8282_v41  ;;  %v8370_v54 = vcombine.high %v15986_v29, %v15985_v25  ;;  %v8369_v55 = vcombine.low %v15986_v29, %v15985_v25  ;;  %v15987_v51 = vld [vmem:[#allocation270_spill] sm:$0xff] }
 0x693   :  { %v7042_v0 = vpop.f32.mrf.mxu0  ;;  %7335 = vmatprep.subr.bf16.mxu0 %v8410_v62  ;;  %v8362_v58 = vcombine.high %v15988_v53, %v15987_v51  ;;  %v15989_v41 = vld [vmem:[#allocation398_spill] sm:$0xff]  ;;  %v8361_v62 = vcombine.low %v15988_v53, %v15987_v51 }
 0x694   :  { %v15990_v43 = vld [vmem:[#allocation394_spill] sm:$0xff] }
 0x695   :  { %7295 = vmatpush1.bf16.msra.mxu1 %v8281_v32  ;;  %v8490_v6 = vcombine.high %v15990_v43, %v15989_v41  ;;  %v8489_v14 = vcombine.low %v15990_v43, %v15989_v41  ;;  %v15991_v10 = vld [vmem:[#allocation262_spill] sm:$0xff] }
 0x696   :  { %7336 = vmatpush1.bf16.msra.mxu0 %v8409_v35  ;;  %7296 = vmatprep.subr.bf16.mxu1 %v8274_v44  ;;  %v15992_v32 = vld [vmem:[#allocation258_spill] sm:$0xff] }
 0x697   :  { %7337 = vmatprep.subr.bf16.mxu0 %v8402_v42  ;;  %v8354_v35 = vcombine.high %v15992_v32, %v15991_v10  ;;  %v15993_v8 = vld [vmem:[#allocation390_spill] sm:$0xff]  ;;  %v8353_v1 = vcombine.low %v15992_v32, %v15991_v10  ;;  %v14700_v32 = vsub.s32 2, %v13770_v4 }
 0x698   :  { %v15994_v0 = vld [vmem:[#allocation386_spill] sm:$0xff] }
 0x699   :  { %7297 = vmatpush1.bf16.msra.mxu1 %v8273_v19  ;;  %v8482_v57 = vcombine.high %v15994_v0, %v15993_v8  ;;  %v8481_v44 = vcombine.low %v15994_v0, %v15993_v8  ;;  %v15995_v11 = vld [vmem:[#allocation254_spill] sm:$0xff] }
 0x69a   :  { %7338 = vmatpush1.bf16.msra.mxu0 %v8401_v30  ;;  %7298 = vmatprep.subr.bf16.mxu1 %v8266_v18  ;;  %v15996_v15 = vld [vmem:[#allocation250_spill] sm:$0xff] }
 0x69b   :  { %7339 = vmatprep.subr.bf16.mxu0 %v8394_v50  ;;  %v8346_v42 = vcombine.high %v15996_v15, %v15995_v11  ;;  %v15997_v19 = vld [vmem:[#allocation382_spill] sm:$0xff]  ;;  %v8345_v28 = vcombine.low %v15996_v15, %v15995_v11  ;;  %v8338_v50 = vcombine.high %v16000_v39, %v15999_v49  ;;  %v7380_v39 = vcombine.low %v14578_v33, %v14591_v2 }
 0x69c   :  { %v15998_v30 = vld [vmem:[#allocation378_spill] sm:$0xff] }
 0x69d   :  { %7299 = vmatpush1.bf16.msra.mxu1 %v8265_v47  ;;  %v8474_v45 = vcombine.high %v15998_v30, %v15997_v19  ;;  %v8473_v18 = vcombine.low %v15998_v30, %v15997_v19  ;;  %v16001_v47 = vld [vmem:[#allocation374_spill] sm:$0xff] }
 0x69e   :  { %7340 = vmatpush1.bf16.msra.mxu0 %v8393_v13  ;;  %7300 = vmatprep.subr.bf16.mxu1 %v8258_v59  ;;  %v16002_v13 = vld [vmem:[#allocation370_spill] sm:$0xff] }
 0x69f   :  { %7341 = vmatprep.subr.bf16.mxu0 %v8386_v5  ;;  %v8466_v60 = vcombine.high %v16002_v13, %v16001_v47  ;;  %v8465_v59 = vcombine.low %v16002_v13, %v16001_v47  ;;  %v8330_v5 = vcombine.high %v16004_v24, %v16003_v12  ;;  %v16007_v48 = vld [vmem:[#allocation230_spill] sm:$0xff] }
 0x6a0   :  { %v16008_v21 = vld [vmem:[#allocation226_spill] sm:$0xff] }
 0x6a1   :  { %7301 = vmatpush1.bf16.msra.mxu1 %v8257_v16  ;;  %v16005_v16 = vld [vmem:[#allocation366_spill] sm:$0xff]  ;;  %v8321_v63 = vcombine.low %v16008_v21, %v16007_v48 }
 0x6a2   :  { %7342 = vmatpush1.bf16.msra.mxu0 %v8385_v22  ;;  %7302 = vmatprep.subr.bf16.mxu1 %v8250_v34  ;;  %v16006_v22 = vld [vmem:[#allocation362_spill] sm:$0xff] }
 0x6a3   :  { %7343 = vmatprep.subr.bf16.mxu0 %v8378_v20  ;;  %v8458_v17 = vcombine.high %v16006_v22, %v16005_v16  ;;  %v8457_v34 = vcombine.low %v16006_v22, %v16005_v16  ;;  %v8322_v20 = vcombine.high %v16008_v21, %v16007_v48  ;;  %v16011_v25 = vld [vmem:[#allocation222_spill] sm:$0xff] }
 0x6a4   :  { %v16012_v29 = vld [vmem:[#allocation218_spill] sm:$0xff] }
 0x6a5   :  { %7303 = vmatpush1.bf16.msra.mxu1 %v8249_v27  ;;  %v16009_v27 = vld [vmem:[#allocation358_spill] sm:$0xff]  ;;  %v8313_v53 = vcombine.low %v16012_v29, %v16011_v25 }
 0x6a6   :  { %7344 = vmatpush1.bf16.msra.mxu0 %v8377_v3  ;;  %7304 = vmatprep.subr.bf16.mxu1 %v8242_v9  ;;  %v16010_v3 = vld [vmem:[#allocation354_spill] sm:$0xff] }
 0x6a7   :  { %7345 = vmatprep.subr.bf16.mxu0 %v8370_v54  ;;  %v8450_v56 = vcombine.high %v16010_v3, %v16009_v27  ;;  %v8449_v9 = vcombine.low %v16010_v3, %v16009_v27  ;;  %v8314_v54 = vcombine.high %v16012_v29, %v16011_v25  ;;  %v16015_v41 = vld [vmem:[#allocation214_spill] sm:$0xff] }
 0x6a8   :  { %v16016_v43 = vld [vmem:[#allocation210_spill] sm:$0xff] }
 0x6a9   :  { %7305 = vmatpush1.bf16.msra.mxu1 %v8241_v52  ;;  %v16013_v52 = vld [vmem:[#allocation350_spill] sm:$0xff]  ;;  %v8305_v8 = vcombine.low %v16016_v43, %v16015_v41 }
 0x6aa   :  { %7346 = vmatpush1.bf16.msra.mxu0 %v8369_v55  ;;  %7306 = vmatprep.subr.bf16.mxu1 %v8362_v58  ;;  %v16014_v55 = vld [vmem:[#allocation346_spill] sm:$0xff] }
 0x6ab   :  { %7347 = vmatprep.subr.bf16.mxu0 %v8490_v6  ;;  %v8442_v51 = vcombine.high %v16014_v55, %v16013_v52  ;;  %v8441_v58 = vcombine.low %v16014_v55, %v16013_v52  ;;  %v8306_v6 = vcombine.high %v16016_v43, %v16015_v41  ;;  %v14744_v43 = vsub.s32 6, %v13770_v4 }
 0x6ad   :  { %7307 = vmatpush2.bf16.msra.mxu1 %v8361_v62  ;;  %v16017_v62 = vld [vmem:[#allocation342_spill] sm:$0xff] }
 0x6ae   :  { %7348 = vmatpush2.bf16.msra.mxu0 %v8489_v14  ;;  %7308 = vmatprep.subr.bf16.mxu1 %v8354_v35  ;;  %v16018_v14 = vld [vmem:[#allocation338_spill] sm:$0xff]  ;;  %v14703_v35 = vsub.s32 3, %v13770_v4 }
 0x6af   :  { %7349 = vmatprep.subr.bf16.mxu0 %v8482_v57  ;;  %v8434_v10 = vcombine.high %v16018_v14, %v16017_v62  ;;  %v8433_v0 = vcombine.low %v16018_v14, %v16017_v62  ;;  %v4931_v57 = vrot.slane %v14416_v61, %v14700_v32  ;;  %v14747_v14 = vsub.s32 7, %v13770_v4 }
 0x6b1   :  { %7309 = vmatpush2.bf16.msra.mxu1 %v8353_v1  ;;  %v4935_v1 = vrot.slane %v14416_v61, %v14703_v35 }
 0x6b2   :  { %7350 = vmatpush2.bf16.msra.mxu0 %v8481_v44  ;;  %7310 = vmatprep.subr.bf16.mxu1 %v8346_v42  ;;  %v7038_v44 = vadd.f32 %v14573_v31, %v4931_v57 }
 0x6b3   :  { %7351 = vmatprep.subr.bf16.mxu0 %v8474_v45  ;;  %v7040_v42 = vadd.f32 %v14584_v38, %v4935_v1 }
 0x6b5   :  { %7311 = vmatpush2.bf16.msra.mxu1 %v8345_v28 }
 0x6b6   :  { %7352 = vmatpush2.bf16.msra.mxu0 %v8473_v18  ;;  %7312 = vmatprep.subr.bf16.mxu1 %v8338_v50 }
 0x6b7   :  { %7353 = vmatprep.subr.bf16.mxu0 %v8466_v60 }
 0x6b9   :  { %7313 = vmatpush2.bf16.msra.mxu1 %v8337_v36  ;;  %v14728_v36 = vsub.s32 4, %v13770_v4 }
 0x6ba   :  { %7354 = vmatpush2.bf16.msra.mxu0 %v8465_v59  ;;  %7314 = vmatprep.subr.bf16.mxu1 %v8330_v5  ;;  %v14731_v59 = vsub.s32 5, %v13770_v4 }
 0x6bb   :  { %7355 = vmatprep.subr.bf16.mxu0 %v8458_v17  ;;  %v4939_v12 = vrot.slane %v14416_v61, %v14728_v36 }
 0x6bc   :  { %v4943_v24 = vrot.slane %v14416_v61, %v14731_v59 }
 0x6bd   :  { %7315 = vmatpush2.bf16.msra.mxu1 %v8329_v40 }
 0x6be   :  { %7356 = vmatpush2.bf16.msra.mxu0 %v8457_v34  ;;  %7316 = vmatprep.subr.bf16.mxu1 %v8322_v20 }
 0x6bf   :  { %7357 = vmatprep.subr.bf16.mxu0 %v8450_v56 }
 0x6c1   :  { %7317 = vmatpush2.bf16.msra.mxu1 %v8321_v63 }
 0x6c2   :  { %7358 = vmatpush2.bf16.msra.mxu0 %v8449_v9  ;;  %7318 = vmatprep.subr.bf16.mxu1 %v8314_v54 }
 0x6c3   :  { %7359 = vmatprep.subr.bf16.mxu0 %v8442_v51 }
 0x6c5   :  { %7319 = vmatpush2.bf16.msra.mxu1 %v8313_v53  ;;  %v7419_v53 = vsel %vm931_vm0, %v14591_v2, 0.0 }
 0x6c6   :  { %7360 = vmatpush2.bf16.msra.mxu0 %v8441_v58  ;;  %7320 = vmatprep.subr.bf16.mxu1 %v8306_v6  ;;  %v7418_v58 = vsel %vm931_vm0, %v14578_v33, 0.0 }
 0x6c7   :  { %7361 = vmatprep.subr.bf16.mxu0 %v8434_v10  ;;  %v7420_v6 = vadd.f32 %v7419_v53, %v7418_v58 }
 0x6c9   :  { %7321 = vmatpush2.bf16.msra.mxu1 %v8305_v8 }
 0x6ca   :  { %7362 = vmatpush2.bf16.msra.mxu0 %v8433_v0  ;;  %v4947_v0 = vrot.slane %v14416_v61, %v14744_v43 }
 0x6cc   :  { %v7078_v11 = vpop.f32.mrf.mxu1  ;;  %7323 = vmatmul.mubr.bf16.vlgmr.msra.gmra.mxu1 %v14010_v7 }
 0x6cd   :  { %v7119_v15 = vpop.f32.mrf.mxu0  ;;  %7364 = vmatmul.mubr.bf16.vlgmr.msra.gmra.mxu0 %v14148_v26  ;;  %v7079_v19 = vadd.f32 %v7078_v11, %v7038_v44  ;;  %v7388_v26 = vrot.slane %v7380_v39, %v13776_v37  ;;  %v4951_v44 = vrot.slane %v14416_v61, %v14747_v14 }
 0x6ce   :  { %v7080_v30 = vpop.f32.mrf.mxu1 }
 0x6cf   :  { %v7121_v45 = vpop.f32.mrf.mxu0  ;;  %v7081_v28 = vadd.f32 %v7080_v30, %v7040_v42  ;;  %v14719_v50 = vadd.f32 %v7119_v15, %v7079_v19 }
 0x6d0   :  { %v7082_v18 = vpop.f32.mrf.mxu1 }
 0x6d1   :  { %v7123_v49 = vpop.f32.mrf.mxu0  ;;  %v14721_v31 = vadd.f32 %v7121_v45, %v7081_v28  ;;  %v7421_v41 = vsel %vm931_vm0, %v14719_v50, 0.0 }
 0x6d2   :  { %v7083_v47 = vpop.f32.mrf.mxu1  ;;  %v7422_v10 = vadd.f32 %v7421_v41, %v7420_v6 }
 0x6d3   :  { %v7124_v13 = vpop.f32.mrf.mxu0  ;;  %v7381_v7 = vcombine.low %v14719_v50, %v14721_v31  ;;  %v7423_v8 = vsel %vm931_vm0, %v14721_v31, 0.0 }
 0x6d4   :  { %v7424_v11 = vadd.f32 %v7423_v8, %v7422_v10 }
 0x6d5   :  { %v7395_v38 = vrot.slane %v7381_v7, %v13776_v37 }
 0x6d7   :  { %v7396_v60 = vcombine.low %v7388_v26, %v7395_v38 }
 0x6d9   :  { %7416 = vst [vmem:[#allocation9] sm:$0xff] %v7396_v60 }
 0x70c   :  { %v7160_v5 = vpop.f32.mrf.mxu1 }
 0x70d   :  { %v7201_v16 = vpop.f32.mrf.mxu0  ;;  %v7161_v22 = vadd.f32 %v7160_v5, %v4939_v12 }
 0x70e   :  { %v7162_v17 = vpop.f32.mrf.mxu1 }
 0x70f   :  { %v7203_v40 = vpop.f32.mrf.mxu0  ;;  %v7202_v34 = vadd.f32 %v7201_v16, %v7161_v22  ;;  %v7163_v48 = vadd.f32 %v7162_v17, %v4943_v24 }
 0x710   :  { %v7164_v21 = vpop.f32.mrf.mxu1 }
 0x711   :  { %v7205_v20 = vpop.f32.mrf.mxu0  ;;  %v7204_v27 = vadd.f32 %v7203_v40, %v7163_v48 }
 0x712   :  { %v7165_v3 = vpop.f32.mrf.mxu1 }
 0x713   :  { %v7206_v56 = vpop.f32.mrf.mxu0 }
 0x74c   :  { %v7242_v63 = vpop.f32.mrf.mxu1 }
 0x74d   :  { %v7283_v9 = vpop.f32.mrf.mxu0  ;;  %v7243_v62 = vadd.f32 %v7242_v63, %v7202_v34 }
 0x74e   :  { %v7244_v25 = vpop.f32.mrf.mxu1  ;;  %v7284_v15 = vadd.f32 %v7283_v9, %v4947_v0 }
 0x74f   :  { %v7285_v29 = vpop.f32.mrf.mxu0  ;;  %v7425_v57 = vsel %vm931_vm0, %v7243_v62, 0.0  ;;  %v7245_v1 = vadd.f32 %v7244_v25, %v7204_v27 }
 0x750   :  { %v7246_v54 = vpop.f32.mrf.mxu1  ;;  %v7426_v30 = vadd.f32 %v7425_v57, %v7424_v11  ;;  %v7286_v4 = vadd.f32 %v7285_v29, %v4951_v44 }
 0x751   :  { %v7287_v52 = vpop.f32.mrf.mxu0  ;;  %v7427_v28 = vsel %vm931_vm0, %v7245_v1, 0.0  ;;  %v7397_v38 = vcombine.low %v7243_v62, %v7245_v1 }
 0x752   :  { %v7247_v55 = vpop.f32.mrf.mxu1  ;;  %v7428_v26 = vadd.f32 %v7427_v28, %v7426_v30 }
 0x753   :  { %v7288_v51 = vpop.f32.mrf.mxu0  ;;  %v7405_v40 = vrot.slane %v7397_v38, %v13776_v37 }
 0x78c   :  { %v7324_v42 = vpop.f32.mrf.mxu1 }
 0x78d   :  { %v7365_v19 = vpop.f32.mrf.mxu0  ;;  %v7325_v45 = vadd.f32 %v7324_v42, %v7284_v15 }
 0x78e   :  { %v7326_v18 = vpop.f32.mrf.mxu1 }
 0x78f   :  { %v7367_v49 = vpop.f32.mrf.mxu0  ;;  %v7366_v39 = vadd.f32 %v7365_v19, %v7325_v45  ;;  %v7327_v47 = vadd.f32 %v7326_v18, %v7286_v4 }
 0x790   :  { %v7328_v13 = vpop.f32.mrf.mxu1 }
 0x791   :  { %v7369_v7 = vpop.f32.mrf.mxu0  ;;  %v7368_v60 = vadd.f32 %v7367_v49, %v7327_v47  ;;  %v7429_v61 = vsel %vm931_vm0, %v7366_v39, 0.0 }
 0x792   :  { %v7329_v12 = vpop.f32.mrf.mxu1  ;;  %v7430_v5 = vadd.f32 %v7429_v61, %v7428_v26 }
 0x793   :  { %v7370_v24 = vpop.f32.mrf.mxu0  ;;  %v7398_v16 = vcombine.low %v7366_v39, %v7368_v60  ;;  %v7431_v22 = vsel %vm931_vm0, %v7368_v60, 0.0 }
 0x794   :  { %v7432_v17 = vadd.f32 %v7431_v22, %v7430_v5 }
 0x795   :  { %v7412_v34 = vrot.slane %v7398_v16, %v13776_v37 }
 0x796   :  { %7433 = vadd.xlane.f32.xlu0 %v7432_v17 }
 0x797   :  { %v7413_v48 = vcombine.low %v7405_v40, %v7412_v34 }
 0x799   :  { %7417 = vst [vmem:[#allocation9 + $0x8] sm:$0xff] %v7413_v48 }
 0x81f   :  { %v7434_v21 = vpop.xlane.xlu0 %7433 }
 0x820   :  { %v7436_v20 = vmul.f32 0.0009765625, %v7434_v21 }
 0x822   :  { %v14762_v27 = vsub.f32 %v14578_v33, %v7436_v20  ;;  %v14765_v3 = vsub.f32 %v14591_v2, %v7436_v20  ;;  %v14768_v56 = vsub.f32 %v14719_v50, %v7436_v20  ;;  %v14771_v63 = vsub.f32 %v14721_v31, %v7436_v20 }
 0x823   :  { %v14773_v9 = vsub.f32 %v7243_v62, %v7436_v20  ;;  %v14781_v54 = vsub.f32 %v7245_v1, %v7436_v20  ;;  %v7443_v55 = vsub.f32 %v7366_v39, %v7436_v20  ;;  %v7444_v41 = vsub.f32 %v7368_v60, %v7436_v20 }
 0x824   :  { %v7445_v25 = vmul.f32 %v14762_v27, %v14762_v27  ;;  %v7446_v29 = vmul.f32 %v14765_v3, %v14765_v3  ;;  %v7447_v33 = vmul.f32 %v14768_v56, %v14768_v56  ;;  %v7448_v2 = vmul.f32 %v14771_v63, %v14771_v63 }
 0x825   :  { %v7449_v51 = vmul.f32 %v14773_v9, %v14773_v9  ;;  %v7450_v6 = vmul.f32 %v14781_v54, %v14781_v54  ;;  %v7451_v8 = vmul.f32 %v7443_v55, %v7443_v55  ;;  %v7452_v1 = vmul.f32 %v7444_v41, %v7444_v41 }
 0x826   :  { %v7453_v50 = vsel %vm931_vm0, %v7445_v25, 0.0  ;;  %v7454_v31 = vsel %vm931_vm0, %v7446_v29, 0.0  ;;  %v7456_v53 = vsel %vm931_vm0, %v7447_v33, 0.0  ;;  %v7458_v62 = vsel %vm931_vm0, %v7448_v2, 0.0 }
 0x827   :  { %v7455_v52 = vadd.f32 %v7454_v31, %v7453_v50  ;;  %v7460_v0 = vsel %vm931_vm0, %v7449_v51, 0.0  ;;  %v7462_v44 = vsel %vm931_vm0, %v7450_v6, 0.0  ;;  %v7464_v15 = vsel %vm931_vm0, %v7451_v8, 0.0 }
 0x828   :  { %v7466_v19 = vsel %vm931_vm0, %v7452_v1, 0.0 }
 0x829   :  { %v7457_v58 = vadd.f32 %v7456_v53, %v7455_v52 }
 0x82b   :  { %v7459_v10 = vadd.f32 %v7458_v62, %v7457_v58 }
 0x82d   :  { %v7461_v57 = vadd.f32 %v7460_v0, %v7459_v10 }
 0x82f   :  { %v7463_v11 = vadd.f32 %v7462_v44, %v7461_v57 }
 0x831   :  { %v7465_v42 = vadd.f32 %v7464_v15, %v7463_v11 }
 0x833   :  { %v7467_v30 = vadd.f32 %v7466_v19, %v7465_v42 }
 0x835   :  { %7468 = vadd.xlane.f32.xlu0 %v7467_v30 }
 0x836   :  { %9911 = shalt.err (!%p9908_p4)
}
 0x837   :  { %7646 = dma.vmem_to_hbm [thread:$0]  %s7644_s23, 256, %s14847_s12, [#allocation10]   ;;  %v7481_v18 = vld [vmem:[%s14844_s9] sm:$0xff] }
 0x838   :  { %v7531_v49 = vld [vmem:[%s14845_s10] sm:$0xff]  ;;  %v7486_v39 = vrot.slane %v7481_v18, %v14411_v46  ;;  %v7490_v13 = vrot.slane %v7481_v18, %v14423_v23  ;;  %v7494_v26 = vrot.slane %v7481_v18, %v14700_v32  ;;  %v7498_v60 = vrot.slane %v7481_v18, %v14703_v35  ;;  %s9957_s9 = smov [#allocation7]  }
 0x839   :  { %v7536_v47 = vrot.slane %v7531_v49, %v14411_v46  ;;  %v7540_v7 = vrot.slane %v7531_v49, %v14423_v23  ;;  %v7544_v38 = vrot.slane %v7531_v49, %v14700_v32  ;;  %v7548_v61 = vrot.slane %v7531_v49, %v14703_v35  ;;  %s7633_s10 = sshll.u32 %s9957_s9, 4  ;;  %s7634_s10 = int_to_ptr.vmem [resolvable:$true] %s7633_s10 }
 0x83a   :  { %v7502_v12 = vrot.slane %v7481_v18, %v14728_v36  ;;  %v7552_v24 = vrot.slane %v7531_v49, %v14728_v36  ;;  %v7506_v5 = vrot.slane %v7481_v18, %v14731_v59  ;;  %v7556_v46 = vrot.slane %v7531_v49, %v14731_v59  ;;  %s9920_s12 = scalar_lea.vmem %s7634_s10, 256  ;;  %p9925_p6 = scmp.lt.s32.totalorder %s7634_s10, %s7634_s10 }
 0x83b   :  { %v7510_v22 = vrot.slane %v7481_v18, %v14744_v43  ;;  %v7560_v23 = vrot.slane %v7531_v49, %v14744_v43  ;;  %v7514_v17 = vrot.slane %v7481_v18, %v14747_v14  ;;  %v7564_v32 = vrot.slane %v7531_v49, %v14747_v14  ;;  %p9921_p5 = scmp.ne.s32.totalorder %s7634_s10, %s9920_s12  ;;  %p9926_p7 = scmp.lt.s32.totalorder %s9920_s12, %s9920_s12 }
 0x83d   :  { %p9927_p8 = por %p9926_p7, %p9925_p6 }
 0x83f   :  { %p9928_p9 = pnand %p9927_p8, %p9921_p5 }
 0x8be   :  { %v7469_v4 = vpop.xlane.xlu0 %7468 }
 0x8bf   :  { %v7470_v45 = vmul.f32 0.0009765625, %v7469_v4 }
 0x8c1   :  { %v7471_v28 = vadd.f32 1e-05, %v7470_v45 }
 0x8c3   :  { %9898 = vrsqrt.f32 %v7471_v28 }
 0x8d0   :  { %v9899_v16 = vpop.eup %9898 }
 0x8d1   :  { %v7473_v40 = vmul.f32 %v9899_v16, %v14762_v27  ;;  %v7474_v35 = vmul.f32 %v9899_v16, %v14765_v3  ;;  %v7475_v34 = vmul.f32 %v9899_v16, %v14768_v56  ;;  %v7476_v36 = vmul.f32 %v9899_v16, %v14771_v63 }
 0x8d2   :  { %v7477_v48 = vmul.f32 %v9899_v16, %v14773_v9  ;;  %v7478_v59 = vmul.f32 %v9899_v16, %v14781_v54  ;;  %v7479_v21 = vmul.f32 %v9899_v16, %v7443_v55  ;;  %v7480_v20 = vmul.f32 %v9899_v16, %v7444_v41 }
 0x8d3   :  { %v7523_v25 = vmul.f32 %v7486_v39, %v7473_v40  ;;  %v7524_v43 = vmul.f32 %v7490_v13, %v7474_v35  ;;  %v7525_v29 = vmul.f32 %v7494_v26, %v7475_v34  ;;  %v7526_v33 = vmul.f32 %v7498_v60, %v7476_v36 }
 0x8d4   :  { %v7527_v2 = vmul.f32 %v7502_v12, %v7477_v48  ;;  %v7528_v14 = vmul.f32 %v7506_v5, %v7478_v59  ;;  %v7529_v50 = vmul.f32 %v7510_v22, %v7479_v21  ;;  %v7530_v27 = vmul.f32 %v7514_v17, %v7480_v20 }
 0x8d5   :  { %v7573_v31 = vadd.f32 %v7536_v47, %v7523_v25  ;;  %v7574_v3 = vadd.f32 %v7540_v7, %v7524_v43  ;;  %v7575_v52 = vadd.f32 %v7544_v38, %v7525_v29  ;;  %v7576_v56 = vadd.f32 %v7548_v61, %v7526_v33 }
 0x8d6   :  { %v7577_v51 = vadd.f32 %v7552_v24, %v7527_v2  ;;  %v7578_v63 = vadd.f32 %v7556_v46, %v7528_v14  ;;  %v7579_v53 = vadd.f32 %v7560_v23, %v7529_v50  ;;  %v7580_v9 = vadd.f32 %v7564_v32, %v7530_v27 }
 0x8d7   :  { %v7589_v58 = vcombine.low %v7573_v31, %v7574_v3  ;;  %v7590_v54 = vcombine.low %v7575_v52, %v7576_v56 }
 0x8d8   :  { %v7606_v55 = vcombine.low %v7577_v51, %v7578_v63  ;;  %v7607_v41 = vcombine.low %v7579_v53, %v7580_v9 }
 0x8d9   :  { %v7597_v6 = vrot.slane %v7589_v58, %v13776_v37  ;;  %v7604_v62 = vrot.slane %v7590_v54, %v13776_v37 }
 0x8da   :  { %v7614_v10 = vrot.slane %v7606_v55, %v13776_v37  ;;  %v7621_v8 = vrot.slane %v7607_v41, %v13776_v37 }
 0x8db   :  { %v7605_v0 = vcombine.low %v7597_v6, %v7604_v62 }
 0x8dc   :  { %v7622_v57 = vcombine.low %v7614_v10, %v7621_v8 }
 0x8dd   :  { %7625 = vst [vmem:[#allocation7] sm:$0xff] %v7605_v0 }
 0x8de   :  { %7626 = vst [vmem:[#allocation7 + $0x8] sm:$0xff] %v7622_v57 }
 0x8df   :  { %9931 = shalt.err (!%p9928_p9)
}
 0x8e0   :  { %7636 = dma.vmem_to_hbm [thread:$0]  %s7634_s10, 256, %s14846_s11, [#allocation8]  }
 0x8e1   :  { %9942 = dma.done.wait [#allocation8], 256  }
 0x8e2   :  { %9943 = vsyncadd [#allocation8], 4294967040 }
 0x8e3   :  { %9944 = dma.done.wait [#allocation10], 256  }
 0x8e4   :  { %9945 = vsyncadd [#allocation10], 4294967040 }
 0x8e5   :  { %7653 = vsyncpa [#allocation8], 1 }
 0x8e6   :  { %7654 = vsyncpa [#allocation10], 1 }
 0x8e7   :  { %7655 = vsyncmov [#allocation6] }
 0x8ea   :  { %s7656_s29 = vpop.sfrf %7655 }
 0x8eb   :  { %p8491_p10 = scmp.ne.s32.totalorder %s7656_s29, 0 }
 0x8ed   :  { %7660 = shalt.err (%p8491_p10)  }

</bundles_post_ra>
